<compile_context>
chip_gen: v5e
topology: v5e:2x2
jax: 0.10.0
libtpu: 0.0.40
codegen_flags: <defaults>
</compile_context>

<pallas_src>
import functools

import jax
import jax.numpy as jnp
from jax import lax
from jax.experimental import pallas as pl
from jax.experimental.pallas import tpu as pltpu


def _fused_mlp_kernel(x_ref, w1_ref, b1_ref, w2_ref, b2_ref, out_ref, acc_ref):
    """grid = (K // bk,): x @ W1^T accumulated over K tiles, epilogue fused.

    x_ref  : (B, bk)   activation strip
    w1_ref : (H, bk)   lane-dense W1 strip (PyTorch (out, in) layout)
    b1_ref : (1, H), w2_ref : (C, H), b2_ref : (1, C)   tiny, resident
    out_ref: (B, C)    resident across the whole (reduction) grid
    acc_ref: (B, H) f32 scratch — the output has a different shape (B, C), so
             a separate accumulator is unavoidable in the fused version.
    """
    k = pl.program_id(0)

    @pl.when(k == 0)
    def _init():
        acc_ref[...] = jnp.zeros_like(acc_ref)

    # Contract the bk axis of both operands: (B, bk) x (H, bk) -> (B, H).
    acc_ref[...] += lax.dot_general(
        x_ref[...], w1_ref[...],
        dimension_numbers=(((1,), (1,)), ((), ())),
        preferred_element_type=jnp.float32)

    @pl.when(k == pl.num_programs(0) - 1)
    def _finalize():
        hidden = acc_ref[...] + b1_ref[...]
        hidden = 1.0 / (1.0 + jnp.exp(-hidden))            # sigmoid (EUP)
        pred = lax.dot_general(
            hidden, w2_ref[...],
            dimension_numbers=(((1,), (1,)), ((), ())),
            preferred_element_type=jnp.float32) + b2_ref[...]
        out_ref[...] = pred.astype(out_ref.dtype)


def _split_xw1_kernel(x_ref, w1_ref, out_ref):
    """grid = (num_k_splits, steps_per_split): per-split partials of x @ W1^T.

    The (B, H) f32 partial accumulates directly in the resident output block
    (no scratch).  Axis 0 shards independent K chunks (intended for v7x).
    """
    k = pl.program_id(1)

    @pl.when(k == 0)
    def _init():
        out_ref[...] = jnp.zeros_like(out_ref)

    out_ref[...] += lax.dot_general(
        x_ref[...], w1_ref[...],
        dimension_numbers=(((1,), (1,)), ((), ())),
        preferred_element_type=jnp.float32)


def _choose_tiling(K, block_k, num_k_splits):
    """Return (num_splits, bk) with num_splits * steps * bk == K and bk a
    multiple of 128, or None if K itself is not a multiple of 128 (caller
    falls back to plain XLA — guards the review's robustness concern)."""
    if K % 128:
        return None
    if num_k_splits < 1 or K % num_k_splits or (K // num_k_splits) % 128:
        num_k_splits = 1
    k_per_split = K // num_k_splits
    divisors = [d for d in range(128, k_per_split + 1, 128)
                if k_per_split % d == 0]
    fitting = [d for d in divisors if d <= block_k]
    bk = max(fitting) if fitting else min(divisors)
    return num_k_splits, bk


def _w1_block_spec(H, bk, index_map, buffers):
    """Lane-dense (H, bk) W1 tile; optionally deeper-than-double buffering."""
    if buffers != 2:
        try:
            return pl.BlockSpec((H, bk), index_map,
                                pipeline_mode=pl.Buffered(buffers))
        except (AttributeError, TypeError):   # older jax: no pipeline_mode
            pass
    return pl.BlockSpec((H, bk), index_map)


@functools.partial(jax.jit,
                   static_argnames=("block_k", "num_k_splits", "w1_buffers"))
def target_classifier_forward(emb, w1, b1, w2, b2, *, block_k=24064,
                              num_k_splits=1, w1_buffers=2):
    """Forward pass of `target_classifier`.

    emb: any shape with a leading batch dim; flattened like
         `emb.reshape(emb.shape[0], -1)` in the PyTorch forward.
    Weights use PyTorch's native nn.Linear layout (lane-dense for streaming):
         w1: (64, 192512) = logits.weight          b1: (64,)
         w2: (C, 64)      = logits_simple.weight   b2: (C,)
    """
    B = emb.shape[0]
    # The flatten is a tiny relayout handled once by XLA outside the hot loop.
    # (On v7x a 3-D BlockSpec on emb would save ~3 MiB of HBM traffic.)
    x = emb.reshape(B, -1)                       # (B, K)
    H, K = w1.shape                              # (64, 192512)
    C, H2 = w2.shape                             # (num_classes_target, 64)
    assert x.shape[1] == K, (x.shape, w1.shape)
    assert H2 == H, (w1.shape, w2.shape)
    out_dtype = emb.dtype

    tiling = _choose_tiling(K, block_k, num_k_splits)
    if tiling is None:         # K not a multiple of 128 — not this model
        hidden = jax.nn.sigmoid(x @ w1.T + b1)
        return (hidden @ w2.T + b2).astype(out_dtype)
    num_splits, bk = tiling
    steps_per_split = (K // num_splits) // bk

    # Scoped-VMEM budget: lane-dense W1 tiles (no 64->128 lane padding now)
    # + double-buffered x tiles (sublane dim padded B -> 8) + headroom for
    # the tiny resident blocks and Mosaic-internal scratch.  Capped at 48 MiB
    # so the request always fits v7x's 64 MiB VMEM with headroom.
    wsz = jnp.dtype(w1.dtype).itemsize
    xsz = jnp.dtype(x.dtype).itemsize
    sub_b = -(-B // 8) * 8
    bufs = max(2, w1_buffers)
    vmem_limit = int(min(bufs * bk * H * wsz + 2 * sub_b * bk * xsz + (8 << 20),
                         48 << 20))

    if num_splits == 1:
        # Fused kernel: bias/sigmoid/W2 head runs in the finalize step; the
        # only HBM output is the (B, C) prediction.
        return pl.pallas_call(
            _fused_mlp_kernel,
            out_shape=jax.ShapeDtypeStruct((B, C), out_dtype),
            grid_spec=pltpu.PrefetchScalarGridSpec(
                num_scalar_prefetch=0,
                grid=(steps_per_split,),
                in_specs=[
                    pl.BlockSpec((B, bk), lambda k: (0, k)),          # x strip
                    _w1_block_spec(H, bk, lambda k: (0, k), w1_buffers),
                    pl.BlockSpec((1, H), lambda k: (0, 0)),           # b1
                    pl.BlockSpec((C, H), lambda k: (0, 0)),           # w2
                    pl.BlockSpec((1, C), lambda k: (0, 0)),           # b2
                ],
                out_specs=pl.BlockSpec((B, C), lambda k: (0, 0)),
                scratch_shapes=[pltpu.VMEM((B, H), jnp.float32)],
            ),
            compiler_params=pltpu.CompilerParams(
                dimension_semantics=("arbitrary",),
                vmem_limit_bytes=vmem_limit,
            ),
        )(x, w1, b1.reshape(1, H), w2, b2.reshape(1, C))

    # Split-K path (intended for v7x's two TensorCores; pure overhead on
    # single-TC chips, hence not the default).
    # TODO(synk): profile on v7x and switch axis 0 to pltpu.CORE_PARALLEL if
    # "parallel" does not actually shard the split axis across cores.
    def x_map(s, k):
        return (0, s * steps_per_split + k)

    def w1_map(s, k):
        return (0, s * steps_per_split + k)

    partials = pl.pallas_call(
        _split_xw1_kernel,
        out_shape=jax.ShapeDtypeStruct((num_splits, B, H), jnp.float32),
        grid_spec=pltpu.PrefetchScalarGridSpec(
            num_scalar_prefetch=0,
            grid=(num_splits, steps_per_split),
            in_specs=[
                pl.BlockSpec((B, bk), x_map),
                _w1_block_spec(H, bk, w1_map, w1_buffers),
            ],
            out_specs=pl.BlockSpec((None, B, H), lambda s, k: (s, 0, 0)),
        ),
        compiler_params=pltpu.CompilerParams(
            dimension_semantics=("parallel", "arbitrary"),
            vmem_limit_bytes=vmem_limit,
        ),
    )(x, w1)

    # Tiny cross-split epilogue on (B, 64) in plain XLA.
    hidden = jax.nn.sigmoid(jnp.sum(partials, axis=0) + b1)
    pred = lax.dot_general(hidden, w2,
                           dimension_numbers=(((1,), (1,)), ((), ())),
                           preferred_element_type=jnp.float32) + b2
    return pred.astype(out_dtype)


def init_params(key, in_features, hidden, num_classes, dtype=jnp.float32):
    """PyTorch-style uniform(+-1/sqrt(fan_in)) init, in nn.Linear's native
    (out_features, in_features) weight layout — which is exactly the
    lane-dense layout the kernel streams."""
    k1, k2, k3, k4 = jax.random.split(key, 4)
    bound1 = 1.0 / (in_features ** 0.5)
    bound2 = 1.0 / (hidden ** 0.5)
    w1 = jax.random.uniform(k1, (hidden, in_features), dtype, -bound1, bound1)
    b1 = jax.random.uniform(k2, (hidden,), dtype, -bound1, bound1)
    w2 = jax.random.uniform(k3, (num_classes, hidden), dtype, -bound2, bound2)
    b2 = jax.random.uniform(k4, (num_classes,), dtype, -bound2, bound2)
    return w1, b1, w2, b2


if __name__ == "__main__":
    # Module spec: nn.Linear(192512, 64) -> sigmoid -> nn.Linear(64, C).
    # 192512 = 376 * 512, so an embedding of shape (B, 376, 512) flattens to
    # exactly the 192512 features the module expects.
    B = 2
    IN_FEATURES = 192512
    HIDDEN = 64
    NUM_CLASSES = 8

    key = jax.random.PRNGKey(0)
    k_emb, k_params = jax.random.split(key)

    emb = jax.random.normal(k_emb, (B, 376, 512), dtype=jnp.float32)
    w1, b1, w2, b2 = init_params(k_params, IN_FEATURES, HIDDEN, NUM_CLASSES)

    pred = target_classifier_forward(emb, w1, b1, w2, b2)
    pred = jax.block_until_ready(pred)

    # Pure-JAX reference of the same forward (PyTorch weight layout).
    x = emb.reshape(B, -1)
    ref = jax.nn.sigmoid(x @ w1.T + b1) @ w2.T + b2
    assert pred.shape == (B, NUM_CLASSES), pred.shape
    assert jnp.allclose(pred, ref, atol=1e-4, rtol=1e-4), (
        float(jnp.max(jnp.abs(pred - ref))))

    print("KERNEL_OK")
</pallas_src>

<mosaic_0001>
module attributes {stable_mosaic.version = 11 : i64} {
  func.func @_fused_mlp_kernel(%arg0: i32, %arg1: memref<2x24064xf32, #tpu.memory_space<vmem>>, %arg2: memref<64x24064xf32, #tpu.memory_space<vmem>>, %arg3: memref<1x64xf32, #tpu.memory_space<vmem>>, %arg4: memref<8x64xf32, #tpu.memory_space<vmem>>, %arg5: memref<1x8xf32, #tpu.memory_space<vmem>>, %arg6: memref<2x8xf32, #tpu.memory_space<vmem>>, %arg7: memref<2x64xf32, #tpu.memory_space<vmem>>) attributes {dimension_semantics = [#tpu.dimension_semantics<arbitrary>], iteration_bounds = array<i64: 8>, scalar_prefetch = 0 : i64, scratch_operands = 1 : i64, tpu.core_type = #tpu.core_type<tc>, window_params = [{transform_indices = @transform_0, window_bounds = array<i64: 2, 24064>}, {transform_indices = @transform_1, window_bounds = array<i64: 64, 24064>}, {pipeline_mode = #tpu.pipeline_mode<synchronous>, transform_indices = @transform_2, window_bounds = array<i64: 1, 64>}, {pipeline_mode = #tpu.pipeline_mode<synchronous>, transform_indices = @transform_3, window_bounds = array<i64: 8, 64>}, {pipeline_mode = #tpu.pipeline_mode<synchronous>, transform_indices = @transform_4, window_bounds = array<i64: 1, 8>}, {pipeline_mode = #tpu.pipeline_mode<synchronous>, transform_indices = @transform_5, window_bounds = array<i64: 2, 8>}]} {
    %c0_i32 = arith.constant 0 : i32
    %0 = arith.cmpi eq, %arg0, %c0_i32 : i32
    %1 = arith.extui %0 : i1 to i32
    %c0_i32_0 = arith.constant 0 : i32
    %2 = arith.cmpi ne, %1, %c0_i32_0 : i32
    scf.if %2 {
      %cst_9 = arith.constant 0.000000e+00 : f32
      %12 = vector.broadcast %cst_9 : f32 to vector<2x64xf32>
      %c0_10 = arith.constant 0 : index
      %c0_11 = arith.constant 0 : index
      %13 = vector.load %arg7[%c0_10, %c0_11] : memref<2x64xf32, #tpu.memory_space<vmem>>, vector<2x64xf32>
      tpu.vector_store %arg7[%c0_10, %c0_11], %12 {strides = array<i32>} : memref<2x64xf32, #tpu.memory_space<vmem>>, vector<2x64xf32>,
    } else {
    }
    %c0 = arith.constant 0 : index
    %c0_1 = arith.constant 0 : index
    %3 = vector.load %arg7[%c0, %c0_1] : memref<2x64xf32, #tpu.memory_space<vmem>>, vector<2x64xf32>
    %c0_2 = arith.constant 0 : index
    %c0_3 = arith.constant 0 : index
    %4 = vector.load %arg1[%c0_2, %c0_3] : memref<2x24064xf32, #tpu.memory_space<vmem>>, vector<2x24064xf32>
    %c0_4 = arith.constant 0 : index
    %c0_5 = arith.constant 0 : index
    %5 = vector.load %arg2[%c0_4, %c0_5] : memref<64x24064xf32, #tpu.memory_space<vmem>>, vector<64x24064xf32>
    %cst = arith.constant dense<0.000000e+00> : vector<2x64xf32>
    %6 = tpu.matmul %4, %5, %cst {dimension_numbers = #tpu.dot_dimension_numbers<[1], [1], [0], [0], [0, 0, 1, 0], [], []>} : vector<2x24064xf32>, vector<64x24064xf32>, vector<2x64xf32> -> vector<2x64xf32>
    %7 = arith.addf %3, %6 : vector<2x64xf32>
    %c0_6 = arith.constant 0 : index
    %c0_7 = arith.constant 0 : index
    %8 = vector.load %arg7[%c0_6, %c0_7] : memref<2x64xf32, #tpu.memory_space<vmem>>, vector<2x64xf32>
    tpu.vector_store %arg7[%c0_6, %c0_7], %7 {strides = array<i32>} : memref<2x64xf32, #tpu.memory_space<vmem>>, vector<2x64xf32>,
    %c7_i32 = arith.constant 7 : i32
    %9 = arith.cmpi eq, %arg0, %c7_i32 : i32
    %10 = arith.extui %9 : i1 to i32
    %c0_i32_8 = arith.constant 0 : i32
    %11 = arith.cmpi ne, %10, %c0_i32_8 : i32
    scf.if %11 {
      %c0_9 = arith.constant 0 : index
      %c0_10 = arith.constant 0 : index
      %12 = vector.load %arg7[%c0_9, %c0_10] : memref<2x64xf32, #tpu.memory_space<vmem>>, vector<2x64xf32>
      %c0_11 = arith.constant 0 : index
      %c0_12 = arith.constant 0 : index
      %13 = vector.load %arg3[%c0_11, %c0_12] : memref<1x64xf32, #tpu.memory_space<vmem>>, vector<1x64xf32>
      %14 = vector.broadcast %13 : vector<1x64xf32> to vector<2x64xf32>
      %15 = arith.addf %12, %14 : vector<2x64xf32>
      %cst_13 = arith.constant 0.000000e+00 : f32
      %16 = vector.broadcast %cst_13 : f32 to vector<2x64xf32>
      %17 = arith.subf %16, %15 : vector<2x64xf32>
      %18 = math.exp %17 : vector<2x64xf32>
      %cst_14 = arith.constant 1.000000e+00 : f32
      %19 = vector.broadcast %cst_14 : f32 to vector<2x64xf32>
      %20 = arith.addf %19, %18 : vector<2x64xf32>
      %cst_15 = arith.constant 1.000000e+00 : f32
      %21 = vector.broadcast %cst_15 : f32 to vector<2x64xf32>
      %22 = arith.divf %21, %20 : vector<2x64xf32>
      %c0_16 = arith.constant 0 : index
      %c0_17 = arith.constant 0 : index
      %23 = vector.load %arg4[%c0_16, %c0_17] : memref<8x64xf32, #tpu.memory_space<vmem>>, vector<8x64xf32>
      %cst_18 = arith.constant dense<0.000000e+00> : vector<2x8xf32>
      %24 = tpu.matmul %22, %23, %cst_18 {dimension_numbers = #tpu.dot_dimension_numbers<[1], [1], [0], [0], [0, 0, 1, 0], [], []>} : vector<2x64xf32>, vector<8x64xf32>, vector<2x8xf32> -> vector<2x8xf32>
      %c0_19 = arith.constant 0 : index
      %c0_20 = arith.constant 0 : index
      %25 = vector.load %arg5[%c0_19, %c0_20] : memref<1x8xf32, #tpu.memory_space<vmem>>, vector<1x8xf32>
      %26 = vector.broadcast %25 : vector<1x8xf32> to vector<2x8xf32>
      %27 = arith.addf %24, %26 : vector<2x8xf32>
      %c0_21 = arith.constant 0 : index
      %c0_22 = arith.constant 0 : index
      %28 = vector.load %arg6[%c0_21, %c0_22] : memref<2x8xf32, #tpu.memory_space<vmem>>, vector<2x8xf32>
      tpu.vector_store %arg6[%c0_21, %c0_22], %27 {strides = array<i32>} : memref<2x8xf32, #tpu.memory_space<vmem>>, vector<2x8xf32>,
    } else {
    }
    return
  }
  func.func @transform_0(%arg0: i32) -> (i32, i32) {
    %c0_i32 = arith.constant 0 : i32
    %c0_i32_0 = arith.constant 0 : i32
    return %c0_i32, %arg0 : i32, i32
  }
  func.func @transform_1(%arg0: i32) -> (i32, i32) {
    %c0_i32 = arith.constant 0 : i32
    %c0_i32_0 = arith.constant 0 : i32
    return %c0_i32, %arg0 : i32, i32
  }
  func.func @transform_2(%arg0: i32) -> (i32, i32) {
    %c0_i32 = arith.constant 0 : i32
    %c0_i32_0 = arith.constant 0 : i32
    %c0_i32_1 = arith.constant 0 : i32
    return %c0_i32, %c0_i32_0 : i32, i32
  }
  func.func @transform_3(%arg0: i32) -> (i32, i32) {
    %c0_i32 = arith.constant 0 : i32
    %c0_i32_0 = arith.constant 0 : i32
    %c0_i32_1 = arith.constant 0 : i32
    return %c0_i32, %c0_i32_0 : i32, i32
  }
  func.func @transform_4(%arg0: i32) -> (i32, i32) {
    %c0_i32 = arith.constant 0 : i32
    %c0_i32_0 = arith.constant 0 : i32
    %c0_i32_1 = arith.constant 0 : i32
    return %c0_i32, %c0_i32_0 : i32, i32
  }
  func.func @transform_5(%arg0: i32) -> (i32, i32) {
    %c0_i32 = arith.constant 0 : i32
    %c0_i32_0 = arith.constant 0 : i32
    %c0_i32_1 = arith.constant 0 : i32
    return %c0_i32, %c0_i32_0 : i32, i32
  }
}

</mosaic_0001>

<bundles_post_ra>
// kernel: target_classifier_forward.1
= control target key start
LH: loop header
LB: loop body
LE: loop exit
PB: predicated region body
PF: predicated region fallthrough
CT: control target
= control target key end

     0   :  { %10 = vsyncpa [#allocation4], 0  ;;  %s8193_s0 = inlined_call_operand.vmem [shape: f32[2,192512], index: 0, kind: input, shape index: {}]   ;;  %s8194_s1 = inlined_call_operand.hbm [shape: f32[64,192512], index: 1, kind: input, shape index: {}]   ;;  %s8195_s2 = inlined_call_operand.vmem [shape: f32[1,64], index: 2, kind: input, shape index: {}]   ;;  %s8196_s3 = inlined_call_operand.vmem [shape: f32[8,64], index: 3, kind: input, shape index: {}]   ;;  %s8197_s4 = inlined_call_operand.vmem [shape: f32[1,8], index: 4, kind: input, shape index: {}]   ;;  %s8198_s5 = inlined_call_operand.hbm [shape: f32[2,8], index: 5, kind: output, shape index: {}]  }
   0x1   :  { %12 = vsyncpa [#allocation4 + $0x1], 0 }
   0x2   :  { %13 = vsyncpa [#allocation5], 0  ;;  %s6388_s18 = smov 0   ;;  %s6390_s19 = smov 0  }
   0x3   :  { %s6392_s20 = smov 0   ;;  %s6394_s21 = smov 0  }
   0x4 LB: > { %s6407_s22 = sadd.s32 4294967295, %s6351_s21   ;;  %s6410_s23 = sadd.s32 1, %s6351_s21   ;;  %s6351_s21 = sphi %s6394_s21, %s8204_s21   ;;  %s6347_s20 = sphi %s6392_s20, %s8203_s20   ;;  %s6343_s19 = sphi %s6390_s19, %s8202_s19   ;;  %s6339_s18 = sphi %s6388_s18, %s8201_s18  }
   0x5   : > { %s49_s24 = ssub.s32 %s6351_s21, %s6410_s23  ;;  %s52_s25 = sadd.s32 1, %s6347_s20 }
   0x6   : > { %p50_p0 = scmp.eq.s32.totalorder %s49_s24, 0  ;;  %p59_p1 = scmp.ne.s32.totalorder %s6347_s20, %s6343_s19 }
   0x7   : > { %p60_p2 = scmp.eq.s32.totalorder %s6351_s21, 0  ;;  %p65_p3 = scmp.ne.s32.totalorder %s6343_s19, %s6339_s18 }
   0x8   : > { %s6420_s26 = scalar_select %p50_p0, %s6347_s20, %s52_s25  }
   0x9   : > { %p61_p4 = por %p60_p2, %p59_p1  ;;  %p66_p5 = scmp.eq.s32.totalorder %s6407_s22, 0 }
   0xa   : > { %p6209_p6 = scmp.lt.s32.totalorder %s6351_s21, 8  ;;  %s191_s28 = sand.u32 1, %s6347_s20  }
   0xb   : > { %p6424_p7 = por %p66_p5, %p65_p3  ;;  %s6197_s29 = smul.u32 12032, %s191_s28 }
   0xc   : > { %s6196_s30 = smul.u32 1504, %s6351_s21  ;;  %p6430_p8 = pnand %p6209_p6, %p61_p4 }
   0xd   : > { %s195_s10 = scalar_lea.vmem [#allocation3], %s6197_s29  ;;  %s192_s13 = scalar_lea.sflag [#allocation4], %s191_s28 }
   0xe   : > { %s200_s9 = scalar_lea.hbm %s8194_s1, %s6196_s30  ;;  %s203_s11 = sshll.u32 %s195_s10, 4  ;;  %s204_s11 = int_to_ptr.vmem [resolvable:$true] %s203_s11 }
   0xf   : > { %s201_s12 = sshll.u32 %s200_s9, 4  ;;  %p6259_p10 = pneg %p6430_p8  ;;  %s202_s12 = int_to_ptr.hbm [resolvable:$true] %s201_s12 }
  0x10   : > { %s6255_s14 = sshra.s32 %s202_s12, 4  ;;  %s6262_s18 = scalar_lea.hbm %s8194_s1, 96256  ;;  %s6256_s14 = int_to_ptr.hbm [resolvable:$true] %s6255_s14 }
  0x11   : > { %s6257_s15 = scalar_lea.hbm %s6256_s14, 12032  ;;  %p6263_p13 = scmp.lt.s32.totalorder %s6256_s14, %s8194_s1 }
  0x12   : > { %p6258_p9 = scmp.ne.s32.totalorder %s6256_s14, %s6257_s15  ;;  %p6264_p0 = scmp.lt.s32.totalorder %s6262_s18, %s6257_s15 }
  0x14   : > { %p6260_p11 = pnand %p6259_p10, %p6258_p9  ;;  %p6265_p1 = por %p6264_p0, %p6263_p13 }
  0x16   : > { %p6261_p12 = pneg %p6260_p11 }
  0x18   : > { %p6266_p2 = pnand %p6265_p1, %p6261_p12 }
  0x1a   : > { %6269 = shalt.err (!%p6266_p2)
}
  0x1b   : > { %s6353_s28 = smov 192512   ;;  %s6354_s29 = smov 24064  }
  0x1c   : > { %s6355_s30 = smov 1504   ;;  %p6186_p3 = scmp.ge.s32.totalorder %s6351_s21, 1 }
  0x1d   : > { %6208 = dma.hbm_to_vmem [thread:$0]  (!%p6430_p8), %s202_s12, 192512, %s204_s11, %s192_s13, %s6353_s28, %s6354_s29, %s6355_s30  }
  0x1e   : > { %p211_p4 = scmp.lt.s32.totalorder %s6351_s21, 9 }
  0x20   : > { %p212_p5 = pnand %p6186_p3, %p211_p4 }
  0x21   : > { %s217_s7 = sand.u32 (!%p212_p5), 1, %s6343_s19  }
  0x22   : > { %215 = sbr.rel (%p212_p5) target bundleno = 1865 (0x749), region = 40  ;;  %s218_s9 = scalar_lea.sflag (!%p212_p5), [#allocation4], %s217_s7 }
  0x23   : > { %s6198_s8 = smul.u32 (!%p212_p5), 12032, %s217_s7 }
  0x25   : > { %s6450_s10 = scalar_lea.vmem (!%p212_p5), [#allocation3], %s6198_s8 }
  0x27   : > { %6330 = dma.done.wait (%p6424_p7), %s218_s9, 192512  }
  0x28   : > { %6332 = vsyncadd (%p6424_p7), %s218_s9, 4294774784  ;;  %s249_s14 = smul.u32 188, %s6407_s22  ;;  %p6188_p8 = scmp.ne.s32.totalorder %s6407_s22, 0 }
  0x2a   : > { %p250_p6 = scmp.lt.s32.totalorder %s249_s14, 1503  ;;  %259 = sbr.rel (%p6188_p8) target bundleno = 49 (0x31), region = 48 }
  0x2c   : > { %s8206_s14 = smov (!%p250_p6, %s249_s14), 1503 }
  0x2d   : > { %s6187_s6 = sshll.u32 %s8206_s14, 1 }
  0x2e   : > { %s6460_s12 = scalar_lea.vmem %s8193_s0, %s6187_s6 }
  0x2f   : > { %vm260_vm0 = vcmask 517120   ;;  %v6356_v0 = vmov 0.0  }
  0x30   : > { %261 = vst.msk [vmem:[#allocation2] sm:$0x3] %vm260_vm0, %v6356_v0 }
  0x31 PF: > { %v1626_v1 = vld [vmem:[%s6450_s10 + $0x2920] sm:$0xff]  ;;  %v1628_v2 = vld [vmem:[%s6450_s10 + $0x2930] sm:$0xff]  ;;  %v1627_v3 = vld [vmem:[%s6450_s10 + $0x2928] sm:$0xff]  ;;  %vm6046_vm1 = vcmask 517120   ;;  %p6189_p7 = scmp.ne.s32.totalorder %s6407_s22, 7 }
  0x32   : > { %2293 = vmatpush.xpose.msra.mxu0 %v1626_v1  ;;  %2333 = vmatpush.xpose.msra.mxu2 %v1628_v2  ;;  %v1629_v4 = vld [vmem:[%s6450_s10 + $0x2938] sm:$0xff]  ;;  %v1438_v5 = vld [vmem:[%s6450_s10 + $0x2340] sm:$0xff]  ;;  %v1440_v6 = vld [vmem:[%s6450_s10 + $0x2350] sm:$0xff] }
  0x33   : > { %2313 = vmatpush.xpose.msra.mxu1 %v1627_v3  ;;  %2353 = vmatpush.xpose.msra.mxu3 %v1629_v4  ;;  %v1439_v7 = vld [vmem:[%s6450_s10 + $0x2348] sm:$0xff]  ;;  %v1441_v8 = vld [vmem:[%s6450_s10 + $0x2358] sm:$0xff]  ;;  %v1250_v9 = vld [vmem:[%s6450_s10 + $0x1d60] sm:$0xff] }
  0x34   : > { %v1252_v10 = vld [vmem:[%s6450_s10 + $0x1d70] sm:$0xff]  ;;  %v1251_v11 = vld [vmem:[%s6450_s10 + $0x1d68] sm:$0xff]  ;;  %v1253_v12 = vld [vmem:[%s6450_s10 + $0x1d78] sm:$0xff] }
  0x35   : > { %v1062_v13 = vld [vmem:[%s6450_s10 + $0x1780] sm:$0xff]  ;;  %v1064_v14 = vld [vmem:[%s6450_s10 + $0x1790] sm:$0xff]  ;;  %v1063_v15 = vld [vmem:[%s6450_s10 + $0x1788] sm:$0xff] }
  0x36   : > { %2294 = vmatpush.xpose.msra.mxu0 %v1438_v5  ;;  %2334 = vmatpush.xpose.msra.mxu2 %v1440_v6  ;;  %v1065_v16 = vld [vmem:[%s6450_s10 + $0x1798] sm:$0xff]  ;;  %v874_v17 = vld [vmem:[%s6450_s10 + $0x11a0] sm:$0xff]  ;;  %v876_v18 = vld [vmem:[%s6450_s10 + $0x11b0] sm:$0xff] }
  0x37   : > { %2314 = vmatpush.xpose.msra.mxu1 %v1439_v7  ;;  %2354 = vmatpush.xpose.msra.mxu3 %v1441_v8  ;;  %v875_v19 = vld [vmem:[%s6450_s10 + $0x11a8] sm:$0xff]  ;;  %v877_v20 = vld [vmem:[%s6450_s10 + $0x11b8] sm:$0xff]  ;;  %v686_v21 = vld [vmem:[%s6450_s10 + $0xbc0] sm:$0xff] }
  0x38   : > { %v688_v22 = vld [vmem:[%s6450_s10 + $0xbd0] sm:$0xff]  ;;  %v687_v24 = vld [vmem:[%s6450_s10 + $0xbc8] sm:$0xff]  ;;  %v689_v25 = vld [vmem:[%s6450_s10 + $0xbd8] sm:$0xff] }
  0x39   : > { %v263_v23 = vld [vmem:[%s6460_s12] sm:$0xff]  ;;  %v498_v26 = vld [vmem:[%s6450_s10 + $0x5e0] sm:$0xff]  ;;  %v499_v28 = vld [vmem:[%s6450_s10 + $0x5e8] sm:$0xff] }
  0x3a   : > { %2295 = vmatpush.xpose.msra.mxu0 %v1250_v9  ;;  %2335 = vmatpush.xpose.msra.mxu2 %v1252_v10  ;;  %1861 = vst [vmem:[#allocation1] ss:$4 sm:$0xff] %v263_v23  ;;  %v500_v27 = vld [vmem:[%s6450_s10 + $0x5f0] sm:$0xff]  ;;  %v501_v29 = vld [vmem:[%s6450_s10 + $0x5f8] sm:$0xff]  ;;  %v310_v31 = vld [vmem:[%s6450_s10] sm:$0xff] }
  0x3b   : > { %2315 = vmatpush.xpose.msra.mxu1 %v1251_v11  ;;  %2355 = vmatpush.xpose.msra.mxu3 %v1253_v12  ;;  %v264_v30 = vld [vmem:[%s6460_s12 + $0x8] sm:$0xff]  ;;  %v312_v32 = vld [vmem:[%s6450_s10 + $0x10] sm:$0xff]  ;;  %v311_v35 = vld [vmem:[%s6450_s10 + $0x8] sm:$0xff] }
  0x3c   : > { %1863 = vst [vmem:[#allocation1 + $0x20] ss:$4 sm:$0xff] %v264_v30  ;;  %v1630_v33 = vld [vmem:[%s6450_s10 + $0x2940] sm:$0xff]  ;;  %v1632_v34 = vld [vmem:[%s6450_s10 + $0x2950] sm:$0xff]  ;;  %v313_v36 = vld [vmem:[%s6450_s10 + $0x18] sm:$0xff] }
  0x3d   : > { %v1631_v37 = vld [vmem:[%s6450_s10 + $0x2948] sm:$0xff]  ;;  %v1633_v38 = vld [vmem:[%s6450_s10 + $0x2958] sm:$0xff]  ;;  %v1442_v41 = vld [vmem:[%s6450_s10 + $0x2360] sm:$0xff] }
  0x3e   : > { %2296 = vmatpush.xpose.msra.mxu0 %v1062_v13  ;;  %2336 = vmatpush.xpose.msra.mxu2 %v1064_v14  ;;  %v1444_v42 = vld [vmem:[%s6450_s10 + $0x2370] sm:$0xff]  ;;  %v1443_v45 = vld [vmem:[%s6450_s10 + $0x2368] sm:$0xff]  ;;  %v1445_v46 = vld [vmem:[%s6450_s10 + $0x2378] sm:$0xff] }
  0x3f   : > { %2316 = vmatpush.xpose.msra.mxu1 %v1063_v15  ;;  %2356 = vmatpush.xpose.msra.mxu3 %v1065_v16  ;;  %v1254_v47 = vld [vmem:[%s6450_s10 + $0x1d80] sm:$0xff]  ;;  %v1256_v48 = vld [vmem:[%s6450_s10 + $0x1d90] sm:$0xff]  ;;  %v1255_v49 = vld [vmem:[%s6450_s10 + $0x1d88] sm:$0xff] }
  0x40   : > { %v1257_v50 = vld [vmem:[%s6450_s10 + $0x1d98] sm:$0xff]  ;;  %v1066_v51 = vld [vmem:[%s6450_s10 + $0x17a0] sm:$0xff]  ;;  %v1068_v52 = vld [vmem:[%s6450_s10 + $0x17b0] sm:$0xff] }
  0x41   : > { %v1866_v39 = vld.sshfl [vmem:[#allocation1 + $0x10] sm:$0xff pattern:$0x73625140]  ;;  %v1864_v40 = vld.sshfl [vmem:[#allocation1] sm:$0xff pattern:$0x73625140] }
  0x42   : > { %2297 = vmatpush.xpose.msra.mxu0 %v874_v17  ;;  %2337 = vmatpush.xpose.msra.mxu2 %v876_v18  ;;  %v1867_v43 = vld.sshfl [vmem:[#allocation1 + $0x18] sm:$0xff pattern:$0x73625140]  ;;  %v1865_v44 = vld.sshfl [vmem:[#allocation1 + $0x8] sm:$0xff pattern:$0x73625140] }
  0x43   : > { %2317 = vmatpush.xpose.msra.mxu1 %v875_v19  ;;  %2357 = vmatpush.xpose.msra.mxu3 %v877_v20  ;;  %v1067_v53 = vld [vmem:[%s6450_s10 + $0x17a8] sm:$0xff]  ;;  %v1069_v54 = vld [vmem:[%s6450_s10 + $0x17b8] sm:$0xff]  ;;  %v878_v55 = vld [vmem:[%s6450_s10 + $0x11c0] sm:$0xff] }
  0x44   : > { %v880_v56 = vld [vmem:[%s6450_s10 + $0x11d0] sm:$0xff]  ;;  %v879_v57 = vld [vmem:[%s6450_s10 + $0x11c8] sm:$0xff]  ;;  %v881_v58 = vld [vmem:[%s6450_s10 + $0x11d8] sm:$0xff] }
  0x45   : > { %v690_v59 = vld [vmem:[%s6450_s10 + $0xbe0] sm:$0xff]  ;;  %v692_v60 = vld [vmem:[%s6450_s10 + $0xbf0] sm:$0xff]  ;;  %v691_v61 = vld [vmem:[%s6450_s10 + $0xbe8] sm:$0xff] }
  0x46   : > { %2298 = vmatpush.xpose.msra.mxu0 %v686_v21  ;;  %2338 = vmatpush.xpose.msra.mxu2 %v688_v22  ;;  %v693_v62 = vld [vmem:[%s6450_s10 + $0xbf8] sm:$0xff]  ;;  %v265_v63 = vld [vmem:[%s6460_s12 + $0x10] sm:$0xff]  ;;  %v504_v1 = vld [vmem:[%s6450_s10 + $0x610] sm:$0xff] }
  0x47   : > { %2318 = vmatpush.xpose.msra.mxu1 %v687_v24  ;;  %2358 = vmatpush.xpose.msra.mxu3 %v689_v25  ;;  %1872 = vst [vmem:[#allocation1] ss:$4 sm:$0xff] %v265_v63  ;;  %v502_v0 = vld [vmem:[%s6450_s10 + $0x600] sm:$0xff]  ;;  %v503_v2 = vld [vmem:[%s6450_s10 + $0x608] sm:$0xff]  ;;  %v505_v3 = vld [vmem:[%s6450_s10 + $0x618] sm:$0xff] }
  0x48   : > { %v314_v4 = vld [vmem:[%s6450_s10 + $0x20] sm:$0xff]  ;;  %v316_v5 = vld [vmem:[%s6450_s10 + $0x30] sm:$0xff]  ;;  %v315_v8 = vld [vmem:[%s6450_s10 + $0x28] sm:$0xff] }
  0x49   : > { %v1634_v6 = vld [vmem:[%s6450_s10 + $0x2960] sm:$0xff]  ;;  %v1636_v7 = vld [vmem:[%s6450_s10 + $0x2970] sm:$0xff]  ;;  %v317_v9 = vld [vmem:[%s6450_s10 + $0x38] sm:$0xff] }
  0x4a   : > { %2299 = vmatpush.xpose.msra.mxu0 %v498_v26  ;;  %2339 = vmatpush.xpose.msra.mxu2 %v500_v27  ;;  %v1635_v10 = vld [vmem:[%s6450_s10 + $0x2968] sm:$0xff]  ;;  %v1637_v11 = vld [vmem:[%s6450_s10 + $0x2978] sm:$0xff]  ;;  %v1446_v14 = vld [vmem:[%s6450_s10 + $0x2380] sm:$0xff] }
  0x4b   : > { %2319 = vmatpush.xpose.msra.mxu1 %v499_v28  ;;  %2359 = vmatpush.xpose.msra.mxu3 %v501_v29  ;;  %v1870_v12 = vld.sshfl [vmem:[#allocation1 + $0x30] sm:$0xff pattern:$0x73625140]  ;;  %v1868_v13 = vld.sshfl [vmem:[#allocation1 + $0x20] sm:$0xff pattern:$0x73625140] }
  0x4c   : > { %v1448_v15 = vld [vmem:[%s6450_s10 + $0x2390] sm:$0xff]  ;;  %v1869_v17 = vld.sshfl [vmem:[#allocation1 + $0x28] sm:$0xff pattern:$0x73625140]  ;;  %v1447_v18 = vld [vmem:[%s6450_s10 + $0x2388] sm:$0xff] }
  0x4d   : > { %v1871_v16 = vld.sshfl [vmem:[#allocation1 + $0x38] sm:$0xff pattern:$0x73625140]  ;;  %v1449_v19 = vld [vmem:[%s6450_s10 + $0x2398] sm:$0xff]  ;;  %v1258_v20 = vld [vmem:[%s6450_s10 + $0x1da0] sm:$0xff] }
  0x4e   : > { %2300 = vmatpush.xpose.msra.mxu0 %v310_v31  ;;  %2340 = vmatpush.xpose.msra.mxu2 %v312_v32  ;;  %v1260_v21 = vld [vmem:[%s6450_s10 + $0x1db0] sm:$0xff]  ;;  %v1259_v22 = vld [vmem:[%s6450_s10 + $0x1da8] sm:$0xff]  ;;  %v1261_v23 = vld [vmem:[%s6450_s10 + $0x1db8] sm:$0xff] }
  0x4f   : > { %2320 = vmatpush.xpose.msra.mxu1 %v311_v35  ;;  %2360 = vmatpush.xpose.msra.mxu3 %v313_v36  ;;  %v1070_v24 = vld [vmem:[%s6450_s10 + $0x17c0] sm:$0xff]  ;;  %v1072_v25 = vld [vmem:[%s6450_s10 + $0x17d0] sm:$0xff]  ;;  %v1071_v26 = vld [vmem:[%s6450_s10 + $0x17c8] sm:$0xff] }
  0x50   : > { %v1073_v27 = vld [vmem:[%s6450_s10 + $0x17d8] sm:$0xff]  ;;  %v882_v28 = vld [vmem:[%s6450_s10 + $0x11e0] sm:$0xff]  ;;  %v884_v29 = vld [vmem:[%s6450_s10 + $0x11f0] sm:$0xff] }
  0x51   : > { %2341 = vmatmul.f32.vlgmr.msra.gmra.mxu2 %v1866_v39  ;;  %2301 = vmatmul.f32.vlgmr.msra.gmra.mxu0 %v1864_v40  ;;  %v883_v30 = vld [vmem:[%s6450_s10 + $0x11e8] sm:$0xff]  ;;  %v885_v31 = vld [vmem:[%s6450_s10 + $0x11f8] sm:$0xff]  ;;  %v694_v32 = vld [vmem:[%s6450_s10 + $0xc00] sm:$0xff] }
  0x52   : > { %2373 = vmatpush.xpose.msrb.mxu0 %v1630_v33  ;;  %2413 = vmatpush.xpose.msrb.mxu2 %v1632_v34  ;;  %v696_v33 = vld [vmem:[%s6450_s10 + $0xc10] sm:$0xff]  ;;  %v695_v34 = vld [vmem:[%s6450_s10 + $0xc08] sm:$0xff]  ;;  %v697_v35 = vld [vmem:[%s6450_s10 + $0xc18] sm:$0xff] }
  0x53   : > { %2393 = vmatpush.xpose.msrb.mxu1 %v1631_v37  ;;  %2433 = vmatpush.xpose.msrb.mxu3 %v1633_v38  ;;  %v266_v36 = vld [vmem:[%s6460_s12 + $0x18] sm:$0xff]  ;;  %v506_v37 = vld [vmem:[%s6450_s10 + $0x620] sm:$0xff]  ;;  %v509_v40 = vld [vmem:[%s6450_s10 + $0x638] sm:$0xff] }
  0x54   : > { %2361 = vmatmul.f32.vlgmr.msra.gmra.mxu3 %v1867_v43  ;;  %2321 = vmatmul.f32.vlgmr.msra.gmra.mxu1 %v1865_v44  ;;  %v508_v38 = vld [vmem:[%s6450_s10 + $0x630] sm:$0xff]  ;;  %1873 = vst [vmem:[#allocation1 + $0x20] ss:$4 sm:$0xff] %v266_v36  ;;  %v507_v39 = vld [vmem:[%s6450_s10 + $0x628] sm:$0xff]  ;;  %v1638_v43 = vld [vmem:[%s6450_s10 + $0x2980] sm:$0xff] }
  0x55   : > { %v1640_v44 = vld [vmem:[%s6450_s10 + $0x2990] sm:$0xff]  ;;  %v1075_v63 = vld [vmem:[%s6450_s10 + $0x17e8] sm:$0xff] }
  0x56   : > { %2374 = vmatpush.xpose.msrb.mxu0 %v1442_v41  ;;  %2414 = vmatpush.xpose.msrb.mxu2 %v1444_v42  ;;  %v318_v41 = vld [vmem:[%s6450_s10 + $0x40] sm:$0xff]  ;;  %v320_v42 = vld [vmem:[%s6450_s10 + $0x50] sm:$0xff]  ;;  %v1079_v36 = vld [vmem:[%s6450_s10 + $0x1808] sm:$0xff] }
  0x57   : > { %2394 = vmatpush.xpose.msrb.mxu1 %v1443_v45  ;;  %2434 = vmatpush.xpose.msrb.mxu3 %v1445_v46  ;;  %v319_v45 = vld [vmem:[%s6450_s10 + $0x48] sm:$0xff]  ;;  %v321_v46 = vld [vmem:[%s6450_s10 + $0x58] sm:$0xff] }
  0x5a   : > { %2375 = vmatpush.xpose.msrb.mxu0 %v1254_v47  ;;  %2415 = vmatpush.xpose.msrb.mxu2 %v1256_v48  ;;  %v1874_v47 = vld.sshfl [vmem:[#allocation1] sm:$0xff pattern:$0x73625140]  ;;  %v1876_v48 = vld.sshfl [vmem:[#allocation1 + $0x10] sm:$0xff pattern:$0x73625140] }
  0x5b   : > { %2395 = vmatpush.xpose.msrb.mxu1 %v1255_v49  ;;  %2435 = vmatpush.xpose.msrb.mxu3 %v1257_v50  ;;  %v1639_v49 = vld [vmem:[%s6450_s10 + $0x2988] sm:$0xff]  ;;  %v1641_v50 = vld [vmem:[%s6450_s10 + $0x2998] sm:$0xff] }
  0x5e   : > { %2376 = vmatpush.xpose.msrb.mxu0 %v1066_v51  ;;  %2416 = vmatpush.xpose.msrb.mxu2 %v1068_v52  ;;  %v1875_v51 = vld.sshfl [vmem:[#allocation1 + $0x8] sm:$0xff pattern:$0x73625140]  ;;  %v1877_v52 = vld.sshfl [vmem:[#allocation1 + $0x18] sm:$0xff pattern:$0x73625140] }
  0x5f   : > { %2396 = vmatpush.xpose.msrb.mxu1 %v1067_v53  ;;  %2436 = vmatpush.xpose.msrb.mxu3 %v1069_v54  ;;  %v1450_v53 = vld [vmem:[%s6450_s10 + $0x23a0] sm:$0xff]  ;;  %v1452_v54 = vld [vmem:[%s6450_s10 + $0x23b0] sm:$0xff] }
  0x62   : > { %2377 = vmatpush.xpose.msrb.mxu0 %v878_v55  ;;  %2417 = vmatpush.xpose.msrb.mxu2 %v880_v56  ;;  %v1451_v55 = vld [vmem:[%s6450_s10 + $0x23a8] sm:$0xff]  ;;  %v1453_v56 = vld [vmem:[%s6450_s10 + $0x23b8] sm:$0xff] }
  0x63   : > { %2397 = vmatpush.xpose.msrb.mxu1 %v879_v57  ;;  %2437 = vmatpush.xpose.msrb.mxu3 %v881_v58  ;;  %v1262_v57 = vld [vmem:[%s6450_s10 + $0x1dc0] sm:$0xff]  ;;  %v1264_v58 = vld [vmem:[%s6450_s10 + $0x1dd0] sm:$0xff] }
  0x66   : > { %2378 = vmatpush.xpose.msrb.mxu0 %v690_v59  ;;  %2418 = vmatpush.xpose.msrb.mxu2 %v692_v60  ;;  %v1263_v59 = vld [vmem:[%s6450_s10 + $0x1dc8] sm:$0xff]  ;;  %v1265_v60 = vld [vmem:[%s6450_s10 + $0x1dd8] sm:$0xff] }
  0x67   : > { %2398 = vmatpush.xpose.msrb.mxu1 %v691_v61  ;;  %2438 = vmatpush.xpose.msrb.mxu3 %v693_v62  ;;  %v1074_v61 = vld [vmem:[%s6450_s10 + $0x17e0] sm:$0xff]  ;;  %v1076_v62 = vld [vmem:[%s6450_s10 + $0x17f0] sm:$0xff] }
  0x6a   : > { %2379 = vmatpush.xpose.msrb.mxu0 %v502_v0  ;;  %2419 = vmatpush.xpose.msrb.mxu2 %v504_v1  ;;  %v1077_v0 = vld [vmem:[%s6450_s10 + $0x17f8] sm:$0xff]  ;;  %v886_v1 = vld [vmem:[%s6450_s10 + $0x1200] sm:$0xff] }
  0x6b   : > { %2399 = vmatpush.xpose.msrb.mxu1 %v503_v2  ;;  %2439 = vmatpush.xpose.msrb.mxu3 %v505_v3  ;;  %v888_v2 = vld [vmem:[%s6450_s10 + $0x1210] sm:$0xff]  ;;  %v887_v3 = vld [vmem:[%s6450_s10 + $0x1208] sm:$0xff] }
  0x6e   : > { %2380 = vmatpush.xpose.msrb.mxu0 %v314_v4  ;;  %2420 = vmatpush.xpose.msrb.mxu2 %v316_v5  ;;  %v889_v4 = vld [vmem:[%s6450_s10 + $0x1218] sm:$0xff]  ;;  %v698_v5 = vld [vmem:[%s6450_s10 + $0xc20] sm:$0xff] }
  0x6f   : > { %2400 = vmatpush.xpose.msrb.mxu1 %v315_v8  ;;  %2440 = vmatpush.xpose.msrb.mxu3 %v317_v9  ;;  %v701_v8 = vld [vmem:[%s6450_s10 + $0xc38] sm:$0xff] }
  0x70   : > { %v267_v9 = vld [vmem:[%s6460_s12 + $0x20] sm:$0xff] }
  0x71   : > { %2421 = vmatmul.f32.vlgmr.msrb.gmra.mxu2 %v1870_v12  ;;  %2381 = vmatmul.f32.vlgmr.msrb.gmra.mxu0 %v1868_v13  ;;  %1882 = vst [vmem:[#allocation1] ss:$4 sm:$0xff] %v267_v9  ;;  %v511_v12 = vld [vmem:[%s6450_s10 + $0x648] sm:$0xff]  ;;  %v513_v13 = vld [vmem:[%s6450_s10 + $0x658] sm:$0xff] }
  0x72   : > { %2453 = vmatpush.xpose.msra.mxu0 %v1634_v6  ;;  %2493 = vmatpush.xpose.msra.mxu2 %v1636_v7  ;;  %v700_v6 = vld [vmem:[%s6450_s10 + $0xc30] sm:$0xff]  ;;  %v699_v7 = vld [vmem:[%s6450_s10 + $0xc28] sm:$0xff] }
  0x73   : > { %2473 = vmatpush.xpose.msra.mxu1 %v1635_v10  ;;  %2513 = vmatpush.xpose.msra.mxu3 %v1637_v11  ;;  %v510_v10 = vld [vmem:[%s6450_s10 + $0x640] sm:$0xff]  ;;  %v512_v11 = vld [vmem:[%s6450_s10 + $0x650] sm:$0xff]  ;;  %v1083_v9 = vld [vmem:[%s6450_s10 + $0x1828] sm:$0xff] }
  0x74   : > { %2441 = vmatmul.f32.vlgmr.msrb.gmra.mxu3 %v1871_v16  ;;  %2401 = vmatmul.f32.vlgmr.msrb.gmra.mxu1 %v1869_v17  ;;  %v1642_v16 = vld [vmem:[%s6450_s10 + $0x29a0] sm:$0xff]  ;;  %v1644_v17 = vld [vmem:[%s6450_s10 + $0x29b0] sm:$0xff] }
  0x76   : > { %2454 = vmatpush.xpose.msra.mxu0 %v1446_v14  ;;  %2494 = vmatpush.xpose.msra.mxu2 %v1448_v15  ;;  %v322_v14 = vld [vmem:[%s6450_s10 + $0x60] sm:$0xff]  ;;  %v324_v15 = vld [vmem:[%s6450_s10 + $0x70] sm:$0xff] }
  0x77   : > { %2474 = vmatpush.xpose.msra.mxu1 %v1447_v18  ;;  %2514 = vmatpush.xpose.msra.mxu3 %v1449_v19  ;;  %v323_v18 = vld [vmem:[%s6450_s10 + $0x68] sm:$0xff]  ;;  %v325_v19 = vld [vmem:[%s6450_s10 + $0x78] sm:$0xff] }
  0x7a   : > { %2455 = vmatpush.xpose.msra.mxu0 %v1258_v20  ;;  %2495 = vmatpush.xpose.msra.mxu2 %v1260_v21  ;;  %v1878_v20 = vld.sshfl [vmem:[#allocation1 + $0x20] sm:$0xff pattern:$0x73625140]  ;;  %v1880_v21 = vld.sshfl [vmem:[#allocation1 + $0x30] sm:$0xff pattern:$0x73625140] }
  0x7b   : > { %2475 = vmatpush.xpose.msra.mxu1 %v1259_v22  ;;  %2515 = vmatpush.xpose.msra.mxu3 %v1261_v23  ;;  %v1643_v22 = vld [vmem:[%s6450_s10 + $0x29a8] sm:$0xff]  ;;  %v1645_v23 = vld [vmem:[%s6450_s10 + $0x29b8] sm:$0xff] }
  0x7e   : > { %2456 = vmatpush.xpose.msra.mxu0 %v1070_v24  ;;  %2496 = vmatpush.xpose.msra.mxu2 %v1072_v25  ;;  %v1879_v24 = vld.sshfl [vmem:[#allocation1 + $0x28] sm:$0xff pattern:$0x73625140]  ;;  %v1881_v25 = vld.sshfl [vmem:[#allocation1 + $0x38] sm:$0xff pattern:$0x73625140] }
  0x7f   : > { %2476 = vmatpush.xpose.msra.mxu1 %v1071_v26  ;;  %2516 = vmatpush.xpose.msra.mxu3 %v1073_v27  ;;  %v1454_v26 = vld [vmem:[%s6450_s10 + $0x23c0] sm:$0xff]  ;;  %v1456_v27 = vld [vmem:[%s6450_s10 + $0x23d0] sm:$0xff] }
  0x82   : > { %2457 = vmatpush.xpose.msra.mxu0 %v882_v28  ;;  %2497 = vmatpush.xpose.msra.mxu2 %v884_v29  ;;  %v1455_v28 = vld [vmem:[%s6450_s10 + $0x23c8] sm:$0xff]  ;;  %v1457_v29 = vld [vmem:[%s6450_s10 + $0x23d8] sm:$0xff] }
  0x83   : > { %2477 = vmatpush.xpose.msra.mxu1 %v883_v30  ;;  %2517 = vmatpush.xpose.msra.mxu3 %v885_v31  ;;  %v1266_v30 = vld [vmem:[%s6450_s10 + $0x1de0] sm:$0xff]  ;;  %v1268_v31 = vld [vmem:[%s6450_s10 + $0x1df0] sm:$0xff] }
  0x86   : > { %2458 = vmatpush.xpose.msra.mxu0 %v694_v32  ;;  %2498 = vmatpush.xpose.msra.mxu2 %v696_v33  ;;  %v1267_v32 = vld [vmem:[%s6450_s10 + $0x1de8] sm:$0xff]  ;;  %v1269_v33 = vld [vmem:[%s6450_s10 + $0x1df8] sm:$0xff] }
  0x87   : > { %2478 = vmatpush.xpose.msra.mxu1 %v695_v34  ;;  %2518 = vmatpush.xpose.msra.mxu3 %v697_v35  ;;  %v1078_v34 = vld [vmem:[%s6450_s10 + $0x1800] sm:$0xff]  ;;  %v1080_v35 = vld [vmem:[%s6450_s10 + $0x1810] sm:$0xff] }
  0x8a   : > { %2459 = vmatpush.xpose.msra.mxu0 %v506_v37  ;;  %2499 = vmatpush.xpose.msra.mxu2 %v508_v38  ;;  %v1081_v37 = vld [vmem:[%s6450_s10 + $0x1818] sm:$0xff]  ;;  %v890_v38 = vld [vmem:[%s6450_s10 + $0x1220] sm:$0xff] }
  0x8b   : > { %2479 = vmatpush.xpose.msra.mxu1 %v507_v39  ;;  %2519 = vmatpush.xpose.msra.mxu3 %v509_v40  ;;  %v892_v39 = vld [vmem:[%s6450_s10 + $0x1230] sm:$0xff]  ;;  %v891_v40 = vld [vmem:[%s6450_s10 + $0x1228] sm:$0xff] }
  0x8e   : > { %2460 = vmatpush.xpose.msra.mxu0 %v318_v41  ;;  %2500 = vmatpush.xpose.msra.mxu2 %v320_v42  ;;  %v893_v41 = vld [vmem:[%s6450_s10 + $0x1238] sm:$0xff]  ;;  %v702_v42 = vld [vmem:[%s6450_s10 + $0xc40] sm:$0xff] }
  0x8f   : > { %2480 = vmatpush.xpose.msra.mxu1 %v319_v45  ;;  %2520 = vmatpush.xpose.msra.mxu3 %v321_v46  ;;  %v705_v45 = vld [vmem:[%s6450_s10 + $0xc58] sm:$0xff] }
  0x90   : > { %v268_v46 = vld [vmem:[%s6460_s12 + $0x28] sm:$0xff] }
  0x91   : > { %2461 = vmatmul.f32.vlgmr.msra.gmra.mxu0 %v1874_v47  ;;  %2501 = vmatmul.f32.vlgmr.msra.gmra.mxu2 %v1876_v48  ;;  %v514_v47 = vld [vmem:[%s6450_s10 + $0x660] sm:$0xff]  ;;  %v516_v48 = vld [vmem:[%s6450_s10 + $0x670] sm:$0xff]  ;;  %1883 = vst [vmem:[#allocation1 + $0x20] ss:$4 sm:$0xff] %v268_v46  ;;  %v1087_v46 = vld [vmem:[%s6450_s10 + $0x1848] sm:$0xff] }
  0x92   : > { %2533 = vmatpush.xpose.msrb.mxu0 %v1638_v43  ;;  %2573 = vmatpush.xpose.msrb.mxu2 %v1640_v44  ;;  %v704_v43 = vld [vmem:[%s6450_s10 + $0xc50] sm:$0xff]  ;;  %v703_v44 = vld [vmem:[%s6450_s10 + $0xc48] sm:$0xff] }
  0x93   : > { %2553 = vmatpush.xpose.msrb.mxu1 %v1639_v49  ;;  %2593 = vmatpush.xpose.msrb.mxu3 %v1641_v50  ;;  %v515_v49 = vld [vmem:[%s6450_s10 + $0x668] sm:$0xff]  ;;  %v517_v50 = vld [vmem:[%s6450_s10 + $0x678] sm:$0xff] }
  0x94   : > { %2481 = vmatmul.f32.vlgmr.msra.gmra.mxu1 %v1875_v51  ;;  %2521 = vmatmul.f32.vlgmr.msra.gmra.mxu3 %v1877_v52  ;;  %v326_v51 = vld [vmem:[%s6450_s10 + $0x80] sm:$0xff]  ;;  %v328_v52 = vld [vmem:[%s6450_s10 + $0x90] sm:$0xff] }
  0x96   : > { %2534 = vmatpush.xpose.msrb.mxu0 %v1450_v53  ;;  %2574 = vmatpush.xpose.msrb.mxu2 %v1452_v54  ;;  %v1646_v53 = vld [vmem:[%s6450_s10 + $0x29c0] sm:$0xff]  ;;  %v1648_v54 = vld [vmem:[%s6450_s10 + $0x29d0] sm:$0xff] }
  0x97   : > { %2554 = vmatpush.xpose.msrb.mxu1 %v1451_v55  ;;  %2594 = vmatpush.xpose.msrb.mxu3 %v1453_v56  ;;  %v327_v55 = vld [vmem:[%s6450_s10 + $0x88] sm:$0xff]  ;;  %v329_v56 = vld [vmem:[%s6450_s10 + $0x98] sm:$0xff] }
  0x9a   : > { %2535 = vmatpush.xpose.msrb.mxu0 %v1262_v57  ;;  %2575 = vmatpush.xpose.msrb.mxu2 %v1264_v58  ;;  %v1884_v57 = vld.sshfl [vmem:[#allocation1] sm:$0xff pattern:$0x73625140]  ;;  %v1886_v58 = vld.sshfl [vmem:[#allocation1 + $0x10] sm:$0xff pattern:$0x73625140] }
  0x9b   : > { %2555 = vmatpush.xpose.msrb.mxu1 %v1263_v59  ;;  %2595 = vmatpush.xpose.msrb.mxu3 %v1265_v60  ;;  %v1647_v59 = vld [vmem:[%s6450_s10 + $0x29c8] sm:$0xff]  ;;  %v1649_v60 = vld [vmem:[%s6450_s10 + $0x29d8] sm:$0xff] }
  0x9e   : > { %2536 = vmatpush.xpose.msrb.mxu0 %v1074_v61  ;;  %2576 = vmatpush.xpose.msrb.mxu2 %v1076_v62  ;;  %v1885_v61 = vld.sshfl [vmem:[#allocation1 + $0x8] sm:$0xff pattern:$0x73625140]  ;;  %v1887_v62 = vld.sshfl [vmem:[#allocation1 + $0x18] sm:$0xff pattern:$0x73625140] }
  0x9f   : > { %2556 = vmatpush.xpose.msrb.mxu1 %v1075_v63  ;;  %2596 = vmatpush.xpose.msrb.mxu3 %v1077_v0  ;;  %v1458_v63 = vld [vmem:[%s6450_s10 + $0x23e0] sm:$0xff]  ;;  %v1460_v0 = vld [vmem:[%s6450_s10 + $0x23f0] sm:$0xff] }
  0xa2   : > { %2537 = vmatpush.xpose.msrb.mxu0 %v886_v1  ;;  %2577 = vmatpush.xpose.msrb.mxu2 %v888_v2  ;;  %v1459_v1 = vld [vmem:[%s6450_s10 + $0x23e8] sm:$0xff]  ;;  %v1461_v2 = vld [vmem:[%s6450_s10 + $0x23f8] sm:$0xff] }
  0xa3   : > { %2557 = vmatpush.xpose.msrb.mxu1 %v887_v3  ;;  %2597 = vmatpush.xpose.msrb.mxu3 %v889_v4  ;;  %v1270_v3 = vld [vmem:[%s6450_s10 + $0x1e00] sm:$0xff]  ;;  %v1272_v4 = vld [vmem:[%s6450_s10 + $0x1e10] sm:$0xff] }
  0xa6   : > { %2538 = vmatpush.xpose.msrb.mxu0 %v698_v5  ;;  %2578 = vmatpush.xpose.msrb.mxu2 %v700_v6  ;;  %v1271_v5 = vld [vmem:[%s6450_s10 + $0x1e08] sm:$0xff]  ;;  %v1273_v6 = vld [vmem:[%s6450_s10 + $0x1e18] sm:$0xff] }
  0xa7   : > { %2558 = vmatpush.xpose.msrb.mxu1 %v699_v7  ;;  %2598 = vmatpush.xpose.msrb.mxu3 %v701_v8  ;;  %v1082_v7 = vld [vmem:[%s6450_s10 + $0x1820] sm:$0xff]  ;;  %v1084_v8 = vld [vmem:[%s6450_s10 + $0x1830] sm:$0xff] }
  0xaa   : > { %2539 = vmatpush.xpose.msrb.mxu0 %v510_v10  ;;  %2579 = vmatpush.xpose.msrb.mxu2 %v512_v11  ;;  %v1085_v10 = vld [vmem:[%s6450_s10 + $0x1838] sm:$0xff]  ;;  %v894_v11 = vld [vmem:[%s6450_s10 + $0x1240] sm:$0xff] }
  0xab   : > { %2559 = vmatpush.xpose.msrb.mxu1 %v511_v12  ;;  %2599 = vmatpush.xpose.msrb.mxu3 %v513_v13  ;;  %v896_v12 = vld [vmem:[%s6450_s10 + $0x1250] sm:$0xff]  ;;  %v895_v13 = vld [vmem:[%s6450_s10 + $0x1248] sm:$0xff] }
  0xae   : > { %2540 = vmatpush.xpose.msrb.mxu0 %v322_v14  ;;  %2580 = vmatpush.xpose.msrb.mxu2 %v324_v15  ;;  %v897_v14 = vld [vmem:[%s6450_s10 + $0x1258] sm:$0xff]  ;;  %v706_v15 = vld [vmem:[%s6450_s10 + $0xc60] sm:$0xff] }
  0xaf   : > { %2560 = vmatpush.xpose.msrb.mxu1 %v323_v18  ;;  %2600 = vmatpush.xpose.msrb.mxu3 %v325_v19  ;;  %v709_v18 = vld [vmem:[%s6450_s10 + $0xc78] sm:$0xff]  ;;  %v269_v19 = vld [vmem:[%s6460_s12 + $0x30] sm:$0xff] }
  0xb0   : > { %1892 = vst [vmem:[#allocation1] ss:$4 sm:$0xff] %v269_v19  ;;  %v1091_v19 = vld [vmem:[%s6450_s10 + $0x1868] sm:$0xff] }
  0xb1   : > { %2541 = vmatmul.f32.vlgmr.msrb.gmra.mxu0 %v1878_v20  ;;  %2581 = vmatmul.f32.vlgmr.msrb.gmra.mxu2 %v1880_v21  ;;  %v518_v20 = vld [vmem:[%s6450_s10 + $0x680] sm:$0xff]  ;;  %v520_v21 = vld [vmem:[%s6450_s10 + $0x690] sm:$0xff] }
  0xb2   : > { %2613 = vmatpush.xpose.msra.mxu0 %v1642_v16  ;;  %2653 = vmatpush.xpose.msra.mxu2 %v1644_v17  ;;  %v708_v16 = vld [vmem:[%s6450_s10 + $0xc70] sm:$0xff]  ;;  %v707_v17 = vld [vmem:[%s6450_s10 + $0xc68] sm:$0xff] }
  0xb3   : > { %2633 = vmatpush.xpose.msra.mxu1 %v1643_v22  ;;  %2673 = vmatpush.xpose.msra.mxu3 %v1645_v23  ;;  %v519_v22 = vld [vmem:[%s6450_s10 + $0x688] sm:$0xff]  ;;  %v521_v23 = vld [vmem:[%s6450_s10 + $0x698] sm:$0xff] }
  0xb4   : > { %2561 = vmatmul.f32.vlgmr.msrb.gmra.mxu1 %v1879_v24  ;;  %2601 = vmatmul.f32.vlgmr.msrb.gmra.mxu3 %v1881_v25  ;;  %v330_v24 = vld [vmem:[%s6450_s10 + $0xa0] sm:$0xff]  ;;  %v332_v25 = vld [vmem:[%s6450_s10 + $0xb0] sm:$0xff] }
  0xb6   : > { %2614 = vmatpush.xpose.msra.mxu0 %v1454_v26  ;;  %2654 = vmatpush.xpose.msra.mxu2 %v1456_v27  ;;  %v1650_v26 = vld [vmem:[%s6450_s10 + $0x29e0] sm:$0xff]  ;;  %v1652_v27 = vld [vmem:[%s6450_s10 + $0x29f0] sm:$0xff] }
  0xb7   : > { %2634 = vmatpush.xpose.msra.mxu1 %v1455_v28  ;;  %2674 = vmatpush.xpose.msra.mxu3 %v1457_v29  ;;  %v331_v28 = vld [vmem:[%s6450_s10 + $0xa8] sm:$0xff]  ;;  %v333_v29 = vld [vmem:[%s6450_s10 + $0xb8] sm:$0xff] }
  0xba   : > { %2615 = vmatpush.xpose.msra.mxu0 %v1266_v30  ;;  %2655 = vmatpush.xpose.msra.mxu2 %v1268_v31  ;;  %v1888_v30 = vld.sshfl [vmem:[#allocation1 + $0x20] sm:$0xff pattern:$0x73625140]  ;;  %v1890_v31 = vld.sshfl [vmem:[#allocation1 + $0x30] sm:$0xff pattern:$0x73625140] }
  0xbb   : > { %2635 = vmatpush.xpose.msra.mxu1 %v1267_v32  ;;  %2675 = vmatpush.xpose.msra.mxu3 %v1269_v33  ;;  %v1651_v32 = vld [vmem:[%s6450_s10 + $0x29e8] sm:$0xff]  ;;  %v1653_v33 = vld [vmem:[%s6450_s10 + $0x29f8] sm:$0xff] }
  0xbe   : > { %2616 = vmatpush.xpose.msra.mxu0 %v1078_v34  ;;  %2656 = vmatpush.xpose.msra.mxu2 %v1080_v35  ;;  %v1889_v34 = vld.sshfl [vmem:[#allocation1 + $0x28] sm:$0xff pattern:$0x73625140]  ;;  %v1891_v35 = vld.sshfl [vmem:[#allocation1 + $0x38] sm:$0xff pattern:$0x73625140] }
  0xbf   : > { %2636 = vmatpush.xpose.msra.mxu1 %v1079_v36  ;;  %2676 = vmatpush.xpose.msra.mxu3 %v1081_v37  ;;  %v1462_v36 = vld [vmem:[%s6450_s10 + $0x2400] sm:$0xff]  ;;  %v1464_v37 = vld [vmem:[%s6450_s10 + $0x2410] sm:$0xff] }
  0xc2   : > { %2617 = vmatpush.xpose.msra.mxu0 %v890_v38  ;;  %2657 = vmatpush.xpose.msra.mxu2 %v892_v39  ;;  %v1463_v38 = vld [vmem:[%s6450_s10 + $0x2408] sm:$0xff]  ;;  %v1465_v39 = vld [vmem:[%s6450_s10 + $0x2418] sm:$0xff] }
  0xc3   : > { %2637 = vmatpush.xpose.msra.mxu1 %v891_v40  ;;  %2677 = vmatpush.xpose.msra.mxu3 %v893_v41  ;;  %v1274_v40 = vld [vmem:[%s6450_s10 + $0x1e20] sm:$0xff]  ;;  %v1276_v41 = vld [vmem:[%s6450_s10 + $0x1e30] sm:$0xff] }
  0xc6   : > { %2618 = vmatpush.xpose.msra.mxu0 %v702_v42  ;;  %2658 = vmatpush.xpose.msra.mxu2 %v704_v43  ;;  %v1275_v42 = vld [vmem:[%s6450_s10 + $0x1e28] sm:$0xff]  ;;  %v1277_v43 = vld [vmem:[%s6450_s10 + $0x1e38] sm:$0xff] }
  0xc7   : > { %2638 = vmatpush.xpose.msra.mxu1 %v703_v44  ;;  %2678 = vmatpush.xpose.msra.mxu3 %v705_v45  ;;  %v1086_v44 = vld [vmem:[%s6450_s10 + $0x1840] sm:$0xff]  ;;  %v1088_v45 = vld [vmem:[%s6450_s10 + $0x1850] sm:$0xff] }
  0xca   : > { %2619 = vmatpush.xpose.msra.mxu0 %v514_v47  ;;  %2659 = vmatpush.xpose.msra.mxu2 %v516_v48  ;;  %v1089_v47 = vld [vmem:[%s6450_s10 + $0x1858] sm:$0xff]  ;;  %v898_v48 = vld [vmem:[%s6450_s10 + $0x1260] sm:$0xff] }
  0xcb   : > { %2639 = vmatpush.xpose.msra.mxu1 %v515_v49  ;;  %2679 = vmatpush.xpose.msra.mxu3 %v517_v50  ;;  %v900_v49 = vld [vmem:[%s6450_s10 + $0x1270] sm:$0xff]  ;;  %v899_v50 = vld [vmem:[%s6450_s10 + $0x1268] sm:$0xff] }
  0xce   : > { %2620 = vmatpush.xpose.msra.mxu0 %v326_v51  ;;  %2660 = vmatpush.xpose.msra.mxu2 %v328_v52  ;;  %v901_v51 = vld [vmem:[%s6450_s10 + $0x1278] sm:$0xff]  ;;  %v710_v52 = vld [vmem:[%s6450_s10 + $0xc80] sm:$0xff] }
  0xcf   : > { %2640 = vmatpush.xpose.msra.mxu1 %v327_v55  ;;  %2680 = vmatpush.xpose.msra.mxu3 %v329_v56  ;;  %v713_v55 = vld [vmem:[%s6450_s10 + $0xc98] sm:$0xff]  ;;  %v270_v56 = vld [vmem:[%s6460_s12 + $0x38] sm:$0xff] }
  0xd0   : > { %1893 = vst [vmem:[#allocation1 + $0x20] ss:$4 sm:$0xff] %v270_v56  ;;  %v1095_v56 = vld [vmem:[%s6450_s10 + $0x1888] sm:$0xff] }
  0xd1   : > { %2621 = vmatmul.f32.vlgmr.msra.gmra.mxu0 %v1884_v57  ;;  %2661 = vmatmul.f32.vlgmr.msra.gmra.mxu2 %v1886_v58  ;;  %v522_v57 = vld [vmem:[%s6450_s10 + $0x6a0] sm:$0xff]  ;;  %v524_v58 = vld [vmem:[%s6450_s10 + $0x6b0] sm:$0xff] }
  0xd2   : > { %2693 = vmatpush.xpose.msrb.mxu0 %v1646_v53  ;;  %2733 = vmatpush.xpose.msrb.mxu2 %v1648_v54  ;;  %v712_v53 = vld [vmem:[%s6450_s10 + $0xc90] sm:$0xff]  ;;  %v711_v54 = vld [vmem:[%s6450_s10 + $0xc88] sm:$0xff] }
  0xd3   : > { %2713 = vmatpush.xpose.msrb.mxu1 %v1647_v59  ;;  %2753 = vmatpush.xpose.msrb.mxu3 %v1649_v60  ;;  %v523_v59 = vld [vmem:[%s6450_s10 + $0x6a8] sm:$0xff]  ;;  %v525_v60 = vld [vmem:[%s6450_s10 + $0x6b8] sm:$0xff] }
  0xd4   : > { %2641 = vmatmul.f32.vlgmr.msra.gmra.mxu1 %v1885_v61  ;;  %2681 = vmatmul.f32.vlgmr.msra.gmra.mxu3 %v1887_v62  ;;  %v334_v61 = vld [vmem:[%s6450_s10 + $0xc0] sm:$0xff]  ;;  %v336_v62 = vld [vmem:[%s6450_s10 + $0xd0] sm:$0xff] }
  0xd6   : > { %2694 = vmatpush.xpose.msrb.mxu0 %v1458_v63  ;;  %2734 = vmatpush.xpose.msrb.mxu2 %v1460_v0  ;;  %v1654_v63 = vld [vmem:[%s6450_s10 + $0x2a00] sm:$0xff]  ;;  %v1656_v0 = vld [vmem:[%s6450_s10 + $0x2a10] sm:$0xff] }
  0xd7   : > { %2714 = vmatpush.xpose.msrb.mxu1 %v1459_v1  ;;  %2754 = vmatpush.xpose.msrb.mxu3 %v1461_v2  ;;  %v335_v1 = vld [vmem:[%s6450_s10 + $0xc8] sm:$0xff]  ;;  %v337_v2 = vld [vmem:[%s6450_s10 + $0xd8] sm:$0xff] }
  0xda   : > { %2695 = vmatpush.xpose.msrb.mxu0 %v1270_v3  ;;  %2735 = vmatpush.xpose.msrb.mxu2 %v1272_v4  ;;  %v1894_v3 = vld.sshfl [vmem:[#allocation1] sm:$0xff pattern:$0x73625140]  ;;  %v1896_v4 = vld.sshfl [vmem:[#allocation1 + $0x10] sm:$0xff pattern:$0x73625140] }
  0xdb   : > { %2715 = vmatpush.xpose.msrb.mxu1 %v1271_v5  ;;  %2755 = vmatpush.xpose.msrb.mxu3 %v1273_v6  ;;  %v1655_v5 = vld [vmem:[%s6450_s10 + $0x2a08] sm:$0xff]  ;;  %v1657_v6 = vld [vmem:[%s6450_s10 + $0x2a18] sm:$0xff] }
  0xde   : > { %2696 = vmatpush.xpose.msrb.mxu0 %v1082_v7  ;;  %2736 = vmatpush.xpose.msrb.mxu2 %v1084_v8  ;;  %v1895_v7 = vld.sshfl [vmem:[#allocation1 + $0x8] sm:$0xff pattern:$0x73625140]  ;;  %v1897_v8 = vld.sshfl [vmem:[#allocation1 + $0x18] sm:$0xff pattern:$0x73625140] }
  0xdf   : > { %2716 = vmatpush.xpose.msrb.mxu1 %v1083_v9  ;;  %2756 = vmatpush.xpose.msrb.mxu3 %v1085_v10  ;;  %v1466_v9 = vld [vmem:[%s6450_s10 + $0x2420] sm:$0xff]  ;;  %v1468_v10 = vld [vmem:[%s6450_s10 + $0x2430] sm:$0xff] }
  0xe2   : > { %2697 = vmatpush.xpose.msrb.mxu0 %v894_v11  ;;  %2737 = vmatpush.xpose.msrb.mxu2 %v896_v12  ;;  %v1467_v11 = vld [vmem:[%s6450_s10 + $0x2428] sm:$0xff]  ;;  %v1469_v12 = vld [vmem:[%s6450_s10 + $0x2438] sm:$0xff] }
  0xe3   : > { %2717 = vmatpush.xpose.msrb.mxu1 %v895_v13  ;;  %2757 = vmatpush.xpose.msrb.mxu3 %v897_v14  ;;  %v1278_v13 = vld [vmem:[%s6450_s10 + $0x1e40] sm:$0xff]  ;;  %v1280_v14 = vld [vmem:[%s6450_s10 + $0x1e50] sm:$0xff] }
  0xe6   : > { %2698 = vmatpush.xpose.msrb.mxu0 %v706_v15  ;;  %2738 = vmatpush.xpose.msrb.mxu2 %v708_v16  ;;  %v1279_v15 = vld [vmem:[%s6450_s10 + $0x1e48] sm:$0xff]  ;;  %v1281_v16 = vld [vmem:[%s6450_s10 + $0x1e58] sm:$0xff] }
  0xe7   : > { %2718 = vmatpush.xpose.msrb.mxu1 %v707_v17  ;;  %2758 = vmatpush.xpose.msrb.mxu3 %v709_v18  ;;  %v1090_v17 = vld [vmem:[%s6450_s10 + $0x1860] sm:$0xff]  ;;  %v1092_v18 = vld [vmem:[%s6450_s10 + $0x1870] sm:$0xff] }
  0xea   : > { %2699 = vmatpush.xpose.msrb.mxu0 %v518_v20  ;;  %2739 = vmatpush.xpose.msrb.mxu2 %v520_v21  ;;  %v1093_v20 = vld [vmem:[%s6450_s10 + $0x1878] sm:$0xff]  ;;  %v902_v21 = vld [vmem:[%s6450_s10 + $0x1280] sm:$0xff] }
  0xeb   : > { %2719 = vmatpush.xpose.msrb.mxu1 %v519_v22  ;;  %2759 = vmatpush.xpose.msrb.mxu3 %v521_v23  ;;  %v904_v22 = vld [vmem:[%s6450_s10 + $0x1290] sm:$0xff]  ;;  %v903_v23 = vld [vmem:[%s6450_s10 + $0x1288] sm:$0xff] }
  0xee   : > { %2700 = vmatpush.xpose.msrb.mxu0 %v330_v24  ;;  %2740 = vmatpush.xpose.msrb.mxu2 %v332_v25  ;;  %v905_v24 = vld [vmem:[%s6450_s10 + $0x1298] sm:$0xff]  ;;  %v714_v25 = vld [vmem:[%s6450_s10 + $0xca0] sm:$0xff] }
  0xef   : > { %2720 = vmatpush.xpose.msrb.mxu1 %v331_v28  ;;  %2760 = vmatpush.xpose.msrb.mxu3 %v333_v29  ;;  %v717_v28 = vld [vmem:[%s6450_s10 + $0xcb8] sm:$0xff] }
  0xf0   : > { %v271_v29 = vld [vmem:[%s6460_s12 + $0x40] sm:$0xff] }
  0xf1   : > { %2701 = vmatmul.f32.vlgmr.msrb.gmra.mxu0 %v1888_v30  ;;  %2741 = vmatmul.f32.vlgmr.msrb.gmra.mxu2 %v1890_v31  ;;  %v526_v30 = vld [vmem:[%s6450_s10 + $0x6c0] sm:$0xff]  ;;  %v528_v31 = vld [vmem:[%s6450_s10 + $0x6d0] sm:$0xff]  ;;  %1902 = vst [vmem:[#allocation1] ss:$4 sm:$0xff] %v271_v29  ;;  %v1099_v29 = vld [vmem:[%s6450_s10 + $0x18a8] sm:$0xff] }
  0xf2   : > { %2773 = vmatpush.xpose.msra.mxu0 %v1650_v26  ;;  %2813 = vmatpush.xpose.msra.mxu2 %v1652_v27  ;;  %v716_v26 = vld [vmem:[%s6450_s10 + $0xcb0] sm:$0xff]  ;;  %v715_v27 = vld [vmem:[%s6450_s10 + $0xca8] sm:$0xff] }
  0xf3   : > { %2793 = vmatpush.xpose.msra.mxu1 %v1651_v32  ;;  %2833 = vmatpush.xpose.msra.mxu3 %v1653_v33  ;;  %v527_v32 = vld [vmem:[%s6450_s10 + $0x6c8] sm:$0xff]  ;;  %v529_v33 = vld [vmem:[%s6450_s10 + $0x6d8] sm:$0xff] }
  0xf4   : > { %2721 = vmatmul.f32.vlgmr.msrb.gmra.mxu1 %v1889_v34  ;;  %2761 = vmatmul.f32.vlgmr.msrb.gmra.mxu3 %v1891_v35  ;;  %v338_v34 = vld [vmem:[%s6450_s10 + $0xe0] sm:$0xff]  ;;  %v340_v35 = vld [vmem:[%s6450_s10 + $0xf0] sm:$0xff] }
  0xf6   : > { %2774 = vmatpush.xpose.msra.mxu0 %v1462_v36  ;;  %2814 = vmatpush.xpose.msra.mxu2 %v1464_v37  ;;  %v1658_v36 = vld [vmem:[%s6450_s10 + $0x2a20] sm:$0xff]  ;;  %v1660_v37 = vld [vmem:[%s6450_s10 + $0x2a30] sm:$0xff] }
  0xf7   : > { %2794 = vmatpush.xpose.msra.mxu1 %v1463_v38  ;;  %2834 = vmatpush.xpose.msra.mxu3 %v1465_v39  ;;  %v339_v38 = vld [vmem:[%s6450_s10 + $0xe8] sm:$0xff]  ;;  %v341_v39 = vld [vmem:[%s6450_s10 + $0xf8] sm:$0xff] }
  0xfa   : > { %2775 = vmatpush.xpose.msra.mxu0 %v1274_v40  ;;  %2815 = vmatpush.xpose.msra.mxu2 %v1276_v41  ;;  %v1898_v40 = vld.sshfl [vmem:[#allocation1 + $0x20] sm:$0xff pattern:$0x73625140]  ;;  %v1900_v41 = vld.sshfl [vmem:[#allocation1 + $0x30] sm:$0xff pattern:$0x73625140] }
  0xfb   : > { %2795 = vmatpush.xpose.msra.mxu1 %v1275_v42  ;;  %2835 = vmatpush.xpose.msra.mxu3 %v1277_v43  ;;  %v1659_v42 = vld [vmem:[%s6450_s10 + $0x2a28] sm:$0xff]  ;;  %v1661_v43 = vld [vmem:[%s6450_s10 + $0x2a38] sm:$0xff] }
  0xfe   : > { %2776 = vmatpush.xpose.msra.mxu0 %v1086_v44  ;;  %2816 = vmatpush.xpose.msra.mxu2 %v1088_v45  ;;  %v1899_v44 = vld.sshfl [vmem:[#allocation1 + $0x28] sm:$0xff pattern:$0x73625140]  ;;  %v1901_v45 = vld.sshfl [vmem:[#allocation1 + $0x38] sm:$0xff pattern:$0x73625140] }
  0xff   : > { %2796 = vmatpush.xpose.msra.mxu1 %v1087_v46  ;;  %2836 = vmatpush.xpose.msra.mxu3 %v1089_v47  ;;  %v1470_v46 = vld [vmem:[%s6450_s10 + $0x2440] sm:$0xff]  ;;  %v1472_v47 = vld [vmem:[%s6450_s10 + $0x2450] sm:$0xff] }
 0x102   : > { %2777 = vmatpush.xpose.msra.mxu0 %v898_v48  ;;  %2817 = vmatpush.xpose.msra.mxu2 %v900_v49  ;;  %v1471_v48 = vld [vmem:[%s6450_s10 + $0x2448] sm:$0xff]  ;;  %v1473_v49 = vld [vmem:[%s6450_s10 + $0x2458] sm:$0xff] }
 0x103   : > { %2797 = vmatpush.xpose.msra.mxu1 %v899_v50  ;;  %2837 = vmatpush.xpose.msra.mxu3 %v901_v51  ;;  %v1282_v50 = vld [vmem:[%s6450_s10 + $0x1e60] sm:$0xff]  ;;  %v1284_v51 = vld [vmem:[%s6450_s10 + $0x1e70] sm:$0xff] }
 0x106   : > { %2778 = vmatpush.xpose.msra.mxu0 %v710_v52  ;;  %2818 = vmatpush.xpose.msra.mxu2 %v712_v53  ;;  %v1283_v52 = vld [vmem:[%s6450_s10 + $0x1e68] sm:$0xff]  ;;  %v1285_v53 = vld [vmem:[%s6450_s10 + $0x1e78] sm:$0xff] }
 0x107   : > { %2798 = vmatpush.xpose.msra.mxu1 %v711_v54  ;;  %2838 = vmatpush.xpose.msra.mxu3 %v713_v55  ;;  %v1094_v54 = vld [vmem:[%s6450_s10 + $0x1880] sm:$0xff]  ;;  %v1096_v55 = vld [vmem:[%s6450_s10 + $0x1890] sm:$0xff] }
 0x10a   : > { %2779 = vmatpush.xpose.msra.mxu0 %v522_v57  ;;  %2819 = vmatpush.xpose.msra.mxu2 %v524_v58  ;;  %v1097_v57 = vld [vmem:[%s6450_s10 + $0x1898] sm:$0xff]  ;;  %v906_v58 = vld [vmem:[%s6450_s10 + $0x12a0] sm:$0xff] }
 0x10b   : > { %2799 = vmatpush.xpose.msra.mxu1 %v523_v59  ;;  %2839 = vmatpush.xpose.msra.mxu3 %v525_v60  ;;  %v908_v59 = vld [vmem:[%s6450_s10 + $0x12b0] sm:$0xff]  ;;  %v907_v60 = vld [vmem:[%s6450_s10 + $0x12a8] sm:$0xff] }
 0x10e   : > { %2780 = vmatpush.xpose.msra.mxu0 %v334_v61  ;;  %2820 = vmatpush.xpose.msra.mxu2 %v336_v62  ;;  %v909_v61 = vld [vmem:[%s6450_s10 + $0x12b8] sm:$0xff]  ;;  %v718_v62 = vld [vmem:[%s6450_s10 + $0xcc0] sm:$0xff] }
 0x10f   : > { %2800 = vmatpush.xpose.msra.mxu1 %v335_v1  ;;  %2840 = vmatpush.xpose.msra.mxu3 %v337_v2  ;;  %v721_v1 = vld [vmem:[%s6450_s10 + $0xcd8] sm:$0xff] }
 0x110   : > { %v272_v2 = vld [vmem:[%s6460_s12 + $0x48] sm:$0xff] }
 0x111   : > { %2781 = vmatmul.f32.vlgmr.msra.gmra.mxu0 %v1894_v3  ;;  %2821 = vmatmul.f32.vlgmr.msra.gmra.mxu2 %v1896_v4  ;;  %v530_v3 = vld [vmem:[%s6450_s10 + $0x6e0] sm:$0xff]  ;;  %v532_v4 = vld [vmem:[%s6450_s10 + $0x6f0] sm:$0xff]  ;;  %1903 = vst [vmem:[#allocation1 + $0x20] ss:$4 sm:$0xff] %v272_v2  ;;  %v1103_v2 = vld [vmem:[%s6450_s10 + $0x18c8] sm:$0xff] }
 0x112   : > { %2853 = vmatpush.xpose.msrb.mxu0 %v1654_v63  ;;  %2893 = vmatpush.xpose.msrb.mxu2 %v1656_v0  ;;  %v720_v63 = vld [vmem:[%s6450_s10 + $0xcd0] sm:$0xff]  ;;  %v719_v0 = vld [vmem:[%s6450_s10 + $0xcc8] sm:$0xff] }
 0x113   : > { %2873 = vmatpush.xpose.msrb.mxu1 %v1655_v5  ;;  %2913 = vmatpush.xpose.msrb.mxu3 %v1657_v6  ;;  %v531_v5 = vld [vmem:[%s6450_s10 + $0x6e8] sm:$0xff]  ;;  %v533_v6 = vld [vmem:[%s6450_s10 + $0x6f8] sm:$0xff] }
 0x114   : > { %2801 = vmatmul.f32.vlgmr.msra.gmra.mxu1 %v1895_v7  ;;  %2841 = vmatmul.f32.vlgmr.msra.gmra.mxu3 %v1897_v8  ;;  %v342_v7 = vld [vmem:[%s6450_s10 + $0x100] sm:$0xff]  ;;  %v344_v8 = vld [vmem:[%s6450_s10 + $0x110] sm:$0xff] }
 0x116   : > { %2854 = vmatpush.xpose.msrb.mxu0 %v1466_v9  ;;  %2894 = vmatpush.xpose.msrb.mxu2 %v1468_v10  ;;  %v1662_v9 = vld [vmem:[%s6450_s10 + $0x2a40] sm:$0xff]  ;;  %v1664_v10 = vld [vmem:[%s6450_s10 + $0x2a50] sm:$0xff] }
 0x117   : > { %2874 = vmatpush.xpose.msrb.mxu1 %v1467_v11  ;;  %2914 = vmatpush.xpose.msrb.mxu3 %v1469_v12  ;;  %v343_v11 = vld [vmem:[%s6450_s10 + $0x108] sm:$0xff]  ;;  %v345_v12 = vld [vmem:[%s6450_s10 + $0x118] sm:$0xff] }
 0x11a   : > { %2855 = vmatpush.xpose.msrb.mxu0 %v1278_v13  ;;  %2895 = vmatpush.xpose.msrb.mxu2 %v1280_v14  ;;  %v1904_v13 = vld.sshfl [vmem:[#allocation1] sm:$0xff pattern:$0x73625140]  ;;  %v1906_v14 = vld.sshfl [vmem:[#allocation1 + $0x10] sm:$0xff pattern:$0x73625140] }
 0x11b   : > { %2875 = vmatpush.xpose.msrb.mxu1 %v1279_v15  ;;  %2915 = vmatpush.xpose.msrb.mxu3 %v1281_v16  ;;  %v1663_v15 = vld [vmem:[%s6450_s10 + $0x2a48] sm:$0xff]  ;;  %v1665_v16 = vld [vmem:[%s6450_s10 + $0x2a58] sm:$0xff] }
 0x11e   : > { %2856 = vmatpush.xpose.msrb.mxu0 %v1090_v17  ;;  %2896 = vmatpush.xpose.msrb.mxu2 %v1092_v18  ;;  %v1905_v17 = vld.sshfl [vmem:[#allocation1 + $0x8] sm:$0xff pattern:$0x73625140]  ;;  %v1907_v18 = vld.sshfl [vmem:[#allocation1 + $0x18] sm:$0xff pattern:$0x73625140] }
 0x11f   : > { %2876 = vmatpush.xpose.msrb.mxu1 %v1091_v19  ;;  %2916 = vmatpush.xpose.msrb.mxu3 %v1093_v20  ;;  %v1474_v19 = vld [vmem:[%s6450_s10 + $0x2460] sm:$0xff]  ;;  %v1476_v20 = vld [vmem:[%s6450_s10 + $0x2470] sm:$0xff] }
 0x122   : > { %2857 = vmatpush.xpose.msrb.mxu0 %v902_v21  ;;  %2897 = vmatpush.xpose.msrb.mxu2 %v904_v22  ;;  %v1475_v21 = vld [vmem:[%s6450_s10 + $0x2468] sm:$0xff]  ;;  %v1477_v22 = vld [vmem:[%s6450_s10 + $0x2478] sm:$0xff] }
 0x123   : > { %2877 = vmatpush.xpose.msrb.mxu1 %v903_v23  ;;  %2917 = vmatpush.xpose.msrb.mxu3 %v905_v24  ;;  %v1286_v23 = vld [vmem:[%s6450_s10 + $0x1e80] sm:$0xff]  ;;  %v1288_v24 = vld [vmem:[%s6450_s10 + $0x1e90] sm:$0xff] }
 0x126   : > { %2858 = vmatpush.xpose.msrb.mxu0 %v714_v25  ;;  %2898 = vmatpush.xpose.msrb.mxu2 %v716_v26  ;;  %v1287_v25 = vld [vmem:[%s6450_s10 + $0x1e88] sm:$0xff]  ;;  %v1289_v26 = vld [vmem:[%s6450_s10 + $0x1e98] sm:$0xff] }
 0x127   : > { %2878 = vmatpush.xpose.msrb.mxu1 %v715_v27  ;;  %2918 = vmatpush.xpose.msrb.mxu3 %v717_v28  ;;  %v1098_v27 = vld [vmem:[%s6450_s10 + $0x18a0] sm:$0xff]  ;;  %v1100_v28 = vld [vmem:[%s6450_s10 + $0x18b0] sm:$0xff] }
 0x12a   : > { %2859 = vmatpush.xpose.msrb.mxu0 %v526_v30  ;;  %2899 = vmatpush.xpose.msrb.mxu2 %v528_v31  ;;  %v1101_v30 = vld [vmem:[%s6450_s10 + $0x18b8] sm:$0xff]  ;;  %v910_v31 = vld [vmem:[%s6450_s10 + $0x12c0] sm:$0xff] }
 0x12b   : > { %2879 = vmatpush.xpose.msrb.mxu1 %v527_v32  ;;  %2919 = vmatpush.xpose.msrb.mxu3 %v529_v33  ;;  %v912_v32 = vld [vmem:[%s6450_s10 + $0x12d0] sm:$0xff]  ;;  %v911_v33 = vld [vmem:[%s6450_s10 + $0x12c8] sm:$0xff] }
 0x12e   : > { %2860 = vmatpush.xpose.msrb.mxu0 %v338_v34  ;;  %2900 = vmatpush.xpose.msrb.mxu2 %v340_v35  ;;  %v913_v34 = vld [vmem:[%s6450_s10 + $0x12d8] sm:$0xff]  ;;  %v722_v35 = vld [vmem:[%s6450_s10 + $0xce0] sm:$0xff] }
 0x12f   : > { %2880 = vmatpush.xpose.msrb.mxu1 %v339_v38  ;;  %2920 = vmatpush.xpose.msrb.mxu3 %v341_v39  ;;  %v725_v38 = vld [vmem:[%s6450_s10 + $0xcf8] sm:$0xff]  ;;  %v273_v39 = vld [vmem:[%s6460_s12 + $0x50] sm:$0xff] }
 0x130   : > { %1912 = vst [vmem:[#allocation1] ss:$4 sm:$0xff] %v273_v39  ;;  %v1107_v39 = vld [vmem:[%s6450_s10 + $0x18e8] sm:$0xff] }
 0x131   : > { %2861 = vmatmul.f32.vlgmr.msrb.gmra.mxu0 %v1898_v40  ;;  %2901 = vmatmul.f32.vlgmr.msrb.gmra.mxu2 %v1900_v41  ;;  %v534_v40 = vld [vmem:[%s6450_s10 + $0x700] sm:$0xff]  ;;  %v536_v41 = vld [vmem:[%s6450_s10 + $0x710] sm:$0xff] }
 0x132   : > { %2933 = vmatpush.xpose.msra.mxu0 %v1658_v36  ;;  %2973 = vmatpush.xpose.msra.mxu2 %v1660_v37  ;;  %v724_v36 = vld [vmem:[%s6450_s10 + $0xcf0] sm:$0xff]  ;;  %v723_v37 = vld [vmem:[%s6450_s10 + $0xce8] sm:$0xff] }
 0x133   : > { %2953 = vmatpush.xpose.msra.mxu1 %v1659_v42  ;;  %2993 = vmatpush.xpose.msra.mxu3 %v1661_v43  ;;  %v535_v42 = vld [vmem:[%s6450_s10 + $0x708] sm:$0xff]  ;;  %v537_v43 = vld [vmem:[%s6450_s10 + $0x718] sm:$0xff] }
 0x134   : > { %2881 = vmatmul.f32.vlgmr.msrb.gmra.mxu1 %v1899_v44  ;;  %2921 = vmatmul.f32.vlgmr.msrb.gmra.mxu3 %v1901_v45  ;;  %v346_v44 = vld [vmem:[%s6450_s10 + $0x120] sm:$0xff]  ;;  %v348_v45 = vld [vmem:[%s6450_s10 + $0x130] sm:$0xff] }
 0x136   : > { %2934 = vmatpush.xpose.msra.mxu0 %v1470_v46  ;;  %2974 = vmatpush.xpose.msra.mxu2 %v1472_v47  ;;  %v1666_v46 = vld [vmem:[%s6450_s10 + $0x2a60] sm:$0xff]  ;;  %v1668_v47 = vld [vmem:[%s6450_s10 + $0x2a70] sm:$0xff] }
 0x137   : > { %2954 = vmatpush.xpose.msra.mxu1 %v1471_v48  ;;  %2994 = vmatpush.xpose.msra.mxu3 %v1473_v49  ;;  %v347_v48 = vld [vmem:[%s6450_s10 + $0x128] sm:$0xff]  ;;  %v349_v49 = vld [vmem:[%s6450_s10 + $0x138] sm:$0xff] }
 0x13a   : > { %2935 = vmatpush.xpose.msra.mxu0 %v1282_v50  ;;  %2975 = vmatpush.xpose.msra.mxu2 %v1284_v51  ;;  %v1908_v50 = vld.sshfl [vmem:[#allocation1 + $0x20] sm:$0xff pattern:$0x73625140]  ;;  %v1910_v51 = vld.sshfl [vmem:[#allocation1 + $0x30] sm:$0xff pattern:$0x73625140] }
 0x13b   : > { %2955 = vmatpush.xpose.msra.mxu1 %v1283_v52  ;;  %2995 = vmatpush.xpose.msra.mxu3 %v1285_v53  ;;  %v1667_v52 = vld [vmem:[%s6450_s10 + $0x2a68] sm:$0xff]  ;;  %v1669_v53 = vld [vmem:[%s6450_s10 + $0x2a78] sm:$0xff] }
 0x13e   : > { %2936 = vmatpush.xpose.msra.mxu0 %v1094_v54  ;;  %2976 = vmatpush.xpose.msra.mxu2 %v1096_v55  ;;  %v1909_v54 = vld.sshfl [vmem:[#allocation1 + $0x28] sm:$0xff pattern:$0x73625140]  ;;  %v1911_v55 = vld.sshfl [vmem:[#allocation1 + $0x38] sm:$0xff pattern:$0x73625140] }
 0x13f   : > { %2956 = vmatpush.xpose.msra.mxu1 %v1095_v56  ;;  %2996 = vmatpush.xpose.msra.mxu3 %v1097_v57  ;;  %v1478_v56 = vld [vmem:[%s6450_s10 + $0x2480] sm:$0xff]  ;;  %v1480_v57 = vld [vmem:[%s6450_s10 + $0x2490] sm:$0xff] }
 0x142   : > { %2937 = vmatpush.xpose.msra.mxu0 %v906_v58  ;;  %2977 = vmatpush.xpose.msra.mxu2 %v908_v59  ;;  %v1479_v58 = vld [vmem:[%s6450_s10 + $0x2488] sm:$0xff]  ;;  %v1481_v59 = vld [vmem:[%s6450_s10 + $0x2498] sm:$0xff] }
 0x143   : > { %2957 = vmatpush.xpose.msra.mxu1 %v907_v60  ;;  %2997 = vmatpush.xpose.msra.mxu3 %v909_v61  ;;  %v1290_v60 = vld [vmem:[%s6450_s10 + $0x1ea0] sm:$0xff]  ;;  %v1292_v61 = vld [vmem:[%s6450_s10 + $0x1eb0] sm:$0xff] }
 0x146   : > { %2938 = vmatpush.xpose.msra.mxu0 %v718_v62  ;;  %2978 = vmatpush.xpose.msra.mxu2 %v720_v63  ;;  %v1291_v62 = vld [vmem:[%s6450_s10 + $0x1ea8] sm:$0xff]  ;;  %v1293_v63 = vld [vmem:[%s6450_s10 + $0x1eb8] sm:$0xff] }
 0x147   : > { %2958 = vmatpush.xpose.msra.mxu1 %v719_v0  ;;  %2998 = vmatpush.xpose.msra.mxu3 %v721_v1  ;;  %v1102_v0 = vld [vmem:[%s6450_s10 + $0x18c0] sm:$0xff]  ;;  %v1104_v1 = vld [vmem:[%s6450_s10 + $0x18d0] sm:$0xff] }
 0x14a   : > { %2939 = vmatpush.xpose.msra.mxu0 %v530_v3  ;;  %2979 = vmatpush.xpose.msra.mxu2 %v532_v4  ;;  %v1105_v3 = vld [vmem:[%s6450_s10 + $0x18d8] sm:$0xff]  ;;  %v914_v4 = vld [vmem:[%s6450_s10 + $0x12e0] sm:$0xff] }
 0x14b   : > { %2959 = vmatpush.xpose.msra.mxu1 %v531_v5  ;;  %2999 = vmatpush.xpose.msra.mxu3 %v533_v6  ;;  %v916_v5 = vld [vmem:[%s6450_s10 + $0x12f0] sm:$0xff]  ;;  %v915_v6 = vld [vmem:[%s6450_s10 + $0x12e8] sm:$0xff] }
 0x14e   : > { %2940 = vmatpush.xpose.msra.mxu0 %v342_v7  ;;  %2980 = vmatpush.xpose.msra.mxu2 %v344_v8  ;;  %v917_v7 = vld [vmem:[%s6450_s10 + $0x12f8] sm:$0xff]  ;;  %v726_v8 = vld [vmem:[%s6450_s10 + $0xd00] sm:$0xff] }
 0x14f   : > { %2960 = vmatpush.xpose.msra.mxu1 %v343_v11  ;;  %3000 = vmatpush.xpose.msra.mxu3 %v345_v12  ;;  %v729_v11 = vld [vmem:[%s6450_s10 + $0xd18] sm:$0xff]  ;;  %v274_v12 = vld [vmem:[%s6460_s12 + $0x58] sm:$0xff] }
 0x150   : > { %1913 = vst [vmem:[#allocation1 + $0x20] ss:$4 sm:$0xff] %v274_v12  ;;  %v1111_v12 = vld [vmem:[%s6450_s10 + $0x1908] sm:$0xff] }
 0x151   : > { %2941 = vmatmul.f32.vlgmr.msra.gmra.mxu0 %v1904_v13  ;;  %2981 = vmatmul.f32.vlgmr.msra.gmra.mxu2 %v1906_v14  ;;  %v538_v13 = vld [vmem:[%s6450_s10 + $0x720] sm:$0xff]  ;;  %v540_v14 = vld [vmem:[%s6450_s10 + $0x730] sm:$0xff] }
 0x152   : > { %3013 = vmatpush.xpose.msrb.mxu0 %v1662_v9  ;;  %3053 = vmatpush.xpose.msrb.mxu2 %v1664_v10  ;;  %v728_v9 = vld [vmem:[%s6450_s10 + $0xd10] sm:$0xff]  ;;  %v727_v10 = vld [vmem:[%s6450_s10 + $0xd08] sm:$0xff] }
 0x153   : > { %3033 = vmatpush.xpose.msrb.mxu1 %v1663_v15  ;;  %3073 = vmatpush.xpose.msrb.mxu3 %v1665_v16  ;;  %v539_v15 = vld [vmem:[%s6450_s10 + $0x728] sm:$0xff]  ;;  %v541_v16 = vld [vmem:[%s6450_s10 + $0x738] sm:$0xff] }
 0x154   : > { %2961 = vmatmul.f32.vlgmr.msra.gmra.mxu1 %v1905_v17  ;;  %3001 = vmatmul.f32.vlgmr.msra.gmra.mxu3 %v1907_v18  ;;  %v350_v17 = vld [vmem:[%s6450_s10 + $0x140] sm:$0xff]  ;;  %v352_v18 = vld [vmem:[%s6450_s10 + $0x150] sm:$0xff] }
 0x156   : > { %3014 = vmatpush.xpose.msrb.mxu0 %v1474_v19  ;;  %3054 = vmatpush.xpose.msrb.mxu2 %v1476_v20  ;;  %v1670_v19 = vld [vmem:[%s6450_s10 + $0x2a80] sm:$0xff]  ;;  %v1672_v20 = vld [vmem:[%s6450_s10 + $0x2a90] sm:$0xff] }
 0x157   : > { %3034 = vmatpush.xpose.msrb.mxu1 %v1475_v21  ;;  %3074 = vmatpush.xpose.msrb.mxu3 %v1477_v22  ;;  %v351_v21 = vld [vmem:[%s6450_s10 + $0x148] sm:$0xff]  ;;  %v353_v22 = vld [vmem:[%s6450_s10 + $0x158] sm:$0xff] }
 0x15a   : > { %3015 = vmatpush.xpose.msrb.mxu0 %v1286_v23  ;;  %3055 = vmatpush.xpose.msrb.mxu2 %v1288_v24  ;;  %v1914_v23 = vld.sshfl [vmem:[#allocation1] sm:$0xff pattern:$0x73625140]  ;;  %v1916_v24 = vld.sshfl [vmem:[#allocation1 + $0x10] sm:$0xff pattern:$0x73625140] }
 0x15b   : > { %3035 = vmatpush.xpose.msrb.mxu1 %v1287_v25  ;;  %3075 = vmatpush.xpose.msrb.mxu3 %v1289_v26  ;;  %v1671_v25 = vld [vmem:[%s6450_s10 + $0x2a88] sm:$0xff]  ;;  %v1673_v26 = vld [vmem:[%s6450_s10 + $0x2a98] sm:$0xff] }
 0x15e   : > { %3016 = vmatpush.xpose.msrb.mxu0 %v1098_v27  ;;  %3056 = vmatpush.xpose.msrb.mxu2 %v1100_v28  ;;  %v1915_v27 = vld.sshfl [vmem:[#allocation1 + $0x8] sm:$0xff pattern:$0x73625140]  ;;  %v1917_v28 = vld.sshfl [vmem:[#allocation1 + $0x18] sm:$0xff pattern:$0x73625140] }
 0x15f   : > { %3036 = vmatpush.xpose.msrb.mxu1 %v1099_v29  ;;  %3076 = vmatpush.xpose.msrb.mxu3 %v1101_v30  ;;  %v1482_v29 = vld [vmem:[%s6450_s10 + $0x24a0] sm:$0xff]  ;;  %v1484_v30 = vld [vmem:[%s6450_s10 + $0x24b0] sm:$0xff] }
 0x162   : > { %3017 = vmatpush.xpose.msrb.mxu0 %v910_v31  ;;  %3057 = vmatpush.xpose.msrb.mxu2 %v912_v32  ;;  %v1483_v31 = vld [vmem:[%s6450_s10 + $0x24a8] sm:$0xff]  ;;  %v1485_v32 = vld [vmem:[%s6450_s10 + $0x24b8] sm:$0xff] }
 0x163   : > { %3037 = vmatpush.xpose.msrb.mxu1 %v911_v33  ;;  %3077 = vmatpush.xpose.msrb.mxu3 %v913_v34  ;;  %v1294_v33 = vld [vmem:[%s6450_s10 + $0x1ec0] sm:$0xff]  ;;  %v1296_v34 = vld [vmem:[%s6450_s10 + $0x1ed0] sm:$0xff] }
 0x166   : > { %3018 = vmatpush.xpose.msrb.mxu0 %v722_v35  ;;  %3058 = vmatpush.xpose.msrb.mxu2 %v724_v36  ;;  %v1295_v35 = vld [vmem:[%s6450_s10 + $0x1ec8] sm:$0xff]  ;;  %v1297_v36 = vld [vmem:[%s6450_s10 + $0x1ed8] sm:$0xff] }
 0x167   : > { %3038 = vmatpush.xpose.msrb.mxu1 %v723_v37  ;;  %3078 = vmatpush.xpose.msrb.mxu3 %v725_v38  ;;  %v1106_v37 = vld [vmem:[%s6450_s10 + $0x18e0] sm:$0xff]  ;;  %v1108_v38 = vld [vmem:[%s6450_s10 + $0x18f0] sm:$0xff] }
 0x16a   : > { %3019 = vmatpush.xpose.msrb.mxu0 %v534_v40  ;;  %3059 = vmatpush.xpose.msrb.mxu2 %v536_v41  ;;  %v1109_v40 = vld [vmem:[%s6450_s10 + $0x18f8] sm:$0xff]  ;;  %v918_v41 = vld [vmem:[%s6450_s10 + $0x1300] sm:$0xff] }
 0x16b   : > { %3039 = vmatpush.xpose.msrb.mxu1 %v535_v42  ;;  %3079 = vmatpush.xpose.msrb.mxu3 %v537_v43  ;;  %v920_v42 = vld [vmem:[%s6450_s10 + $0x1310] sm:$0xff]  ;;  %v919_v43 = vld [vmem:[%s6450_s10 + $0x1308] sm:$0xff] }
 0x16e   : > { %3020 = vmatpush.xpose.msrb.mxu0 %v346_v44  ;;  %3060 = vmatpush.xpose.msrb.mxu2 %v348_v45  ;;  %v921_v44 = vld [vmem:[%s6450_s10 + $0x1318] sm:$0xff]  ;;  %v730_v45 = vld [vmem:[%s6450_s10 + $0xd20] sm:$0xff] }
 0x16f   : > { %3040 = vmatpush.xpose.msrb.mxu1 %v347_v48  ;;  %3080 = vmatpush.xpose.msrb.mxu3 %v349_v49  ;;  %v733_v48 = vld [vmem:[%s6450_s10 + $0xd38] sm:$0xff] }
 0x170   : > { %v275_v49 = vld [vmem:[%s6460_s12 + $0x60] sm:$0xff] }
 0x171   : > { %3021 = vmatmul.f32.vlgmr.msrb.gmra.mxu0 %v1908_v50  ;;  %3061 = vmatmul.f32.vlgmr.msrb.gmra.mxu2 %v1910_v51  ;;  %v542_v50 = vld [vmem:[%s6450_s10 + $0x740] sm:$0xff]  ;;  %v544_v51 = vld [vmem:[%s6450_s10 + $0x750] sm:$0xff]  ;;  %1922 = vst [vmem:[#allocation1] ss:$4 sm:$0xff] %v275_v49  ;;  %v1115_v49 = vld [vmem:[%s6450_s10 + $0x1928] sm:$0xff] }
 0x172   : > { %3093 = vmatpush.xpose.msra.mxu0 %v1666_v46  ;;  %3133 = vmatpush.xpose.msra.mxu2 %v1668_v47  ;;  %v732_v46 = vld [vmem:[%s6450_s10 + $0xd30] sm:$0xff]  ;;  %v731_v47 = vld [vmem:[%s6450_s10 + $0xd28] sm:$0xff] }
 0x173   : > { %3113 = vmatpush.xpose.msra.mxu1 %v1667_v52  ;;  %3153 = vmatpush.xpose.msra.mxu3 %v1669_v53  ;;  %v543_v52 = vld [vmem:[%s6450_s10 + $0x748] sm:$0xff]  ;;  %v545_v53 = vld [vmem:[%s6450_s10 + $0x758] sm:$0xff] }
 0x174   : > { %3041 = vmatmul.f32.vlgmr.msrb.gmra.mxu1 %v1909_v54  ;;  %3081 = vmatmul.f32.vlgmr.msrb.gmra.mxu3 %v1911_v55  ;;  %v354_v54 = vld [vmem:[%s6450_s10 + $0x160] sm:$0xff]  ;;  %v356_v55 = vld [vmem:[%s6450_s10 + $0x170] sm:$0xff] }
 0x176   : > { %3094 = vmatpush.xpose.msra.mxu0 %v1478_v56  ;;  %3134 = vmatpush.xpose.msra.mxu2 %v1480_v57  ;;  %v1674_v56 = vld [vmem:[%s6450_s10 + $0x2aa0] sm:$0xff]  ;;  %v1676_v57 = vld [vmem:[%s6450_s10 + $0x2ab0] sm:$0xff] }
 0x177   : > { %3114 = vmatpush.xpose.msra.mxu1 %v1479_v58  ;;  %3154 = vmatpush.xpose.msra.mxu3 %v1481_v59  ;;  %v355_v58 = vld [vmem:[%s6450_s10 + $0x168] sm:$0xff]  ;;  %v357_v59 = vld [vmem:[%s6450_s10 + $0x178] sm:$0xff] }
 0x17a   : > { %3095 = vmatpush.xpose.msra.mxu0 %v1290_v60  ;;  %3135 = vmatpush.xpose.msra.mxu2 %v1292_v61  ;;  %v1918_v60 = vld.sshfl [vmem:[#allocation1 + $0x20] sm:$0xff pattern:$0x73625140]  ;;  %v1920_v61 = vld.sshfl [vmem:[#allocation1 + $0x30] sm:$0xff pattern:$0x73625140] }
 0x17b   : > { %3115 = vmatpush.xpose.msra.mxu1 %v1291_v62  ;;  %3155 = vmatpush.xpose.msra.mxu3 %v1293_v63  ;;  %v1675_v62 = vld [vmem:[%s6450_s10 + $0x2aa8] sm:$0xff]  ;;  %v1677_v63 = vld [vmem:[%s6450_s10 + $0x2ab8] sm:$0xff] }
 0x17e   : > { %3096 = vmatpush.xpose.msra.mxu0 %v1102_v0  ;;  %3136 = vmatpush.xpose.msra.mxu2 %v1104_v1  ;;  %v1919_v0 = vld.sshfl [vmem:[#allocation1 + $0x28] sm:$0xff pattern:$0x73625140]  ;;  %v1921_v1 = vld.sshfl [vmem:[#allocation1 + $0x38] sm:$0xff pattern:$0x73625140] }
 0x17f   : > { %3116 = vmatpush.xpose.msra.mxu1 %v1103_v2  ;;  %3156 = vmatpush.xpose.msra.mxu3 %v1105_v3  ;;  %v1486_v2 = vld [vmem:[%s6450_s10 + $0x24c0] sm:$0xff]  ;;  %v1488_v3 = vld [vmem:[%s6450_s10 + $0x24d0] sm:$0xff] }
 0x182   : > { %3097 = vmatpush.xpose.msra.mxu0 %v914_v4  ;;  %3137 = vmatpush.xpose.msra.mxu2 %v916_v5  ;;  %v1487_v4 = vld [vmem:[%s6450_s10 + $0x24c8] sm:$0xff]  ;;  %v1489_v5 = vld [vmem:[%s6450_s10 + $0x24d8] sm:$0xff] }
 0x183   : > { %3117 = vmatpush.xpose.msra.mxu1 %v915_v6  ;;  %3157 = vmatpush.xpose.msra.mxu3 %v917_v7  ;;  %v1298_v6 = vld [vmem:[%s6450_s10 + $0x1ee0] sm:$0xff]  ;;  %v1300_v7 = vld [vmem:[%s6450_s10 + $0x1ef0] sm:$0xff] }
 0x186   : > { %3098 = vmatpush.xpose.msra.mxu0 %v726_v8  ;;  %3138 = vmatpush.xpose.msra.mxu2 %v728_v9  ;;  %v1299_v8 = vld [vmem:[%s6450_s10 + $0x1ee8] sm:$0xff]  ;;  %v1301_v9 = vld [vmem:[%s6450_s10 + $0x1ef8] sm:$0xff] }
 0x187   : > { %3118 = vmatpush.xpose.msra.mxu1 %v727_v10  ;;  %3158 = vmatpush.xpose.msra.mxu3 %v729_v11  ;;  %v1110_v10 = vld [vmem:[%s6450_s10 + $0x1900] sm:$0xff]  ;;  %v1112_v11 = vld [vmem:[%s6450_s10 + $0x1910] sm:$0xff] }
 0x18a   : > { %3099 = vmatpush.xpose.msra.mxu0 %v538_v13  ;;  %3139 = vmatpush.xpose.msra.mxu2 %v540_v14  ;;  %v1113_v13 = vld [vmem:[%s6450_s10 + $0x1918] sm:$0xff]  ;;  %v922_v14 = vld [vmem:[%s6450_s10 + $0x1320] sm:$0xff] }
 0x18b   : > { %3119 = vmatpush.xpose.msra.mxu1 %v539_v15  ;;  %3159 = vmatpush.xpose.msra.mxu3 %v541_v16  ;;  %v924_v15 = vld [vmem:[%s6450_s10 + $0x1330] sm:$0xff]  ;;  %v923_v16 = vld [vmem:[%s6450_s10 + $0x1328] sm:$0xff] }
 0x18e   : > { %3100 = vmatpush.xpose.msra.mxu0 %v350_v17  ;;  %3140 = vmatpush.xpose.msra.mxu2 %v352_v18  ;;  %v925_v17 = vld [vmem:[%s6450_s10 + $0x1338] sm:$0xff]  ;;  %v734_v18 = vld [vmem:[%s6450_s10 + $0xd40] sm:$0xff] }
 0x18f   : > { %3120 = vmatpush.xpose.msra.mxu1 %v351_v21  ;;  %3160 = vmatpush.xpose.msra.mxu3 %v353_v22  ;;  %v737_v21 = vld [vmem:[%s6450_s10 + $0xd58] sm:$0xff] }
 0x190   : > { %v276_v22 = vld [vmem:[%s6460_s12 + $0x68] sm:$0xff] }
 0x191   : > { %3101 = vmatmul.f32.vlgmr.msra.gmra.mxu0 %v1914_v23  ;;  %3141 = vmatmul.f32.vlgmr.msra.gmra.mxu2 %v1916_v24  ;;  %v546_v23 = vld [vmem:[%s6450_s10 + $0x760] sm:$0xff]  ;;  %v548_v24 = vld [vmem:[%s6450_s10 + $0x770] sm:$0xff]  ;;  %1923 = vst [vmem:[#allocation1 + $0x20] ss:$4 sm:$0xff] %v276_v22  ;;  %v1119_v22 = vld [vmem:[%s6450_s10 + $0x1948] sm:$0xff] }
 0x192   : > { %3173 = vmatpush.xpose.msrb.mxu0 %v1670_v19  ;;  %3213 = vmatpush.xpose.msrb.mxu2 %v1672_v20  ;;  %v736_v19 = vld [vmem:[%s6450_s10 + $0xd50] sm:$0xff]  ;;  %v735_v20 = vld [vmem:[%s6450_s10 + $0xd48] sm:$0xff] }
 0x193   : > { %3193 = vmatpush.xpose.msrb.mxu1 %v1671_v25  ;;  %3233 = vmatpush.xpose.msrb.mxu3 %v1673_v26  ;;  %v547_v25 = vld [vmem:[%s6450_s10 + $0x768] sm:$0xff]  ;;  %v549_v26 = vld [vmem:[%s6450_s10 + $0x778] sm:$0xff] }
 0x194   : > { %3121 = vmatmul.f32.vlgmr.msra.gmra.mxu1 %v1915_v27  ;;  %3161 = vmatmul.f32.vlgmr.msra.gmra.mxu3 %v1917_v28  ;;  %v358_v27 = vld [vmem:[%s6450_s10 + $0x180] sm:$0xff]  ;;  %v360_v28 = vld [vmem:[%s6450_s10 + $0x190] sm:$0xff] }
 0x196   : > { %3174 = vmatpush.xpose.msrb.mxu0 %v1482_v29  ;;  %3214 = vmatpush.xpose.msrb.mxu2 %v1484_v30  ;;  %v1678_v29 = vld [vmem:[%s6450_s10 + $0x2ac0] sm:$0xff]  ;;  %v1680_v30 = vld [vmem:[%s6450_s10 + $0x2ad0] sm:$0xff] }
 0x197   : > { %3194 = vmatpush.xpose.msrb.mxu1 %v1483_v31  ;;  %3234 = vmatpush.xpose.msrb.mxu3 %v1485_v32  ;;  %v359_v31 = vld [vmem:[%s6450_s10 + $0x188] sm:$0xff]  ;;  %v361_v32 = vld [vmem:[%s6450_s10 + $0x198] sm:$0xff] }
 0x19a   : > { %3175 = vmatpush.xpose.msrb.mxu0 %v1294_v33  ;;  %3215 = vmatpush.xpose.msrb.mxu2 %v1296_v34  ;;  %v1924_v33 = vld.sshfl [vmem:[#allocation1] sm:$0xff pattern:$0x73625140]  ;;  %v1926_v34 = vld.sshfl [vmem:[#allocation1 + $0x10] sm:$0xff pattern:$0x73625140] }
 0x19b   : > { %3195 = vmatpush.xpose.msrb.mxu1 %v1295_v35  ;;  %3235 = vmatpush.xpose.msrb.mxu3 %v1297_v36  ;;  %v1679_v35 = vld [vmem:[%s6450_s10 + $0x2ac8] sm:$0xff]  ;;  %v1681_v36 = vld [vmem:[%s6450_s10 + $0x2ad8] sm:$0xff] }
 0x19e   : > { %3176 = vmatpush.xpose.msrb.mxu0 %v1106_v37  ;;  %3216 = vmatpush.xpose.msrb.mxu2 %v1108_v38  ;;  %v1925_v37 = vld.sshfl [vmem:[#allocation1 + $0x8] sm:$0xff pattern:$0x73625140]  ;;  %v1927_v38 = vld.sshfl [vmem:[#allocation1 + $0x18] sm:$0xff pattern:$0x73625140] }
 0x19f   : > { %3196 = vmatpush.xpose.msrb.mxu1 %v1107_v39  ;;  %3236 = vmatpush.xpose.msrb.mxu3 %v1109_v40  ;;  %v1490_v39 = vld [vmem:[%s6450_s10 + $0x24e0] sm:$0xff]  ;;  %v1492_v40 = vld [vmem:[%s6450_s10 + $0x24f0] sm:$0xff] }
 0x1a2   : > { %3177 = vmatpush.xpose.msrb.mxu0 %v918_v41  ;;  %3217 = vmatpush.xpose.msrb.mxu2 %v920_v42  ;;  %v1491_v41 = vld [vmem:[%s6450_s10 + $0x24e8] sm:$0xff]  ;;  %v1493_v42 = vld [vmem:[%s6450_s10 + $0x24f8] sm:$0xff] }
 0x1a3   : > { %3197 = vmatpush.xpose.msrb.mxu1 %v919_v43  ;;  %3237 = vmatpush.xpose.msrb.mxu3 %v921_v44  ;;  %v1302_v43 = vld [vmem:[%s6450_s10 + $0x1f00] sm:$0xff]  ;;  %v1304_v44 = vld [vmem:[%s6450_s10 + $0x1f10] sm:$0xff] }
 0x1a6   : > { %3178 = vmatpush.xpose.msrb.mxu0 %v730_v45  ;;  %3218 = vmatpush.xpose.msrb.mxu2 %v732_v46  ;;  %v1303_v45 = vld [vmem:[%s6450_s10 + $0x1f08] sm:$0xff]  ;;  %v1305_v46 = vld [vmem:[%s6450_s10 + $0x1f18] sm:$0xff] }
 0x1a7   : > { %3198 = vmatpush.xpose.msrb.mxu1 %v731_v47  ;;  %3238 = vmatpush.xpose.msrb.mxu3 %v733_v48  ;;  %v1114_v47 = vld [vmem:[%s6450_s10 + $0x1920] sm:$0xff]  ;;  %v1116_v48 = vld [vmem:[%s6450_s10 + $0x1930] sm:$0xff] }
 0x1aa   : > { %3179 = vmatpush.xpose.msrb.mxu0 %v542_v50  ;;  %3219 = vmatpush.xpose.msrb.mxu2 %v544_v51  ;;  %v1117_v50 = vld [vmem:[%s6450_s10 + $0x1938] sm:$0xff]  ;;  %v926_v51 = vld [vmem:[%s6450_s10 + $0x1340] sm:$0xff] }
 0x1ab   : > { %3199 = vmatpush.xpose.msrb.mxu1 %v543_v52  ;;  %3239 = vmatpush.xpose.msrb.mxu3 %v545_v53  ;;  %v928_v52 = vld [vmem:[%s6450_s10 + $0x1350] sm:$0xff]  ;;  %v927_v53 = vld [vmem:[%s6450_s10 + $0x1348] sm:$0xff] }
 0x1ae   : > { %3180 = vmatpush.xpose.msrb.mxu0 %v354_v54  ;;  %3220 = vmatpush.xpose.msrb.mxu2 %v356_v55  ;;  %v929_v54 = vld [vmem:[%s6450_s10 + $0x1358] sm:$0xff]  ;;  %v738_v55 = vld [vmem:[%s6450_s10 + $0xd60] sm:$0xff] }
 0x1af   : > { %3200 = vmatpush.xpose.msrb.mxu1 %v355_v58  ;;  %3240 = vmatpush.xpose.msrb.mxu3 %v357_v59  ;;  %v741_v58 = vld [vmem:[%s6450_s10 + $0xd78] sm:$0xff]  ;;  %v277_v59 = vld [vmem:[%s6460_s12 + $0x70] sm:$0xff] }
 0x1b0   : > { %1932 = vst [vmem:[#allocation1] ss:$4 sm:$0xff] %v277_v59  ;;  %v1123_v59 = vld [vmem:[%s6450_s10 + $0x1968] sm:$0xff] }
 0x1b1   : > { %3181 = vmatmul.f32.vlgmr.msrb.gmra.mxu0 %v1918_v60  ;;  %3221 = vmatmul.f32.vlgmr.msrb.gmra.mxu2 %v1920_v61  ;;  %v550_v60 = vld [vmem:[%s6450_s10 + $0x780] sm:$0xff]  ;;  %v552_v61 = vld [vmem:[%s6450_s10 + $0x790] sm:$0xff] }
 0x1b2   : > { %3253 = vmatpush.xpose.msra.mxu0 %v1674_v56  ;;  %3293 = vmatpush.xpose.msra.mxu2 %v1676_v57  ;;  %v740_v56 = vld [vmem:[%s6450_s10 + $0xd70] sm:$0xff]  ;;  %v739_v57 = vld [vmem:[%s6450_s10 + $0xd68] sm:$0xff] }
 0x1b3   : > { %3273 = vmatpush.xpose.msra.mxu1 %v1675_v62  ;;  %3313 = vmatpush.xpose.msra.mxu3 %v1677_v63  ;;  %v551_v62 = vld [vmem:[%s6450_s10 + $0x788] sm:$0xff]  ;;  %v553_v63 = vld [vmem:[%s6450_s10 + $0x798] sm:$0xff] }
 0x1b4   : > { %3201 = vmatmul.f32.vlgmr.msrb.gmra.mxu1 %v1919_v0  ;;  %3241 = vmatmul.f32.vlgmr.msrb.gmra.mxu3 %v1921_v1  ;;  %v362_v0 = vld [vmem:[%s6450_s10 + $0x1a0] sm:$0xff]  ;;  %v364_v1 = vld [vmem:[%s6450_s10 + $0x1b0] sm:$0xff] }
 0x1b6   : > { %3254 = vmatpush.xpose.msra.mxu0 %v1486_v2  ;;  %3294 = vmatpush.xpose.msra.mxu2 %v1488_v3  ;;  %v1682_v2 = vld [vmem:[%s6450_s10 + $0x2ae0] sm:$0xff]  ;;  %v1684_v3 = vld [vmem:[%s6450_s10 + $0x2af0] sm:$0xff] }
 0x1b7   : > { %3274 = vmatpush.xpose.msra.mxu1 %v1487_v4  ;;  %3314 = vmatpush.xpose.msra.mxu3 %v1489_v5  ;;  %v363_v4 = vld [vmem:[%s6450_s10 + $0x1a8] sm:$0xff]  ;;  %v365_v5 = vld [vmem:[%s6450_s10 + $0x1b8] sm:$0xff] }
 0x1ba   : > { %3255 = vmatpush.xpose.msra.mxu0 %v1298_v6  ;;  %3295 = vmatpush.xpose.msra.mxu2 %v1300_v7  ;;  %v1928_v6 = vld.sshfl [vmem:[#allocation1 + $0x20] sm:$0xff pattern:$0x73625140]  ;;  %v1930_v7 = vld.sshfl [vmem:[#allocation1 + $0x30] sm:$0xff pattern:$0x73625140] }
 0x1bb   : > { %3275 = vmatpush.xpose.msra.mxu1 %v1299_v8  ;;  %3315 = vmatpush.xpose.msra.mxu3 %v1301_v9  ;;  %v1683_v8 = vld [vmem:[%s6450_s10 + $0x2ae8] sm:$0xff]  ;;  %v1685_v9 = vld [vmem:[%s6450_s10 + $0x2af8] sm:$0xff] }
 0x1be   : > { %3256 = vmatpush.xpose.msra.mxu0 %v1110_v10  ;;  %3296 = vmatpush.xpose.msra.mxu2 %v1112_v11  ;;  %v1929_v10 = vld.sshfl [vmem:[#allocation1 + $0x28] sm:$0xff pattern:$0x73625140]  ;;  %v1931_v11 = vld.sshfl [vmem:[#allocation1 + $0x38] sm:$0xff pattern:$0x73625140] }
 0x1bf   : > { %3276 = vmatpush.xpose.msra.mxu1 %v1111_v12  ;;  %3316 = vmatpush.xpose.msra.mxu3 %v1113_v13  ;;  %v1494_v12 = vld [vmem:[%s6450_s10 + $0x2500] sm:$0xff]  ;;  %v1496_v13 = vld [vmem:[%s6450_s10 + $0x2510] sm:$0xff] }
 0x1c2   : > { %3257 = vmatpush.xpose.msra.mxu0 %v922_v14  ;;  %3297 = vmatpush.xpose.msra.mxu2 %v924_v15  ;;  %v1495_v14 = vld [vmem:[%s6450_s10 + $0x2508] sm:$0xff]  ;;  %v1497_v15 = vld [vmem:[%s6450_s10 + $0x2518] sm:$0xff] }
 0x1c3   : > { %3277 = vmatpush.xpose.msra.mxu1 %v923_v16  ;;  %3317 = vmatpush.xpose.msra.mxu3 %v925_v17  ;;  %v1306_v16 = vld [vmem:[%s6450_s10 + $0x1f20] sm:$0xff]  ;;  %v1308_v17 = vld [vmem:[%s6450_s10 + $0x1f30] sm:$0xff] }
 0x1c6   : > { %3258 = vmatpush.xpose.msra.mxu0 %v734_v18  ;;  %3298 = vmatpush.xpose.msra.mxu2 %v736_v19  ;;  %v1307_v18 = vld [vmem:[%s6450_s10 + $0x1f28] sm:$0xff]  ;;  %v1309_v19 = vld [vmem:[%s6450_s10 + $0x1f38] sm:$0xff] }
 0x1c7   : > { %3278 = vmatpush.xpose.msra.mxu1 %v735_v20  ;;  %3318 = vmatpush.xpose.msra.mxu3 %v737_v21  ;;  %v1118_v20 = vld [vmem:[%s6450_s10 + $0x1940] sm:$0xff]  ;;  %v1120_v21 = vld [vmem:[%s6450_s10 + $0x1950] sm:$0xff] }
 0x1ca   : > { %3259 = vmatpush.xpose.msra.mxu0 %v546_v23  ;;  %3299 = vmatpush.xpose.msra.mxu2 %v548_v24  ;;  %v1121_v23 = vld [vmem:[%s6450_s10 + $0x1958] sm:$0xff]  ;;  %v930_v24 = vld [vmem:[%s6450_s10 + $0x1360] sm:$0xff] }
 0x1cb   : > { %3279 = vmatpush.xpose.msra.mxu1 %v547_v25  ;;  %3319 = vmatpush.xpose.msra.mxu3 %v549_v26  ;;  %v932_v25 = vld [vmem:[%s6450_s10 + $0x1370] sm:$0xff]  ;;  %v931_v26 = vld [vmem:[%s6450_s10 + $0x1368] sm:$0xff] }
 0x1ce   : > { %3260 = vmatpush.xpose.msra.mxu0 %v358_v27  ;;  %3300 = vmatpush.xpose.msra.mxu2 %v360_v28  ;;  %v933_v27 = vld [vmem:[%s6450_s10 + $0x1378] sm:$0xff]  ;;  %v742_v28 = vld [vmem:[%s6450_s10 + $0xd80] sm:$0xff] }
 0x1cf   : > { %3280 = vmatpush.xpose.msra.mxu1 %v359_v31  ;;  %3320 = vmatpush.xpose.msra.mxu3 %v361_v32  ;;  %v745_v31 = vld [vmem:[%s6450_s10 + $0xd98] sm:$0xff]  ;;  %v278_v32 = vld [vmem:[%s6460_s12 + $0x78] sm:$0xff] }
 0x1d0   : > { %1933 = vst [vmem:[#allocation1 + $0x20] ss:$4 sm:$0xff] %v278_v32  ;;  %v1127_v32 = vld [vmem:[%s6450_s10 + $0x1988] sm:$0xff] }
 0x1d1   : > { %3261 = vmatmul.f32.vlgmr.msra.gmra.mxu0 %v1924_v33  ;;  %3301 = vmatmul.f32.vlgmr.msra.gmra.mxu2 %v1926_v34  ;;  %v554_v33 = vld [vmem:[%s6450_s10 + $0x7a0] sm:$0xff]  ;;  %v556_v34 = vld [vmem:[%s6450_s10 + $0x7b0] sm:$0xff] }
 0x1d2   : > { %3333 = vmatpush.xpose.msrb.mxu0 %v1678_v29  ;;  %3373 = vmatpush.xpose.msrb.mxu2 %v1680_v30  ;;  %v744_v29 = vld [vmem:[%s6450_s10 + $0xd90] sm:$0xff]  ;;  %v743_v30 = vld [vmem:[%s6450_s10 + $0xd88] sm:$0xff] }
 0x1d3   : > { %3353 = vmatpush.xpose.msrb.mxu1 %v1679_v35  ;;  %3393 = vmatpush.xpose.msrb.mxu3 %v1681_v36  ;;  %v555_v35 = vld [vmem:[%s6450_s10 + $0x7a8] sm:$0xff]  ;;  %v557_v36 = vld [vmem:[%s6450_s10 + $0x7b8] sm:$0xff] }
 0x1d4   : > { %3281 = vmatmul.f32.vlgmr.msra.gmra.mxu1 %v1925_v37  ;;  %3321 = vmatmul.f32.vlgmr.msra.gmra.mxu3 %v1927_v38  ;;  %v366_v37 = vld [vmem:[%s6450_s10 + $0x1c0] sm:$0xff]  ;;  %v368_v38 = vld [vmem:[%s6450_s10 + $0x1d0] sm:$0xff] }
 0x1d6   : > { %3334 = vmatpush.xpose.msrb.mxu0 %v1490_v39  ;;  %3374 = vmatpush.xpose.msrb.mxu2 %v1492_v40  ;;  %v1686_v39 = vld [vmem:[%s6450_s10 + $0x2b00] sm:$0xff]  ;;  %v1688_v40 = vld [vmem:[%s6450_s10 + $0x2b10] sm:$0xff] }
 0x1d7   : > { %3354 = vmatpush.xpose.msrb.mxu1 %v1491_v41  ;;  %3394 = vmatpush.xpose.msrb.mxu3 %v1493_v42  ;;  %v367_v41 = vld [vmem:[%s6450_s10 + $0x1c8] sm:$0xff]  ;;  %v369_v42 = vld [vmem:[%s6450_s10 + $0x1d8] sm:$0xff] }
 0x1da   : > { %3335 = vmatpush.xpose.msrb.mxu0 %v1302_v43  ;;  %3375 = vmatpush.xpose.msrb.mxu2 %v1304_v44  ;;  %v1934_v43 = vld.sshfl [vmem:[#allocation1] sm:$0xff pattern:$0x73625140]  ;;  %v1936_v44 = vld.sshfl [vmem:[#allocation1 + $0x10] sm:$0xff pattern:$0x73625140] }
 0x1db   : > { %3355 = vmatpush.xpose.msrb.mxu1 %v1303_v45  ;;  %3395 = vmatpush.xpose.msrb.mxu3 %v1305_v46  ;;  %v1687_v45 = vld [vmem:[%s6450_s10 + $0x2b08] sm:$0xff]  ;;  %v1689_v46 = vld [vmem:[%s6450_s10 + $0x2b18] sm:$0xff] }
 0x1de   : > { %3336 = vmatpush.xpose.msrb.mxu0 %v1114_v47  ;;  %3376 = vmatpush.xpose.msrb.mxu2 %v1116_v48  ;;  %v1935_v47 = vld.sshfl [vmem:[#allocation1 + $0x8] sm:$0xff pattern:$0x73625140]  ;;  %v1937_v48 = vld.sshfl [vmem:[#allocation1 + $0x18] sm:$0xff pattern:$0x73625140] }
 0x1df   : > { %3356 = vmatpush.xpose.msrb.mxu1 %v1115_v49  ;;  %3396 = vmatpush.xpose.msrb.mxu3 %v1117_v50  ;;  %v1498_v49 = vld [vmem:[%s6450_s10 + $0x2520] sm:$0xff]  ;;  %v1500_v50 = vld [vmem:[%s6450_s10 + $0x2530] sm:$0xff] }
 0x1e2   : > { %3337 = vmatpush.xpose.msrb.mxu0 %v926_v51  ;;  %3377 = vmatpush.xpose.msrb.mxu2 %v928_v52  ;;  %v1499_v51 = vld [vmem:[%s6450_s10 + $0x2528] sm:$0xff]  ;;  %v1501_v52 = vld [vmem:[%s6450_s10 + $0x2538] sm:$0xff] }
 0x1e3   : > { %3357 = vmatpush.xpose.msrb.mxu1 %v927_v53  ;;  %3397 = vmatpush.xpose.msrb.mxu3 %v929_v54  ;;  %v1310_v53 = vld [vmem:[%s6450_s10 + $0x1f40] sm:$0xff]  ;;  %v1312_v54 = vld [vmem:[%s6450_s10 + $0x1f50] sm:$0xff] }
 0x1e6   : > { %3338 = vmatpush.xpose.msrb.mxu0 %v738_v55  ;;  %3378 = vmatpush.xpose.msrb.mxu2 %v740_v56  ;;  %v1311_v55 = vld [vmem:[%s6450_s10 + $0x1f48] sm:$0xff]  ;;  %v1313_v56 = vld [vmem:[%s6450_s10 + $0x1f58] sm:$0xff] }
 0x1e7   : > { %3358 = vmatpush.xpose.msrb.mxu1 %v739_v57  ;;  %3398 = vmatpush.xpose.msrb.mxu3 %v741_v58  ;;  %v1122_v57 = vld [vmem:[%s6450_s10 + $0x1960] sm:$0xff]  ;;  %v1124_v58 = vld [vmem:[%s6450_s10 + $0x1970] sm:$0xff] }
 0x1ea   : > { %3339 = vmatpush.xpose.msrb.mxu0 %v550_v60  ;;  %3379 = vmatpush.xpose.msrb.mxu2 %v552_v61  ;;  %v1125_v60 = vld [vmem:[%s6450_s10 + $0x1978] sm:$0xff]  ;;  %v934_v61 = vld [vmem:[%s6450_s10 + $0x1380] sm:$0xff] }
 0x1eb   : > { %3359 = vmatpush.xpose.msrb.mxu1 %v551_v62  ;;  %3399 = vmatpush.xpose.msrb.mxu3 %v553_v63  ;;  %v936_v62 = vld [vmem:[%s6450_s10 + $0x1390] sm:$0xff]  ;;  %v935_v63 = vld [vmem:[%s6450_s10 + $0x1388] sm:$0xff] }
 0x1ee   : > { %3340 = vmatpush.xpose.msrb.mxu0 %v362_v0  ;;  %3380 = vmatpush.xpose.msrb.mxu2 %v364_v1  ;;  %v937_v0 = vld [vmem:[%s6450_s10 + $0x1398] sm:$0xff]  ;;  %v746_v1 = vld [vmem:[%s6450_s10 + $0xda0] sm:$0xff] }
 0x1ef   : > { %3360 = vmatpush.xpose.msrb.mxu1 %v363_v4  ;;  %3400 = vmatpush.xpose.msrb.mxu3 %v365_v5  ;;  %v749_v4 = vld [vmem:[%s6450_s10 + $0xdb8] sm:$0xff] }
 0x1f0   : > { %v279_v5 = vld [vmem:[%s6460_s12 + $0x80] sm:$0xff] }
 0x1f1   : > { %3341 = vmatmul.f32.vlgmr.msrb.gmra.mxu0 %v1928_v6  ;;  %3381 = vmatmul.f32.vlgmr.msrb.gmra.mxu2 %v1930_v7  ;;  %v558_v6 = vld [vmem:[%s6450_s10 + $0x7c0] sm:$0xff]  ;;  %v560_v7 = vld [vmem:[%s6450_s10 + $0x7d0] sm:$0xff]  ;;  %1942 = vst [vmem:[#allocation1] ss:$4 sm:$0xff] %v279_v5  ;;  %v1131_v5 = vld [vmem:[%s6450_s10 + $0x19a8] sm:$0xff] }
 0x1f2   : > { %3413 = vmatpush.xpose.msra.mxu0 %v1682_v2  ;;  %3453 = vmatpush.xpose.msra.mxu2 %v1684_v3  ;;  %v748_v2 = vld [vmem:[%s6450_s10 + $0xdb0] sm:$0xff]  ;;  %v747_v3 = vld [vmem:[%s6450_s10 + $0xda8] sm:$0xff] }
 0x1f3   : > { %3433 = vmatpush.xpose.msra.mxu1 %v1683_v8  ;;  %3473 = vmatpush.xpose.msra.mxu3 %v1685_v9  ;;  %v559_v8 = vld [vmem:[%s6450_s10 + $0x7c8] sm:$0xff]  ;;  %v561_v9 = vld [vmem:[%s6450_s10 + $0x7d8] sm:$0xff] }
 0x1f4   : > { %3361 = vmatmul.f32.vlgmr.msrb.gmra.mxu1 %v1929_v10  ;;  %3401 = vmatmul.f32.vlgmr.msrb.gmra.mxu3 %v1931_v11  ;;  %v370_v10 = vld [vmem:[%s6450_s10 + $0x1e0] sm:$0xff]  ;;  %v372_v11 = vld [vmem:[%s6450_s10 + $0x1f0] sm:$0xff] }
 0x1f6   : > { %3414 = vmatpush.xpose.msra.mxu0 %v1494_v12  ;;  %3454 = vmatpush.xpose.msra.mxu2 %v1496_v13  ;;  %v1690_v12 = vld [vmem:[%s6450_s10 + $0x2b20] sm:$0xff]  ;;  %v1692_v13 = vld [vmem:[%s6450_s10 + $0x2b30] sm:$0xff] }
 0x1f7   : > { %3434 = vmatpush.xpose.msra.mxu1 %v1495_v14  ;;  %3474 = vmatpush.xpose.msra.mxu3 %v1497_v15  ;;  %v371_v14 = vld [vmem:[%s6450_s10 + $0x1e8] sm:$0xff]  ;;  %v373_v15 = vld [vmem:[%s6450_s10 + $0x1f8] sm:$0xff] }
 0x1fa   : > { %3415 = vmatpush.xpose.msra.mxu0 %v1306_v16  ;;  %3455 = vmatpush.xpose.msra.mxu2 %v1308_v17  ;;  %v1938_v16 = vld.sshfl [vmem:[#allocation1 + $0x20] sm:$0xff pattern:$0x73625140]  ;;  %v1940_v17 = vld.sshfl [vmem:[#allocation1 + $0x30] sm:$0xff pattern:$0x73625140] }
 0x1fb   : > { %3435 = vmatpush.xpose.msra.mxu1 %v1307_v18  ;;  %3475 = vmatpush.xpose.msra.mxu3 %v1309_v19  ;;  %v1691_v18 = vld [vmem:[%s6450_s10 + $0x2b28] sm:$0xff]  ;;  %v1693_v19 = vld [vmem:[%s6450_s10 + $0x2b38] sm:$0xff] }
 0x1fe   : > { %3416 = vmatpush.xpose.msra.mxu0 %v1118_v20  ;;  %3456 = vmatpush.xpose.msra.mxu2 %v1120_v21  ;;  %v1939_v20 = vld.sshfl [vmem:[#allocation1 + $0x28] sm:$0xff pattern:$0x73625140]  ;;  %v1941_v21 = vld.sshfl [vmem:[#allocation1 + $0x38] sm:$0xff pattern:$0x73625140] }
 0x1ff   : > { %3436 = vmatpush.xpose.msra.mxu1 %v1119_v22  ;;  %3476 = vmatpush.xpose.msra.mxu3 %v1121_v23  ;;  %v1502_v22 = vld [vmem:[%s6450_s10 + $0x2540] sm:$0xff]  ;;  %v1504_v23 = vld [vmem:[%s6450_s10 + $0x2550] sm:$0xff] }
 0x202   : > { %3417 = vmatpush.xpose.msra.mxu0 %v930_v24  ;;  %3457 = vmatpush.xpose.msra.mxu2 %v932_v25  ;;  %v1503_v24 = vld [vmem:[%s6450_s10 + $0x2548] sm:$0xff]  ;;  %v1505_v25 = vld [vmem:[%s6450_s10 + $0x2558] sm:$0xff] }
 0x203   : > { %3437 = vmatpush.xpose.msra.mxu1 %v931_v26  ;;  %3477 = vmatpush.xpose.msra.mxu3 %v933_v27  ;;  %v1314_v26 = vld [vmem:[%s6450_s10 + $0x1f60] sm:$0xff]  ;;  %v1316_v27 = vld [vmem:[%s6450_s10 + $0x1f70] sm:$0xff] }
 0x206   : > { %3418 = vmatpush.xpose.msra.mxu0 %v742_v28  ;;  %3458 = vmatpush.xpose.msra.mxu2 %v744_v29  ;;  %v1315_v28 = vld [vmem:[%s6450_s10 + $0x1f68] sm:$0xff]  ;;  %v1317_v29 = vld [vmem:[%s6450_s10 + $0x1f78] sm:$0xff] }
 0x207   : > { %3438 = vmatpush.xpose.msra.mxu1 %v743_v30  ;;  %3478 = vmatpush.xpose.msra.mxu3 %v745_v31  ;;  %v1126_v30 = vld [vmem:[%s6450_s10 + $0x1980] sm:$0xff]  ;;  %v1128_v31 = vld [vmem:[%s6450_s10 + $0x1990] sm:$0xff] }
 0x20a   : > { %3419 = vmatpush.xpose.msra.mxu0 %v554_v33  ;;  %3459 = vmatpush.xpose.msra.mxu2 %v556_v34  ;;  %v1129_v33 = vld [vmem:[%s6450_s10 + $0x1998] sm:$0xff]  ;;  %v938_v34 = vld [vmem:[%s6450_s10 + $0x13a0] sm:$0xff] }
 0x20b   : > { %3439 = vmatpush.xpose.msra.mxu1 %v555_v35  ;;  %3479 = vmatpush.xpose.msra.mxu3 %v557_v36  ;;  %v940_v35 = vld [vmem:[%s6450_s10 + $0x13b0] sm:$0xff]  ;;  %v939_v36 = vld [vmem:[%s6450_s10 + $0x13a8] sm:$0xff] }
 0x20e   : > { %3420 = vmatpush.xpose.msra.mxu0 %v366_v37  ;;  %3460 = vmatpush.xpose.msra.mxu2 %v368_v38  ;;  %v941_v37 = vld [vmem:[%s6450_s10 + $0x13b8] sm:$0xff]  ;;  %v750_v38 = vld [vmem:[%s6450_s10 + $0xdc0] sm:$0xff] }
 0x20f   : > { %3440 = vmatpush.xpose.msra.mxu1 %v367_v41  ;;  %3480 = vmatpush.xpose.msra.mxu3 %v369_v42  ;;  %v753_v41 = vld [vmem:[%s6450_s10 + $0xdd8] sm:$0xff] }
 0x210   : > { %v280_v42 = vld [vmem:[%s6460_s12 + $0x88] sm:$0xff] }
 0x211   : > { %3421 = vmatmul.f32.vlgmr.msra.gmra.mxu0 %v1934_v43  ;;  %3461 = vmatmul.f32.vlgmr.msra.gmra.mxu2 %v1936_v44  ;;  %v562_v43 = vld [vmem:[%s6450_s10 + $0x7e0] sm:$0xff]  ;;  %v564_v44 = vld [vmem:[%s6450_s10 + $0x7f0] sm:$0xff]  ;;  %1943 = vst [vmem:[#allocation1 + $0x20] ss:$4 sm:$0xff] %v280_v42  ;;  %v1135_v42 = vld [vmem:[%s6450_s10 + $0x19c8] sm:$0xff] }
 0x212   : > { %3493 = vmatpush.xpose.msrb.mxu0 %v1686_v39  ;;  %3533 = vmatpush.xpose.msrb.mxu2 %v1688_v40  ;;  %v752_v39 = vld [vmem:[%s6450_s10 + $0xdd0] sm:$0xff]  ;;  %v751_v40 = vld [vmem:[%s6450_s10 + $0xdc8] sm:$0xff] }
 0x213   : > { %3513 = vmatpush.xpose.msrb.mxu1 %v1687_v45  ;;  %3553 = vmatpush.xpose.msrb.mxu3 %v1689_v46  ;;  %v563_v45 = vld [vmem:[%s6450_s10 + $0x7e8] sm:$0xff]  ;;  %v565_v46 = vld [vmem:[%s6450_s10 + $0x7f8] sm:$0xff] }
 0x214   : > { %3441 = vmatmul.f32.vlgmr.msra.gmra.mxu1 %v1935_v47  ;;  %3481 = vmatmul.f32.vlgmr.msra.gmra.mxu3 %v1937_v48  ;;  %v374_v47 = vld [vmem:[%s6450_s10 + $0x200] sm:$0xff]  ;;  %v376_v48 = vld [vmem:[%s6450_s10 + $0x210] sm:$0xff] }
 0x216   : > { %3494 = vmatpush.xpose.msrb.mxu0 %v1498_v49  ;;  %3534 = vmatpush.xpose.msrb.mxu2 %v1500_v50  ;;  %v1694_v49 = vld [vmem:[%s6450_s10 + $0x2b40] sm:$0xff]  ;;  %v1696_v50 = vld [vmem:[%s6450_s10 + $0x2b50] sm:$0xff] }
 0x217   : > { %3514 = vmatpush.xpose.msrb.mxu1 %v1499_v51  ;;  %3554 = vmatpush.xpose.msrb.mxu3 %v1501_v52  ;;  %v375_v51 = vld [vmem:[%s6450_s10 + $0x208] sm:$0xff]  ;;  %v377_v52 = vld [vmem:[%s6450_s10 + $0x218] sm:$0xff] }
 0x21a   : > { %3495 = vmatpush.xpose.msrb.mxu0 %v1310_v53  ;;  %3535 = vmatpush.xpose.msrb.mxu2 %v1312_v54  ;;  %v1944_v53 = vld.sshfl [vmem:[#allocation1] sm:$0xff pattern:$0x73625140]  ;;  %v1946_v54 = vld.sshfl [vmem:[#allocation1 + $0x10] sm:$0xff pattern:$0x73625140] }
 0x21b   : > { %3515 = vmatpush.xpose.msrb.mxu1 %v1311_v55  ;;  %3555 = vmatpush.xpose.msrb.mxu3 %v1313_v56  ;;  %v1695_v55 = vld [vmem:[%s6450_s10 + $0x2b48] sm:$0xff]  ;;  %v1697_v56 = vld [vmem:[%s6450_s10 + $0x2b58] sm:$0xff] }
 0x21e   : > { %3496 = vmatpush.xpose.msrb.mxu0 %v1122_v57  ;;  %3536 = vmatpush.xpose.msrb.mxu2 %v1124_v58  ;;  %v1945_v57 = vld.sshfl [vmem:[#allocation1 + $0x8] sm:$0xff pattern:$0x73625140]  ;;  %v1947_v58 = vld.sshfl [vmem:[#allocation1 + $0x18] sm:$0xff pattern:$0x73625140] }
 0x21f   : > { %3516 = vmatpush.xpose.msrb.mxu1 %v1123_v59  ;;  %3556 = vmatpush.xpose.msrb.mxu3 %v1125_v60  ;;  %v1506_v59 = vld [vmem:[%s6450_s10 + $0x2560] sm:$0xff]  ;;  %v1508_v60 = vld [vmem:[%s6450_s10 + $0x2570] sm:$0xff] }
 0x222   : > { %3497 = vmatpush.xpose.msrb.mxu0 %v934_v61  ;;  %3537 = vmatpush.xpose.msrb.mxu2 %v936_v62  ;;  %v1507_v61 = vld [vmem:[%s6450_s10 + $0x2568] sm:$0xff]  ;;  %v1509_v62 = vld [vmem:[%s6450_s10 + $0x2578] sm:$0xff] }
 0x223   : > { %3517 = vmatpush.xpose.msrb.mxu1 %v935_v63  ;;  %3557 = vmatpush.xpose.msrb.mxu3 %v937_v0  ;;  %v1318_v63 = vld [vmem:[%s6450_s10 + $0x1f80] sm:$0xff]  ;;  %v1320_v0 = vld [vmem:[%s6450_s10 + $0x1f90] sm:$0xff] }
 0x226   : > { %3498 = vmatpush.xpose.msrb.mxu0 %v746_v1  ;;  %3538 = vmatpush.xpose.msrb.mxu2 %v748_v2  ;;  %v1319_v1 = vld [vmem:[%s6450_s10 + $0x1f88] sm:$0xff]  ;;  %v1321_v2 = vld [vmem:[%s6450_s10 + $0x1f98] sm:$0xff] }
 0x227   : > { %3518 = vmatpush.xpose.msrb.mxu1 %v747_v3  ;;  %3558 = vmatpush.xpose.msrb.mxu3 %v749_v4  ;;  %v1130_v3 = vld [vmem:[%s6450_s10 + $0x19a0] sm:$0xff]  ;;  %v1132_v4 = vld [vmem:[%s6450_s10 + $0x19b0] sm:$0xff] }
 0x22a   : > { %3499 = vmatpush.xpose.msrb.mxu0 %v558_v6  ;;  %3539 = vmatpush.xpose.msrb.mxu2 %v560_v7  ;;  %v1133_v6 = vld [vmem:[%s6450_s10 + $0x19b8] sm:$0xff]  ;;  %v942_v7 = vld [vmem:[%s6450_s10 + $0x13c0] sm:$0xff] }
 0x22b   : > { %3519 = vmatpush.xpose.msrb.mxu1 %v559_v8  ;;  %3559 = vmatpush.xpose.msrb.mxu3 %v561_v9  ;;  %v944_v8 = vld [vmem:[%s6450_s10 + $0x13d0] sm:$0xff]  ;;  %v943_v9 = vld [vmem:[%s6450_s10 + $0x13c8] sm:$0xff] }
 0x22e   : > { %3500 = vmatpush.xpose.msrb.mxu0 %v370_v10  ;;  %3540 = vmatpush.xpose.msrb.mxu2 %v372_v11  ;;  %v945_v10 = vld [vmem:[%s6450_s10 + $0x13d8] sm:$0xff]  ;;  %v754_v11 = vld [vmem:[%s6450_s10 + $0xde0] sm:$0xff] }
 0x22f   : > { %3520 = vmatpush.xpose.msrb.mxu1 %v371_v14  ;;  %3560 = vmatpush.xpose.msrb.mxu3 %v373_v15  ;;  %v757_v14 = vld [vmem:[%s6450_s10 + $0xdf8] sm:$0xff]  ;;  %v281_v15 = vld [vmem:[%s6460_s12 + $0x90] sm:$0xff] }
 0x230   : > { %1952 = vst [vmem:[#allocation1] ss:$4 sm:$0xff] %v281_v15  ;;  %v1139_v15 = vld [vmem:[%s6450_s10 + $0x19e8] sm:$0xff] }
 0x231   : > { %3501 = vmatmul.f32.vlgmr.msrb.gmra.mxu0 %v1938_v16  ;;  %3541 = vmatmul.f32.vlgmr.msrb.gmra.mxu2 %v1940_v17  ;;  %v566_v16 = vld [vmem:[%s6450_s10 + $0x800] sm:$0xff]  ;;  %v568_v17 = vld [vmem:[%s6450_s10 + $0x810] sm:$0xff] }
 0x232   : > { %3573 = vmatpush.xpose.msra.mxu0 %v1690_v12  ;;  %3613 = vmatpush.xpose.msra.mxu2 %v1692_v13  ;;  %v756_v12 = vld [vmem:[%s6450_s10 + $0xdf0] sm:$0xff]  ;;  %v755_v13 = vld [vmem:[%s6450_s10 + $0xde8] sm:$0xff] }
 0x233   : > { %3593 = vmatpush.xpose.msra.mxu1 %v1691_v18  ;;  %3633 = vmatpush.xpose.msra.mxu3 %v1693_v19  ;;  %v567_v18 = vld [vmem:[%s6450_s10 + $0x808] sm:$0xff]  ;;  %v569_v19 = vld [vmem:[%s6450_s10 + $0x818] sm:$0xff] }
 0x234   : > { %3521 = vmatmul.f32.vlgmr.msrb.gmra.mxu1 %v1939_v20  ;;  %3561 = vmatmul.f32.vlgmr.msrb.gmra.mxu3 %v1941_v21  ;;  %v378_v20 = vld [vmem:[%s6450_s10 + $0x220] sm:$0xff]  ;;  %v380_v21 = vld [vmem:[%s6450_s10 + $0x230] sm:$0xff] }
 0x236   : > { %3574 = vmatpush.xpose.msra.mxu0 %v1502_v22  ;;  %3614 = vmatpush.xpose.msra.mxu2 %v1504_v23  ;;  %v1698_v22 = vld [vmem:[%s6450_s10 + $0x2b60] sm:$0xff]  ;;  %v1700_v23 = vld [vmem:[%s6450_s10 + $0x2b70] sm:$0xff] }
 0x237   : > { %3594 = vmatpush.xpose.msra.mxu1 %v1503_v24  ;;  %3634 = vmatpush.xpose.msra.mxu3 %v1505_v25  ;;  %v379_v24 = vld [vmem:[%s6450_s10 + $0x228] sm:$0xff]  ;;  %v381_v25 = vld [vmem:[%s6450_s10 + $0x238] sm:$0xff] }
 0x23a   : > { %3575 = vmatpush.xpose.msra.mxu0 %v1314_v26  ;;  %3615 = vmatpush.xpose.msra.mxu2 %v1316_v27  ;;  %v1948_v26 = vld.sshfl [vmem:[#allocation1 + $0x20] sm:$0xff pattern:$0x73625140]  ;;  %v1950_v27 = vld.sshfl [vmem:[#allocation1 + $0x30] sm:$0xff pattern:$0x73625140] }
 0x23b   : > { %3595 = vmatpush.xpose.msra.mxu1 %v1315_v28  ;;  %3635 = vmatpush.xpose.msra.mxu3 %v1317_v29  ;;  %v1699_v28 = vld [vmem:[%s6450_s10 + $0x2b68] sm:$0xff]  ;;  %v1701_v29 = vld [vmem:[%s6450_s10 + $0x2b78] sm:$0xff] }
 0x23e   : > { %3576 = vmatpush.xpose.msra.mxu0 %v1126_v30  ;;  %3616 = vmatpush.xpose.msra.mxu2 %v1128_v31  ;;  %v1949_v30 = vld.sshfl [vmem:[#allocation1 + $0x28] sm:$0xff pattern:$0x73625140]  ;;  %v1951_v31 = vld.sshfl [vmem:[#allocation1 + $0x38] sm:$0xff pattern:$0x73625140] }
 0x23f   : > { %3596 = vmatpush.xpose.msra.mxu1 %v1127_v32  ;;  %3636 = vmatpush.xpose.msra.mxu3 %v1129_v33  ;;  %v1510_v32 = vld [vmem:[%s6450_s10 + $0x2580] sm:$0xff]  ;;  %v1512_v33 = vld [vmem:[%s6450_s10 + $0x2590] sm:$0xff] }
 0x242   : > { %3577 = vmatpush.xpose.msra.mxu0 %v938_v34  ;;  %3617 = vmatpush.xpose.msra.mxu2 %v940_v35  ;;  %v1511_v34 = vld [vmem:[%s6450_s10 + $0x2588] sm:$0xff]  ;;  %v1513_v35 = vld [vmem:[%s6450_s10 + $0x2598] sm:$0xff] }
 0x243   : > { %3597 = vmatpush.xpose.msra.mxu1 %v939_v36  ;;  %3637 = vmatpush.xpose.msra.mxu3 %v941_v37  ;;  %v1322_v36 = vld [vmem:[%s6450_s10 + $0x1fa0] sm:$0xff]  ;;  %v1324_v37 = vld [vmem:[%s6450_s10 + $0x1fb0] sm:$0xff] }
 0x246   : > { %3578 = vmatpush.xpose.msra.mxu0 %v750_v38  ;;  %3618 = vmatpush.xpose.msra.mxu2 %v752_v39  ;;  %v1323_v38 = vld [vmem:[%s6450_s10 + $0x1fa8] sm:$0xff]  ;;  %v1325_v39 = vld [vmem:[%s6450_s10 + $0x1fb8] sm:$0xff] }
 0x247   : > { %3598 = vmatpush.xpose.msra.mxu1 %v751_v40  ;;  %3638 = vmatpush.xpose.msra.mxu3 %v753_v41  ;;  %v1134_v40 = vld [vmem:[%s6450_s10 + $0x19c0] sm:$0xff]  ;;  %v1136_v41 = vld [vmem:[%s6450_s10 + $0x19d0] sm:$0xff] }
 0x24a   : > { %3579 = vmatpush.xpose.msra.mxu0 %v562_v43  ;;  %3619 = vmatpush.xpose.msra.mxu2 %v564_v44  ;;  %v1137_v43 = vld [vmem:[%s6450_s10 + $0x19d8] sm:$0xff]  ;;  %v946_v44 = vld [vmem:[%s6450_s10 + $0x13e0] sm:$0xff] }
 0x24b   : > { %3599 = vmatpush.xpose.msra.mxu1 %v563_v45  ;;  %3639 = vmatpush.xpose.msra.mxu3 %v565_v46  ;;  %v948_v45 = vld [vmem:[%s6450_s10 + $0x13f0] sm:$0xff]  ;;  %v947_v46 = vld [vmem:[%s6450_s10 + $0x13e8] sm:$0xff] }
 0x24e   : > { %3580 = vmatpush.xpose.msra.mxu0 %v374_v47  ;;  %3620 = vmatpush.xpose.msra.mxu2 %v376_v48  ;;  %v949_v47 = vld [vmem:[%s6450_s10 + $0x13f8] sm:$0xff]  ;;  %v758_v48 = vld [vmem:[%s6450_s10 + $0xe00] sm:$0xff] }
 0x24f   : > { %3600 = vmatpush.xpose.msra.mxu1 %v375_v51  ;;  %3640 = vmatpush.xpose.msra.mxu3 %v377_v52  ;;  %v761_v51 = vld [vmem:[%s6450_s10 + $0xe18] sm:$0xff]  ;;  %v282_v52 = vld [vmem:[%s6460_s12 + $0x98] sm:$0xff] }
 0x250   : > { %1953 = vst [vmem:[#allocation1 + $0x20] ss:$4 sm:$0xff] %v282_v52  ;;  %v1143_v52 = vld [vmem:[%s6450_s10 + $0x1a08] sm:$0xff] }
 0x251   : > { %3581 = vmatmul.f32.vlgmr.msra.gmra.mxu0 %v1944_v53  ;;  %3621 = vmatmul.f32.vlgmr.msra.gmra.mxu2 %v1946_v54  ;;  %v570_v53 = vld [vmem:[%s6450_s10 + $0x820] sm:$0xff]  ;;  %v572_v54 = vld [vmem:[%s6450_s10 + $0x830] sm:$0xff] }
 0x252   : > { %3653 = vmatpush.xpose.msrb.mxu0 %v1694_v49  ;;  %3693 = vmatpush.xpose.msrb.mxu2 %v1696_v50  ;;  %v760_v49 = vld [vmem:[%s6450_s10 + $0xe10] sm:$0xff]  ;;  %v759_v50 = vld [vmem:[%s6450_s10 + $0xe08] sm:$0xff] }
 0x253   : > { %3673 = vmatpush.xpose.msrb.mxu1 %v1695_v55  ;;  %3713 = vmatpush.xpose.msrb.mxu3 %v1697_v56  ;;  %v571_v55 = vld [vmem:[%s6450_s10 + $0x828] sm:$0xff]  ;;  %v573_v56 = vld [vmem:[%s6450_s10 + $0x838] sm:$0xff] }
 0x254   : > { %3601 = vmatmul.f32.vlgmr.msra.gmra.mxu1 %v1945_v57  ;;  %3641 = vmatmul.f32.vlgmr.msra.gmra.mxu3 %v1947_v58  ;;  %v382_v57 = vld [vmem:[%s6450_s10 + $0x240] sm:$0xff]  ;;  %v384_v58 = vld [vmem:[%s6450_s10 + $0x250] sm:$0xff] }
 0x256   : > { %3654 = vmatpush.xpose.msrb.mxu0 %v1506_v59  ;;  %3694 = vmatpush.xpose.msrb.mxu2 %v1508_v60  ;;  %v1702_v59 = vld [vmem:[%s6450_s10 + $0x2b80] sm:$0xff]  ;;  %v1704_v60 = vld [vmem:[%s6450_s10 + $0x2b90] sm:$0xff] }
 0x257   : > { %3674 = vmatpush.xpose.msrb.mxu1 %v1507_v61  ;;  %3714 = vmatpush.xpose.msrb.mxu3 %v1509_v62  ;;  %v383_v61 = vld [vmem:[%s6450_s10 + $0x248] sm:$0xff]  ;;  %v385_v62 = vld [vmem:[%s6450_s10 + $0x258] sm:$0xff] }
 0x25a   : > { %3655 = vmatpush.xpose.msrb.mxu0 %v1318_v63  ;;  %3695 = vmatpush.xpose.msrb.mxu2 %v1320_v0  ;;  %v1954_v63 = vld.sshfl [vmem:[#allocation1] sm:$0xff pattern:$0x73625140]  ;;  %v1956_v0 = vld.sshfl [vmem:[#allocation1 + $0x10] sm:$0xff pattern:$0x73625140] }
 0x25b   : > { %3675 = vmatpush.xpose.msrb.mxu1 %v1319_v1  ;;  %3715 = vmatpush.xpose.msrb.mxu3 %v1321_v2  ;;  %v1703_v1 = vld [vmem:[%s6450_s10 + $0x2b88] sm:$0xff]  ;;  %v1705_v2 = vld [vmem:[%s6450_s10 + $0x2b98] sm:$0xff] }
 0x25e   : > { %3656 = vmatpush.xpose.msrb.mxu0 %v1130_v3  ;;  %3696 = vmatpush.xpose.msrb.mxu2 %v1132_v4  ;;  %v1955_v3 = vld.sshfl [vmem:[#allocation1 + $0x8] sm:$0xff pattern:$0x73625140]  ;;  %v1957_v4 = vld.sshfl [vmem:[#allocation1 + $0x18] sm:$0xff pattern:$0x73625140] }
 0x25f   : > { %3676 = vmatpush.xpose.msrb.mxu1 %v1131_v5  ;;  %3716 = vmatpush.xpose.msrb.mxu3 %v1133_v6  ;;  %v1514_v5 = vld [vmem:[%s6450_s10 + $0x25a0] sm:$0xff]  ;;  %v1516_v6 = vld [vmem:[%s6450_s10 + $0x25b0] sm:$0xff] }
 0x262   : > { %3657 = vmatpush.xpose.msrb.mxu0 %v942_v7  ;;  %3697 = vmatpush.xpose.msrb.mxu2 %v944_v8  ;;  %v1515_v7 = vld [vmem:[%s6450_s10 + $0x25a8] sm:$0xff]  ;;  %v1517_v8 = vld [vmem:[%s6450_s10 + $0x25b8] sm:$0xff] }
 0x263   : > { %3677 = vmatpush.xpose.msrb.mxu1 %v943_v9  ;;  %3717 = vmatpush.xpose.msrb.mxu3 %v945_v10  ;;  %v1326_v9 = vld [vmem:[%s6450_s10 + $0x1fc0] sm:$0xff]  ;;  %v1328_v10 = vld [vmem:[%s6450_s10 + $0x1fd0] sm:$0xff] }
 0x266   : > { %3658 = vmatpush.xpose.msrb.mxu0 %v754_v11  ;;  %3698 = vmatpush.xpose.msrb.mxu2 %v756_v12  ;;  %v1327_v11 = vld [vmem:[%s6450_s10 + $0x1fc8] sm:$0xff]  ;;  %v1329_v12 = vld [vmem:[%s6450_s10 + $0x1fd8] sm:$0xff] }
 0x267   : > { %3678 = vmatpush.xpose.msrb.mxu1 %v755_v13  ;;  %3718 = vmatpush.xpose.msrb.mxu3 %v757_v14  ;;  %v1138_v13 = vld [vmem:[%s6450_s10 + $0x19e0] sm:$0xff]  ;;  %v1140_v14 = vld [vmem:[%s6450_s10 + $0x19f0] sm:$0xff] }
 0x26a   : > { %3659 = vmatpush.xpose.msrb.mxu0 %v566_v16  ;;  %3699 = vmatpush.xpose.msrb.mxu2 %v568_v17  ;;  %v1141_v16 = vld [vmem:[%s6450_s10 + $0x19f8] sm:$0xff]  ;;  %v950_v17 = vld [vmem:[%s6450_s10 + $0x1400] sm:$0xff] }
 0x26b   : > { %3679 = vmatpush.xpose.msrb.mxu1 %v567_v18  ;;  %3719 = vmatpush.xpose.msrb.mxu3 %v569_v19  ;;  %v952_v18 = vld [vmem:[%s6450_s10 + $0x1410] sm:$0xff]  ;;  %v951_v19 = vld [vmem:[%s6450_s10 + $0x1408] sm:$0xff] }
 0x26e   : > { %3660 = vmatpush.xpose.msrb.mxu0 %v378_v20  ;;  %3700 = vmatpush.xpose.msrb.mxu2 %v380_v21  ;;  %v953_v20 = vld [vmem:[%s6450_s10 + $0x1418] sm:$0xff]  ;;  %v762_v21 = vld [vmem:[%s6450_s10 + $0xe20] sm:$0xff] }
 0x26f   : > { %3680 = vmatpush.xpose.msrb.mxu1 %v379_v24  ;;  %3720 = vmatpush.xpose.msrb.mxu3 %v381_v25  ;;  %v765_v24 = vld [vmem:[%s6450_s10 + $0xe38] sm:$0xff] }
 0x270   : > { %v283_v25 = vld [vmem:[%s6460_s12 + $0xa0] sm:$0xff] }
 0x271   : > { %3661 = vmatmul.f32.vlgmr.msrb.gmra.mxu0 %v1948_v26  ;;  %3701 = vmatmul.f32.vlgmr.msrb.gmra.mxu2 %v1950_v27  ;;  %v574_v26 = vld [vmem:[%s6450_s10 + $0x840] sm:$0xff]  ;;  %v576_v27 = vld [vmem:[%s6450_s10 + $0x850] sm:$0xff]  ;;  %1962 = vst [vmem:[#allocation1] ss:$4 sm:$0xff] %v283_v25  ;;  %v1147_v25 = vld [vmem:[%s6450_s10 + $0x1a28] sm:$0xff] }
 0x272   : > { %3733 = vmatpush.xpose.msra.mxu0 %v1698_v22  ;;  %3773 = vmatpush.xpose.msra.mxu2 %v1700_v23  ;;  %v764_v22 = vld [vmem:[%s6450_s10 + $0xe30] sm:$0xff]  ;;  %v763_v23 = vld [vmem:[%s6450_s10 + $0xe28] sm:$0xff] }
 0x273   : > { %3753 = vmatpush.xpose.msra.mxu1 %v1699_v28  ;;  %3793 = vmatpush.xpose.msra.mxu3 %v1701_v29  ;;  %v575_v28 = vld [vmem:[%s6450_s10 + $0x848] sm:$0xff]  ;;  %v577_v29 = vld [vmem:[%s6450_s10 + $0x858] sm:$0xff] }
 0x274   : > { %3681 = vmatmul.f32.vlgmr.msrb.gmra.mxu1 %v1949_v30  ;;  %3721 = vmatmul.f32.vlgmr.msrb.gmra.mxu3 %v1951_v31  ;;  %v386_v30 = vld [vmem:[%s6450_s10 + $0x260] sm:$0xff]  ;;  %v388_v31 = vld [vmem:[%s6450_s10 + $0x270] sm:$0xff] }
 0x276   : > { %3734 = vmatpush.xpose.msra.mxu0 %v1510_v32  ;;  %3774 = vmatpush.xpose.msra.mxu2 %v1512_v33  ;;  %v1706_v32 = vld [vmem:[%s6450_s10 + $0x2ba0] sm:$0xff]  ;;  %v1708_v33 = vld [vmem:[%s6450_s10 + $0x2bb0] sm:$0xff] }
 0x277   : > { %3754 = vmatpush.xpose.msra.mxu1 %v1511_v34  ;;  %3794 = vmatpush.xpose.msra.mxu3 %v1513_v35  ;;  %v387_v34 = vld [vmem:[%s6450_s10 + $0x268] sm:$0xff]  ;;  %v389_v35 = vld [vmem:[%s6450_s10 + $0x278] sm:$0xff] }
 0x27a   : > { %3735 = vmatpush.xpose.msra.mxu0 %v1322_v36  ;;  %3775 = vmatpush.xpose.msra.mxu2 %v1324_v37  ;;  %v1958_v36 = vld.sshfl [vmem:[#allocation1 + $0x20] sm:$0xff pattern:$0x73625140]  ;;  %v1960_v37 = vld.sshfl [vmem:[#allocation1 + $0x30] sm:$0xff pattern:$0x73625140] }
 0x27b   : > { %3755 = vmatpush.xpose.msra.mxu1 %v1323_v38  ;;  %3795 = vmatpush.xpose.msra.mxu3 %v1325_v39  ;;  %v1707_v38 = vld [vmem:[%s6450_s10 + $0x2ba8] sm:$0xff]  ;;  %v1709_v39 = vld [vmem:[%s6450_s10 + $0x2bb8] sm:$0xff] }
 0x27e   : > { %3736 = vmatpush.xpose.msra.mxu0 %v1134_v40  ;;  %3776 = vmatpush.xpose.msra.mxu2 %v1136_v41  ;;  %v1959_v40 = vld.sshfl [vmem:[#allocation1 + $0x28] sm:$0xff pattern:$0x73625140]  ;;  %v1961_v41 = vld.sshfl [vmem:[#allocation1 + $0x38] sm:$0xff pattern:$0x73625140] }
 0x27f   : > { %3756 = vmatpush.xpose.msra.mxu1 %v1135_v42  ;;  %3796 = vmatpush.xpose.msra.mxu3 %v1137_v43  ;;  %v1518_v42 = vld [vmem:[%s6450_s10 + $0x25c0] sm:$0xff]  ;;  %v1520_v43 = vld [vmem:[%s6450_s10 + $0x25d0] sm:$0xff] }
 0x282   : > { %3737 = vmatpush.xpose.msra.mxu0 %v946_v44  ;;  %3777 = vmatpush.xpose.msra.mxu2 %v948_v45  ;;  %v1519_v44 = vld [vmem:[%s6450_s10 + $0x25c8] sm:$0xff]  ;;  %v1521_v45 = vld [vmem:[%s6450_s10 + $0x25d8] sm:$0xff] }
 0x283   : > { %3757 = vmatpush.xpose.msra.mxu1 %v947_v46  ;;  %3797 = vmatpush.xpose.msra.mxu3 %v949_v47  ;;  %v1330_v46 = vld [vmem:[%s6450_s10 + $0x1fe0] sm:$0xff]  ;;  %v1332_v47 = vld [vmem:[%s6450_s10 + $0x1ff0] sm:$0xff] }
 0x286   : > { %3738 = vmatpush.xpose.msra.mxu0 %v758_v48  ;;  %3778 = vmatpush.xpose.msra.mxu2 %v760_v49  ;;  %v1331_v48 = vld [vmem:[%s6450_s10 + $0x1fe8] sm:$0xff]  ;;  %v1333_v49 = vld [vmem:[%s6450_s10 + $0x1ff8] sm:$0xff] }
 0x287   : > { %3758 = vmatpush.xpose.msra.mxu1 %v759_v50  ;;  %3798 = vmatpush.xpose.msra.mxu3 %v761_v51  ;;  %v1142_v50 = vld [vmem:[%s6450_s10 + $0x1a00] sm:$0xff]  ;;  %v1144_v51 = vld [vmem:[%s6450_s10 + $0x1a10] sm:$0xff] }
 0x28a   : > { %3739 = vmatpush.xpose.msra.mxu0 %v570_v53  ;;  %3779 = vmatpush.xpose.msra.mxu2 %v572_v54  ;;  %v1145_v53 = vld [vmem:[%s6450_s10 + $0x1a18] sm:$0xff]  ;;  %v954_v54 = vld [vmem:[%s6450_s10 + $0x1420] sm:$0xff] }
 0x28b   : > { %3759 = vmatpush.xpose.msra.mxu1 %v571_v55  ;;  %3799 = vmatpush.xpose.msra.mxu3 %v573_v56  ;;  %v956_v55 = vld [vmem:[%s6450_s10 + $0x1430] sm:$0xff]  ;;  %v955_v56 = vld [vmem:[%s6450_s10 + $0x1428] sm:$0xff] }
 0x28e   : > { %3740 = vmatpush.xpose.msra.mxu0 %v382_v57  ;;  %3780 = vmatpush.xpose.msra.mxu2 %v384_v58  ;;  %v957_v57 = vld [vmem:[%s6450_s10 + $0x1438] sm:$0xff]  ;;  %v766_v58 = vld [vmem:[%s6450_s10 + $0xe40] sm:$0xff] }
 0x28f   : > { %3760 = vmatpush.xpose.msra.mxu1 %v383_v61  ;;  %3800 = vmatpush.xpose.msra.mxu3 %v385_v62  ;;  %v769_v61 = vld [vmem:[%s6450_s10 + $0xe58] sm:$0xff] }
 0x290   : > { %v284_v62 = vld [vmem:[%s6460_s12 + $0xa8] sm:$0xff] }
 0x291   : > { %3741 = vmatmul.f32.vlgmr.msra.gmra.mxu0 %v1954_v63  ;;  %3781 = vmatmul.f32.vlgmr.msra.gmra.mxu2 %v1956_v0  ;;  %v578_v63 = vld [vmem:[%s6450_s10 + $0x860] sm:$0xff]  ;;  %v580_v0 = vld [vmem:[%s6450_s10 + $0x870] sm:$0xff]  ;;  %1963 = vst [vmem:[#allocation1 + $0x20] ss:$4 sm:$0xff] %v284_v62  ;;  %v1151_v62 = vld [vmem:[%s6450_s10 + $0x1a48] sm:$0xff] }
 0x292   : > { %3813 = vmatpush.xpose.msrb.mxu0 %v1702_v59  ;;  %3853 = vmatpush.xpose.msrb.mxu2 %v1704_v60  ;;  %v768_v59 = vld [vmem:[%s6450_s10 + $0xe50] sm:$0xff]  ;;  %v767_v60 = vld [vmem:[%s6450_s10 + $0xe48] sm:$0xff] }
 0x293   : > { %3833 = vmatpush.xpose.msrb.mxu1 %v1703_v1  ;;  %3873 = vmatpush.xpose.msrb.mxu3 %v1705_v2  ;;  %v579_v1 = vld [vmem:[%s6450_s10 + $0x868] sm:$0xff]  ;;  %v581_v2 = vld [vmem:[%s6450_s10 + $0x878] sm:$0xff] }
 0x294   : > { %3761 = vmatmul.f32.vlgmr.msra.gmra.mxu1 %v1955_v3  ;;  %3801 = vmatmul.f32.vlgmr.msra.gmra.mxu3 %v1957_v4  ;;  %v390_v3 = vld [vmem:[%s6450_s10 + $0x280] sm:$0xff]  ;;  %v392_v4 = vld [vmem:[%s6450_s10 + $0x290] sm:$0xff] }
 0x296   : > { %3814 = vmatpush.xpose.msrb.mxu0 %v1514_v5  ;;  %3854 = vmatpush.xpose.msrb.mxu2 %v1516_v6  ;;  %v1710_v5 = vld [vmem:[%s6450_s10 + $0x2bc0] sm:$0xff]  ;;  %v1712_v6 = vld [vmem:[%s6450_s10 + $0x2bd0] sm:$0xff] }
 0x297   : > { %3834 = vmatpush.xpose.msrb.mxu1 %v1515_v7  ;;  %3874 = vmatpush.xpose.msrb.mxu3 %v1517_v8  ;;  %v391_v7 = vld [vmem:[%s6450_s10 + $0x288] sm:$0xff]  ;;  %v393_v8 = vld [vmem:[%s6450_s10 + $0x298] sm:$0xff] }
 0x29a   : > { %3815 = vmatpush.xpose.msrb.mxu0 %v1326_v9  ;;  %3855 = vmatpush.xpose.msrb.mxu2 %v1328_v10  ;;  %v1964_v9 = vld.sshfl [vmem:[#allocation1] sm:$0xff pattern:$0x73625140]  ;;  %v1966_v10 = vld.sshfl [vmem:[#allocation1 + $0x10] sm:$0xff pattern:$0x73625140] }
 0x29b   : > { %3835 = vmatpush.xpose.msrb.mxu1 %v1327_v11  ;;  %3875 = vmatpush.xpose.msrb.mxu3 %v1329_v12  ;;  %v1711_v11 = vld [vmem:[%s6450_s10 + $0x2bc8] sm:$0xff]  ;;  %v1713_v12 = vld [vmem:[%s6450_s10 + $0x2bd8] sm:$0xff] }
 0x29e   : > { %3816 = vmatpush.xpose.msrb.mxu0 %v1138_v13  ;;  %3856 = vmatpush.xpose.msrb.mxu2 %v1140_v14  ;;  %v1965_v13 = vld.sshfl [vmem:[#allocation1 + $0x8] sm:$0xff pattern:$0x73625140]  ;;  %v1967_v14 = vld.sshfl [vmem:[#allocation1 + $0x18] sm:$0xff pattern:$0x73625140] }
 0x29f   : > { %3836 = vmatpush.xpose.msrb.mxu1 %v1139_v15  ;;  %3876 = vmatpush.xpose.msrb.mxu3 %v1141_v16  ;;  %v1522_v15 = vld [vmem:[%s6450_s10 + $0x25e0] sm:$0xff]  ;;  %v1524_v16 = vld [vmem:[%s6450_s10 + $0x25f0] sm:$0xff] }
 0x2a2   : > { %3817 = vmatpush.xpose.msrb.mxu0 %v950_v17  ;;  %3857 = vmatpush.xpose.msrb.mxu2 %v952_v18  ;;  %v1523_v17 = vld [vmem:[%s6450_s10 + $0x25e8] sm:$0xff]  ;;  %v1525_v18 = vld [vmem:[%s6450_s10 + $0x25f8] sm:$0xff] }
 0x2a3   : > { %3837 = vmatpush.xpose.msrb.mxu1 %v951_v19  ;;  %3877 = vmatpush.xpose.msrb.mxu3 %v953_v20  ;;  %v1334_v19 = vld [vmem:[%s6450_s10 + $0x2000] sm:$0xff]  ;;  %v1336_v20 = vld [vmem:[%s6450_s10 + $0x2010] sm:$0xff] }
 0x2a6   : > { %3818 = vmatpush.xpose.msrb.mxu0 %v762_v21  ;;  %3858 = vmatpush.xpose.msrb.mxu2 %v764_v22  ;;  %v1335_v21 = vld [vmem:[%s6450_s10 + $0x2008] sm:$0xff]  ;;  %v1337_v22 = vld [vmem:[%s6450_s10 + $0x2018] sm:$0xff] }
 0x2a7   : > { %3838 = vmatpush.xpose.msrb.mxu1 %v763_v23  ;;  %3878 = vmatpush.xpose.msrb.mxu3 %v765_v24  ;;  %v1146_v23 = vld [vmem:[%s6450_s10 + $0x1a20] sm:$0xff]  ;;  %v1148_v24 = vld [vmem:[%s6450_s10 + $0x1a30] sm:$0xff] }
 0x2aa   : > { %3819 = vmatpush.xpose.msrb.mxu0 %v574_v26  ;;  %3859 = vmatpush.xpose.msrb.mxu2 %v576_v27  ;;  %v1149_v26 = vld [vmem:[%s6450_s10 + $0x1a38] sm:$0xff]  ;;  %v958_v27 = vld [vmem:[%s6450_s10 + $0x1440] sm:$0xff] }
 0x2ab   : > { %3839 = vmatpush.xpose.msrb.mxu1 %v575_v28  ;;  %3879 = vmatpush.xpose.msrb.mxu3 %v577_v29  ;;  %v960_v28 = vld [vmem:[%s6450_s10 + $0x1450] sm:$0xff]  ;;  %v959_v29 = vld [vmem:[%s6450_s10 + $0x1448] sm:$0xff] }
 0x2ae   : > { %3820 = vmatpush.xpose.msrb.mxu0 %v386_v30  ;;  %3860 = vmatpush.xpose.msrb.mxu2 %v388_v31  ;;  %v961_v30 = vld [vmem:[%s6450_s10 + $0x1458] sm:$0xff]  ;;  %v770_v31 = vld [vmem:[%s6450_s10 + $0xe60] sm:$0xff] }
 0x2af   : > { %3840 = vmatpush.xpose.msrb.mxu1 %v387_v34  ;;  %3880 = vmatpush.xpose.msrb.mxu3 %v389_v35  ;;  %v773_v34 = vld [vmem:[%s6450_s10 + $0xe78] sm:$0xff]  ;;  %v285_v35 = vld [vmem:[%s6460_s12 + $0xb0] sm:$0xff] }
 0x2b0   : > { %1972 = vst [vmem:[#allocation1] ss:$4 sm:$0xff] %v285_v35  ;;  %v1155_v35 = vld [vmem:[%s6450_s10 + $0x1a68] sm:$0xff] }
 0x2b1   : > { %3821 = vmatmul.f32.vlgmr.msrb.gmra.mxu0 %v1958_v36  ;;  %3861 = vmatmul.f32.vlgmr.msrb.gmra.mxu2 %v1960_v37  ;;  %v582_v36 = vld [vmem:[%s6450_s10 + $0x880] sm:$0xff]  ;;  %v584_v37 = vld [vmem:[%s6450_s10 + $0x890] sm:$0xff] }
 0x2b2   : > { %3893 = vmatpush.xpose.msra.mxu0 %v1706_v32  ;;  %3933 = vmatpush.xpose.msra.mxu2 %v1708_v33  ;;  %v772_v32 = vld [vmem:[%s6450_s10 + $0xe70] sm:$0xff]  ;;  %v771_v33 = vld [vmem:[%s6450_s10 + $0xe68] sm:$0xff] }
 0x2b3   : > { %3913 = vmatpush.xpose.msra.mxu1 %v1707_v38  ;;  %3953 = vmatpush.xpose.msra.mxu3 %v1709_v39  ;;  %v583_v38 = vld [vmem:[%s6450_s10 + $0x888] sm:$0xff]  ;;  %v585_v39 = vld [vmem:[%s6450_s10 + $0x898] sm:$0xff] }
 0x2b4   : > { %3841 = vmatmul.f32.vlgmr.msrb.gmra.mxu1 %v1959_v40  ;;  %3881 = vmatmul.f32.vlgmr.msrb.gmra.mxu3 %v1961_v41  ;;  %v394_v40 = vld [vmem:[%s6450_s10 + $0x2a0] sm:$0xff]  ;;  %v396_v41 = vld [vmem:[%s6450_s10 + $0x2b0] sm:$0xff] }
 0x2b6   : > { %3894 = vmatpush.xpose.msra.mxu0 %v1518_v42  ;;  %3934 = vmatpush.xpose.msra.mxu2 %v1520_v43  ;;  %v1714_v42 = vld [vmem:[%s6450_s10 + $0x2be0] sm:$0xff]  ;;  %v1716_v43 = vld [vmem:[%s6450_s10 + $0x2bf0] sm:$0xff] }
 0x2b7   : > { %3914 = vmatpush.xpose.msra.mxu1 %v1519_v44  ;;  %3954 = vmatpush.xpose.msra.mxu3 %v1521_v45  ;;  %v395_v44 = vld [vmem:[%s6450_s10 + $0x2a8] sm:$0xff]  ;;  %v397_v45 = vld [vmem:[%s6450_s10 + $0x2b8] sm:$0xff] }
 0x2ba   : > { %3895 = vmatpush.xpose.msra.mxu0 %v1330_v46  ;;  %3935 = vmatpush.xpose.msra.mxu2 %v1332_v47  ;;  %v1968_v46 = vld.sshfl [vmem:[#allocation1 + $0x20] sm:$0xff pattern:$0x73625140]  ;;  %v1970_v47 = vld.sshfl [vmem:[#allocation1 + $0x30] sm:$0xff pattern:$0x73625140] }
 0x2bb   : > { %3915 = vmatpush.xpose.msra.mxu1 %v1331_v48  ;;  %3955 = vmatpush.xpose.msra.mxu3 %v1333_v49  ;;  %v1715_v48 = vld [vmem:[%s6450_s10 + $0x2be8] sm:$0xff]  ;;  %v1717_v49 = vld [vmem:[%s6450_s10 + $0x2bf8] sm:$0xff] }
 0x2be   : > { %3896 = vmatpush.xpose.msra.mxu0 %v1142_v50  ;;  %3936 = vmatpush.xpose.msra.mxu2 %v1144_v51  ;;  %v1969_v50 = vld.sshfl [vmem:[#allocation1 + $0x28] sm:$0xff pattern:$0x73625140]  ;;  %v1971_v51 = vld.sshfl [vmem:[#allocation1 + $0x38] sm:$0xff pattern:$0x73625140] }
 0x2bf   : > { %3916 = vmatpush.xpose.msra.mxu1 %v1143_v52  ;;  %3956 = vmatpush.xpose.msra.mxu3 %v1145_v53  ;;  %v1526_v52 = vld [vmem:[%s6450_s10 + $0x2600] sm:$0xff]  ;;  %v1528_v53 = vld [vmem:[%s6450_s10 + $0x2610] sm:$0xff] }
 0x2c2   : > { %3897 = vmatpush.xpose.msra.mxu0 %v954_v54  ;;  %3937 = vmatpush.xpose.msra.mxu2 %v956_v55  ;;  %v1527_v54 = vld [vmem:[%s6450_s10 + $0x2608] sm:$0xff]  ;;  %v1529_v55 = vld [vmem:[%s6450_s10 + $0x2618] sm:$0xff] }
 0x2c3   : > { %3917 = vmatpush.xpose.msra.mxu1 %v955_v56  ;;  %3957 = vmatpush.xpose.msra.mxu3 %v957_v57  ;;  %v1338_v56 = vld [vmem:[%s6450_s10 + $0x2020] sm:$0xff]  ;;  %v1340_v57 = vld [vmem:[%s6450_s10 + $0x2030] sm:$0xff] }
 0x2c6   : > { %3898 = vmatpush.xpose.msra.mxu0 %v766_v58  ;;  %3938 = vmatpush.xpose.msra.mxu2 %v768_v59  ;;  %v1339_v58 = vld [vmem:[%s6450_s10 + $0x2028] sm:$0xff]  ;;  %v1341_v59 = vld [vmem:[%s6450_s10 + $0x2038] sm:$0xff] }
 0x2c7   : > { %3918 = vmatpush.xpose.msra.mxu1 %v767_v60  ;;  %3958 = vmatpush.xpose.msra.mxu3 %v769_v61  ;;  %v1150_v60 = vld [vmem:[%s6450_s10 + $0x1a40] sm:$0xff]  ;;  %v1152_v61 = vld [vmem:[%s6450_s10 + $0x1a50] sm:$0xff] }
 0x2ca   : > { %3899 = vmatpush.xpose.msra.mxu0 %v578_v63  ;;  %3939 = vmatpush.xpose.msra.mxu2 %v580_v0  ;;  %v1153_v63 = vld [vmem:[%s6450_s10 + $0x1a58] sm:$0xff]  ;;  %v962_v0 = vld [vmem:[%s6450_s10 + $0x1460] sm:$0xff] }
 0x2cb   : > { %3919 = vmatpush.xpose.msra.mxu1 %v579_v1  ;;  %3959 = vmatpush.xpose.msra.mxu3 %v581_v2  ;;  %v964_v1 = vld [vmem:[%s6450_s10 + $0x1470] sm:$0xff]  ;;  %v963_v2 = vld [vmem:[%s6450_s10 + $0x1468] sm:$0xff] }
 0x2ce   : > { %3900 = vmatpush.xpose.msra.mxu0 %v390_v3  ;;  %3940 = vmatpush.xpose.msra.mxu2 %v392_v4  ;;  %v965_v3 = vld [vmem:[%s6450_s10 + $0x1478] sm:$0xff]  ;;  %v774_v4 = vld [vmem:[%s6450_s10 + $0xe80] sm:$0xff] }
 0x2cf   : > { %3920 = vmatpush.xpose.msra.mxu1 %v391_v7  ;;  %3960 = vmatpush.xpose.msra.mxu3 %v393_v8  ;;  %v777_v7 = vld [vmem:[%s6450_s10 + $0xe98] sm:$0xff]  ;;  %v286_v8 = vld [vmem:[%s6460_s12 + $0xb8] sm:$0xff] }
 0x2d0   : > { %1973 = vst [vmem:[#allocation1 + $0x20] ss:$4 sm:$0xff] %v286_v8  ;;  %v1159_v8 = vld [vmem:[%s6450_s10 + $0x1a88] sm:$0xff] }
 0x2d1   : > { %3901 = vmatmul.f32.vlgmr.msra.gmra.mxu0 %v1964_v9  ;;  %3941 = vmatmul.f32.vlgmr.msra.gmra.mxu2 %v1966_v10  ;;  %v586_v9 = vld [vmem:[%s6450_s10 + $0x8a0] sm:$0xff]  ;;  %v588_v10 = vld [vmem:[%s6450_s10 + $0x8b0] sm:$0xff] }
 0x2d2   : > { %3973 = vmatpush.xpose.msrb.mxu0 %v1710_v5  ;;  %4013 = vmatpush.xpose.msrb.mxu2 %v1712_v6  ;;  %v776_v5 = vld [vmem:[%s6450_s10 + $0xe90] sm:$0xff]  ;;  %v775_v6 = vld [vmem:[%s6450_s10 + $0xe88] sm:$0xff] }
 0x2d3   : > { %3993 = vmatpush.xpose.msrb.mxu1 %v1711_v11  ;;  %4033 = vmatpush.xpose.msrb.mxu3 %v1713_v12  ;;  %v587_v11 = vld [vmem:[%s6450_s10 + $0x8a8] sm:$0xff]  ;;  %v589_v12 = vld [vmem:[%s6450_s10 + $0x8b8] sm:$0xff] }
 0x2d4   : > { %3921 = vmatmul.f32.vlgmr.msra.gmra.mxu1 %v1965_v13  ;;  %3961 = vmatmul.f32.vlgmr.msra.gmra.mxu3 %v1967_v14  ;;  %v398_v13 = vld [vmem:[%s6450_s10 + $0x2c0] sm:$0xff]  ;;  %v400_v14 = vld [vmem:[%s6450_s10 + $0x2d0] sm:$0xff] }
 0x2d6   : > { %3974 = vmatpush.xpose.msrb.mxu0 %v1522_v15  ;;  %4014 = vmatpush.xpose.msrb.mxu2 %v1524_v16  ;;  %v1718_v15 = vld [vmem:[%s6450_s10 + $0x2c00] sm:$0xff]  ;;  %v1720_v16 = vld [vmem:[%s6450_s10 + $0x2c10] sm:$0xff] }
 0x2d7   : > { %3994 = vmatpush.xpose.msrb.mxu1 %v1523_v17  ;;  %4034 = vmatpush.xpose.msrb.mxu3 %v1525_v18  ;;  %v399_v17 = vld [vmem:[%s6450_s10 + $0x2c8] sm:$0xff]  ;;  %v401_v18 = vld [vmem:[%s6450_s10 + $0x2d8] sm:$0xff] }
 0x2da   : > { %3975 = vmatpush.xpose.msrb.mxu0 %v1334_v19  ;;  %4015 = vmatpush.xpose.msrb.mxu2 %v1336_v20  ;;  %v1974_v19 = vld.sshfl [vmem:[#allocation1] sm:$0xff pattern:$0x73625140]  ;;  %v1976_v20 = vld.sshfl [vmem:[#allocation1 + $0x10] sm:$0xff pattern:$0x73625140] }
 0x2db   : > { %3995 = vmatpush.xpose.msrb.mxu1 %v1335_v21  ;;  %4035 = vmatpush.xpose.msrb.mxu3 %v1337_v22  ;;  %v1719_v21 = vld [vmem:[%s6450_s10 + $0x2c08] sm:$0xff]  ;;  %v1721_v22 = vld [vmem:[%s6450_s10 + $0x2c18] sm:$0xff] }
 0x2de   : > { %3976 = vmatpush.xpose.msrb.mxu0 %v1146_v23  ;;  %4016 = vmatpush.xpose.msrb.mxu2 %v1148_v24  ;;  %v1975_v23 = vld.sshfl [vmem:[#allocation1 + $0x8] sm:$0xff pattern:$0x73625140]  ;;  %v1977_v24 = vld.sshfl [vmem:[#allocation1 + $0x18] sm:$0xff pattern:$0x73625140] }
 0x2df   : > { %3996 = vmatpush.xpose.msrb.mxu1 %v1147_v25  ;;  %4036 = vmatpush.xpose.msrb.mxu3 %v1149_v26  ;;  %v1530_v25 = vld [vmem:[%s6450_s10 + $0x2620] sm:$0xff]  ;;  %v1532_v26 = vld [vmem:[%s6450_s10 + $0x2630] sm:$0xff] }
 0x2e2   : > { %3977 = vmatpush.xpose.msrb.mxu0 %v958_v27  ;;  %4017 = vmatpush.xpose.msrb.mxu2 %v960_v28  ;;  %v1531_v27 = vld [vmem:[%s6450_s10 + $0x2628] sm:$0xff]  ;;  %v1533_v28 = vld [vmem:[%s6450_s10 + $0x2638] sm:$0xff] }
 0x2e3   : > { %3997 = vmatpush.xpose.msrb.mxu1 %v959_v29  ;;  %4037 = vmatpush.xpose.msrb.mxu3 %v961_v30  ;;  %v1342_v29 = vld [vmem:[%s6450_s10 + $0x2040] sm:$0xff]  ;;  %v1344_v30 = vld [vmem:[%s6450_s10 + $0x2050] sm:$0xff] }
 0x2e6   : > { %3978 = vmatpush.xpose.msrb.mxu0 %v770_v31  ;;  %4018 = vmatpush.xpose.msrb.mxu2 %v772_v32  ;;  %v1343_v31 = vld [vmem:[%s6450_s10 + $0x2048] sm:$0xff]  ;;  %v1345_v32 = vld [vmem:[%s6450_s10 + $0x2058] sm:$0xff] }
 0x2e7   : > { %3998 = vmatpush.xpose.msrb.mxu1 %v771_v33  ;;  %4038 = vmatpush.xpose.msrb.mxu3 %v773_v34  ;;  %v1154_v33 = vld [vmem:[%s6450_s10 + $0x1a60] sm:$0xff]  ;;  %v1156_v34 = vld [vmem:[%s6450_s10 + $0x1a70] sm:$0xff] }
 0x2ea   : > { %3979 = vmatpush.xpose.msrb.mxu0 %v582_v36  ;;  %4019 = vmatpush.xpose.msrb.mxu2 %v584_v37  ;;  %v1157_v36 = vld [vmem:[%s6450_s10 + $0x1a78] sm:$0xff]  ;;  %v966_v37 = vld [vmem:[%s6450_s10 + $0x1480] sm:$0xff] }
 0x2eb   : > { %3999 = vmatpush.xpose.msrb.mxu1 %v583_v38  ;;  %4039 = vmatpush.xpose.msrb.mxu3 %v585_v39  ;;  %v968_v38 = vld [vmem:[%s6450_s10 + $0x1490] sm:$0xff]  ;;  %v967_v39 = vld [vmem:[%s6450_s10 + $0x1488] sm:$0xff] }
 0x2ee   : > { %3980 = vmatpush.xpose.msrb.mxu0 %v394_v40  ;;  %4020 = vmatpush.xpose.msrb.mxu2 %v396_v41  ;;  %v969_v40 = vld [vmem:[%s6450_s10 + $0x1498] sm:$0xff]  ;;  %v778_v41 = vld [vmem:[%s6450_s10 + $0xea0] sm:$0xff] }
 0x2ef   : > { %4000 = vmatpush.xpose.msrb.mxu1 %v395_v44  ;;  %4040 = vmatpush.xpose.msrb.mxu3 %v397_v45  ;;  %v781_v44 = vld [vmem:[%s6450_s10 + $0xeb8] sm:$0xff] }
 0x2f0   : > { %v287_v45 = vld [vmem:[%s6460_s12 + $0xc0] sm:$0xff] }
 0x2f1   : > { %3981 = vmatmul.f32.vlgmr.msrb.gmra.mxu0 %v1968_v46  ;;  %4021 = vmatmul.f32.vlgmr.msrb.gmra.mxu2 %v1970_v47  ;;  %v590_v46 = vld [vmem:[%s6450_s10 + $0x8c0] sm:$0xff]  ;;  %v592_v47 = vld [vmem:[%s6450_s10 + $0x8d0] sm:$0xff]  ;;  %1982 = vst [vmem:[#allocation1] ss:$4 sm:$0xff] %v287_v45  ;;  %v1351_v45 = vld [vmem:[%s6450_s10 + $0x2088] sm:$0xff] }
 0x2f2   : > { %4053 = vmatpush.xpose.msra.mxu0 %v1714_v42  ;;  %4093 = vmatpush.xpose.msra.mxu2 %v1716_v43  ;;  %v780_v42 = vld [vmem:[%s6450_s10 + $0xeb0] sm:$0xff]  ;;  %v779_v43 = vld [vmem:[%s6450_s10 + $0xea8] sm:$0xff] }
 0x2f3   : > { %4073 = vmatpush.xpose.msra.mxu1 %v1715_v48  ;;  %4113 = vmatpush.xpose.msra.mxu3 %v1717_v49  ;;  %v591_v48 = vld [vmem:[%s6450_s10 + $0x8c8] sm:$0xff]  ;;  %v593_v49 = vld [vmem:[%s6450_s10 + $0x8d8] sm:$0xff] }
 0x2f4   : > { %4001 = vmatmul.f32.vlgmr.msrb.gmra.mxu1 %v1969_v50  ;;  %4041 = vmatmul.f32.vlgmr.msrb.gmra.mxu3 %v1971_v51  ;;  %v402_v50 = vld [vmem:[%s6450_s10 + $0x2e0] sm:$0xff]  ;;  %v404_v51 = vld [vmem:[%s6450_s10 + $0x2f0] sm:$0xff] }
 0x2f6   : > { %4054 = vmatpush.xpose.msra.mxu0 %v1526_v52  ;;  %4094 = vmatpush.xpose.msra.mxu2 %v1528_v53  ;;  %v1722_v52 = vld [vmem:[%s6450_s10 + $0x2c20] sm:$0xff]  ;;  %v1724_v53 = vld [vmem:[%s6450_s10 + $0x2c30] sm:$0xff] }
 0x2f7   : > { %4074 = vmatpush.xpose.msra.mxu1 %v1527_v54  ;;  %4114 = vmatpush.xpose.msra.mxu3 %v1529_v55  ;;  %v403_v54 = vld [vmem:[%s6450_s10 + $0x2e8] sm:$0xff]  ;;  %v405_v55 = vld [vmem:[%s6450_s10 + $0x2f8] sm:$0xff] }
 0x2fa   : > { %4055 = vmatpush.xpose.msra.mxu0 %v1338_v56  ;;  %4095 = vmatpush.xpose.msra.mxu2 %v1340_v57  ;;  %v1978_v56 = vld.sshfl [vmem:[#allocation1 + $0x20] sm:$0xff pattern:$0x73625140]  ;;  %v1980_v57 = vld.sshfl [vmem:[#allocation1 + $0x30] sm:$0xff pattern:$0x73625140] }
 0x2fb   : > { %4075 = vmatpush.xpose.msra.mxu1 %v1339_v58  ;;  %4115 = vmatpush.xpose.msra.mxu3 %v1341_v59  ;;  %v1723_v58 = vld [vmem:[%s6450_s10 + $0x2c28] sm:$0xff]  ;;  %v1725_v59 = vld [vmem:[%s6450_s10 + $0x2c38] sm:$0xff] }
 0x2fe   : > { %4056 = vmatpush.xpose.msra.mxu0 %v1150_v60  ;;  %4096 = vmatpush.xpose.msra.mxu2 %v1152_v61  ;;  %v1979_v60 = vld.sshfl [vmem:[#allocation1 + $0x28] sm:$0xff pattern:$0x73625140]  ;;  %v1981_v61 = vld.sshfl [vmem:[#allocation1 + $0x38] sm:$0xff pattern:$0x73625140] }
 0x2ff   : > { %4076 = vmatpush.xpose.msra.mxu1 %v1151_v62  ;;  %4116 = vmatpush.xpose.msra.mxu3 %v1153_v63  ;;  %v1534_v62 = vld [vmem:[%s6450_s10 + $0x2640] sm:$0xff]  ;;  %v1536_v63 = vld [vmem:[%s6450_s10 + $0x2650] sm:$0xff] }
 0x302   : > { %4057 = vmatpush.xpose.msra.mxu0 %v962_v0  ;;  %4097 = vmatpush.xpose.msra.mxu2 %v964_v1  ;;  %v1535_v0 = vld [vmem:[%s6450_s10 + $0x2648] sm:$0xff]  ;;  %v1537_v1 = vld [vmem:[%s6450_s10 + $0x2658] sm:$0xff] }
 0x303   : > { %4077 = vmatpush.xpose.msra.mxu1 %v963_v2  ;;  %4117 = vmatpush.xpose.msra.mxu3 %v965_v3  ;;  %v1346_v2 = vld [vmem:[%s6450_s10 + $0x2060] sm:$0xff]  ;;  %v1348_v3 = vld [vmem:[%s6450_s10 + $0x2070] sm:$0xff] }
 0x306   : > { %4058 = vmatpush.xpose.msra.mxu0 %v774_v4  ;;  %4098 = vmatpush.xpose.msra.mxu2 %v776_v5  ;;  %v1347_v4 = vld [vmem:[%s6450_s10 + $0x2068] sm:$0xff]  ;;  %v1349_v5 = vld [vmem:[%s6450_s10 + $0x2078] sm:$0xff] }
 0x307   : > { %4078 = vmatpush.xpose.msra.mxu1 %v775_v6  ;;  %4118 = vmatpush.xpose.msra.mxu3 %v777_v7  ;;  %v1158_v6 = vld [vmem:[%s6450_s10 + $0x1a80] sm:$0xff]  ;;  %v1160_v7 = vld [vmem:[%s6450_s10 + $0x1a90] sm:$0xff] }
 0x30a   : > { %4059 = vmatpush.xpose.msra.mxu0 %v586_v9  ;;  %4099 = vmatpush.xpose.msra.mxu2 %v588_v10  ;;  %v1161_v9 = vld [vmem:[%s6450_s10 + $0x1a98] sm:$0xff]  ;;  %v970_v10 = vld [vmem:[%s6450_s10 + $0x14a0] sm:$0xff] }
 0x30b   : > { %4079 = vmatpush.xpose.msra.mxu1 %v587_v11  ;;  %4119 = vmatpush.xpose.msra.mxu3 %v589_v12  ;;  %v972_v11 = vld [vmem:[%s6450_s10 + $0x14b0] sm:$0xff]  ;;  %v971_v12 = vld [vmem:[%s6450_s10 + $0x14a8] sm:$0xff] }
 0x30e   : > { %4060 = vmatpush.xpose.msra.mxu0 %v398_v13  ;;  %4100 = vmatpush.xpose.msra.mxu2 %v400_v14  ;;  %v973_v13 = vld [vmem:[%s6450_s10 + $0x14b8] sm:$0xff]  ;;  %v782_v14 = vld [vmem:[%s6450_s10 + $0xec0] sm:$0xff] }
 0x30f   : > { %4080 = vmatpush.xpose.msra.mxu1 %v399_v17  ;;  %4120 = vmatpush.xpose.msra.mxu3 %v401_v18  ;;  %v785_v17 = vld [vmem:[%s6450_s10 + $0xed8] sm:$0xff] }
 0x310   : > { %v288_v18 = vld [vmem:[%s6460_s12 + $0xc8] sm:$0xff] }
 0x311   : > { %4061 = vmatmul.f32.vlgmr.msra.gmra.mxu0 %v1974_v19  ;;  %4101 = vmatmul.f32.vlgmr.msra.gmra.mxu2 %v1976_v20  ;;  %v594_v19 = vld [vmem:[%s6450_s10 + $0x8e0] sm:$0xff]  ;;  %v596_v20 = vld [vmem:[%s6450_s10 + $0x8f0] sm:$0xff]  ;;  %1983 = vst [vmem:[#allocation1 + $0x20] ss:$4 sm:$0xff] %v288_v18  ;;  %v1543_v18 = vld [vmem:[%s6450_s10 + $0x2688] sm:$0xff] }
 0x312   : > { %4133 = vmatpush.xpose.msrb.mxu0 %v1718_v15  ;;  %4173 = vmatpush.xpose.msrb.mxu2 %v1720_v16  ;;  %v784_v15 = vld [vmem:[%s6450_s10 + $0xed0] sm:$0xff]  ;;  %v783_v16 = vld [vmem:[%s6450_s10 + $0xec8] sm:$0xff] }
 0x313   : > { %4153 = vmatpush.xpose.msrb.mxu1 %v1719_v21  ;;  %4193 = vmatpush.xpose.msrb.mxu3 %v1721_v22  ;;  %v595_v21 = vld [vmem:[%s6450_s10 + $0x8e8] sm:$0xff]  ;;  %v597_v22 = vld [vmem:[%s6450_s10 + $0x8f8] sm:$0xff] }
 0x314   : > { %4081 = vmatmul.f32.vlgmr.msra.gmra.mxu1 %v1975_v23  ;;  %4121 = vmatmul.f32.vlgmr.msra.gmra.mxu3 %v1977_v24  ;;  %v406_v23 = vld [vmem:[%s6450_s10 + $0x300] sm:$0xff]  ;;  %v408_v24 = vld [vmem:[%s6450_s10 + $0x310] sm:$0xff] }
 0x316   : > { %4134 = vmatpush.xpose.msrb.mxu0 %v1530_v25  ;;  %4174 = vmatpush.xpose.msrb.mxu2 %v1532_v26  ;;  %v1726_v25 = vld [vmem:[%s6450_s10 + $0x2c40] sm:$0xff]  ;;  %v1728_v26 = vld [vmem:[%s6450_s10 + $0x2c50] sm:$0xff] }
 0x317   : > { %4154 = vmatpush.xpose.msrb.mxu1 %v1531_v27  ;;  %4194 = vmatpush.xpose.msrb.mxu3 %v1533_v28  ;;  %v407_v27 = vld [vmem:[%s6450_s10 + $0x308] sm:$0xff]  ;;  %v409_v28 = vld [vmem:[%s6450_s10 + $0x318] sm:$0xff] }
 0x31a   : > { %4135 = vmatpush.xpose.msrb.mxu0 %v1342_v29  ;;  %4175 = vmatpush.xpose.msrb.mxu2 %v1344_v30  ;;  %v1984_v29 = vld.sshfl [vmem:[#allocation1] sm:$0xff pattern:$0x73625140]  ;;  %v1986_v30 = vld.sshfl [vmem:[#allocation1 + $0x10] sm:$0xff pattern:$0x73625140] }
 0x31b   : > { %4155 = vmatpush.xpose.msrb.mxu1 %v1343_v31  ;;  %4195 = vmatpush.xpose.msrb.mxu3 %v1345_v32  ;;  %v1727_v31 = vld [vmem:[%s6450_s10 + $0x2c48] sm:$0xff]  ;;  %v1729_v32 = vld [vmem:[%s6450_s10 + $0x2c58] sm:$0xff] }
 0x31e   : > { %4136 = vmatpush.xpose.msrb.mxu0 %v1154_v33  ;;  %4176 = vmatpush.xpose.msrb.mxu2 %v1156_v34  ;;  %v1985_v33 = vld.sshfl [vmem:[#allocation1 + $0x8] sm:$0xff pattern:$0x73625140]  ;;  %v1987_v34 = vld.sshfl [vmem:[#allocation1 + $0x18] sm:$0xff pattern:$0x73625140] }
 0x31f   : > { %4156 = vmatpush.xpose.msrb.mxu1 %v1155_v35  ;;  %4196 = vmatpush.xpose.msrb.mxu3 %v1157_v36  ;;  %v7293_v35 = vpop.f32.mrf.mxu0  ;;  %v7295_v36 = vpop.f32.mrf.mxu2 }
 0x322   : > { %4137 = vmatpush.xpose.msrb.mxu0 %v966_v37  ;;  %4177 = vmatpush.xpose.msrb.mxu2 %v968_v38  ;;  %v1538_v37 = vld [vmem:[%s6450_s10 + $0x2660] sm:$0xff]  ;;  %v1540_v38 = vld [vmem:[%s6450_s10 + $0x2670] sm:$0xff] }
 0x323   : > { %4157 = vmatpush.xpose.msrb.mxu1 %v967_v39  ;;  %4197 = vmatpush.xpose.msrb.mxu3 %v969_v40  ;;  %v7299_v39 = vpop.f32.mrf.mxu1  ;;  %v7301_v40 = vpop.f32.mrf.mxu3 }
 0x326   : > { %4138 = vmatpush.xpose.msrb.mxu0 %v778_v41  ;;  %4178 = vmatpush.xpose.msrb.mxu2 %v780_v42  ;;  %v1539_v41 = vld [vmem:[%s6450_s10 + $0x2668] sm:$0xff]  ;;  %v1541_v42 = vld [vmem:[%s6450_s10 + $0x2678] sm:$0xff] }
 0x327   : > { %4158 = vmatpush.xpose.msrb.mxu1 %v779_v43  ;;  %4198 = vmatpush.xpose.msrb.mxu3 %v781_v44  ;;  %v1350_v43 = vld [vmem:[%s6450_s10 + $0x2080] sm:$0xff]  ;;  %v1352_v44 = vld [vmem:[%s6450_s10 + $0x2090] sm:$0xff] }
 0x32a   : > { %4139 = vmatpush.xpose.msrb.mxu0 %v590_v46  ;;  %4179 = vmatpush.xpose.msrb.mxu2 %v592_v47  ;;  %v1353_v46 = vld [vmem:[%s6450_s10 + $0x2098] sm:$0xff]  ;;  %v1162_v47 = vld [vmem:[%s6450_s10 + $0x1aa0] sm:$0xff] }
 0x32b   : > { %4159 = vmatpush.xpose.msrb.mxu1 %v591_v48  ;;  %4199 = vmatpush.xpose.msrb.mxu3 %v593_v49  ;;  %v1164_v48 = vld [vmem:[%s6450_s10 + $0x1ab0] sm:$0xff]  ;;  %v1163_v49 = vld [vmem:[%s6450_s10 + $0x1aa8] sm:$0xff] }
 0x32e   : > { %4140 = vmatpush.xpose.msrb.mxu0 %v402_v50  ;;  %4180 = vmatpush.xpose.msrb.mxu2 %v404_v51  ;;  %v1165_v50 = vld [vmem:[%s6450_s10 + $0x1ab8] sm:$0xff]  ;;  %v974_v51 = vld [vmem:[%s6450_s10 + $0x14c0] sm:$0xff] }
 0x32f   : > { %4160 = vmatpush.xpose.msrb.mxu1 %v403_v54  ;;  %4200 = vmatpush.xpose.msrb.mxu3 %v405_v55  ;;  %v977_v54 = vld [vmem:[%s6450_s10 + $0x14d8] sm:$0xff]  ;;  %v786_v55 = vld [vmem:[%s6450_s10 + $0xee0] sm:$0xff] }
 0x331   : > { %4141 = vmatmul.f32.vlgmr.msrb.gmra.mxu0 %v1978_v56  ;;  %4181 = vmatmul.f32.vlgmr.msrb.gmra.mxu2 %v1980_v57  ;;  %v788_v56 = vld [vmem:[%s6450_s10 + $0xef0] sm:$0xff]  ;;  %v787_v57 = vld [vmem:[%s6450_s10 + $0xee8] sm:$0xff] }
 0x332   : > { %4213 = vmatpush.xpose.msra.mxu0 %v1722_v52  ;;  %4253 = vmatpush.xpose.msra.mxu2 %v1724_v53  ;;  %v976_v52 = vld [vmem:[%s6450_s10 + $0x14d0] sm:$0xff]  ;;  %v975_v53 = vld [vmem:[%s6450_s10 + $0x14c8] sm:$0xff] }
 0x333   : > { %4233 = vmatpush.xpose.msra.mxu1 %v1723_v58  ;;  %4273 = vmatpush.xpose.msra.mxu3 %v1725_v59  ;;  %v789_v58 = vld [vmem:[%s6450_s10 + $0xef8] sm:$0xff]  ;;  %v289_v59 = vld [vmem:[%s6460_s12 + $0xd0] sm:$0xff] }
 0x334   : > { %4161 = vmatmul.f32.vlgmr.msrb.gmra.mxu1 %v1979_v60  ;;  %4201 = vmatmul.f32.vlgmr.msrb.gmra.mxu3 %v1981_v61  ;;  %v598_v60 = vld [vmem:[%s6450_s10 + $0x900] sm:$0xff]  ;;  %v600_v61 = vld [vmem:[%s6450_s10 + $0x910] sm:$0xff]  ;;  %1992 = vst [vmem:[#allocation1] ss:$4 sm:$0xff] %v289_v59 }
 0x335   : > { %v1546_v59 = vld [vmem:[%s6450_s10 + $0x26a0] sm:$0xff] }
 0x336   : > { %4214 = vmatpush.xpose.msra.mxu0 %v1534_v62  ;;  %4254 = vmatpush.xpose.msra.mxu2 %v1536_v63  ;;  %v599_v62 = vld [vmem:[%s6450_s10 + $0x908] sm:$0xff]  ;;  %v601_v63 = vld [vmem:[%s6450_s10 + $0x918] sm:$0xff] }
 0x337   : > { %4234 = vmatpush.xpose.msra.mxu1 %v1535_v0  ;;  %4274 = vmatpush.xpose.msra.mxu3 %v1537_v1  ;;  %v410_v0 = vld [vmem:[%s6450_s10 + $0x320] sm:$0xff]  ;;  %v412_v1 = vld [vmem:[%s6450_s10 + $0x330] sm:$0xff] }
 0x33a   : > { %4215 = vmatpush.xpose.msra.mxu0 %v1346_v2  ;;  %4255 = vmatpush.xpose.msra.mxu2 %v1348_v3  ;;  %v1730_v2 = vld [vmem:[%s6450_s10 + $0x2c60] sm:$0xff]  ;;  %v1732_v3 = vld [vmem:[%s6450_s10 + $0x2c70] sm:$0xff] }
 0x33b   : > { %4235 = vmatpush.xpose.msra.mxu1 %v1347_v4  ;;  %4275 = vmatpush.xpose.msra.mxu3 %v1349_v5  ;;  %v411_v4 = vld [vmem:[%s6450_s10 + $0x328] sm:$0xff]  ;;  %v413_v5 = vld [vmem:[%s6450_s10 + $0x338] sm:$0xff] }
 0x33e   : > { %4216 = vmatpush.xpose.msra.mxu0 %v1158_v6  ;;  %4256 = vmatpush.xpose.msra.mxu2 %v1160_v7  ;;  %v1988_v6 = vld.sshfl [vmem:[#allocation1 + $0x20] sm:$0xff pattern:$0x73625140]  ;;  %v1990_v7 = vld.sshfl [vmem:[#allocation1 + $0x30] sm:$0xff pattern:$0x73625140] }
 0x33f   : > { %4236 = vmatpush.xpose.msra.mxu1 %v1159_v8  ;;  %4276 = vmatpush.xpose.msra.mxu3 %v1161_v9  ;;  %v1731_v8 = vld [vmem:[%s6450_s10 + $0x2c68] sm:$0xff]  ;;  %v1733_v9 = vld [vmem:[%s6450_s10 + $0x2c78] sm:$0xff] }
 0x342   : > { %4217 = vmatpush.xpose.msra.mxu0 %v970_v10  ;;  %4257 = vmatpush.xpose.msra.mxu2 %v972_v11  ;;  %v1989_v10 = vld.sshfl [vmem:[#allocation1 + $0x28] sm:$0xff pattern:$0x73625140]  ;;  %v1991_v11 = vld.sshfl [vmem:[#allocation1 + $0x38] sm:$0xff pattern:$0x73625140] }
 0x343   : > { %4237 = vmatpush.xpose.msra.mxu1 %v971_v12  ;;  %4277 = vmatpush.xpose.msra.mxu3 %v973_v13  ;;  %v7334_v12 = vpop.f32.mrf.mxu0  ;;  %v7336_v13 = vpop.f32.mrf.mxu2 }
 0x346   : > { %4218 = vmatpush.xpose.msra.mxu0 %v782_v14  ;;  %4258 = vmatpush.xpose.msra.mxu2 %v784_v15  ;;  %v1542_v14 = vld [vmem:[%s6450_s10 + $0x2680] sm:$0xff]  ;;  %v1544_v15 = vld [vmem:[%s6450_s10 + $0x2690] sm:$0xff] }
 0x347   : > { %4238 = vmatpush.xpose.msra.mxu1 %v783_v16  ;;  %4278 = vmatpush.xpose.msra.mxu3 %v785_v17  ;;  %v7340_v16 = vpop.f32.mrf.mxu1  ;;  %v7342_v17 = vpop.f32.mrf.mxu3 }
 0x34a   : > { %4219 = vmatpush.xpose.msra.mxu0 %v594_v19  ;;  %4259 = vmatpush.xpose.msra.mxu2 %v596_v20  ;;  %v1545_v19 = vld [vmem:[%s6450_s10 + $0x2698] sm:$0xff]  ;;  %v1354_v20 = vld [vmem:[%s6450_s10 + $0x20a0] sm:$0xff] }
 0x34b   : > { %4239 = vmatpush.xpose.msra.mxu1 %v595_v21  ;;  %4279 = vmatpush.xpose.msra.mxu3 %v597_v22  ;;  %v1356_v21 = vld [vmem:[%s6450_s10 + $0x20b0] sm:$0xff]  ;;  %v1355_v22 = vld [vmem:[%s6450_s10 + $0x20a8] sm:$0xff] }
 0x34e   : > { %4220 = vmatpush.xpose.msra.mxu0 %v406_v23  ;;  %4260 = vmatpush.xpose.msra.mxu2 %v408_v24  ;;  %v1357_v23 = vld [vmem:[%s6450_s10 + $0x20b8] sm:$0xff]  ;;  %v1166_v24 = vld [vmem:[%s6450_s10 + $0x1ac0] sm:$0xff] }
 0x34f   : > { %4240 = vmatpush.xpose.msra.mxu1 %v407_v27  ;;  %4280 = vmatpush.xpose.msra.mxu3 %v409_v28  ;;  %v1169_v27 = vld [vmem:[%s6450_s10 + $0x1ad8] sm:$0xff]  ;;  %v978_v28 = vld [vmem:[%s6450_s10 + $0x14e0] sm:$0xff] }
 0x351   : > { %4221 = vmatmul.f32.vlgmr.msra.gmra.mxu0 %v1984_v29  ;;  %4261 = vmatmul.f32.vlgmr.msra.gmra.mxu2 %v1986_v30  ;;  %v980_v29 = vld [vmem:[%s6450_s10 + $0x14f0] sm:$0xff]  ;;  %v979_v30 = vld [vmem:[%s6450_s10 + $0x14e8] sm:$0xff] }
 0x352   : > { %4293 = vmatpush.xpose.msrb.mxu0 %v1726_v25  ;;  %4333 = vmatpush.xpose.msrb.mxu2 %v1728_v26  ;;  %v1168_v25 = vld [vmem:[%s6450_s10 + $0x1ad0] sm:$0xff]  ;;  %v1167_v26 = vld [vmem:[%s6450_s10 + $0x1ac8] sm:$0xff] }
 0x353   : > { %4313 = vmatpush.xpose.msrb.mxu1 %v1727_v31  ;;  %4353 = vmatpush.xpose.msrb.mxu3 %v1729_v32  ;;  %v981_v31 = vld [vmem:[%s6450_s10 + $0x14f8] sm:$0xff]  ;;  %v790_v32 = vld [vmem:[%s6450_s10 + $0xf00] sm:$0xff] }
 0x354   : > { %4241 = vmatmul.f32.vlgmr.msra.gmra.mxu1 %v1985_v33  ;;  %4281 = vmatmul.f32.vlgmr.msra.gmra.mxu3 %v1987_v34  ;;  %v792_v33 = vld [vmem:[%s6450_s10 + $0xf10] sm:$0xff]  ;;  %v791_v34 = vld [vmem:[%s6450_s10 + $0xf08] sm:$0xff] }
 0x356   : > { %4294 = vmatpush.xpose.msrb.mxu0 %v1538_v37  ;;  %4334 = vmatpush.xpose.msrb.mxu2 %v1540_v38  ;;  %v793_v37 = vld [vmem:[%s6450_s10 + $0xf18] sm:$0xff]  ;;  %v290_v38 = vld [vmem:[%s6460_s12 + $0xd8] sm:$0xff] }
 0x357   : > { %4314 = vmatpush.xpose.msrb.mxu1 %v1539_v41  ;;  %4354 = vmatpush.xpose.msrb.mxu3 %v1541_v42  ;;  %v602_v41 = vld [vmem:[%s6450_s10 + $0x920] sm:$0xff]  ;;  %v604_v42 = vld [vmem:[%s6450_s10 + $0x930] sm:$0xff]  ;;  %1993 = vst [vmem:[#allocation1 + $0x20] ss:$4 sm:$0xff] %v290_v38 }
 0x35a   : > { %4295 = vmatpush.xpose.msrb.mxu0 %v1350_v43  ;;  %4335 = vmatpush.xpose.msrb.mxu2 %v1352_v44  ;;  %v603_v43 = vld [vmem:[%s6450_s10 + $0x928] sm:$0xff]  ;;  %v605_v44 = vld [vmem:[%s6450_s10 + $0x938] sm:$0xff] }
 0x35b   : > { %4315 = vmatpush.xpose.msrb.mxu1 %v1351_v45  ;;  %4355 = vmatpush.xpose.msrb.mxu3 %v1353_v46  ;;  %v414_v45 = vld [vmem:[%s6450_s10 + $0x340] sm:$0xff]  ;;  %v416_v46 = vld [vmem:[%s6450_s10 + $0x350] sm:$0xff] }
 0x35e   : > { %4296 = vmatpush.xpose.msrb.mxu0 %v1162_v47  ;;  %4336 = vmatpush.xpose.msrb.mxu2 %v1164_v48  ;;  %v1734_v47 = vld [vmem:[%s6450_s10 + $0x2c80] sm:$0xff]  ;;  %v1736_v48 = vld [vmem:[%s6450_s10 + $0x2c90] sm:$0xff] }
 0x35f   : > { %4316 = vmatpush.xpose.msrb.mxu1 %v1163_v49  ;;  %4356 = vmatpush.xpose.msrb.mxu3 %v1165_v50  ;;  %v415_v49 = vld [vmem:[%s6450_s10 + $0x348] sm:$0xff]  ;;  %v417_v50 = vld [vmem:[%s6450_s10 + $0x358] sm:$0xff] }
 0x360   : > { %v1999_v38 = vld.sshfl [vmem:[#allocation1 + $0x28] sm:$0xff pattern:$0x73625140] }
 0x362   : > { %4297 = vmatpush.xpose.msrb.mxu0 %v974_v51  ;;  %4337 = vmatpush.xpose.msrb.mxu2 %v976_v52  ;;  %v1994_v51 = vld.sshfl [vmem:[#allocation1] sm:$0xff pattern:$0x73625140]  ;;  %v1996_v52 = vld.sshfl [vmem:[#allocation1 + $0x10] sm:$0xff pattern:$0x73625140] }
 0x363   : > { %4317 = vmatpush.xpose.msrb.mxu1 %v975_v53  ;;  %4357 = vmatpush.xpose.msrb.mxu3 %v977_v54  ;;  %v1735_v53 = vld [vmem:[%s6450_s10 + $0x2c88] sm:$0xff]  ;;  %v1737_v54 = vld [vmem:[%s6450_s10 + $0x2c98] sm:$0xff] }
 0x366   : > { %4298 = vmatpush.xpose.msrb.mxu0 %v786_v55  ;;  %4338 = vmatpush.xpose.msrb.mxu2 %v788_v56  ;;  %v1995_v55 = vld.sshfl [vmem:[#allocation1 + $0x8] sm:$0xff pattern:$0x73625140]  ;;  %v1997_v56 = vld.sshfl [vmem:[#allocation1 + $0x18] sm:$0xff pattern:$0x73625140] }
 0x367   : > { %4318 = vmatpush.xpose.msrb.mxu1 %v787_v57  ;;  %4358 = vmatpush.xpose.msrb.mxu3 %v789_v58  ;;  %v7375_v57 = vpop.f32.mrf.mxu0  ;;  %v7377_v58 = vpop.f32.mrf.mxu2 }
 0x36a   : > { %4299 = vmatpush.xpose.msrb.mxu0 %v598_v60  ;;  %4339 = vmatpush.xpose.msrb.mxu2 %v600_v61  ;;  %v1548_v60 = vld [vmem:[%s6450_s10 + $0x26b0] sm:$0xff]  ;;  %v7381_v61 = vpop.f32.mrf.mxu1 }
 0x36b   : > { %4319 = vmatpush.xpose.msrb.mxu1 %v599_v62  ;;  %4359 = vmatpush.xpose.msrb.mxu3 %v601_v63  ;;  %v7383_v62 = vpop.f32.mrf.mxu3  ;;  %v1547_v63 = vld [vmem:[%s6450_s10 + $0x26a8] sm:$0xff] }
 0x36e   : > { %4300 = vmatpush.xpose.msrb.mxu0 %v410_v0  ;;  %4340 = vmatpush.xpose.msrb.mxu2 %v412_v1  ;;  %v1549_v0 = vld [vmem:[%s6450_s10 + $0x26b8] sm:$0xff]  ;;  %v1358_v1 = vld [vmem:[%s6450_s10 + $0x20c0] sm:$0xff] }
 0x36f   : > { %4320 = vmatpush.xpose.msrb.mxu1 %v411_v4  ;;  %4360 = vmatpush.xpose.msrb.mxu3 %v413_v5  ;;  %v1361_v4 = vld [vmem:[%s6450_s10 + $0x20d8] sm:$0xff]  ;;  %v1170_v5 = vld [vmem:[%s6450_s10 + $0x1ae0] sm:$0xff] }
 0x371   : > { %4301 = vmatmul.f32.vlgmr.msrb.gmra.mxu0 %v1988_v6  ;;  %4341 = vmatmul.f32.vlgmr.msrb.gmra.mxu2 %v1990_v7  ;;  %v1172_v6 = vld [vmem:[%s6450_s10 + $0x1af0] sm:$0xff]  ;;  %v1171_v7 = vld [vmem:[%s6450_s10 + $0x1ae8] sm:$0xff] }
 0x372   : > { %4373 = vmatpush.xpose.msra.mxu0 %v1730_v2  ;;  %4413 = vmatpush.xpose.msra.mxu2 %v1732_v3  ;;  %v1360_v2 = vld [vmem:[%s6450_s10 + $0x20d0] sm:$0xff]  ;;  %v1359_v3 = vld [vmem:[%s6450_s10 + $0x20c8] sm:$0xff] }
 0x373   : > { %4393 = vmatpush.xpose.msra.mxu1 %v1731_v8  ;;  %4433 = vmatpush.xpose.msra.mxu3 %v1733_v9  ;;  %v1173_v8 = vld [vmem:[%s6450_s10 + $0x1af8] sm:$0xff]  ;;  %v982_v9 = vld [vmem:[%s6450_s10 + $0x1500] sm:$0xff] }
 0x374   : > { %4321 = vmatmul.f32.vlgmr.msrb.gmra.mxu1 %v1989_v10  ;;  %4361 = vmatmul.f32.vlgmr.msrb.gmra.mxu3 %v1991_v11  ;;  %v984_v10 = vld [vmem:[%s6450_s10 + $0x1510] sm:$0xff]  ;;  %v983_v11 = vld [vmem:[%s6450_s10 + $0x1508] sm:$0xff] }
 0x376   : > { %4374 = vmatpush.xpose.msra.mxu0 %v1542_v14  ;;  %4414 = vmatpush.xpose.msra.mxu2 %v1544_v15  ;;  %v985_v14 = vld [vmem:[%s6450_s10 + $0x1518] sm:$0xff]  ;;  %v794_v15 = vld [vmem:[%s6450_s10 + $0xf20] sm:$0xff] }
 0x377   : > { %4394 = vmatpush.xpose.msra.mxu1 %v1543_v18  ;;  %4434 = vmatpush.xpose.msra.mxu3 %v1545_v19  ;;  %v796_v18 = vld [vmem:[%s6450_s10 + $0xf30] sm:$0xff]  ;;  %v795_v19 = vld [vmem:[%s6450_s10 + $0xf28] sm:$0xff] }
 0x37a   : > { %4375 = vmatpush.xpose.msra.mxu0 %v1354_v20  ;;  %4415 = vmatpush.xpose.msra.mxu2 %v1356_v21  ;;  %v797_v20 = vld [vmem:[%s6450_s10 + $0xf38] sm:$0xff] }
 0x37b   : > { %4395 = vmatpush.xpose.msra.mxu1 %v1355_v22  ;;  %4435 = vmatpush.xpose.msra.mxu3 %v1357_v23  ;;  %v291_v21 = vld [vmem:[%s6460_s12 + $0xe0] sm:$0xff]  ;;  %v606_v22 = vld [vmem:[%s6450_s10 + $0x940] sm:$0xff] }
 0x37c   : > { %v608_v23 = vld [vmem:[%s6450_s10 + $0x950] sm:$0xff]  ;;  %2002 = vst [vmem:[#allocation1] ss:$4 sm:$0xff] %v291_v21 }
 0x37e   : > { %4376 = vmatpush.xpose.msra.mxu0 %v1166_v24  ;;  %4416 = vmatpush.xpose.msra.mxu2 %v1168_v25  ;;  %v607_v24 = vld [vmem:[%s6450_s10 + $0x948] sm:$0xff]  ;;  %v609_v25 = vld [vmem:[%s6450_s10 + $0x958] sm:$0xff] }
 0x37f   : > { %4396 = vmatpush.xpose.msra.mxu1 %v1167_v26  ;;  %4436 = vmatpush.xpose.msra.mxu3 %v1169_v27  ;;  %v418_v26 = vld [vmem:[%s6450_s10 + $0x360] sm:$0xff]  ;;  %v420_v27 = vld [vmem:[%s6450_s10 + $0x370] sm:$0xff] }
 0x382   : > { %4377 = vmatpush.xpose.msra.mxu0 %v978_v28  ;;  %4417 = vmatpush.xpose.msra.mxu2 %v980_v29  ;;  %v1738_v28 = vld [vmem:[%s6450_s10 + $0x2ca0] sm:$0xff]  ;;  %v1740_v29 = vld [vmem:[%s6450_s10 + $0x2cb0] sm:$0xff] }
 0x383   : > { %4397 = vmatpush.xpose.msra.mxu1 %v979_v30  ;;  %4437 = vmatpush.xpose.msra.mxu3 %v981_v31  ;;  %v419_v30 = vld [vmem:[%s6450_s10 + $0x368] sm:$0xff]  ;;  %v421_v31 = vld [vmem:[%s6450_s10 + $0x378] sm:$0xff] }
 0x384   : > { %v2004_v21 = vld.sshfl [vmem:[#allocation1] sm:$0xff pattern:$0x73625140] }
 0x386   : > { %4378 = vmatpush.xpose.msra.mxu0 %v790_v32  ;;  %4418 = vmatpush.xpose.msra.mxu2 %v792_v33  ;;  %v1998_v32 = vld.sshfl [vmem:[#allocation1 + $0x20] sm:$0xff pattern:$0x73625140]  ;;  %v2000_v33 = vld.sshfl [vmem:[#allocation1 + $0x30] sm:$0xff pattern:$0x73625140] }
 0x387   : > { %4398 = vmatpush.xpose.msra.mxu1 %v791_v34  ;;  %4438 = vmatpush.xpose.msra.mxu3 %v793_v37  ;;  %v1739_v34 = vld [vmem:[%s6450_s10 + $0x2ca8] sm:$0xff]  ;;  %v1741_v37 = vld [vmem:[%s6450_s10 + $0x2cb8] sm:$0xff] }
 0x38a   : > { %4379 = vmatpush.xpose.msra.mxu0 %v602_v41  ;;  %4419 = vmatpush.xpose.msra.mxu2 %v604_v42  ;;  %v2001_v41 = vld.sshfl [vmem:[#allocation1 + $0x38] sm:$0xff pattern:$0x73625140]  ;;  %v7416_v42 = vpop.f32.mrf.mxu0 }
 0x38b   : > { %4399 = vmatpush.xpose.msra.mxu1 %v603_v43  ;;  %4439 = vmatpush.xpose.msra.mxu3 %v605_v44  ;;  %v7418_v43 = vpop.f32.mrf.mxu2  ;;  %v1550_v44 = vld [vmem:[%s6450_s10 + $0x26c0] sm:$0xff] }
 0x38e   : > { %4380 = vmatpush.xpose.msra.mxu0 %v414_v45  ;;  %4420 = vmatpush.xpose.msra.mxu2 %v416_v46  ;;  %v1552_v45 = vld [vmem:[%s6450_s10 + $0x26d0] sm:$0xff]  ;;  %v7422_v46 = vpop.f32.mrf.mxu1 }
 0x38f   : > { %4400 = vmatpush.xpose.msra.mxu1 %v415_v49  ;;  %4440 = vmatpush.xpose.msra.mxu3 %v417_v50  ;;  %v1553_v49 = vld [vmem:[%s6450_s10 + $0x26d8] sm:$0xff]  ;;  %v1362_v50 = vld [vmem:[%s6450_s10 + $0x20e0] sm:$0xff] }
 0x391   : > { %4381 = vmatmul.f32.vlgmr.msra.gmra.mxu0 %v1994_v51  ;;  %4421 = vmatmul.f32.vlgmr.msra.gmra.mxu2 %v1996_v52  ;;  %v1364_v51 = vld [vmem:[%s6450_s10 + $0x20f0] sm:$0xff]  ;;  %v1363_v52 = vld [vmem:[%s6450_s10 + $0x20e8] sm:$0xff] }
 0x392   : > { %4453 = vmatpush.xpose.msrb.mxu0 %v1734_v47  ;;  %4493 = vmatpush.xpose.msrb.mxu2 %v1736_v48  ;;  %v7424_v47 = vpop.f32.mrf.mxu3  ;;  %v1551_v48 = vld [vmem:[%s6450_s10 + $0x26c8] sm:$0xff] }
 0x393   : > { %4473 = vmatpush.xpose.msrb.mxu1 %v1735_v53  ;;  %4513 = vmatpush.xpose.msrb.mxu3 %v1737_v54  ;;  %v1365_v53 = vld [vmem:[%s6450_s10 + $0x20f8] sm:$0xff]  ;;  %v1174_v54 = vld [vmem:[%s6450_s10 + $0x1b00] sm:$0xff] }
 0x394   : > { %4401 = vmatmul.f32.vlgmr.msra.gmra.mxu1 %v1995_v55  ;;  %4441 = vmatmul.f32.vlgmr.msra.gmra.mxu3 %v1997_v56  ;;  %v1176_v55 = vld [vmem:[%s6450_s10 + $0x1b10] sm:$0xff]  ;;  %v1175_v56 = vld [vmem:[%s6450_s10 + $0x1b08] sm:$0xff] }
 0x396   : > { %4454 = vmatpush.xpose.msrb.mxu0 %v1546_v59  ;;  %4494 = vmatpush.xpose.msrb.mxu2 %v1548_v60  ;;  %v1177_v59 = vld [vmem:[%s6450_s10 + $0x1b18] sm:$0xff]  ;;  %v986_v60 = vld [vmem:[%s6450_s10 + $0x1520] sm:$0xff] }
 0x397   : > { %4474 = vmatpush.xpose.msrb.mxu1 %v1547_v63  ;;  %4514 = vmatpush.xpose.msrb.mxu3 %v1549_v0  ;;  %v988_v63 = vld [vmem:[%s6450_s10 + $0x1530] sm:$0xff]  ;;  %v987_v0 = vld [vmem:[%s6450_s10 + $0x1528] sm:$0xff] }
 0x39a   : > { %4455 = vmatpush.xpose.msrb.mxu0 %v1358_v1  ;;  %4495 = vmatpush.xpose.msrb.mxu2 %v1360_v2  ;;  %v989_v1 = vld [vmem:[%s6450_s10 + $0x1538] sm:$0xff]  ;;  %v798_v2 = vld [vmem:[%s6450_s10 + $0xf40] sm:$0xff] }
 0x39b   : > { %4475 = vmatpush.xpose.msrb.mxu1 %v1359_v3  ;;  %4515 = vmatpush.xpose.msrb.mxu3 %v1361_v4  ;;  %v800_v3 = vld [vmem:[%s6450_s10 + $0xf50] sm:$0xff]  ;;  %v799_v4 = vld [vmem:[%s6450_s10 + $0xf48] sm:$0xff] }
 0x39e   : > { %4456 = vmatpush.xpose.msrb.mxu0 %v1170_v5  ;;  %4496 = vmatpush.xpose.msrb.mxu2 %v1172_v6  ;;  %v801_v5 = vld [vmem:[%s6450_s10 + $0xf58] sm:$0xff] }
 0x39f   : > { %4476 = vmatpush.xpose.msrb.mxu1 %v1171_v7  ;;  %4516 = vmatpush.xpose.msrb.mxu3 %v1173_v8  ;;  %v292_v6 = vld [vmem:[%s6460_s12 + $0xe8] sm:$0xff]  ;;  %v612_v8 = vld [vmem:[%s6450_s10 + $0x970] sm:$0xff] }
 0x3a0   : > { %v610_v7 = vld [vmem:[%s6450_s10 + $0x960] sm:$0xff]  ;;  %2003 = vst [vmem:[#allocation1 + $0x20] ss:$4 sm:$0xff] %v292_v6 }
 0x3a1   : > { %v1746_v6 = vld [vmem:[%s6450_s10 + $0x2ce0] sm:$0xff] }
 0x3a2   : > { %4457 = vmatpush.xpose.msrb.mxu0 %v982_v9  ;;  %4497 = vmatpush.xpose.msrb.mxu2 %v984_v10  ;;  %v611_v9 = vld [vmem:[%s6450_s10 + $0x968] sm:$0xff]  ;;  %v613_v10 = vld [vmem:[%s6450_s10 + $0x978] sm:$0xff] }
 0x3a3   : > { %4477 = vmatpush.xpose.msrb.mxu1 %v983_v11  ;;  %4517 = vmatpush.xpose.msrb.mxu3 %v985_v14  ;;  %v422_v11 = vld [vmem:[%s6450_s10 + $0x380] sm:$0xff]  ;;  %v424_v14 = vld [vmem:[%s6450_s10 + $0x390] sm:$0xff] }
 0x3a6   : > { %4458 = vmatpush.xpose.msrb.mxu0 %v794_v15  ;;  %4498 = vmatpush.xpose.msrb.mxu2 %v796_v18  ;;  %v1742_v15 = vld [vmem:[%s6450_s10 + $0x2cc0] sm:$0xff]  ;;  %v1744_v18 = vld [vmem:[%s6450_s10 + $0x2cd0] sm:$0xff] }
 0x3a7   : > { %4478 = vmatpush.xpose.msrb.mxu1 %v795_v19  ;;  %4518 = vmatpush.xpose.msrb.mxu3 %v797_v20  ;;  %v423_v19 = vld [vmem:[%s6450_s10 + $0x388] sm:$0xff]  ;;  %v425_v20 = vld [vmem:[%s6450_s10 + $0x398] sm:$0xff] }
 0x3aa   : > { %4459 = vmatpush.xpose.msrb.mxu0 %v606_v22  ;;  %4499 = vmatpush.xpose.msrb.mxu2 %v608_v23  ;;  %v2006_v22 = vld.sshfl [vmem:[#allocation1 + $0x10] sm:$0xff pattern:$0x73625140] }
 0x3ab   : > { %4479 = vmatpush.xpose.msrb.mxu1 %v607_v24  ;;  %4519 = vmatpush.xpose.msrb.mxu3 %v609_v25  ;;  %v1743_v23 = vld [vmem:[%s6450_s10 + $0x2cc8] sm:$0xff]  ;;  %v1745_v24 = vld [vmem:[%s6450_s10 + $0x2cd8] sm:$0xff] }
 0x3ac   : > { %v2005_v25 = vld.sshfl [vmem:[#allocation1 + $0x8] sm:$0xff pattern:$0x73625140] }
 0x3ae   : > { %4460 = vmatpush.xpose.msrb.mxu0 %v418_v26  ;;  %4500 = vmatpush.xpose.msrb.mxu2 %v420_v27  ;;  %v2007_v26 = vld.sshfl [vmem:[#allocation1 + $0x18] sm:$0xff pattern:$0x73625140]  ;;  %v7457_v27 = vpop.f32.mrf.mxu0 }
 0x3af   : > { %4480 = vmatpush.xpose.msrb.mxu1 %v419_v30  ;;  %4520 = vmatpush.xpose.msrb.mxu3 %v421_v31  ;;  %v1556_v30 = vld [vmem:[%s6450_s10 + $0x26f0] sm:$0xff]  ;;  %v7463_v31 = vpop.f32.mrf.mxu1 }
 0x3b1   : > { %4461 = vmatmul.f32.vlgmr.msrb.gmra.mxu0 %v1998_v32  ;;  %4501 = vmatmul.f32.vlgmr.msrb.gmra.mxu2 %v2000_v33  ;;  %v7465_v32 = vpop.f32.mrf.mxu3  ;;  %v1555_v33 = vld [vmem:[%s6450_s10 + $0x26e8] sm:$0xff] }
 0x3b2   : > { %4533 = vmatpush.xpose.msra.mxu0 %v1738_v28  ;;  %4573 = vmatpush.xpose.msra.mxu2 %v1740_v29  ;;  %v7459_v28 = vpop.f32.mrf.mxu2  ;;  %v1554_v29 = vld [vmem:[%s6450_s10 + $0x26e0] sm:$0xff] }
 0x3b3   : > { %4553 = vmatpush.xpose.msra.mxu1 %v1739_v34  ;;  %4593 = vmatpush.xpose.msra.mxu3 %v1741_v37  ;;  %v1557_v34 = vld [vmem:[%s6450_s10 + $0x26f8] sm:$0xff]  ;;  %v1366_v37 = vld [vmem:[%s6450_s10 + $0x2100] sm:$0xff] }
 0x3b4   : > { %4481 = vmatmul.f32.vlgmr.msrb.gmra.mxu1 %v1999_v38  ;;  %4521 = vmatmul.f32.vlgmr.msrb.gmra.mxu3 %v2001_v41  ;;  %v1368_v38 = vld [vmem:[%s6450_s10 + $0x2110] sm:$0xff]  ;;  %v1367_v41 = vld [vmem:[%s6450_s10 + $0x2108] sm:$0xff] }
 0x3b6   : > { %4534 = vmatpush.xpose.msra.mxu0 %v1550_v44  ;;  %4574 = vmatpush.xpose.msra.mxu2 %v1552_v45  ;;  %v1369_v44 = vld [vmem:[%s6450_s10 + $0x2118] sm:$0xff]  ;;  %v1178_v45 = vld [vmem:[%s6450_s10 + $0x1b20] sm:$0xff] }
 0x3b7   : > { %4554 = vmatpush.xpose.msra.mxu1 %v1551_v48  ;;  %4594 = vmatpush.xpose.msra.mxu3 %v1553_v49  ;;  %v1180_v48 = vld [vmem:[%s6450_s10 + $0x1b30] sm:$0xff]  ;;  %v1179_v49 = vld [vmem:[%s6450_s10 + $0x1b28] sm:$0xff] }
 0x3ba   : > { %4535 = vmatpush.xpose.msra.mxu0 %v1362_v50  ;;  %4575 = vmatpush.xpose.msra.mxu2 %v1364_v51  ;;  %v1181_v50 = vld [vmem:[%s6450_s10 + $0x1b38] sm:$0xff]  ;;  %v990_v51 = vld [vmem:[%s6450_s10 + $0x1540] sm:$0xff] }
 0x3bb   : > { %4555 = vmatpush.xpose.msra.mxu1 %v1363_v52  ;;  %4595 = vmatpush.xpose.msra.mxu3 %v1365_v53  ;;  %v992_v52 = vld [vmem:[%s6450_s10 + $0x1550] sm:$0xff]  ;;  %v991_v53 = vld [vmem:[%s6450_s10 + $0x1548] sm:$0xff] }
 0x3be   : > { %4536 = vmatpush.xpose.msra.mxu0 %v1174_v54  ;;  %4576 = vmatpush.xpose.msra.mxu2 %v1176_v55  ;;  %v993_v54 = vld [vmem:[%s6450_s10 + $0x1558] sm:$0xff]  ;;  %v802_v55 = vld [vmem:[%s6450_s10 + $0xf60] sm:$0xff] }
 0x3bf   : > { %4556 = vmatpush.xpose.msra.mxu1 %v1175_v56  ;;  %4596 = vmatpush.xpose.msra.mxu3 %v1177_v59  ;;  %v804_v56 = vld [vmem:[%s6450_s10 + $0xf70] sm:$0xff]  ;;  %v803_v59 = vld [vmem:[%s6450_s10 + $0xf68] sm:$0xff] }
 0x3c2   : > { %4537 = vmatpush.xpose.msra.mxu0 %v986_v60  ;;  %4577 = vmatpush.xpose.msra.mxu2 %v988_v63  ;;  %v805_v60 = vld [vmem:[%s6450_s10 + $0xf78] sm:$0xff]  ;;  %v293_v63 = vld [vmem:[%s6460_s12 + $0xf0] sm:$0xff] }
 0x3c3   : > { %4557 = vmatpush.xpose.msra.mxu1 %v987_v0  ;;  %4597 = vmatpush.xpose.msra.mxu3 %v989_v1  ;;  %v614_v0 = vld [vmem:[%s6450_s10 + $0x980] sm:$0xff]  ;;  %v616_v1 = vld [vmem:[%s6450_s10 + $0x990] sm:$0xff]  ;;  %2012 = vst [vmem:[#allocation1] ss:$4 sm:$0xff] %v293_v63  ;;  %v619_v63 = vld [vmem:[%s6450_s10 + $0x9a8] sm:$0xff] }
 0x3c6   : > { %4538 = vmatpush.xpose.msra.mxu0 %v798_v2  ;;  %4578 = vmatpush.xpose.msra.mxu2 %v800_v3  ;;  %v615_v2 = vld [vmem:[%s6450_s10 + $0x988] sm:$0xff]  ;;  %v617_v3 = vld [vmem:[%s6450_s10 + $0x998] sm:$0xff] }
 0x3c7   : > { %4558 = vmatpush.xpose.msra.mxu1 %v799_v4  ;;  %4598 = vmatpush.xpose.msra.mxu3 %v801_v5  ;;  %v426_v4 = vld [vmem:[%s6450_s10 + $0x3a0] sm:$0xff]  ;;  %v428_v5 = vld [vmem:[%s6450_s10 + $0x3b0] sm:$0xff] }
 0x3ca   : > { %4539 = vmatpush.xpose.msra.mxu0 %v610_v7  ;;  %4579 = vmatpush.xpose.msra.mxu2 %v612_v8  ;;  %v1748_v7 = vld [vmem:[%s6450_s10 + $0x2cf0] sm:$0xff]  ;;  %v427_v8 = vld [vmem:[%s6450_s10 + $0x3a8] sm:$0xff] }
 0x3cb   : > { %4559 = vmatpush.xpose.msra.mxu1 %v611_v9  ;;  %4599 = vmatpush.xpose.msra.mxu3 %v613_v10  ;;  %v429_v9 = vld [vmem:[%s6450_s10 + $0x3b8] sm:$0xff] }
 0x3cc   : > { %v2008_v10 = vld.sshfl [vmem:[#allocation1 + $0x20] sm:$0xff pattern:$0x73625140] }
 0x3ce   : > { %4540 = vmatpush.xpose.msra.mxu0 %v422_v11  ;;  %4580 = vmatpush.xpose.msra.mxu2 %v424_v14  ;;  %v2010_v11 = vld.sshfl [vmem:[#allocation1 + $0x30] sm:$0xff pattern:$0x73625140] }
 0x3cf   : > { %4560 = vmatpush.xpose.msra.mxu1 %v423_v19  ;;  %4600 = vmatpush.xpose.msra.mxu3 %v425_v20  ;;  %v1747_v14 = vld [vmem:[%s6450_s10 + $0x2ce8] sm:$0xff]  ;;  %v7498_v20 = vpop.f32.mrf.mxu0 }
 0x3d0   : > { %v2011_v19 = vld.sshfl [vmem:[#allocation1 + $0x38] sm:$0xff pattern:$0x73625140] }
 0x3d1   : > { %4541 = vmatmul.f32.vlgmr.msra.gmra.mxu0 %v2004_v21  ;;  %4581 = vmatmul.f32.vlgmr.msra.gmra.mxu2 %v2006_v22  ;;  %v7500_v21 = vpop.f32.mrf.mxu2  ;;  %v1558_v22 = vld [vmem:[%s6450_s10 + $0x2700] sm:$0xff] }
 0x3d2   : > { %4613 = vmatpush.xpose.msrb.mxu0 %v1742_v15  ;;  %4653 = vmatpush.xpose.msrb.mxu2 %v1744_v18  ;;  %v1749_v15 = vld [vmem:[%s6450_s10 + $0x2cf8] sm:$0xff] }
 0x3d3   : > { %4633 = vmatpush.xpose.msrb.mxu1 %v1743_v23  ;;  %4673 = vmatpush.xpose.msrb.mxu3 %v1745_v24  ;;  %v2009_v18 = vld.sshfl [vmem:[#allocation1 + $0x28] sm:$0xff pattern:$0x73625140]  ;;  %v1560_v23 = vld [vmem:[%s6450_s10 + $0x2710] sm:$0xff]  ;;  %v7504_v24 = vpop.f32.mrf.mxu1 }
 0x3d4   : > { %4561 = vmatmul.f32.vlgmr.msra.gmra.mxu1 %v2005_v25  ;;  %4601 = vmatmul.f32.vlgmr.msra.gmra.mxu3 %v2007_v26  ;;  %v7506_v25 = vpop.f32.mrf.mxu3  ;;  %v1559_v26 = vld [vmem:[%s6450_s10 + $0x2708] sm:$0xff] }
 0x3d6   : > { %4614 = vmatpush.xpose.msrb.mxu0 %v1554_v29  ;;  %4654 = vmatpush.xpose.msrb.mxu2 %v1556_v30  ;;  %v1561_v29 = vld [vmem:[%s6450_s10 + $0x2718] sm:$0xff]  ;;  %v1370_v30 = vld [vmem:[%s6450_s10 + $0x2120] sm:$0xff] }
 0x3d7   : > { %4634 = vmatpush.xpose.msrb.mxu1 %v1555_v33  ;;  %4674 = vmatpush.xpose.msrb.mxu3 %v1557_v34  ;;  %v1372_v33 = vld [vmem:[%s6450_s10 + $0x2130] sm:$0xff]  ;;  %v1371_v34 = vld [vmem:[%s6450_s10 + $0x2128] sm:$0xff] }
 0x3da   : > { %4615 = vmatpush.xpose.msrb.mxu0 %v1366_v37  ;;  %4655 = vmatpush.xpose.msrb.mxu2 %v1368_v38  ;;  %v1373_v37 = vld [vmem:[%s6450_s10 + $0x2138] sm:$0xff]  ;;  %v1182_v38 = vld [vmem:[%s6450_s10 + $0x1b40] sm:$0xff] }
 0x3db   : > { %4635 = vmatpush.xpose.msrb.mxu1 %v1367_v41  ;;  %4675 = vmatpush.xpose.msrb.mxu3 %v1369_v44  ;;  %v1184_v41 = vld [vmem:[%s6450_s10 + $0x1b50] sm:$0xff]  ;;  %v1183_v44 = vld [vmem:[%s6450_s10 + $0x1b48] sm:$0xff] }
 0x3de   : > { %4616 = vmatpush.xpose.msrb.mxu0 %v1178_v45  ;;  %4656 = vmatpush.xpose.msrb.mxu2 %v1180_v48  ;;  %v1185_v45 = vld [vmem:[%s6450_s10 + $0x1b58] sm:$0xff]  ;;  %v994_v48 = vld [vmem:[%s6450_s10 + $0x1560] sm:$0xff] }
 0x3df   : > { %4636 = vmatpush.xpose.msrb.mxu1 %v1179_v49  ;;  %4676 = vmatpush.xpose.msrb.mxu3 %v1181_v50  ;;  %v996_v49 = vld [vmem:[%s6450_s10 + $0x1570] sm:$0xff]  ;;  %v995_v50 = vld [vmem:[%s6450_s10 + $0x1568] sm:$0xff] }
 0x3e2   : > { %4617 = vmatpush.xpose.msrb.mxu0 %v990_v51  ;;  %4657 = vmatpush.xpose.msrb.mxu2 %v992_v52  ;;  %v997_v51 = vld [vmem:[%s6450_s10 + $0x1578] sm:$0xff]  ;;  %v806_v52 = vld [vmem:[%s6450_s10 + $0xf80] sm:$0xff] }
 0x3e3   : > { %4637 = vmatpush.xpose.msrb.mxu1 %v991_v53  ;;  %4677 = vmatpush.xpose.msrb.mxu3 %v993_v54  ;;  %v808_v53 = vld [vmem:[%s6450_s10 + $0xf90] sm:$0xff]  ;;  %v807_v54 = vld [vmem:[%s6450_s10 + $0xf88] sm:$0xff] }
 0x3e6   : > { %4618 = vmatpush.xpose.msrb.mxu0 %v802_v55  ;;  %4658 = vmatpush.xpose.msrb.mxu2 %v804_v56  ;;  %v809_v55 = vld [vmem:[%s6450_s10 + $0xf98] sm:$0xff]  ;;  %v294_v56 = vld [vmem:[%s6460_s12 + $0xf8] sm:$0xff] }
 0x3e7   : > { %4638 = vmatpush.xpose.msrb.mxu1 %v803_v59  ;;  %4678 = vmatpush.xpose.msrb.mxu3 %v805_v60  ;;  %v618_v59 = vld [vmem:[%s6450_s10 + $0x9a0] sm:$0xff]  ;;  %v620_v60 = vld [vmem:[%s6450_s10 + $0x9b0] sm:$0xff]  ;;  %2013 = vst [vmem:[#allocation1 + $0x20] ss:$4 sm:$0xff] %v294_v56  ;;  %v813_v56 = vld [vmem:[%s6450_s10 + $0xfb8] sm:$0xff] }
 0x3ea   : > { %4619 = vmatpush.xpose.msrb.mxu0 %v614_v0  ;;  %4659 = vmatpush.xpose.msrb.mxu2 %v616_v1  ;;  %v621_v0 = vld [vmem:[%s6450_s10 + $0x9b8] sm:$0xff]  ;;  %v430_v1 = vld [vmem:[%s6450_s10 + $0x3c0] sm:$0xff] }
 0x3eb   : > { %4639 = vmatpush.xpose.msrb.mxu1 %v615_v2  ;;  %4679 = vmatpush.xpose.msrb.mxu3 %v617_v3  ;;  %v432_v2 = vld [vmem:[%s6450_s10 + $0x3d0] sm:$0xff]  ;;  %v1750_v3 = vld [vmem:[%s6450_s10 + $0x2d00] sm:$0xff] }
 0x3ee   : > { %4620 = vmatpush.xpose.msrb.mxu0 %v426_v4  ;;  %4660 = vmatpush.xpose.msrb.mxu2 %v428_v5  ;;  %v1752_v4 = vld [vmem:[%s6450_s10 + $0x2d10] sm:$0xff]  ;;  %v431_v5 = vld [vmem:[%s6450_s10 + $0x3c8] sm:$0xff] }
 0x3ef   : > { %4640 = vmatpush.xpose.msrb.mxu1 %v427_v8  ;;  %4680 = vmatpush.xpose.msrb.mxu3 %v429_v9  ;;  %v2016_v8 = vld.sshfl [vmem:[#allocation1 + $0x10] sm:$0xff pattern:$0x73625140] }
 0x3f0   : > { %v1751_v9 = vld [vmem:[%s6450_s10 + $0x2d08] sm:$0xff] }
 0x3f1   : > { %4621 = vmatmul.f32.vlgmr.msrb.gmra.mxu0 %v2008_v10  ;;  %4661 = vmatmul.f32.vlgmr.msrb.gmra.mxu2 %v2010_v11  ;;  %v1753_v10 = vld [vmem:[%s6450_s10 + $0x2d18] sm:$0xff] }
 0x3f2   : > { %4693 = vmatpush.xpose.msra.mxu0 %v1746_v6  ;;  %4733 = vmatpush.xpose.msra.mxu2 %v1748_v7  ;;  %v433_v6 = vld [vmem:[%s6450_s10 + $0x3d8] sm:$0xff] }
 0x3f3   : > { %4713 = vmatpush.xpose.msra.mxu1 %v1747_v14  ;;  %4753 = vmatpush.xpose.msra.mxu3 %v1749_v15  ;;  %v2014_v7 = vld.sshfl [vmem:[#allocation1] sm:$0xff pattern:$0x73625140]  ;;  %v2015_v11 = vld.sshfl [vmem:[#allocation1 + $0x8] sm:$0xff pattern:$0x73625140]  ;;  %v7539_v15 = vpop.f32.mrf.mxu0 }
 0x3f4   : > { %4641 = vmatmul.f32.vlgmr.msrb.gmra.mxu1 %v2009_v18  ;;  %4681 = vmatmul.f32.vlgmr.msrb.gmra.mxu3 %v2011_v19  ;;  %v2017_v14 = vld.sshfl [vmem:[#allocation1 + $0x18] sm:$0xff pattern:$0x73625140]  ;;  %v7541_v18 = vpop.f32.mrf.mxu2  ;;  %v1562_v19 = vld [vmem:[%s6450_s10 + $0x2720] sm:$0xff] }
 0x3f6   : > { %4694 = vmatpush.xpose.msra.mxu0 %v1558_v22  ;;  %4734 = vmatpush.xpose.msra.mxu2 %v1560_v23  ;;  %v1564_v22 = vld [vmem:[%s6450_s10 + $0x2730] sm:$0xff]  ;;  %v7545_v23 = vpop.f32.mrf.mxu1 }
 0x3f7   : > { %4714 = vmatpush.xpose.msra.mxu1 %v1559_v26  ;;  %4754 = vmatpush.xpose.msra.mxu3 %v1561_v29  ;;  %v7547_v26 = vpop.f32.mrf.mxu3  ;;  %v1563_v29 = vld [vmem:[%s6450_s10 + $0x2728] sm:$0xff] }
 0x3fa   : > { %4695 = vmatpush.xpose.msra.mxu0 %v1370_v30  ;;  %4735 = vmatpush.xpose.msra.mxu2 %v1372_v33  ;;  %v1565_v30 = vld [vmem:[%s6450_s10 + $0x2738] sm:$0xff]  ;;  %v1374_v33 = vld [vmem:[%s6450_s10 + $0x2140] sm:$0xff] }
 0x3fb   : > { %4715 = vmatpush.xpose.msra.mxu1 %v1371_v34  ;;  %4755 = vmatpush.xpose.msra.mxu3 %v1373_v37  ;;  %v1376_v34 = vld [vmem:[%s6450_s10 + $0x2150] sm:$0xff]  ;;  %v1375_v37 = vld [vmem:[%s6450_s10 + $0x2148] sm:$0xff] }
 0x3fe   : > { %4696 = vmatpush.xpose.msra.mxu0 %v1182_v38  ;;  %4736 = vmatpush.xpose.msra.mxu2 %v1184_v41  ;;  %v1377_v38 = vld [vmem:[%s6450_s10 + $0x2158] sm:$0xff]  ;;  %v1186_v41 = vld [vmem:[%s6450_s10 + $0x1b60] sm:$0xff] }
 0x3ff   : > { %4716 = vmatpush.xpose.msra.mxu1 %v1183_v44  ;;  %4756 = vmatpush.xpose.msra.mxu3 %v1185_v45  ;;  %v1188_v44 = vld [vmem:[%s6450_s10 + $0x1b70] sm:$0xff]  ;;  %v1187_v45 = vld [vmem:[%s6450_s10 + $0x1b68] sm:$0xff] }
 0x402   : > { %4697 = vmatpush.xpose.msra.mxu0 %v994_v48  ;;  %4737 = vmatpush.xpose.msra.mxu2 %v996_v49  ;;  %v1189_v48 = vld [vmem:[%s6450_s10 + $0x1b78] sm:$0xff]  ;;  %v998_v49 = vld [vmem:[%s6450_s10 + $0x1580] sm:$0xff] }
 0x403   : > { %4717 = vmatpush.xpose.msra.mxu1 %v995_v50  ;;  %4757 = vmatpush.xpose.msra.mxu3 %v997_v51  ;;  %v1000_v50 = vld [vmem:[%s6450_s10 + $0x1590] sm:$0xff]  ;;  %v999_v51 = vld [vmem:[%s6450_s10 + $0x1588] sm:$0xff] }
 0x406   : > { %4698 = vmatpush.xpose.msra.mxu0 %v806_v52  ;;  %4738 = vmatpush.xpose.msra.mxu2 %v808_v53  ;;  %v1001_v52 = vld [vmem:[%s6450_s10 + $0x1598] sm:$0xff]  ;;  %v810_v53 = vld [vmem:[%s6450_s10 + $0xfa0] sm:$0xff] }
 0x407   : > { %4718 = vmatpush.xpose.msra.mxu1 %v807_v54  ;;  %4758 = vmatpush.xpose.msra.mxu3 %v809_v55  ;;  %v812_v54 = vld [vmem:[%s6450_s10 + $0xfb0] sm:$0xff]  ;;  %v811_v55 = vld [vmem:[%s6450_s10 + $0xfa8] sm:$0xff] }
 0x40a   : > { %4699 = vmatpush.xpose.msra.mxu0 %v618_v59  ;;  %4739 = vmatpush.xpose.msra.mxu2 %v620_v60  ;;  %v295_v59 = vld [vmem:[%s6460_s12 + $0x100] sm:$0xff]  ;;  %v622_v60 = vld [vmem:[%s6450_s10 + $0x9c0] sm:$0xff] }
 0x40b   : > { %4719 = vmatpush.xpose.msra.mxu1 %v619_v63  ;;  %4759 = vmatpush.xpose.msra.mxu3 %v621_v0  ;;  %v624_v63 = vld [vmem:[%s6450_s10 + $0x9d0] sm:$0xff]  ;;  %2022 = vst [vmem:[#allocation1] ss:$4 sm:$0xff] %v295_v59  ;;  %v623_v0 = vld [vmem:[%s6450_s10 + $0x9c8] sm:$0xff]  ;;  %v1005_v59 = vld [vmem:[%s6450_s10 + $0x15b8] sm:$0xff] }
 0x40e   : > { %4700 = vmatpush.xpose.msra.mxu0 %v430_v1  ;;  %4740 = vmatpush.xpose.msra.mxu2 %v432_v2  ;;  %v625_v1 = vld [vmem:[%s6450_s10 + $0x9d8] sm:$0xff]  ;;  %v434_v2 = vld [vmem:[%s6450_s10 + $0x3e0] sm:$0xff] }
 0x40f   : > { %4720 = vmatpush.xpose.msra.mxu1 %v431_v5  ;;  %4760 = vmatpush.xpose.msra.mxu3 %v433_v6  ;;  %v1756_v5 = vld [vmem:[%s6450_s10 + $0x2d30] sm:$0xff]  ;;  %v435_v6 = vld [vmem:[%s6450_s10 + $0x3e8] sm:$0xff] }
 0x411   : > { %4701 = vmatmul.f32.vlgmr.msra.gmra.mxu0 %v2014_v7  ;;  %4741 = vmatmul.f32.vlgmr.msra.gmra.mxu2 %v2016_v8  ;;  %v437_v7 = vld [vmem:[%s6450_s10 + $0x3f8] sm:$0xff] }
 0x412   : > { %4773 = vmatpush.xpose.msrb.mxu0 %v1750_v3  ;;  %4813 = vmatpush.xpose.msrb.mxu2 %v1752_v4  ;;  %v436_v3 = vld [vmem:[%s6450_s10 + $0x3f0] sm:$0xff]  ;;  %v1754_v4 = vld [vmem:[%s6450_s10 + $0x2d20] sm:$0xff] }
 0x413   : > { %4793 = vmatpush.xpose.msrb.mxu1 %v1751_v9  ;;  %4833 = vmatpush.xpose.msrb.mxu3 %v1753_v10  ;;  %v2018_v8 = vld.sshfl [vmem:[#allocation1 + $0x20] sm:$0xff pattern:$0x73625140]  ;;  %v2020_v9 = vld.sshfl [vmem:[#allocation1 + $0x30] sm:$0xff pattern:$0x73625140] }
 0x414   : > { %4721 = vmatmul.f32.vlgmr.msra.gmra.mxu1 %v2015_v11  ;;  %4761 = vmatmul.f32.vlgmr.msra.gmra.mxu3 %v2017_v14  ;;  %v1755_v10 = vld [vmem:[%s6450_s10 + $0x2d28] sm:$0xff]  ;;  %v1757_v11 = vld [vmem:[%s6450_s10 + $0x2d38] sm:$0xff] }
 0x415   : > { %v2019_v14 = vld.sshfl [vmem:[#allocation1 + $0x28] sm:$0xff pattern:$0x73625140] }
 0x416   : > { %4774 = vmatpush.xpose.msrb.mxu0 %v1562_v19  ;;  %4814 = vmatpush.xpose.msrb.mxu2 %v1564_v22  ;;  %v2021_v19 = vld.sshfl [vmem:[#allocation1 + $0x38] sm:$0xff pattern:$0x73625140]  ;;  %v7580_v22 = vpop.f32.mrf.mxu0 }
 0x417   : > { %4794 = vmatpush.xpose.msrb.mxu1 %v1563_v29  ;;  %4834 = vmatpush.xpose.msrb.mxu3 %v1565_v30  ;;  %v7582_v29 = vpop.f32.mrf.mxu2  ;;  %v1566_v30 = vld [vmem:[%s6450_s10 + $0x2740] sm:$0xff] }
 0x41a   : > { %4775 = vmatpush.xpose.msrb.mxu0 %v1374_v33  ;;  %4815 = vmatpush.xpose.msrb.mxu2 %v1376_v34  ;;  %v1568_v33 = vld [vmem:[%s6450_s10 + $0x2750] sm:$0xff]  ;;  %v7586_v34 = vpop.f32.mrf.mxu1 }
 0x41b   : > { %4795 = vmatpush.xpose.msrb.mxu1 %v1375_v37  ;;  %4835 = vmatpush.xpose.msrb.mxu3 %v1377_v38  ;;  %v7588_v37 = vpop.f32.mrf.mxu3  ;;  %v1567_v38 = vld [vmem:[%s6450_s10 + $0x2748] sm:$0xff] }
 0x41e   : > { %4776 = vmatpush.xpose.msrb.mxu0 %v1186_v41  ;;  %4816 = vmatpush.xpose.msrb.mxu2 %v1188_v44  ;;  %v1569_v41 = vld [vmem:[%s6450_s10 + $0x2758] sm:$0xff]  ;;  %v1378_v44 = vld [vmem:[%s6450_s10 + $0x2160] sm:$0xff] }
 0x41f   : > { %4796 = vmatpush.xpose.msrb.mxu1 %v1187_v45  ;;  %4836 = vmatpush.xpose.msrb.mxu3 %v1189_v48  ;;  %v1380_v45 = vld [vmem:[%s6450_s10 + $0x2170] sm:$0xff]  ;;  %v1379_v48 = vld [vmem:[%s6450_s10 + $0x2168] sm:$0xff] }
 0x422   : > { %4777 = vmatpush.xpose.msrb.mxu0 %v998_v49  ;;  %4817 = vmatpush.xpose.msrb.mxu2 %v1000_v50  ;;  %v1381_v49 = vld [vmem:[%s6450_s10 + $0x2178] sm:$0xff]  ;;  %v1190_v50 = vld [vmem:[%s6450_s10 + $0x1b80] sm:$0xff] }
 0x423   : > { %4797 = vmatpush.xpose.msrb.mxu1 %v999_v51  ;;  %4837 = vmatpush.xpose.msrb.mxu3 %v1001_v52  ;;  %v1192_v51 = vld [vmem:[%s6450_s10 + $0x1b90] sm:$0xff]  ;;  %v1191_v52 = vld [vmem:[%s6450_s10 + $0x1b88] sm:$0xff] }
 0x426   : > { %4778 = vmatpush.xpose.msrb.mxu0 %v810_v53  ;;  %4818 = vmatpush.xpose.msrb.mxu2 %v812_v54  ;;  %v1193_v53 = vld [vmem:[%s6450_s10 + $0x1b98] sm:$0xff]  ;;  %v1002_v54 = vld [vmem:[%s6450_s10 + $0x15a0] sm:$0xff] }
 0x427   : > { %4798 = vmatpush.xpose.msrb.mxu1 %v811_v55  ;;  %4838 = vmatpush.xpose.msrb.mxu3 %v813_v56  ;;  %v1004_v55 = vld [vmem:[%s6450_s10 + $0x15b0] sm:$0xff]  ;;  %v1003_v56 = vld [vmem:[%s6450_s10 + $0x15a8] sm:$0xff] }
 0x42a   : > { %4779 = vmatpush.xpose.msrb.mxu0 %v622_v60  ;;  %4819 = vmatpush.xpose.msrb.mxu2 %v624_v63  ;;  %v814_v60 = vld [vmem:[%s6450_s10 + $0xfc0] sm:$0xff]  ;;  %v816_v63 = vld [vmem:[%s6450_s10 + $0xfd0] sm:$0xff] }
 0x42b   : > { %4799 = vmatpush.xpose.msrb.mxu1 %v623_v0  ;;  %4839 = vmatpush.xpose.msrb.mxu3 %v625_v1  ;;  %v815_v0 = vld [vmem:[%s6450_s10 + $0xfc8] sm:$0xff]  ;;  %v817_v1 = vld [vmem:[%s6450_s10 + $0xfd8] sm:$0xff] }
 0x42e   : > { %4780 = vmatpush.xpose.msrb.mxu0 %v434_v2  ;;  %4820 = vmatpush.xpose.msrb.mxu2 %v436_v3  ;;  %v296_v2 = vld [vmem:[%s6460_s12 + $0x108] sm:$0xff] }
 0x42f   : > { %4800 = vmatpush.xpose.msrb.mxu1 %v435_v6  ;;  %4840 = vmatpush.xpose.msrb.mxu3 %v437_v7  ;;  %v626_v3 = vld [vmem:[%s6450_s10 + $0x9e0] sm:$0xff]  ;;  %2023 = vst [vmem:[#allocation1 + $0x20] ss:$4 sm:$0xff] %v296_v2  ;;  %v627_v6 = vld [vmem:[%s6450_s10 + $0x9e8] sm:$0xff]  ;;  %v629_v7 = vld [vmem:[%s6450_s10 + $0x9f8] sm:$0xff] }
 0x430   : > { %v1197_v2 = vld [vmem:[%s6450_s10 + $0x1bb8] sm:$0xff] }
 0x431   : > { %4781 = vmatmul.f32.vlgmr.msrb.gmra.mxu0 %v2018_v8  ;;  %4821 = vmatmul.f32.vlgmr.msrb.gmra.mxu2 %v2020_v9  ;;  %v438_v8 = vld [vmem:[%s6450_s10 + $0x400] sm:$0xff]  ;;  %v440_v9 = vld [vmem:[%s6450_s10 + $0x410] sm:$0xff] }
 0x432   : > { %4853 = vmatpush.xpose.msra.mxu0 %v1754_v4  ;;  %4893 = vmatpush.xpose.msra.mxu2 %v1756_v5  ;;  %v628_v4 = vld [vmem:[%s6450_s10 + $0x9f0] sm:$0xff]  ;;  %v2323_v5 = vadd.f32 %v7299_v39, %v7293_v35  ;;  %v2026_v39 = vld.sshfl [vmem:[#allocation1 + $0x10] sm:$0xff pattern:$0x73625140] }
 0x433   : > { %4873 = vmatpush.xpose.msra.mxu1 %v1755_v10  ;;  %4913 = vmatpush.xpose.msra.mxu3 %v1757_v11  ;;  %v1758_v10 = vld [vmem:[%s6450_s10 + $0x2d40] sm:$0xff]  ;;  %v1760_v11 = vld [vmem:[%s6450_s10 + $0x2d50] sm:$0xff] }
 0x434   : > { %4801 = vmatmul.f32.vlgmr.msrb.gmra.mxu1 %v2019_v14  ;;  %4841 = vmatmul.f32.vlgmr.msrb.gmra.mxu3 %v2021_v19  ;;  %v2343_v14 = vadd.f32 %v7295_v36, %v2323_v5  ;;  %v439_v19 = vld [vmem:[%s6450_s10 + $0x408] sm:$0xff]  ;;  %v2024_v35 = vld.sshfl [vmem:[#allocation1] sm:$0xff pattern:$0x73625140] }
 0x435   : > { %v1008_v5 = vld [vmem:[%s6450_s10 + $0x15d0] sm:$0xff] }
 0x436   : > { %4854 = vmatpush.xpose.msra.mxu0 %v1566_v30  ;;  %4894 = vmatpush.xpose.msra.mxu2 %v1568_v33  ;;  %v441_v30 = vld [vmem:[%s6450_s10 + $0x418] sm:$0xff]  ;;  %v1759_v33 = vld [vmem:[%s6450_s10 + $0x2d48] sm:$0xff]  ;;  %v2363_v36 = vadd.f32 %v7301_v40, %v2343_v14 }
 0x437   : > { %4874 = vmatpush.xpose.msra.mxu1 %v1567_v38  ;;  %4914 = vmatpush.xpose.msra.mxu3 %v1569_v41  ;;  %v1761_v38 = vld [vmem:[%s6450_s10 + $0x2d58] sm:$0xff]  ;;  %v1571_v40 = vld [vmem:[%s6450_s10 + $0x2768] sm:$0xff] }
 0x438   : > { %v2025_v41 = vld.sshfl [vmem:[#allocation1 + $0x8] sm:$0xff pattern:$0x73625140]  ;;  %v297_v14 = vld [vmem:[%s6460_s12 + $0x110] sm:$0xff] }
 0x43a   : > { %4855 = vmatpush.xpose.msra.mxu0 %v1378_v44  ;;  %4895 = vmatpush.xpose.msra.mxu2 %v1380_v45  ;;  %v2027_v44 = vld.sshfl [vmem:[#allocation1 + $0x18] sm:$0xff pattern:$0x73625140]  ;;  %v7625_v45 = vpop.f32.mrf.mxu0 }
 0x43b   : > { %4875 = vmatpush.xpose.msra.mxu1 %v1379_v48  ;;  %4915 = vmatpush.xpose.msra.mxu3 %v1381_v49  ;;  %v7627_v48 = vpop.f32.mrf.mxu2  ;;  %v1570_v49 = vld [vmem:[%s6450_s10 + $0x2760] sm:$0xff]  ;;  %2032 = vst [vmem:[#allocation1] ss:$4 sm:$0xff] %v297_v14  ;;  %v1011_v14 = vld [vmem:[%s6450_s10 + $0x15e8] sm:$0xff] }
 0x43e   : > { %4856 = vmatpush.xpose.msra.mxu0 %v1190_v50  ;;  %4896 = vmatpush.xpose.msra.mxu2 %v1192_v51  ;;  %v1572_v50 = vld [vmem:[%s6450_s10 + $0x2770] sm:$0xff]  ;;  %v7631_v51 = vpop.f32.mrf.mxu1 }
 0x43f   : > { %4876 = vmatpush.xpose.msra.mxu1 %v1191_v52  ;;  %4916 = vmatpush.xpose.msra.mxu3 %v1193_v53  ;;  %v7633_v52 = vpop.f32.mrf.mxu3  ;;  %v1573_v53 = vld [vmem:[%s6450_s10 + $0x2778] sm:$0xff] }
 0x442   : > { %4857 = vmatpush.xpose.msra.mxu0 %v1002_v54  ;;  %4897 = vmatpush.xpose.msra.mxu2 %v1004_v55  ;;  %v2383_v54 = vadd.f32 %v7334_v12, %v2363_v36  ;;  %v1382_v55 = vld [vmem:[%s6450_s10 + $0x2180] sm:$0xff]  ;;  %v1195_v12 = vld [vmem:[%s6450_s10 + $0x1ba8] sm:$0xff] }
 0x443   : > { %4877 = vmatpush.xpose.msra.mxu1 %v1003_v56  ;;  %4917 = vmatpush.xpose.msra.mxu3 %v1005_v59  ;;  %v1384_v56 = vld [vmem:[%s6450_s10 + $0x2190] sm:$0xff]  ;;  %v1383_v59 = vld [vmem:[%s6450_s10 + $0x2188] sm:$0xff] }
 0x444   : > { %v443_v36 = vld [vmem:[%s6450_s10 + $0x428] sm:$0xff] }
 0x446   : > { %4858 = vmatpush.xpose.msra.mxu0 %v814_v60  ;;  %4898 = vmatpush.xpose.msra.mxu2 %v816_v63  ;;  %v1385_v60 = vld [vmem:[%s6450_s10 + $0x2198] sm:$0xff]  ;;  %v2403_v63 = vadd.f32 %v7340_v16, %v2383_v54  ;;  %v1007_v16 = vld [vmem:[%s6450_s10 + $0x15c8] sm:$0xff] }
 0x447   : > { %4878 = vmatpush.xpose.msra.mxu1 %v815_v0  ;;  %4918 = vmatpush.xpose.msra.mxu3 %v817_v1  ;;  %v1194_v0 = vld [vmem:[%s6450_s10 + $0x1ba0] sm:$0xff]  ;;  %v1196_v1 = vld [vmem:[%s6450_s10 + $0x1bb0] sm:$0xff] }
 0x448   : > { %v2029_v54 = vld.sshfl [vmem:[#allocation1 + $0x28] sm:$0xff pattern:$0x73625140] }
 0x44a   : > { %4859 = vmatpush.xpose.msra.mxu0 %v626_v3  ;;  %4899 = vmatpush.xpose.msra.mxu2 %v628_v4  ;;  %v2423_v3 = vadd.f32 %v7336_v13, %v2403_v63  ;;  %v1006_v4 = vld [vmem:[%s6450_s10 + $0x15c0] sm:$0xff]  ;;  %v1576_v63 = vld [vmem:[%s6450_s10 + $0x2790] sm:$0xff] }
 0x44b   : > { %4879 = vmatpush.xpose.msra.mxu1 %v627_v6  ;;  %4919 = vmatpush.xpose.msra.mxu3 %v629_v7  ;;  %v1009_v6 = vld [vmem:[%s6450_s10 + $0x15d8] sm:$0xff] }
 0x44c   : > { %v2443_v7 = vadd.f32 %v7342_v17, %v2423_v3  ;;  %v1386_v3 = vld [vmem:[%s6450_s10 + $0x21a0] sm:$0xff] }
 0x44e   : > { %4860 = vmatpush.xpose.msra.mxu0 %v438_v8  ;;  %4900 = vmatpush.xpose.msra.mxu2 %v440_v9  ;;  %v818_v8 = vld [vmem:[%s6450_s10 + $0xfe0] sm:$0xff]  ;;  %v820_v9 = vld [vmem:[%s6450_s10 + $0xff0] sm:$0xff]  ;;  %v2463_v13 = vadd.f32 %v7375_v57, %v2443_v7  ;;  %v633_v57 = vld [vmem:[%s6450_s10 + $0xa18] sm:$0xff] }
 0x44f   : > { %4880 = vmatpush.xpose.msra.mxu1 %v439_v19  ;;  %4920 = vmatpush.xpose.msra.mxu3 %v441_v30  ;;  %v630_v19 = vld [vmem:[%s6450_s10 + $0xa00] sm:$0xff]  ;;  %v632_v30 = vld [vmem:[%s6450_s10 + $0xa10] sm:$0xff] }
 0x450   : > { %v2483_v17 = vadd.f32 %v7381_v61, %v2463_v13  ;;  %v2030_v61 = vld.sshfl [vmem:[#allocation1 + $0x30] sm:$0xff pattern:$0x73625140]  ;;  %v1201_v13 = vld [vmem:[%s6450_s10 + $0x1bd8] sm:$0xff] }
 0x451   : > { %4861 = vmatmul.f32.vlgmr.msra.gmra.mxu0 %v2024_v35  ;;  %4901 = vmatmul.f32.vlgmr.msra.gmra.mxu2 %v2026_v39  ;;  %v631_v35 = vld [vmem:[%s6450_s10 + $0xa08] sm:$0xff]  ;;  %v1198_v7 = vld [vmem:[%s6450_s10 + $0x1bc0] sm:$0xff] }
 0x452   : > { %4933 = vmatpush.xpose.msrb.mxu0 %v1758_v10  ;;  %4973 = vmatpush.xpose.msrb.mxu2 %v1760_v11  ;;  %v819_v10 = vld [vmem:[%s6450_s10 + $0xfe8] sm:$0xff]  ;;  %v821_v11 = vld [vmem:[%s6450_s10 + $0xff8] sm:$0xff]  ;;  %v2503_v39 = vadd.f32 %v7377_v58, %v2483_v17  ;;  %v824_v17 = vld [vmem:[%s6450_s10 + $0x1010] sm:$0xff] }
 0x453   : > { %4953 = vmatpush.xpose.msrb.mxu1 %v1759_v33  ;;  %4993 = vmatpush.xpose.msrb.mxu3 %v1761_v38  ;;  %v442_v33 = vld [vmem:[%s6450_s10 + $0x420] sm:$0xff]  ;;  %v444_v38 = vld [vmem:[%s6450_s10 + $0x430] sm:$0xff]  ;;  %v1763_v58 = vld [vmem:[%s6450_s10 + $0x2d68] sm:$0xff] }
 0x454   : > { %4881 = vmatmul.f32.vlgmr.msra.gmra.mxu1 %v2025_v41  ;;  %4921 = vmatmul.f32.vlgmr.msra.gmra.mxu3 %v2027_v44  ;;  %v1762_v41 = vld [vmem:[%s6450_s10 + $0x2d60] sm:$0xff]  ;;  %v1764_v44 = vld [vmem:[%s6450_s10 + $0x2d70] sm:$0xff] }
 0x456   : > { %4934 = vmatpush.xpose.msrb.mxu0 %v1570_v49  ;;  %4974 = vmatpush.xpose.msrb.mxu2 %v1572_v50  ;;  %v445_v49 = vld [vmem:[%s6450_s10 + $0x438] sm:$0xff] }
 0x457   : > { %4954 = vmatpush.xpose.msrb.mxu1 %v1571_v40  ;;  %4994 = vmatpush.xpose.msrb.mxu3 %v1573_v53  ;;  %v2028_v50 = vld.sshfl [vmem:[#allocation1 + $0x20] sm:$0xff pattern:$0x73625140]  ;;  %v2523_v40 = vadd.f32 %v7383_v62, %v2503_v39  ;;  %v1574_v62 = vld [vmem:[%s6450_s10 + $0x2780] sm:$0xff]  ;;  %v298_v39 = vld [vmem:[%s6460_s12 + $0x118] sm:$0xff] }
 0x458   : > { %v1765_v53 = vld [vmem:[%s6450_s10 + $0x2d78] sm:$0xff] }
 0x45a   : > { %4935 = vmatpush.xpose.msrb.mxu0 %v1382_v55  ;;  %4975 = vmatpush.xpose.msrb.mxu2 %v1384_v56  ;;  %v2031_v55 = vld.sshfl [vmem:[#allocation1 + $0x38] sm:$0xff pattern:$0x73625140]  ;;  %v2543_v56 = vadd.f32 %v7416_v42, %v2523_v40 }
 0x45b   : > { %4955 = vmatpush.xpose.msrb.mxu1 %v1383_v59  ;;  %4995 = vmatpush.xpose.msrb.mxu3 %v1385_v60  ;;  %v7675_v59 = vpop.f32.mrf.mxu0  ;;  %v7677_v60 = vpop.f32.mrf.mxu2  ;;  %v1575_v42 = vld [vmem:[%s6450_s10 + $0x2788] sm:$0xff]  ;;  %2033 = vst [vmem:[#allocation1 + $0x20] ss:$4 sm:$0xff] %v298_v39  ;;  %v299_v39 = vld [vmem:[%s6460_s12 + $0x120] sm:$0xff] }
 0x45c   : > { %v447_v40 = vld [vmem:[%s6450_s10 + $0x448] sm:$0xff] }
 0x45e   : > { %4936 = vmatpush.xpose.msrb.mxu0 %v1194_v0  ;;  %4976 = vmatpush.xpose.msrb.mxu2 %v1196_v1  ;;  %v7681_v0 = vpop.f32.mrf.mxu1  ;;  %v7683_v1 = vpop.f32.mrf.mxu3 }
 0x45f   : > { %4956 = vmatpush.xpose.msrb.mxu1 %v1195_v12  ;;  %4996 = vmatpush.xpose.msrb.mxu3 %v1197_v2  ;;  %v1577_v12 = vld [vmem:[%s6450_s10 + $0x2798] sm:$0xff]  ;;  %v2563_v2 = vadd.f32 %v7422_v46, %v2543_v56 }
 0x460   : > { %v2035_v56 = vld.sshfl [vmem:[#allocation1 + $0x8] sm:$0xff pattern:$0x73625140] }
 0x462   : > { %4937 = vmatpush.xpose.msrb.mxu0 %v1006_v4  ;;  %4977 = vmatpush.xpose.msrb.mxu2 %v1008_v5  ;;  %v1388_v4 = vld [vmem:[%s6450_s10 + $0x21b0] sm:$0xff]  ;;  %v2583_v5 = vadd.f32 %v7418_v43, %v2563_v2 }
 0x463   : > { %4957 = vmatpush.xpose.msrb.mxu1 %v1007_v16  ;;  %4997 = vmatpush.xpose.msrb.mxu3 %v1009_v6  ;;  %v1387_v16 = vld [vmem:[%s6450_s10 + $0x21a8] sm:$0xff]  ;;  %v1389_v6 = vld [vmem:[%s6450_s10 + $0x21b8] sm:$0xff]  ;;  %v1580_v2 = vld [vmem:[%s6450_s10 + $0x27b0] sm:$0xff] }
 0x464   : > { %v2603_v46 = vadd.f32 %v7424_v47, %v2583_v5  ;;  %v1581_v5 = vld [vmem:[%s6450_s10 + $0x27b8] sm:$0xff] }
 0x466   : > { %4938 = vmatpush.xpose.msrb.mxu0 %v818_v8  ;;  %4978 = vmatpush.xpose.msrb.mxu2 %v820_v9  ;;  %v1200_v8 = vld [vmem:[%s6450_s10 + $0x1bd0] sm:$0xff]  ;;  %v1199_v9 = vld [vmem:[%s6450_s10 + $0x1bc8] sm:$0xff]  ;;  %v2623_v43 = vadd.f32 %v7457_v27, %v2603_v46 }
 0x467   : > { %4958 = vmatpush.xpose.msrb.mxu1 %v819_v10  ;;  %4998 = vmatpush.xpose.msrb.mxu3 %v821_v11  ;;  %v1010_v10 = vld [vmem:[%s6450_s10 + $0x15e0] sm:$0xff]  ;;  %v1012_v11 = vld [vmem:[%s6450_s10 + $0x15f0] sm:$0xff]  ;;  %v1391_v46 = vld [vmem:[%s6450_s10 + $0x21c8] sm:$0xff] }
 0x468   : > { %v2643_v47 = vadd.f32 %v7463_v31, %v2623_v43  ;;  %v1204_v43 = vld [vmem:[%s6450_s10 + $0x1bf0] sm:$0xff] }
 0x46a   : > { %4939 = vmatpush.xpose.msrb.mxu0 %v630_v19  ;;  %4979 = vmatpush.xpose.msrb.mxu2 %v632_v30  ;;  %v1013_v19 = vld [vmem:[%s6450_s10 + $0x15f8] sm:$0xff]  ;;  %v822_v30 = vld [vmem:[%s6450_s10 + $0x1000] sm:$0xff]  ;;  %v2663_v27 = vadd.f32 %v7459_v28, %v2643_v47  ;;  %v1015_v47 = vld [vmem:[%s6450_s10 + $0x1608] sm:$0xff] }
 0x46b   : > { %4959 = vmatpush.xpose.msrb.mxu1 %v631_v35  ;;  %4999 = vmatpush.xpose.msrb.mxu3 %v633_v57  ;;  %v823_v35 = vld [vmem:[%s6450_s10 + $0x1008] sm:$0xff]  ;;  %v825_v57 = vld [vmem:[%s6450_s10 + $0x1018] sm:$0xff] }
 0x46c   : > { %v2683_v31 = vadd.f32 %v7465_v32, %v2663_v27  ;;  %v637_v28 = vld [vmem:[%s6450_s10 + $0xa38] sm:$0xff]  ;;  %v2036_v32 = vld.sshfl [vmem:[#allocation1 + $0x10] sm:$0xff pattern:$0x73625140]  ;;  %v828_v27 = vld [vmem:[%s6450_s10 + $0x1030] sm:$0xff] }
 0x46e   : > { %4940 = vmatpush.xpose.msrb.mxu0 %v442_v33  ;;  %4980 = vmatpush.xpose.msrb.mxu2 %v444_v38  ;;  %v634_v33 = vld [vmem:[%s6450_s10 + $0xa20] sm:$0xff]  ;;  %v636_v38 = vld [vmem:[%s6450_s10 + $0xa30] sm:$0xff] }
 0x46f   : > { %4960 = vmatpush.xpose.msrb.mxu1 %v443_v36  ;;  %5000 = vmatpush.xpose.msrb.mxu3 %v445_v49  ;;  %v446_v36 = vld [vmem:[%s6450_s10 + $0x440] sm:$0xff]  ;;  %v448_v49 = vld [vmem:[%s6450_s10 + $0x450] sm:$0xff] }
 0x471   : > { %4941 = vmatmul.f32.vlgmr.msrb.gmra.mxu0 %v2028_v50  ;;  %4981 = vmatmul.f32.vlgmr.msrb.gmra.mxu2 %v2030_v61  ;;  %v1766_v50 = vld [vmem:[%s6450_s10 + $0x2d80] sm:$0xff]  ;;  %v1768_v61 = vld [vmem:[%s6450_s10 + $0x2d90] sm:$0xff] }
 0x472   : > { %5013 = vmatpush.xpose.msra.mxu0 %v1762_v41  ;;  %5053 = vmatpush.xpose.msra.mxu2 %v1764_v44  ;;  %v635_v41 = vld [vmem:[%s6450_s10 + $0xa28] sm:$0xff]  ;;  %v2703_v44 = vadd.f32 %v7498_v20, %v2683_v31 }
 0x473   : > { %5033 = vmatpush.xpose.msra.mxu1 %v1763_v58  ;;  %5073 = vmatpush.xpose.msra.mxu3 %v1765_v53  ;;  %v449_v58 = vld [vmem:[%s6450_s10 + $0x458] sm:$0xff]  ;;  %v1767_v20 = vld [vmem:[%s6450_s10 + $0x2d88] sm:$0xff] }
 0x474   : > { %4961 = vmatmul.f32.vlgmr.msrb.gmra.mxu1 %v2029_v54  ;;  %5001 = vmatmul.f32.vlgmr.msrb.gmra.mxu3 %v2031_v55  ;;  %v2034_v53 = vld.sshfl [vmem:[#allocation1] sm:$0xff pattern:$0x73625140]  ;;  %v2723_v54 = vadd.f32 %v7504_v24, %v2703_v44  ;;  %v1578_v24 = vld [vmem:[%s6450_s10 + $0x27a0] sm:$0xff]  ;;  %v639_v31 = vld [vmem:[%s6450_s10 + $0xa48] sm:$0xff] }
 0x475   : > { %v1769_v55 = vld [vmem:[%s6450_s10 + $0x2d98] sm:$0xff]  ;;  %v452_v44 = vld [vmem:[%s6450_s10 + $0x470] sm:$0xff] }
 0x476   : > { %5014 = vmatpush.xpose.msra.mxu0 %v1574_v62  ;;  %5054 = vmatpush.xpose.msra.mxu2 %v1576_v63  ;;  %v2037_v62 = vld.sshfl [vmem:[#allocation1 + $0x18] sm:$0xff pattern:$0x73625140]  ;;  %v2743_v63 = vadd.f32 %v7500_v21, %v2723_v54 }
 0x477   : > { %5034 = vmatpush.xpose.msra.mxu1 %v1575_v42  ;;  %5074 = vmatpush.xpose.msra.mxu3 %v1577_v12  ;;  %v7726_v42 = vpop.f32.mrf.mxu0  ;;  %v7728_v12 = vpop.f32.mrf.mxu2  ;;  %v1579_v21 = vld [vmem:[%s6450_s10 + $0x27a8] sm:$0xff]  ;;  %2042 = vst [vmem:[#allocation1] ss:$4 sm:$0xff] %v299_v39  ;;  %v456_v39 = vld [vmem:[%s6450_s10 + $0x490] sm:$0xff] }
 0x478   : > { %v2041_v54 = vld.sshfl [vmem:[#allocation1 + $0x38] sm:$0xff pattern:$0x73625140] }
 0x47a   : > { %5015 = vmatpush.xpose.msra.mxu0 %v1386_v3  ;;  %5055 = vmatpush.xpose.msra.mxu2 %v1388_v4  ;;  %v7732_v3 = vpop.f32.mrf.mxu1  ;;  %v7734_v4 = vpop.f32.mrf.mxu3 }
 0x47b   : > { %5035 = vmatpush.xpose.msra.mxu1 %v1387_v16  ;;  %5075 = vmatpush.xpose.msra.mxu3 %v1389_v6  ;;  %v2763_v16 = vadd.f32 %v7506_v25, %v2743_v63  ;;  %v1390_v6 = vld [vmem:[%s6450_s10 + $0x21c0] sm:$0xff] }
 0x47e   : > { %5016 = vmatpush.xpose.msra.mxu0 %v1198_v7  ;;  %5056 = vmatpush.xpose.msra.mxu2 %v1200_v8  ;;  %v1392_v7 = vld [vmem:[%s6450_s10 + $0x21d0] sm:$0xff]  ;;  %v2783_v8 = vadd.f32 %v7539_v15, %v2763_v16 }
 0x47f   : > { %5036 = vmatpush.xpose.msra.mxu1 %v1199_v9  ;;  %5076 = vmatpush.xpose.msra.mxu3 %v1201_v13  ;;  %v1393_v9 = vld [vmem:[%s6450_s10 + $0x21d8] sm:$0xff]  ;;  %v1202_v13 = vld [vmem:[%s6450_s10 + $0x1be0] sm:$0xff]  ;;  %v1396_v16 = vld [vmem:[%s6450_s10 + $0x21f0] sm:$0xff] }
 0x480   : > { %v2803_v25 = vadd.f32 %v7545_v23, %v2783_v8  ;;  %v1397_v8 = vld [vmem:[%s6450_s10 + $0x21f8] sm:$0xff] }
 0x482   : > { %5017 = vmatpush.xpose.msra.mxu0 %v1010_v10  ;;  %5057 = vmatpush.xpose.msra.mxu2 %v1012_v11  ;;  %v1203_v10 = vld [vmem:[%s6450_s10 + $0x1be8] sm:$0xff]  ;;  %v1205_v11 = vld [vmem:[%s6450_s10 + $0x1bf8] sm:$0xff]  ;;  %v2823_v15 = vadd.f32 %v7541_v18, %v2803_v25  ;;  %v7783_v63 = vpop.f32.mrf.mxu1  ;;  %v1018_v25 = vld [vmem:[%s6450_s10 + $0x1620] sm:$0xff] }
 0x483   : > { %5037 = vmatpush.xpose.msra.mxu1 %v1011_v14  ;;  %5077 = vmatpush.xpose.msra.mxu3 %v1013_v19  ;;  %v1014_v14 = vld [vmem:[%s6450_s10 + $0x1600] sm:$0xff]  ;;  %v1016_v19 = vld [vmem:[%s6450_s10 + $0x1610] sm:$0xff] }
 0x484   : > { %v2843_v23 = vadd.f32 %v7547_v26, %v2823_v15  ;;  %v1021_v15 = vld [vmem:[%s6450_s10 + $0x1638] sm:$0xff] }
 0x486   : > { %5018 = vmatpush.xpose.msra.mxu0 %v822_v30  ;;  %5058 = vmatpush.xpose.msra.mxu2 %v824_v17  ;;  %v1017_v30 = vld [vmem:[%s6450_s10 + $0x1618] sm:$0xff]  ;;  %v826_v17 = vld [vmem:[%s6450_s10 + $0x1020] sm:$0xff]  ;;  %v2863_v18 = vadd.f32 %v7580_v22, %v2843_v23 }
 0x487   : > { %5038 = vmatpush.xpose.msra.mxu1 %v823_v35  ;;  %5078 = vmatpush.xpose.msra.mxu3 %v825_v57  ;;  %v827_v35 = vld [vmem:[%s6450_s10 + $0x1028] sm:$0xff]  ;;  %v829_v57 = vld [vmem:[%s6450_s10 + $0x1038] sm:$0xff] }
 0x488   : > { %v2883_v26 = vadd.f32 %v7586_v34, %v2863_v18  ;;  %v641_v22 = vld [vmem:[%s6450_s10 + $0xa58] sm:$0xff]  ;;  %v2040_v34 = vld.sshfl [vmem:[#allocation1 + $0x30] sm:$0xff pattern:$0x73625140] }
 0x489   : > { %v300_v23 = vld [vmem:[%s6460_s12 + $0x128] sm:$0xff]  ;;  %v643_v18 = vld [vmem:[%s6450_s10 + $0xa68] sm:$0xff] }
 0x48a   : > { %5019 = vmatpush.xpose.msra.mxu0 %v634_v33  ;;  %5059 = vmatpush.xpose.msra.mxu2 %v636_v38  ;;  %v638_v33 = vld [vmem:[%s6450_s10 + $0xa40] sm:$0xff]  ;;  %v640_v38 = vld [vmem:[%s6450_s10 + $0xa50] sm:$0xff] }
 0x48b   : > { %5039 = vmatpush.xpose.msra.mxu1 %v635_v41  ;;  %5079 = vmatpush.xpose.msra.mxu3 %v637_v28  ;;  %v2903_v41 = vadd.f32 %v7582_v29, %v2883_v26  ;;  %v450_v28 = vld [vmem:[%s6450_s10 + $0x460] sm:$0xff]  ;;  %v1771_v29 = vld [vmem:[%s6450_s10 + $0x2da8] sm:$0xff] }
 0x48c   : > { %v455_v26 = vld [vmem:[%s6450_s10 + $0x488] sm:$0xff] }
 0x48e   : > { %5020 = vmatpush.xpose.msra.mxu0 %v446_v36  ;;  %5060 = vmatpush.xpose.msra.mxu2 %v448_v49  ;;  %v1770_v36 = vld [vmem:[%s6450_s10 + $0x2da0] sm:$0xff]  ;;  %v1772_v49 = vld [vmem:[%s6450_s10 + $0x2db0] sm:$0xff] }
 0x48f   : > { %5040 = vmatpush.xpose.msra.mxu1 %v447_v40  ;;  %5080 = vmatpush.xpose.msra.mxu3 %v449_v58  ;;  %v2038_v40 = vld.sshfl [vmem:[#allocation1 + $0x20] sm:$0xff pattern:$0x73625140]  ;;  %v2923_v58 = vadd.f32 %v7588_v37, %v2903_v41  ;;  %v1582_v37 = vld [vmem:[%s6450_s10 + $0x27c0] sm:$0xff] }
 0x491   : > { %5021 = vmatmul.f32.vlgmr.msra.gmra.mxu0 %v2034_v53  ;;  %5061 = vmatmul.f32.vlgmr.msra.gmra.mxu2 %v2036_v32  ;;  %v1773_v53 = vld [vmem:[%s6450_s10 + $0x2db8] sm:$0xff] }
 0x492   : > { %5093 = vmatpush.xpose.msrb.mxu0 %v1766_v50  ;;  %5133 = vmatpush.xpose.msrb.mxu2 %v1768_v61  ;;  %v451_v50 = vld [vmem:[%s6450_s10 + $0x468] sm:$0xff]  ;;  %v453_v61 = vld [vmem:[%s6450_s10 + $0x478] sm:$0xff] }
 0x493   : > { %5113 = vmatpush.xpose.msrb.mxu1 %v1767_v20  ;;  %5153 = vmatpush.xpose.msrb.mxu3 %v1769_v55  ;;  %v2039_v32 = vld.sshfl [vmem:[#allocation1 + $0x28] sm:$0xff pattern:$0x73625140]  ;;  %v2943_v20 = vadd.f32 %v7625_v45, %v2923_v58  ;;  %v7777_v55 = vpop.f32.mrf.mxu0  ;;  %v1583_v45 = vld [vmem:[%s6450_s10 + $0x27c8] sm:$0xff] }
 0x494   : > { %5041 = vmatmul.f32.vlgmr.msra.gmra.mxu1 %v2035_v56  ;;  %5081 = vmatmul.f32.vlgmr.msra.gmra.mxu3 %v2037_v62  ;;  %v7779_v56 = vpop.f32.mrf.mxu2  ;;  %v1584_v62 = vld [vmem:[%s6450_s10 + $0x27d0] sm:$0xff]  ;;  %2043 = vst [vmem:[#allocation1 + $0x20] ss:$4 sm:$0xff] %v300_v23 }
 0x496   : > { %5094 = vmatpush.xpose.msrb.mxu0 %v1578_v24  ;;  %5134 = vmatpush.xpose.msrb.mxu2 %v1580_v2  ;;  %v7785_v24 = vpop.f32.mrf.mxu3  ;;  %v1585_v2 = vld [vmem:[%s6450_s10 + $0x27d8] sm:$0xff] }
 0x497   : > { %5114 = vmatpush.xpose.msrb.mxu1 %v1579_v21  ;;  %5154 = vmatpush.xpose.msrb.mxu3 %v1581_v5  ;;  %v2963_v21 = vadd.f32 %v7631_v51, %v2943_v20  ;;  %v1394_v5 = vld [vmem:[%s6450_s10 + $0x21e0] sm:$0xff] }
 0x49a   : > { %5095 = vmatpush.xpose.msrb.mxu0 %v1390_v6  ;;  %5135 = vmatpush.xpose.msrb.mxu2 %v1392_v7  ;;  %v2983_v6 = vadd.f32 %v7627_v48, %v2963_v21  ;;  %v1395_v7 = vld [vmem:[%s6450_s10 + $0x21e8] sm:$0xff] }
 0x49b   : > { %5115 = vmatpush.xpose.msrb.mxu1 %v1391_v46  ;;  %5155 = vmatpush.xpose.msrb.mxu3 %v1393_v9  ;;  %v1206_v46 = vld [vmem:[%s6450_s10 + $0x1c00] sm:$0xff]  ;;  %v1208_v9 = vld [vmem:[%s6450_s10 + $0x1c10] sm:$0xff]  ;;  %v1211_v21 = vld [vmem:[%s6450_s10 + $0x1c28] sm:$0xff] }
 0x49c   : > { %v3003_v51 = vadd.f32 %v7633_v52, %v2983_v6  ;;  %v1024_v6 = vld [vmem:[%s6450_s10 + $0x1650] sm:$0xff] }
 0x49e   : > { %5096 = vmatpush.xpose.msrb.mxu0 %v1202_v13  ;;  %5136 = vmatpush.xpose.msrb.mxu2 %v1204_v43  ;;  %v1207_v13 = vld [vmem:[%s6450_s10 + $0x1c08] sm:$0xff]  ;;  %v1209_v43 = vld [vmem:[%s6450_s10 + $0x1c18] sm:$0xff]  ;;  %v3023_v48 = vadd.f32 %v7675_v59, %v3003_v51  ;;  %v7832_v58 = vpop.f32.mrf.mxu3 }
 0x49f   : > { %5116 = vmatpush.xpose.msrb.mxu1 %v1203_v10  ;;  %5156 = vmatpush.xpose.msrb.mxu3 %v1205_v11  ;;  %v1020_v10 = vld [vmem:[%s6450_s10 + $0x1630] sm:$0xff]  ;;  %v1019_v11 = vld [vmem:[%s6450_s10 + $0x1628] sm:$0xff] }
 0x4a0   : > { %v3043_v52 = vadd.f32 %v7681_v0, %v3023_v48  ;;  %v835_v51 = vld [vmem:[%s6450_s10 + $0x1068] sm:$0xff]  ;;  %v646_v48 = vld [vmem:[%s6450_s10 + $0xa80] sm:$0xff] }
 0x4a2   : > { %5097 = vmatpush.xpose.msrb.mxu0 %v1014_v14  ;;  %5137 = vmatpush.xpose.msrb.mxu2 %v1016_v19  ;;  %v830_v14 = vld [vmem:[%s6450_s10 + $0x1040] sm:$0xff]  ;;  %v832_v19 = vld [vmem:[%s6450_s10 + $0x1050] sm:$0xff]  ;;  %v3063_v59 = vadd.f32 %v7677_v60, %v3043_v52  ;;  %v645_v60 = vld [vmem:[%s6450_s10 + $0xa78] sm:$0xff] }
 0x4a3   : > { %5117 = vmatpush.xpose.msrb.mxu1 %v1015_v47  ;;  %5157 = vmatpush.xpose.msrb.mxu3 %v1017_v30  ;;  %v831_v47 = vld [vmem:[%s6450_s10 + $0x1048] sm:$0xff]  ;;  %v833_v30 = vld [vmem:[%s6450_s10 + $0x1058] sm:$0xff]  ;;  %v458_v52 = vld [vmem:[%s6450_s10 + $0x4a0] sm:$0xff] }
 0x4a4   : > { %v3083_v0 = vadd.f32 %v7683_v1, %v3063_v59  ;;  %v2046_v1 = vld.sshfl [vmem:[#allocation1 + $0x10] sm:$0xff pattern:$0x73625140]  ;;  %v1780_v59 = vld [vmem:[%s6450_s10 + $0x2df0] sm:$0xff] }
 0x4a6   : > { %5098 = vmatpush.xpose.msrb.mxu0 %v826_v17  ;;  %5138 = vmatpush.xpose.msrb.mxu2 %v828_v27  ;;  %v642_v17 = vld [vmem:[%s6450_s10 + $0xa60] sm:$0xff]  ;;  %v644_v27 = vld [vmem:[%s6450_s10 + $0xa70] sm:$0xff] }
 0x4a7   : > { %5118 = vmatpush.xpose.msrb.mxu1 %v827_v35  ;;  %5158 = vmatpush.xpose.msrb.mxu3 %v829_v57  ;;  %v3103_v35 = vadd.f32 %v7726_v42, %v3083_v0  ;;  %v454_v57 = vld [vmem:[%s6450_s10 + $0x480] sm:$0xff]  ;;  %v1775_v42 = vld [vmem:[%s6450_s10 + $0x2dc8] sm:$0xff] }
 0x4a9   : > { %v3123_v41 = vadd.f32 %v7732_v3, %v3103_v35  ;;  %v1586_v3 = vld [vmem:[%s6450_s10 + $0x27e0] sm:$0xff] }
 0x4aa   : > { %5099 = vmatpush.xpose.msrb.mxu0 %v638_v33  ;;  %5139 = vmatpush.xpose.msrb.mxu2 %v640_v38  ;;  %v1774_v33 = vld [vmem:[%s6450_s10 + $0x2dc0] sm:$0xff]  ;;  %v1776_v38 = vld [vmem:[%s6450_s10 + $0x2dd0] sm:$0xff] }
 0x4ab   : > { %5119 = vmatpush.xpose.msrb.mxu1 %v639_v31  ;;  %5159 = vmatpush.xpose.msrb.mxu3 %v641_v22  ;;  %v457_v31 = vld [vmem:[%s6450_s10 + $0x498] sm:$0xff] }
 0x4ac   : > { %v2044_v22 = vld.sshfl [vmem:[#allocation1] sm:$0xff pattern:$0x73625140]  ;;  %v2049_v35 = vld.sshfl [vmem:[#allocation1 + $0x28] sm:$0xff pattern:$0x73625140] }
 0x4ae   : > { %5100 = vmatpush.xpose.msrb.mxu0 %v450_v28  ;;  %5140 = vmatpush.xpose.msrb.mxu2 %v452_v44  ;;  %v1777_v28 = vld [vmem:[%s6450_s10 + $0x2dd8] sm:$0xff] }
 0x4af   : > { %5120 = vmatpush.xpose.msrb.mxu1 %v451_v50  ;;  %5160 = vmatpush.xpose.msrb.mxu3 %v453_v61  ;;  %v2045_v44 = vld.sshfl [vmem:[#allocation1 + $0x8] sm:$0xff pattern:$0x73625140]  ;;  %v3262_v50 = vpop.f32.mrf.mxu0  ;;  %v7828_v61 = vpop.f32.mrf.mxu2 }
 0x4b1   : > { %5101 = vmatmul.f32.vlgmr.msrb.gmra.mxu0 %v2038_v40  ;;  %5141 = vmatmul.f32.vlgmr.msrb.gmra.mxu2 %v2040_v34  ;;  %v1588_v40 = vld [vmem:[%s6450_s10 + $0x27f0] sm:$0xff]  ;;  %v3282_v34 = vpop.f32.mrf.mxu1 }
 0x4b2   : > { %5173 = vmatpush.xpose.msra.mxu0 %v1770_v36  ;;  %5213 = vmatpush.xpose.msra.mxu2 %v1772_v49  ;;  %v2047_v36 = vld.sshfl [vmem:[#allocation1 + $0x18] sm:$0xff pattern:$0x73625140]  ;;  %v3143_v49 = vadd.f32 %v7728_v12, %v3123_v41  ;;  %v1593_v41 = vld [vmem:[%s6450_s10 + $0x2818] sm:$0xff] }
 0x4b3   : > { %5193 = vmatpush.xpose.msra.mxu1 %v1771_v29  ;;  %5233 = vmatpush.xpose.msra.mxu3 %v1773_v53  ;;  %v1587_v12 = vld [vmem:[%s6450_s10 + $0x27e8] sm:$0xff]  ;;  %v1589_v29 = vld [vmem:[%s6450_s10 + $0x27f8] sm:$0xff] }
 0x4b4   : > { %5121 = vmatmul.f32.vlgmr.msrb.gmra.mxu1 %v2039_v32  ;;  %5161 = vmatmul.f32.vlgmr.msrb.gmra.mxu3 %v2041_v54  ;;  %v3163_v53 = vadd.f32 %v7734_v4, %v3143_v49  ;;  %v1398_v32 = vld [vmem:[%s6450_s10 + $0x2200] sm:$0xff]  ;;  %v1400_v54 = vld [vmem:[%s6450_s10 + $0x2210] sm:$0xff]  ;;  %v1403_v49 = vld [vmem:[%s6450_s10 + $0x2228] sm:$0xff] }
 0x4b6   : > { %5174 = vmatpush.xpose.msra.mxu0 %v1582_v37  ;;  %5214 = vmatpush.xpose.msra.mxu2 %v1584_v62  ;;  %v3183_v20 = vadd.f32 %v7777_v55, %v3163_v53  ;;  %v1399_v37 = vld [vmem:[%s6450_s10 + $0x2208] sm:$0xff]  ;;  %v1401_v62 = vld [vmem:[%s6450_s10 + $0x2218] sm:$0xff]  ;;  %v1026_v53 = vld [vmem:[%s6450_s10 + $0x1660] sm:$0xff] }
 0x4b7   : > { %5194 = vmatpush.xpose.msra.mxu1 %v1583_v45  ;;  %5234 = vmatpush.xpose.msra.mxu3 %v1585_v2  ;;  %v1210_v45 = vld [vmem:[%s6450_s10 + $0x1c20] sm:$0xff]  ;;  %v1212_v2 = vld [vmem:[%s6450_s10 + $0x1c30] sm:$0xff]  ;;  %v3342_v23 = vpop.f32.mrf.mxu0 }
 0x4b8   : > { %v3203_v4 = vadd.f32 %v7783_v63, %v3183_v20  ;;  %v1027_v20 = vld [vmem:[%s6450_s10 + $0x1668] sm:$0xff] }
 0x4ba   : > { %5175 = vmatpush.xpose.msra.mxu0 %v1394_v5  ;;  %5215 = vmatpush.xpose.msra.mxu2 %v1396_v16  ;;  %v1213_v5 = vld [vmem:[%s6450_s10 + $0x1c38] sm:$0xff]  ;;  %v3223_v55 = vadd.f32 %v7779_v56, %v3203_v4  ;;  %v1022_v16 = vld [vmem:[%s6450_s10 + $0x1640] sm:$0xff]  ;;  %v840_v4 = vld [vmem:[%s6450_s10 + $0x1090] sm:$0xff] }
 0x4bb   : > { %5195 = vmatpush.xpose.msra.mxu1 %v1395_v7  ;;  %5235 = vmatpush.xpose.msra.mxu3 %v1397_v8  ;;  %v1023_v7 = vld [vmem:[%s6450_s10 + $0x1648] sm:$0xff]  ;;  %v1025_v8 = vld [vmem:[%s6450_s10 + $0x1658] sm:$0xff] }
 0x4bc   : > { %v3243_v63 = vadd.f32 %v7785_v24, %v3223_v55  ;;  %v841_v55 = vld [vmem:[%s6450_s10 + $0x1098] sm:$0xff] }
 0x4be   : > { %5176 = vmatpush.xpose.msra.mxu0 %v1206_v46  ;;  %5216 = vmatpush.xpose.msra.mxu2 %v1208_v9  ;;  %v834_v46 = vld [vmem:[%s6450_s10 + $0x1060] sm:$0xff]  ;;  %v836_v9 = vld [vmem:[%s6450_s10 + $0x1070] sm:$0xff]  ;;  %v3263_v56 = vadd.f32 %v3262_v50, %v3243_v63  ;;  %v1405_v50 = vld [vmem:[%s6450_s10 + $0x2238] sm:$0xff] }
 0x4bf   : > { %5196 = vmatpush.xpose.msra.mxu1 %v1207_v13  ;;  %5236 = vmatpush.xpose.msra.mxu3 %v1209_v43  ;;  %v837_v13 = vld [vmem:[%s6450_s10 + $0x1078] sm:$0xff]  ;;  %v301_v43 = vld [vmem:[%s6460_s12 + $0x130] sm:$0xff] }
 0x4c0   : > { %2052 = vst [vmem:[#allocation1] ss:$4 sm:$0xff] %v301_v43  ;;  %v3283_v24 = vadd.f32 %v3282_v34, %v3263_v56  ;;  %v653_v56 = vld [vmem:[%s6450_s10 + $0xab8] sm:$0xff]  ;;  %v464_v43 = vld [vmem:[%s6450_s10 + $0x4d0] sm:$0xff] }
 0x4c2   : > { %5177 = vmatpush.xpose.msra.mxu0 %v1018_v25  ;;  %5217 = vmatpush.xpose.msra.mxu2 %v1020_v10  ;;  %v648_v25 = vld [vmem:[%s6450_s10 + $0xa90] sm:$0xff]  ;;  %v647_v10 = vld [vmem:[%s6450_s10 + $0xa88] sm:$0xff] }
 0x4c3   : > { %5197 = vmatpush.xpose.msra.mxu1 %v1019_v11  ;;  %5237 = vmatpush.xpose.msra.mxu3 %v1021_v15  ;;  %v649_v11 = vld [vmem:[%s6450_s10 + $0xa98] sm:$0xff]  ;;  %v3303_v15 = vadd.f32 %v7828_v61, %v3283_v24  ;;  %v1214_v61 = vld [vmem:[%s6450_s10 + $0x1c40] sm:$0xff]  ;;  %v1784_v24 = vld [vmem:[%s6450_s10 + $0x2e10] sm:$0xff] }
 0x4c5   : > { %v3323_v0 = vadd.f32 %v7832_v58, %v3303_v15  ;;  %v1215_v58 = vld [vmem:[%s6450_s10 + $0x1c48] sm:$0xff] }
 0x4c6   : > { %5178 = vmatpush.xpose.msra.mxu0 %v830_v14  ;;  %5218 = vmatpush.xpose.msra.mxu2 %v832_v19  ;;  %v460_v14 = vld [vmem:[%s6450_s10 + $0x4b0] sm:$0xff]  ;;  %v1778_v19 = vld [vmem:[%s6450_s10 + $0x2de0] sm:$0xff] }
 0x4c7   : > { %5198 = vmatpush.xpose.msra.mxu1 %v831_v47  ;;  %5238 = vmatpush.xpose.msra.mxu3 %v833_v30  ;;  %v459_v47 = vld [vmem:[%s6450_s10 + $0x4a8] sm:$0xff]  ;;  %v461_v30 = vld [vmem:[%s6450_s10 + $0x4b8] sm:$0xff] }
 0x4ca   : > { %5179 = vmatpush.xpose.msra.mxu0 %v642_v17  ;;  %5219 = vmatpush.xpose.msra.mxu2 %v644_v27  ;;  %v2048_v17 = vld.sshfl [vmem:[#allocation1 + $0x20] sm:$0xff pattern:$0x73625140]  ;;  %v2050_v27 = vld.sshfl [vmem:[#allocation1 + $0x30] sm:$0xff pattern:$0x73625140] }
 0x4cb   : > { %5199 = vmatpush.xpose.msra.mxu1 %v643_v18  ;;  %5239 = vmatpush.xpose.msra.mxu3 %v645_v60  ;;  %v1779_v18 = vld [vmem:[%s6450_s10 + $0x2de8] sm:$0xff]  ;;  %v1781_v60 = vld [vmem:[%s6450_s10 + $0x2df8] sm:$0xff] }
 0x4ce   : > { %5180 = vmatpush.xpose.msra.mxu0 %v454_v57  ;;  %5220 = vmatpush.xpose.msra.mxu2 %v456_v39  ;;  %v2051_v57 = vld.sshfl [vmem:[#allocation1 + $0x38] sm:$0xff pattern:$0x73625140]  ;;  %v3343_v39 = vadd.f32 %v3342_v23, %v3323_v0 }
 0x4cf   : > { %5200 = vmatpush.xpose.msra.mxu1 %v455_v26  ;;  %5240 = vmatpush.xpose.msra.mxu3 %v457_v31  ;;  %v1592_v26 = vld [vmem:[%s6450_s10 + $0x2810] sm:$0xff]  ;;  %v3362_v31 = vpop.f32.mrf.mxu1 }
 0x4d0   : > { %v2057_v23 = vld.sshfl [vmem:[#allocation1 + $0x18] sm:$0xff pattern:$0x73625140] }
 0x4d1   : > { %5181 = vmatmul.f32.vlgmr.msra.gmra.mxu0 %v2044_v22  ;;  %5221 = vmatmul.f32.vlgmr.msra.gmra.mxu2 %v2046_v1  ;;  %v3402_v22 = vpop.f32.mrf.mxu3  ;;  %v1591_v1 = vld [vmem:[%s6450_s10 + $0x2808] sm:$0xff]  ;;  %v1596_v0 = vld [vmem:[%s6450_s10 + $0x2830] sm:$0xff] }
 0x4d2   : > { %5253 = vmatpush.xpose.msrb.mxu0 %v1774_v33  ;;  %5293 = vmatpush.xpose.msrb.mxu2 %v1776_v38  ;;  %v3382_v33 = vpop.f32.mrf.mxu2  ;;  %v1590_v38 = vld [vmem:[%s6450_s10 + $0x2800] sm:$0xff] }
 0x4d3   : > { %5273 = vmatpush.xpose.msrb.mxu1 %v1775_v42  ;;  %5313 = vmatpush.xpose.msrb.mxu3 %v1777_v28  ;;  %v3363_v42 = vadd.f32 %v3362_v31, %v3343_v39  ;;  %v1402_v28 = vld [vmem:[%s6450_s10 + $0x2220] sm:$0xff]  ;;  %v1407_v31 = vld [vmem:[%s6450_s10 + $0x2248] sm:$0xff] }
 0x4d4   : > { %5201 = vmatmul.f32.vlgmr.msra.gmra.mxu1 %v2045_v44  ;;  %5241 = vmatmul.f32.vlgmr.msra.gmra.mxu3 %v2047_v36  ;;  %v1404_v44 = vld [vmem:[%s6450_s10 + $0x2230] sm:$0xff] }
 0x4d5   : > { %v3383_v36 = vadd.f32 %v3382_v33, %v3363_v42  ;;  %v1406_v33 = vld [vmem:[%s6450_s10 + $0x2240] sm:$0xff]  ;;  %v1220_v42 = vld [vmem:[%s6450_s10 + $0x1c70] sm:$0xff] }
 0x4d6   : > { %5254 = vmatpush.xpose.msrb.mxu0 %v1586_v3  ;;  %5294 = vmatpush.xpose.msrb.mxu2 %v1588_v40  ;;  %v1216_v3 = vld [vmem:[%s6450_s10 + $0x1c50] sm:$0xff]  ;;  %v3422_v40 = vpop.f32.mrf.mxu0 }
 0x4d7   : > { %5274 = vmatpush.xpose.msrb.mxu1 %v1587_v12  ;;  %5314 = vmatpush.xpose.msrb.mxu3 %v1589_v29  ;;  %v3403_v34 = vadd.f32 %v3402_v22, %v3383_v36  ;;  %v1217_v12 = vld [vmem:[%s6450_s10 + $0x1c58] sm:$0xff]  ;;  %v1219_v36 = vld [vmem:[%s6450_s10 + $0x1c68] sm:$0xff] }
 0x4d8   : > { %v1409_v22 = vld [vmem:[%s6450_s10 + $0x2258] sm:$0xff] }
 0x4d9   : > { %v3423_v29 = vadd.f32 %v3422_v40, %v3403_v34  ;;  %v1031_v34 = vld [vmem:[%s6450_s10 + $0x1688] sm:$0xff] }
 0x4da   : > { %5255 = vmatpush.xpose.msrb.mxu0 %v1398_v32  ;;  %5295 = vmatpush.xpose.msrb.mxu2 %v1400_v54  ;;  %v1028_v32 = vld [vmem:[%s6450_s10 + $0x1670] sm:$0xff]  ;;  %v3442_v54 = vpop.f32.mrf.mxu1 }
 0x4db   : > { %5275 = vmatpush.xpose.msrb.mxu1 %v1399_v37  ;;  %5315 = vmatpush.xpose.msrb.mxu3 %v1401_v62  ;;  %v1029_v37 = vld [vmem:[%s6450_s10 + $0x1678] sm:$0xff]  ;;  %v3462_v62 = vpop.f32.mrf.mxu2 }
 0x4de   : > { %5256 = vmatpush.xpose.msrb.mxu0 %v1210_v45  ;;  %5296 = vmatpush.xpose.msrb.mxu2 %v1212_v2  ;;  %v3443_v45 = vadd.f32 %v3442_v54, %v3423_v29  ;;  %v838_v2 = vld [vmem:[%s6450_s10 + $0x1080] sm:$0xff]  ;;  %v3502_v63 = vpop.f32.mrf.mxu0 }
 0x4df   : > { %5276 = vmatpush.xpose.msrb.mxu1 %v1211_v21  ;;  %5316 = vmatpush.xpose.msrb.mxu3 %v1213_v5  ;;  %v839_v5 = vld [vmem:[%s6450_s10 + $0x1088] sm:$0xff] }
 0x4e0   : > { %v3463_v21 = vadd.f32 %v3462_v62, %v3443_v45  ;;  %v303_v45 = vld [vmem:[%s6460_s12 + $0x140] sm:$0xff] }
 0x4e2   : > { %5257 = vmatpush.xpose.msrb.mxu0 %v1022_v16  ;;  %5297 = vmatpush.xpose.msrb.mxu2 %v1024_v6  ;;  %v3482_v16 = vpop.f32.mrf.mxu3  ;;  %v302_v6 = vld [vmem:[%s6460_s12 + $0x138] sm:$0xff] }
 0x4e3   : > { %5277 = vmatpush.xpose.msrb.mxu1 %v1023_v7  ;;  %5317 = vmatpush.xpose.msrb.mxu3 %v1025_v8  ;;  %v650_v7 = vld [vmem:[%s6450_s10 + $0xaa0] sm:$0xff]  ;;  %v652_v8 = vld [vmem:[%s6450_s10 + $0xab0] sm:$0xff]  ;;  %2053 = vst [vmem:[#allocation1 + $0x20] ss:$4 sm:$0xff] %v302_v6  ;;  %v3542_v15 = vpop.f32.mrf.mxu2 }
 0x4e6   : > { %5258 = vmatpush.xpose.msrb.mxu0 %v834_v46  ;;  %5298 = vmatpush.xpose.msrb.mxu2 %v836_v9  ;;  %v3483_v46 = vadd.f32 %v3482_v16, %v3463_v21  ;;  %v651_v9 = vld [vmem:[%s6450_s10 + $0xaa8] sm:$0xff]  ;;  %v657_v16 = vld [vmem:[%s6450_s10 + $0xad8] sm:$0xff] }
 0x4e7   : > { %5278 = vmatpush.xpose.msrb.mxu1 %v835_v51  ;;  %5318 = vmatpush.xpose.msrb.mxu3 %v837_v13  ;;  %v462_v13 = vld [vmem:[%s6450_s10 + $0x4c0] sm:$0xff] }
 0x4e8   : > { %v3503_v51 = vadd.f32 %v3502_v63, %v3483_v46  ;;  %v1786_v46 = vld [vmem:[%s6450_s10 + $0x2e20] sm:$0xff] }
 0x4ea   : > { %5259 = vmatpush.xpose.msrb.mxu0 %v646_v48  ;;  %5299 = vmatpush.xpose.msrb.mxu2 %v648_v25  ;;  %v3522_v48 = vpop.f32.mrf.mxu1  ;;  %v1782_v25 = vld [vmem:[%s6450_s10 + $0x2e00] sm:$0xff] }
 0x4eb   : > { %5279 = vmatpush.xpose.msrb.mxu1 %v647_v10  ;;  %5319 = vmatpush.xpose.msrb.mxu3 %v649_v11  ;;  %v463_v10 = vld [vmem:[%s6450_s10 + $0x4c8] sm:$0xff]  ;;  %v465_v11 = vld [vmem:[%s6450_s10 + $0x4d8] sm:$0xff] }
 0x4ee   : > { %5260 = vmatpush.xpose.msrb.mxu0 %v458_v52  ;;  %5300 = vmatpush.xpose.msrb.mxu2 %v460_v14  ;;  %v2054_v52 = vld.sshfl [vmem:[#allocation1] sm:$0xff pattern:$0x73625140]  ;;  %v2056_v14 = vld.sshfl [vmem:[#allocation1 + $0x10] sm:$0xff pattern:$0x73625140] }
 0x4ef   : > { %5280 = vmatpush.xpose.msrb.mxu1 %v459_v47  ;;  %5320 = vmatpush.xpose.msrb.mxu3 %v461_v30  ;;  %v1785_v47 = vld [vmem:[%s6450_s10 + $0x2e18] sm:$0xff] }
 0x4f0   : > { %v2055_v30 = vld.sshfl [vmem:[#allocation1 + $0x8] sm:$0xff pattern:$0x73625140] }
 0x4f1   : > { %5261 = vmatmul.f32.vlgmr.msrb.gmra.mxu0 %v2048_v17  ;;  %5301 = vmatmul.f32.vlgmr.msrb.gmra.mxu2 %v2050_v27  ;;  %v1594_v27 = vld [vmem:[%s6450_s10 + $0x2820] sm:$0xff]  ;;  %2062 = vst [vmem:[#allocation1] ss:$4 sm:$0xff] %v303_v45 }
 0x4f2   : > { %5333 = vmatpush.xpose.msra.mxu0 %v1778_v19  ;;  %5373 = vmatpush.xpose.msra.mxu2 %v1780_v59  ;;  %v3523_v19 = vadd.f32 %v3522_v48, %v3503_v51  ;;  %v1783_v59 = vld [vmem:[%s6450_s10 + $0x2e08] sm:$0xff]  ;;  %v469_v51 = vld [vmem:[%s6450_s10 + $0x4f8] sm:$0xff] }
 0x4f3   : > { %5353 = vmatpush.xpose.msra.mxu1 %v1779_v18  ;;  %5393 = vmatpush.xpose.msra.mxu3 %v1781_v60  ;;  %v3562_v18 = vpop.f32.mrf.mxu3  ;;  %v1595_v60 = vld [vmem:[%s6450_s10 + $0x2828] sm:$0xff] }
 0x4f4   : > { %5281 = vmatmul.f32.vlgmr.msrb.gmra.mxu1 %v2049_v35  ;;  %5321 = vmatmul.f32.vlgmr.msrb.gmra.mxu3 %v2051_v57  ;;  %v3543_v17 = vadd.f32 %v3542_v15, %v3523_v19  ;;  %v1597_v35 = vld [vmem:[%s6450_s10 + $0x2838] sm:$0xff]  ;;  %v3582_v57 = vpop.f32.mrf.mxu0  ;;  %v2060_v48 = vld.sshfl [vmem:[#allocation1 + $0x30] sm:$0xff pattern:$0x73625140]  ;;  %v1600_v19 = vld [vmem:[%s6450_s10 + $0x2850] sm:$0xff] }
 0x4f5   : > { %v2061_v15 = vld.sshfl [vmem:[#allocation1 + $0x38] sm:$0xff pattern:$0x73625140] }
 0x4f6   : > { %5334 = vmatpush.xpose.msra.mxu0 %v1590_v38  ;;  %5374 = vmatpush.xpose.msra.mxu2 %v1592_v26  ;;  %v3563_v39 = vadd.f32 %v3562_v18, %v3543_v17  ;;  %v1408_v38 = vld [vmem:[%s6450_s10 + $0x2250] sm:$0xff] }
 0x4f7   : > { %5354 = vmatpush.xpose.msra.mxu1 %v1591_v1  ;;  %5394 = vmatpush.xpose.msra.mxu3 %v1593_v41  ;;  %v3602_v1 = vpop.f32.mrf.mxu1  ;;  %v1218_v41 = vld [vmem:[%s6450_s10 + $0x1c60] sm:$0xff] }
 0x4f8   : > { %v3583_v26 = vadd.f32 %v3582_v57, %v3563_v39  ;;  %v1222_v39 = vld [vmem:[%s6450_s10 + $0x1c80] sm:$0xff] }
 0x4fa   : > { %5335 = vmatpush.xpose.msra.mxu0 %v1402_v28  ;;  %5375 = vmatpush.xpose.msra.mxu2 %v1404_v44  ;;  %v3622_v28 = vpop.f32.mrf.mxu2  ;;  %v3603_v44 = vadd.f32 %v3602_v1, %v3583_v26 }
 0x4fb   : > { %5355 = vmatpush.xpose.msra.mxu1 %v1403_v49  ;;  %5395 = vmatpush.xpose.msra.mxu3 %v1405_v50  ;;  %v1221_v49 = vld [vmem:[%s6450_s10 + $0x1c78] sm:$0xff]  ;;  %v3642_v40 = vpop.f32.mrf.mxu3 }
 0x4fc   : > { %v3623_v50 = vadd.f32 %v3622_v28, %v3603_v44  ;;  %v1035_v44 = vld [vmem:[%s6450_s10 + $0x16a8] sm:$0xff] }
 0x4fe   : > { %5336 = vmatpush.xpose.msra.mxu0 %v1214_v61  ;;  %5376 = vmatpush.xpose.msra.mxu2 %v1216_v3  ;;  %v1030_v61 = vld [vmem:[%s6450_s10 + $0x1680] sm:$0xff]  ;;  %v1032_v3 = vld [vmem:[%s6450_s10 + $0x1690] sm:$0xff]  ;;  %v3643_v29 = vadd.f32 %v3642_v40, %v3623_v50 }
 0x4ff   : > { %5356 = vmatpush.xpose.msra.mxu1 %v1215_v58  ;;  %5396 = vmatpush.xpose.msra.mxu3 %v1217_v12  ;;  %v1033_v58 = vld [vmem:[%s6450_s10 + $0x1698] sm:$0xff]  ;;  %v3662_v12 = vpop.f32.mrf.mxu0  ;;  %v3682_v62 = vpop.f32.mrf.mxu1 }
 0x500   : > { %v3663_v54 = vadd.f32 %v3662_v12, %v3643_v29  ;;  %v304_v29 = vld [vmem:[%s6460_s12 + $0x148] sm:$0xff] }
 0x502   : > { %5337 = vmatpush.xpose.msra.mxu0 %v1026_v53  ;;  %5377 = vmatpush.xpose.msra.mxu2 %v1028_v32  ;;  %v842_v53 = vld [vmem:[%s6450_s10 + $0x10a0] sm:$0xff]  ;;  %v844_v32 = vld [vmem:[%s6450_s10 + $0x10b0] sm:$0xff]  ;;  %v3702_v21 = vpop.f32.mrf.mxu2 }
 0x503   : > { %5357 = vmatpush.xpose.msra.mxu1 %v1027_v20  ;;  %5397 = vmatpush.xpose.msra.mxu3 %v1029_v37  ;;  %v843_v20 = vld [vmem:[%s6450_s10 + $0x10a8] sm:$0xff]  ;;  %v845_v37 = vld [vmem:[%s6450_s10 + $0x10b8] sm:$0xff]  ;;  %v3722_v63 = vpop.f32.mrf.mxu3 }
 0x506   : > { %5338 = vmatpush.xpose.msra.mxu0 %v838_v2  ;;  %5378 = vmatpush.xpose.msra.mxu2 %v840_v4  ;;  %v654_v2 = vld [vmem:[%s6450_s10 + $0xac0] sm:$0xff]  ;;  %v656_v4 = vld [vmem:[%s6450_s10 + $0xad0] sm:$0xff] }
 0x507   : > { %5358 = vmatpush.xpose.msra.mxu1 %v839_v5  ;;  %5398 = vmatpush.xpose.msra.mxu3 %v841_v55  ;;  %v3683_v5 = vadd.f32 %v3682_v62, %v3663_v54  ;;  %v655_v55 = vld [vmem:[%s6450_s10 + $0xac8] sm:$0xff]  ;;  %v661_v62 = vld [vmem:[%s6450_s10 + $0xaf8] sm:$0xff] }
 0x509   : > { %v3703_v6 = vadd.f32 %v3702_v21, %v3683_v5  ;;  %v1790_v5 = vld [vmem:[%s6450_s10 + $0x2e40] sm:$0xff] }
 0x50a   : > { %5339 = vmatpush.xpose.msra.mxu0 %v650_v7  ;;  %5379 = vmatpush.xpose.msra.mxu2 %v652_v8  ;;  %v466_v7 = vld [vmem:[%s6450_s10 + $0x4e0] sm:$0xff]  ;;  %v468_v8 = vld [vmem:[%s6450_s10 + $0x4f0] sm:$0xff] }
 0x50b   : > { %5359 = vmatpush.xpose.msra.mxu1 %v651_v9  ;;  %5399 = vmatpush.xpose.msra.mxu3 %v653_v56  ;;  %v1788_v9 = vld [vmem:[%s6450_s10 + $0x2e30] sm:$0xff]  ;;  %v467_v56 = vld [vmem:[%s6450_s10 + $0x4e8] sm:$0xff]  ;;  %v3802_v57 = vpop.f32.mrf.mxu3 }
 0x50e   : > { %5340 = vmatpush.xpose.msra.mxu0 %v462_v13  ;;  %5380 = vmatpush.xpose.msra.mxu2 %v464_v43  ;;  %v3742_v13 = vpop.f32.mrf.mxu0  ;;  %v2058_v43 = vld.sshfl [vmem:[#allocation1 + $0x20] sm:$0xff pattern:$0x73625140] }
 0x50f   : > { %5360 = vmatpush.xpose.msra.mxu1 %v463_v10  ;;  %5400 = vmatpush.xpose.msra.mxu3 %v465_v11  ;;  %v1789_v10 = vld [vmem:[%s6450_s10 + $0x2e38] sm:$0xff] }
 0x510   : > { %v2059_v11 = vld.sshfl [vmem:[#allocation1 + $0x28] sm:$0xff pattern:$0x73625140] }
 0x511   : > { %5341 = vmatmul.f32.vlgmr.msra.gmra.mxu0 %v2054_v52  ;;  %5381 = vmatmul.f32.vlgmr.msra.gmra.mxu2 %v2056_v14  ;;  %v1598_v14 = vld [vmem:[%s6450_s10 + $0x2840] sm:$0xff]  ;;  %2063 = vst [vmem:[#allocation1 + $0x20] ss:$4 sm:$0xff] %v304_v29 }
 0x512   : > { %5413 = vmatpush.xpose.msrb.mxu0 %v1782_v25  ;;  %5453 = vmatpush.xpose.msrb.mxu2 %v1784_v24  ;;  %v3723_v25 = vadd.f32 %v3722_v63, %v3703_v6  ;;  %v1787_v24 = vld [vmem:[%s6450_s10 + $0x2e28] sm:$0xff]  ;;  %v473_v6 = vld [vmem:[%s6450_s10 + $0x518] sm:$0xff] }
 0x513   : > { %5433 = vmatpush.xpose.msrb.mxu1 %v1783_v59  ;;  %5473 = vmatpush.xpose.msrb.mxu3 %v1785_v47  ;;  %v3762_v59 = vpop.f32.mrf.mxu1  ;;  %v1599_v47 = vld [vmem:[%s6450_s10 + $0x2848] sm:$0xff]  ;;  %v3882_v12 = vpop.f32.mrf.mxu3 }
 0x514   : > { %5361 = vmatmul.f32.vlgmr.msra.gmra.mxu1 %v2055_v30  ;;  %5401 = vmatmul.f32.vlgmr.msra.gmra.mxu3 %v2057_v23  ;;  %v3743_v52 = vadd.f32 %v3742_v13, %v3723_v25  ;;  %v1601_v30 = vld [vmem:[%s6450_s10 + $0x2858] sm:$0xff]  ;;  %v3782_v23 = vpop.f32.mrf.mxu2  ;;  %v2066_v63 = vld.sshfl [vmem:[#allocation1 + $0x10] sm:$0xff pattern:$0x73625140]  ;;  %v1604_v25 = vld [vmem:[%s6450_s10 + $0x2870] sm:$0xff] }
 0x515   : > { %v2067_v13 = vld.sshfl [vmem:[#allocation1 + $0x18] sm:$0xff pattern:$0x73625140] }
 0x516   : > { %5414 = vmatpush.xpose.msrb.mxu0 %v1594_v27  ;;  %5454 = vmatpush.xpose.msrb.mxu2 %v1596_v0  ;;  %v3763_v17 = vadd.f32 %v3762_v59, %v3743_v52  ;;  %v1410_v27 = vld [vmem:[%s6450_s10 + $0x2260] sm:$0xff]  ;;  %v1412_v0 = vld [vmem:[%s6450_s10 + $0x2270] sm:$0xff] }
 0x517   : > { %5434 = vmatpush.xpose.msrb.mxu1 %v1595_v60  ;;  %5474 = vmatpush.xpose.msrb.mxu3 %v1597_v35  ;;  %v1411_v60 = vld [vmem:[%s6450_s10 + $0x2268] sm:$0xff]  ;;  %v1413_v35 = vld [vmem:[%s6450_s10 + $0x2278] sm:$0xff] }
 0x518   : > { %v3783_v18 = vadd.f32 %v3782_v23, %v3763_v17  ;;  %v1226_v17 = vld [vmem:[%s6450_s10 + $0x1ca0] sm:$0xff] }
 0x51a   : > { %5415 = vmatpush.xpose.msrb.mxu0 %v1406_v33  ;;  %5455 = vmatpush.xpose.msrb.mxu2 %v1408_v38  ;;  %v1224_v33 = vld [vmem:[%s6450_s10 + $0x1c90] sm:$0xff]  ;;  %v3822_v38 = vpop.f32.mrf.mxu0  ;;  %v3803_v26 = vadd.f32 %v3802_v57, %v3783_v18 }
 0x51b   : > { %5435 = vmatpush.xpose.msrb.mxu1 %v1407_v31  ;;  %5475 = vmatpush.xpose.msrb.mxu3 %v1409_v22  ;;  %v1223_v31 = vld [vmem:[%s6450_s10 + $0x1c88] sm:$0xff]  ;;  %v1225_v22 = vld [vmem:[%s6450_s10 + $0x1c98] sm:$0xff]  ;;  %v3842_v28 = vpop.f32.mrf.mxu1 }
 0x51c   : > { %v3823_v1 = vadd.f32 %v3822_v38, %v3803_v26  ;;  %v1039_v26 = vld [vmem:[%s6450_s10 + $0x16c8] sm:$0xff] }
 0x51e   : > { %5416 = vmatpush.xpose.msrb.mxu0 %v1218_v41  ;;  %5456 = vmatpush.xpose.msrb.mxu2 %v1220_v42  ;;  %v1034_v41 = vld [vmem:[%s6450_s10 + $0x16a0] sm:$0xff]  ;;  %v1036_v42 = vld [vmem:[%s6450_s10 + $0x16b0] sm:$0xff]  ;;  %v3843_v50 = vadd.f32 %v3842_v28, %v3823_v1 }
 0x51f   : > { %5436 = vmatpush.xpose.msrb.mxu1 %v1219_v36  ;;  %5476 = vmatpush.xpose.msrb.mxu3 %v1221_v49  ;;  %v1037_v36 = vld [vmem:[%s6450_s10 + $0x16b8] sm:$0xff]  ;;  %v3862_v49 = vpop.f32.mrf.mxu2 }
 0x520   : > { %v3863_v40 = vadd.f32 %v3862_v49, %v3843_v50  ;;  %v305_v50 = vld [vmem:[%s6460_s12 + $0x150] sm:$0xff] }
 0x522   : > { %5417 = vmatpush.xpose.msrb.mxu0 %v1030_v61  ;;  %5457 = vmatpush.xpose.msrb.mxu2 %v1032_v3  ;;  %v846_v61 = vld [vmem:[%s6450_s10 + $0x10c0] sm:$0xff]  ;;  %v848_v3 = vld [vmem:[%s6450_s10 + $0x10d0] sm:$0xff]  ;;  %v3902_v54 = vpop.f32.mrf.mxu0 }
 0x523   : > { %5437 = vmatpush.xpose.msrb.mxu1 %v1031_v34  ;;  %5477 = vmatpush.xpose.msrb.mxu3 %v1033_v58  ;;  %v847_v34 = vld [vmem:[%s6450_s10 + $0x10c8] sm:$0xff]  ;;  %v849_v58 = vld [vmem:[%s6450_s10 + $0x10d8] sm:$0xff]  ;;  %v3922_v21 = vpop.f32.mrf.mxu1 }
 0x526   : > { %5418 = vmatpush.xpose.msrb.mxu0 %v842_v53  ;;  %5458 = vmatpush.xpose.msrb.mxu2 %v844_v32  ;;  %v658_v53 = vld [vmem:[%s6450_s10 + $0xae0] sm:$0xff]  ;;  %v660_v32 = vld [vmem:[%s6450_s10 + $0xaf0] sm:$0xff] }
 0x527   : > { %5438 = vmatpush.xpose.msrb.mxu1 %v843_v20  ;;  %5478 = vmatpush.xpose.msrb.mxu3 %v845_v37  ;;  %v3883_v20 = vadd.f32 %v3882_v12, %v3863_v40  ;;  %v659_v37 = vld [vmem:[%s6450_s10 + $0xae8] sm:$0xff]  ;;  %v665_v12 = vld [vmem:[%s6450_s10 + $0xb18] sm:$0xff] }
 0x529   : > { %v3903_v45 = vadd.f32 %v3902_v54, %v3883_v20  ;;  %v1794_v20 = vld [vmem:[%s6450_s10 + $0x2e60] sm:$0xff] }
 0x52a   : > { %5419 = vmatpush.xpose.msrb.mxu0 %v654_v2  ;;  %5459 = vmatpush.xpose.msrb.mxu2 %v656_v4  ;;  %v470_v2 = vld [vmem:[%s6450_s10 + $0x500] sm:$0xff]  ;;  %v472_v4 = vld [vmem:[%s6450_s10 + $0x510] sm:$0xff] }
 0x52b   : > { %5439 = vmatpush.xpose.msrb.mxu1 %v655_v55  ;;  %5479 = vmatpush.xpose.msrb.mxu3 %v657_v16  ;;  %v1792_v55 = vld [vmem:[%s6450_s10 + $0x2e50] sm:$0xff]  ;;  %v471_v16 = vld [vmem:[%s6450_s10 + $0x508] sm:$0xff]  ;;  %v4002_v23 = vpop.f32.mrf.mxu1 }
 0x52e   : > { %5420 = vmatpush.xpose.msrb.mxu0 %v466_v7  ;;  %5460 = vmatpush.xpose.msrb.mxu2 %v468_v8  ;;  %v3942_v7 = vpop.f32.mrf.mxu2  ;;  %v2064_v8 = vld.sshfl [vmem:[#allocation1] sm:$0xff pattern:$0x73625140] }
 0x52f   : > { %5440 = vmatpush.xpose.msrb.mxu1 %v467_v56  ;;  %5480 = vmatpush.xpose.msrb.mxu3 %v469_v51  ;;  %v1793_v56 = vld [vmem:[%s6450_s10 + $0x2e58] sm:$0xff] }
 0x530   : > { %v2065_v51 = vld.sshfl [vmem:[#allocation1 + $0x8] sm:$0xff pattern:$0x73625140] }
 0x531   : > { %5421 = vmatmul.f32.vlgmr.msrb.gmra.mxu0 %v2058_v43  ;;  %5461 = vmatmul.f32.vlgmr.msrb.gmra.mxu2 %v2060_v48  ;;  %v1602_v48 = vld [vmem:[%s6450_s10 + $0x2860] sm:$0xff]  ;;  %2072 = vst [vmem:[#allocation1] ss:$4 sm:$0xff] %v305_v50 }
 0x532   : > { %5493 = vmatpush.xpose.msra.mxu0 %v1786_v46  ;;  %5533 = vmatpush.xpose.msra.mxu2 %v1788_v9  ;;  %v3923_v46 = vadd.f32 %v3922_v21, %v3903_v45  ;;  %v1791_v9 = vld [vmem:[%s6450_s10 + $0x2e48] sm:$0xff]  ;;  %v477_v45 = vld [vmem:[%s6450_s10 + $0x538] sm:$0xff] }
 0x533   : > { %5513 = vmatpush.xpose.msra.mxu1 %v1787_v24  ;;  %5553 = vmatpush.xpose.msra.mxu3 %v1789_v10  ;;  %v3962_v24 = vpop.f32.mrf.mxu3  ;;  %v1603_v10 = vld [vmem:[%s6450_s10 + $0x2868] sm:$0xff]  ;;  %v4082_v49 = vpop.f32.mrf.mxu1 }
 0x534   : > { %5441 = vmatmul.f32.vlgmr.msrb.gmra.mxu1 %v2059_v11  ;;  %5481 = vmatmul.f32.vlgmr.msrb.gmra.mxu3 %v2061_v15  ;;  %v3943_v43 = vadd.f32 %v3942_v7, %v3923_v46  ;;  %v1605_v11 = vld [vmem:[%s6450_s10 + $0x2878] sm:$0xff]  ;;  %v3982_v15 = vpop.f32.mrf.mxu0  ;;  %v2070_v21 = vld.sshfl [vmem:[#allocation1 + $0x30] sm:$0xff pattern:$0x73625140]  ;;  %v1608_v46 = vld [vmem:[%s6450_s10 + $0x2890] sm:$0xff] }
 0x535   : > { %v2071_v7 = vld.sshfl [vmem:[#allocation1 + $0x38] sm:$0xff pattern:$0x73625140] }
 0x536   : > { %5494 = vmatpush.xpose.msra.mxu0 %v1598_v14  ;;  %5534 = vmatpush.xpose.msra.mxu2 %v1600_v19  ;;  %v3963_v52 = vadd.f32 %v3962_v24, %v3943_v43  ;;  %v1414_v14 = vld [vmem:[%s6450_s10 + $0x2280] sm:$0xff]  ;;  %v1416_v19 = vld [vmem:[%s6450_s10 + $0x2290] sm:$0xff] }
 0x537   : > { %5514 = vmatpush.xpose.msra.mxu1 %v1599_v47  ;;  %5554 = vmatpush.xpose.msra.mxu3 %v1601_v30  ;;  %v1415_v47 = vld [vmem:[%s6450_s10 + $0x2288] sm:$0xff]  ;;  %v1417_v30 = vld [vmem:[%s6450_s10 + $0x2298] sm:$0xff] }
 0x538   : > { %v3983_v59 = vadd.f32 %v3982_v15, %v3963_v52  ;;  %v1230_v52 = vld [vmem:[%s6450_s10 + $0x1cc0] sm:$0xff] }
 0x53a   : > { %5495 = vmatpush.xpose.msra.mxu0 %v1410_v27  ;;  %5535 = vmatpush.xpose.msra.mxu2 %v1412_v0  ;;  %v1228_v27 = vld [vmem:[%s6450_s10 + $0x1cb0] sm:$0xff]  ;;  %v4022_v0 = vpop.f32.mrf.mxu2  ;;  %v4003_v18 = vadd.f32 %v4002_v23, %v3983_v59 }
 0x53b   : > { %5515 = vmatpush.xpose.msra.mxu1 %v1411_v60  ;;  %5555 = vmatpush.xpose.msra.mxu3 %v1413_v35  ;;  %v1227_v60 = vld [vmem:[%s6450_s10 + $0x1ca8] sm:$0xff]  ;;  %v1229_v35 = vld [vmem:[%s6450_s10 + $0x1cb8] sm:$0xff]  ;;  %v4042_v38 = vpop.f32.mrf.mxu3 }
 0x53c   : > { %v4023_v57 = vadd.f32 %v4022_v0, %v4003_v18  ;;  %v1043_v18 = vld [vmem:[%s6450_s10 + $0x16e8] sm:$0xff] }
 0x53e   : > { %5496 = vmatpush.xpose.msra.mxu0 %v1222_v39  ;;  %5536 = vmatpush.xpose.msra.mxu2 %v1224_v33  ;;  %v1038_v39 = vld [vmem:[%s6450_s10 + $0x16c0] sm:$0xff]  ;;  %v1040_v33 = vld [vmem:[%s6450_s10 + $0x16d0] sm:$0xff]  ;;  %v4043_v1 = vadd.f32 %v4042_v38, %v4023_v57 }
 0x53f   : > { %5516 = vmatpush.xpose.msra.mxu1 %v1223_v31  ;;  %5556 = vmatpush.xpose.msra.mxu3 %v1225_v22  ;;  %v1041_v31 = vld [vmem:[%s6450_s10 + $0x16d8] sm:$0xff]  ;;  %v4062_v22 = vpop.f32.mrf.mxu0 }
 0x540   : > { %v4063_v28 = vadd.f32 %v4062_v22, %v4043_v1  ;;  %v306_v1 = vld [vmem:[%s6460_s12 + $0x158] sm:$0xff] }
 0x542   : > { %5497 = vmatpush.xpose.msra.mxu0 %v1034_v41  ;;  %5537 = vmatpush.xpose.msra.mxu2 %v1036_v42  ;;  %v850_v41 = vld [vmem:[%s6450_s10 + $0x10e0] sm:$0xff]  ;;  %v852_v42 = vld [vmem:[%s6450_s10 + $0x10f0] sm:$0xff]  ;;  %v4102_v40 = vpop.f32.mrf.mxu2 }
 0x543   : > { %5517 = vmatpush.xpose.msra.mxu1 %v1035_v44  ;;  %5557 = vmatpush.xpose.msra.mxu3 %v1037_v36  ;;  %v851_v44 = vld [vmem:[%s6450_s10 + $0x10e8] sm:$0xff]  ;;  %v853_v36 = vld [vmem:[%s6450_s10 + $0x10f8] sm:$0xff]  ;;  %v4122_v54 = vpop.f32.mrf.mxu3 }
 0x546   : > { %5498 = vmatpush.xpose.msra.mxu0 %v846_v61  ;;  %5538 = vmatpush.xpose.msra.mxu2 %v848_v3  ;;  %v662_v61 = vld [vmem:[%s6450_s10 + $0xb00] sm:$0xff]  ;;  %v664_v3 = vld [vmem:[%s6450_s10 + $0xb10] sm:$0xff] }
 0x547   : > { %5518 = vmatpush.xpose.msra.mxu1 %v847_v34  ;;  %5558 = vmatpush.xpose.msra.mxu3 %v849_v58  ;;  %v4083_v34 = vadd.f32 %v4082_v49, %v4063_v28  ;;  %v663_v58 = vld [vmem:[%s6450_s10 + $0xb08] sm:$0xff]  ;;  %v669_v49 = vld [vmem:[%s6450_s10 + $0xb38] sm:$0xff] }
 0x549   : > { %v4103_v29 = vadd.f32 %v4102_v40, %v4083_v34  ;;  %v1798_v34 = vld [vmem:[%s6450_s10 + $0x2e80] sm:$0xff] }
 0x54a   : > { %5499 = vmatpush.xpose.msra.mxu0 %v658_v53  ;;  %5539 = vmatpush.xpose.msra.mxu2 %v660_v32  ;;  %v474_v53 = vld [vmem:[%s6450_s10 + $0x520] sm:$0xff]  ;;  %v476_v32 = vld [vmem:[%s6450_s10 + $0x530] sm:$0xff] }
 0x54b   : > { %5519 = vmatpush.xpose.msra.mxu1 %v659_v37  ;;  %5559 = vmatpush.xpose.msra.mxu3 %v661_v62  ;;  %v1796_v37 = vld [vmem:[%s6450_s10 + $0x2e70] sm:$0xff]  ;;  %v475_v62 = vld [vmem:[%s6450_s10 + $0x528] sm:$0xff]  ;;  %v4202_v15 = vpop.f32.mrf.mxu3 }
 0x54e   : > { %5500 = vmatpush.xpose.msra.mxu0 %v470_v2  ;;  %5540 = vmatpush.xpose.msra.mxu2 %v472_v4  ;;  %v4142_v2 = vpop.f32.mrf.mxu0  ;;  %v2068_v4 = vld.sshfl [vmem:[#allocation1 + $0x20] sm:$0xff pattern:$0x73625140] }
 0x54f   : > { %5520 = vmatpush.xpose.msra.mxu1 %v471_v16  ;;  %5560 = vmatpush.xpose.msra.mxu3 %v473_v6  ;;  %v1797_v16 = vld [vmem:[%s6450_s10 + $0x2e78] sm:$0xff] }
 0x550   : > { %v2069_v6 = vld.sshfl [vmem:[#allocation1 + $0x28] sm:$0xff pattern:$0x73625140] }
 0x551   : > { %5501 = vmatmul.f32.vlgmr.msra.gmra.mxu0 %v2064_v8  ;;  %5541 = vmatmul.f32.vlgmr.msra.gmra.mxu2 %v2066_v63  ;;  %v1606_v63 = vld [vmem:[%s6450_s10 + $0x2880] sm:$0xff]  ;;  %2073 = vst [vmem:[#allocation1 + $0x20] ss:$4 sm:$0xff] %v306_v1 }
 0x552   : > { %5573 = vmatpush.xpose.msrb.mxu0 %v1790_v5  ;;  %5613 = vmatpush.xpose.msrb.mxu2 %v1792_v55  ;;  %v4123_v5 = vadd.f32 %v4122_v54, %v4103_v29  ;;  %v1795_v55 = vld [vmem:[%s6450_s10 + $0x2e68] sm:$0xff]  ;;  %v481_v29 = vld [vmem:[%s6450_s10 + $0x558] sm:$0xff] }
 0x553   : > { %5593 = vmatpush.xpose.msrb.mxu1 %v1791_v9  ;;  %5633 = vmatpush.xpose.msrb.mxu3 %v1793_v56  ;;  %v4162_v9 = vpop.f32.mrf.mxu1  ;;  %v1607_v56 = vld [vmem:[%s6450_s10 + $0x2888] sm:$0xff]  ;;  %v4282_v22 = vpop.f32.mrf.mxu3 }
 0x554   : > { %5521 = vmatmul.f32.vlgmr.msra.gmra.mxu1 %v2065_v51  ;;  %5561 = vmatmul.f32.vlgmr.msra.gmra.mxu3 %v2067_v13  ;;  %v4143_v8 = vadd.f32 %v4142_v2, %v4123_v5  ;;  %v1609_v51 = vld [vmem:[%s6450_s10 + $0x2898] sm:$0xff]  ;;  %v4182_v13 = vpop.f32.mrf.mxu2  ;;  %v2076_v54 = vld.sshfl [vmem:[#allocation1 + $0x10] sm:$0xff pattern:$0x73625140]  ;;  %v1612_v5 = vld [vmem:[%s6450_s10 + $0x28b0] sm:$0xff] }
 0x555   : > { %v2077_v2 = vld.sshfl [vmem:[#allocation1 + $0x18] sm:$0xff pattern:$0x73625140] }
 0x556   : > { %5574 = vmatpush.xpose.msrb.mxu0 %v1602_v48  ;;  %5614 = vmatpush.xpose.msrb.mxu2 %v1604_v25  ;;  %v4163_v43 = vadd.f32 %v4162_v9, %v4143_v8  ;;  %v1418_v48 = vld [vmem:[%s6450_s10 + $0x22a0] sm:$0xff]  ;;  %v1420_v25 = vld [vmem:[%s6450_s10 + $0x22b0] sm:$0xff] }
 0x557   : > { %5594 = vmatpush.xpose.msrb.mxu1 %v1603_v10  ;;  %5634 = vmatpush.xpose.msrb.mxu3 %v1605_v11  ;;  %v1419_v10 = vld [vmem:[%s6450_s10 + $0x22a8] sm:$0xff]  ;;  %v1421_v11 = vld [vmem:[%s6450_s10 + $0x22b8] sm:$0xff] }
 0x558   : > { %v4183_v24 = vadd.f32 %v4182_v13, %v4163_v43  ;;  %v1234_v43 = vld [vmem:[%s6450_s10 + $0x1ce0] sm:$0xff] }
 0x55a   : > { %5575 = vmatpush.xpose.msrb.mxu0 %v1414_v14  ;;  %5615 = vmatpush.xpose.msrb.mxu2 %v1416_v19  ;;  %v1232_v14 = vld [vmem:[%s6450_s10 + $0x1cd0] sm:$0xff]  ;;  %v4222_v19 = vpop.f32.mrf.mxu0  ;;  %v4203_v59 = vadd.f32 %v4202_v15, %v4183_v24 }
 0x55b   : > { %5595 = vmatpush.xpose.msrb.mxu1 %v1415_v47  ;;  %5635 = vmatpush.xpose.msrb.mxu3 %v1417_v30  ;;  %v1231_v47 = vld [vmem:[%s6450_s10 + $0x1cc8] sm:$0xff]  ;;  %v1233_v30 = vld [vmem:[%s6450_s10 + $0x1cd8] sm:$0xff]  ;;  %v4242_v0 = vpop.f32.mrf.mxu1 }
 0x55c   : > { %v4223_v23 = vadd.f32 %v4222_v19, %v4203_v59  ;;  %v1047_v59 = vld [vmem:[%s6450_s10 + $0x1708] sm:$0xff] }
 0x55e   : > { %5576 = vmatpush.xpose.msrb.mxu0 %v1226_v17  ;;  %5616 = vmatpush.xpose.msrb.mxu2 %v1228_v27  ;;  %v1042_v17 = vld [vmem:[%s6450_s10 + $0x16e0] sm:$0xff]  ;;  %v1044_v27 = vld [vmem:[%s6450_s10 + $0x16f0] sm:$0xff]  ;;  %v4243_v57 = vadd.f32 %v4242_v0, %v4223_v23 }
 0x55f   : > { %5596 = vmatpush.xpose.msrb.mxu1 %v1227_v60  ;;  %5636 = vmatpush.xpose.msrb.mxu3 %v1229_v35  ;;  %v1045_v60 = vld [vmem:[%s6450_s10 + $0x16f8] sm:$0xff]  ;;  %v4262_v35 = vpop.f32.mrf.mxu2 }
 0x560   : > { %v4263_v38 = vadd.f32 %v4262_v35, %v4243_v57  ;;  %v307_v57 = vld [vmem:[%s6460_s12 + $0x160] sm:$0xff] }
 0x562   : > { %5577 = vmatpush.xpose.msrb.mxu0 %v1038_v39  ;;  %5617 = vmatpush.xpose.msrb.mxu2 %v1040_v33  ;;  %v854_v39 = vld [vmem:[%s6450_s10 + $0x1100] sm:$0xff]  ;;  %v856_v33 = vld [vmem:[%s6450_s10 + $0x1110] sm:$0xff]  ;;  %v4302_v28 = vpop.f32.mrf.mxu0 }
 0x563   : > { %5597 = vmatpush.xpose.msrb.mxu1 %v1039_v26  ;;  %5637 = vmatpush.xpose.msrb.mxu3 %v1041_v31  ;;  %v855_v26 = vld [vmem:[%s6450_s10 + $0x1108] sm:$0xff]  ;;  %v857_v31 = vld [vmem:[%s6450_s10 + $0x1118] sm:$0xff]  ;;  %v4322_v40 = vpop.f32.mrf.mxu1 }
 0x566   : > { %5578 = vmatpush.xpose.msrb.mxu0 %v850_v41  ;;  %5618 = vmatpush.xpose.msrb.mxu2 %v852_v42  ;;  %v666_v41 = vld [vmem:[%s6450_s10 + $0xb20] sm:$0xff]  ;;  %v668_v42 = vld [vmem:[%s6450_s10 + $0xb30] sm:$0xff] }
 0x567   : > { %5598 = vmatpush.xpose.msrb.mxu1 %v851_v44  ;;  %5638 = vmatpush.xpose.msrb.mxu3 %v853_v36  ;;  %v4283_v44 = vadd.f32 %v4282_v22, %v4263_v38  ;;  %v667_v36 = vld [vmem:[%s6450_s10 + $0xb28] sm:$0xff]  ;;  %v673_v22 = vld [vmem:[%s6450_s10 + $0xb58] sm:$0xff] }
 0x569   : > { %v4303_v50 = vadd.f32 %v4302_v28, %v4283_v44  ;;  %v1802_v44 = vld [vmem:[%s6450_s10 + $0x2ea0] sm:$0xff] }
 0x56a   : > { %5579 = vmatpush.xpose.msrb.mxu0 %v662_v61  ;;  %5619 = vmatpush.xpose.msrb.mxu2 %v664_v3  ;;  %v478_v61 = vld [vmem:[%s6450_s10 + $0x540] sm:$0xff]  ;;  %v480_v3 = vld [vmem:[%s6450_s10 + $0x550] sm:$0xff] }
 0x56b   : > { %5599 = vmatpush.xpose.msrb.mxu1 %v663_v58  ;;  %5639 = vmatpush.xpose.msrb.mxu3 %v665_v12  ;;  %v1800_v58 = vld [vmem:[%s6450_s10 + $0x2e90] sm:$0xff]  ;;  %v479_v12 = vld [vmem:[%s6450_s10 + $0x548] sm:$0xff]  ;;  %v4402_v13 = vpop.f32.mrf.mxu1 }
 0x56e   : > { %5580 = vmatpush.xpose.msrb.mxu0 %v474_v53  ;;  %5620 = vmatpush.xpose.msrb.mxu2 %v476_v32  ;;  %v4342_v53 = vpop.f32.mrf.mxu2  ;;  %v2074_v32 = vld.sshfl [vmem:[#allocation1] sm:$0xff pattern:$0x73625140] }
 0x56f   : > { %5600 = vmatpush.xpose.msrb.mxu1 %v475_v62  ;;  %5640 = vmatpush.xpose.msrb.mxu3 %v477_v45  ;;  %v1801_v62 = vld [vmem:[%s6450_s10 + $0x2e98] sm:$0xff] }
 0x570   : > { %v2075_v45 = vld.sshfl [vmem:[#allocation1 + $0x8] sm:$0xff pattern:$0x73625140] }
 0x571   : > { %5581 = vmatmul.f32.vlgmr.msrb.gmra.mxu0 %v2068_v4  ;;  %5621 = vmatmul.f32.vlgmr.msrb.gmra.mxu2 %v2070_v21  ;;  %v1610_v21 = vld [vmem:[%s6450_s10 + $0x28a0] sm:$0xff]  ;;  %2082 = vst [vmem:[#allocation1] ss:$4 sm:$0xff] %v307_v57 }
 0x572   : > { %5653 = vmatpush.xpose.msra.mxu0 %v1794_v20  ;;  %5693 = vmatpush.xpose.msra.mxu2 %v1796_v37  ;;  %v4323_v20 = vadd.f32 %v4322_v40, %v4303_v50  ;;  %v1799_v37 = vld [vmem:[%s6450_s10 + $0x2e88] sm:$0xff]  ;;  %v485_v50 = vld [vmem:[%s6450_s10 + $0x578] sm:$0xff] }
 0x573   : > { %5673 = vmatpush.xpose.msra.mxu1 %v1795_v55  ;;  %5713 = vmatpush.xpose.msra.mxu3 %v1797_v16  ;;  %v4362_v55 = vpop.f32.mrf.mxu3  ;;  %v1611_v16 = vld [vmem:[%s6450_s10 + $0x28a8] sm:$0xff]  ;;  %v4482_v35 = vpop.f32.mrf.mxu1 }
 0x574   : > { %5601 = vmatmul.f32.vlgmr.msrb.gmra.mxu1 %v2069_v6  ;;  %5641 = vmatmul.f32.vlgmr.msrb.gmra.mxu3 %v2071_v7  ;;  %v4343_v4 = vadd.f32 %v4342_v53, %v4323_v20  ;;  %v1613_v6 = vld [vmem:[%s6450_s10 + $0x28b8] sm:$0xff]  ;;  %v4382_v7 = vpop.f32.mrf.mxu0  ;;  %v2080_v40 = vld.sshfl [vmem:[#allocation1 + $0x30] sm:$0xff pattern:$0x73625140]  ;;  %v1616_v20 = vld [vmem:[%s6450_s10 + $0x28d0] sm:$0xff] }
 0x575   : > { %v2081_v53 = vld.sshfl [vmem:[#allocation1 + $0x38] sm:$0xff pattern:$0x73625140] }
 0x576   : > { %5654 = vmatpush.xpose.msra.mxu0 %v1606_v63  ;;  %5694 = vmatpush.xpose.msra.mxu2 %v1608_v46  ;;  %v4363_v8 = vadd.f32 %v4362_v55, %v4343_v4  ;;  %v1422_v63 = vld [vmem:[%s6450_s10 + $0x22c0] sm:$0xff]  ;;  %v1424_v46 = vld [vmem:[%s6450_s10 + $0x22d0] sm:$0xff] }
 0x577   : > { %5674 = vmatpush.xpose.msra.mxu1 %v1607_v56  ;;  %5714 = vmatpush.xpose.msra.mxu3 %v1609_v51  ;;  %v1423_v56 = vld [vmem:[%s6450_s10 + $0x22c8] sm:$0xff]  ;;  %v1425_v51 = vld [vmem:[%s6450_s10 + $0x22d8] sm:$0xff] }
 0x578   : > { %v4383_v9 = vadd.f32 %v4382_v7, %v4363_v8  ;;  %v1238_v8 = vld [vmem:[%s6450_s10 + $0x1d00] sm:$0xff] }
 0x57a   : > { %5655 = vmatpush.xpose.msra.mxu0 %v1418_v48  ;;  %5695 = vmatpush.xpose.msra.mxu2 %v1420_v25  ;;  %v1236_v48 = vld [vmem:[%s6450_s10 + $0x1cf0] sm:$0xff]  ;;  %v4422_v25 = vpop.f32.mrf.mxu2  ;;  %v4403_v24 = vadd.f32 %v4402_v13, %v4383_v9 }
 0x57b   : > { %5675 = vmatpush.xpose.msra.mxu1 %v1419_v10  ;;  %5715 = vmatpush.xpose.msra.mxu3 %v1421_v11  ;;  %v1235_v10 = vld [vmem:[%s6450_s10 + $0x1ce8] sm:$0xff]  ;;  %v1237_v11 = vld [vmem:[%s6450_s10 + $0x1cf8] sm:$0xff]  ;;  %v4442_v19 = vpop.f32.mrf.mxu3 }
 0x57c   : > { %v4423_v15 = vadd.f32 %v4422_v25, %v4403_v24  ;;  %v1051_v24 = vld [vmem:[%s6450_s10 + $0x1728] sm:$0xff] }
 0x57e   : > { %5656 = vmatpush.xpose.msra.mxu0 %v1230_v52  ;;  %5696 = vmatpush.xpose.msra.mxu2 %v1232_v14  ;;  %v1046_v52 = vld [vmem:[%s6450_s10 + $0x1700] sm:$0xff]  ;;  %v1048_v14 = vld [vmem:[%s6450_s10 + $0x1710] sm:$0xff]  ;;  %v4443_v23 = vadd.f32 %v4442_v19, %v4423_v15 }
 0x57f   : > { %5676 = vmatpush.xpose.msra.mxu1 %v1231_v47  ;;  %5716 = vmatpush.xpose.msra.mxu3 %v1233_v30  ;;  %v1049_v47 = vld [vmem:[%s6450_s10 + $0x1718] sm:$0xff]  ;;  %v4462_v30 = vpop.f32.mrf.mxu0 }
 0x580   : > { %v4463_v0 = vadd.f32 %v4462_v30, %v4443_v23  ;;  %v308_v23 = vld [vmem:[%s6460_s12 + $0x168] sm:$0xff] }
 0x582   : > { %5657 = vmatpush.xpose.msra.mxu0 %v1042_v17  ;;  %5697 = vmatpush.xpose.msra.mxu2 %v1044_v27  ;;  %v858_v17 = vld [vmem:[%s6450_s10 + $0x1120] sm:$0xff]  ;;  %v860_v27 = vld [vmem:[%s6450_s10 + $0x1130] sm:$0xff]  ;;  %v4502_v38 = vpop.f32.mrf.mxu2 }
 0x583   : > { %5677 = vmatpush.xpose.msra.mxu1 %v1043_v18  ;;  %5717 = vmatpush.xpose.msra.mxu3 %v1045_v60  ;;  %v859_v18 = vld [vmem:[%s6450_s10 + $0x1128] sm:$0xff]  ;;  %v861_v60 = vld [vmem:[%s6450_s10 + $0x1138] sm:$0xff]  ;;  %v4522_v28 = vpop.f32.mrf.mxu3 }
 0x586   : > { %5658 = vmatpush.xpose.msra.mxu0 %v854_v39  ;;  %5698 = vmatpush.xpose.msra.mxu2 %v856_v33  ;;  %v670_v39 = vld [vmem:[%s6450_s10 + $0xb40] sm:$0xff]  ;;  %v672_v33 = vld [vmem:[%s6450_s10 + $0xb50] sm:$0xff] }
 0x587   : > { %5678 = vmatpush.xpose.msra.mxu1 %v855_v26  ;;  %5718 = vmatpush.xpose.msra.mxu3 %v857_v31  ;;  %v4483_v26 = vadd.f32 %v4482_v35, %v4463_v0  ;;  %v671_v31 = vld [vmem:[%s6450_s10 + $0xb48] sm:$0xff]  ;;  %v677_v35 = vld [vmem:[%s6450_s10 + $0xb78] sm:$0xff] }
 0x589   : > { %v4503_v1 = vadd.f32 %v4502_v38, %v4483_v26  ;;  %v1806_v26 = vld [vmem:[%s6450_s10 + $0x2ec0] sm:$0xff] }
 0x58a   : > { %5659 = vmatpush.xpose.msra.mxu0 %v666_v41  ;;  %5699 = vmatpush.xpose.msra.mxu2 %v668_v42  ;;  %v482_v41 = vld [vmem:[%s6450_s10 + $0x560] sm:$0xff]  ;;  %v484_v42 = vld [vmem:[%s6450_s10 + $0x570] sm:$0xff] }
 0x58b   : > { %5679 = vmatpush.xpose.msra.mxu1 %v667_v36  ;;  %5719 = vmatpush.xpose.msra.mxu3 %v669_v49  ;;  %v1804_v36 = vld [vmem:[%s6450_s10 + $0x2eb0] sm:$0xff]  ;;  %v483_v49 = vld [vmem:[%s6450_s10 + $0x568] sm:$0xff]  ;;  %v4602_v7 = vpop.f32.mrf.mxu3 }
 0x58e   : > { %5660 = vmatpush.xpose.msra.mxu0 %v478_v61  ;;  %5700 = vmatpush.xpose.msra.mxu2 %v480_v3  ;;  %v4542_v61 = vpop.f32.mrf.mxu0  ;;  %v2078_v3 = vld.sshfl [vmem:[#allocation1 + $0x20] sm:$0xff pattern:$0x73625140] }
 0x58f   : > { %5680 = vmatpush.xpose.msra.mxu1 %v479_v12  ;;  %5720 = vmatpush.xpose.msra.mxu3 %v481_v29  ;;  %v1805_v12 = vld [vmem:[%s6450_s10 + $0x2eb8] sm:$0xff] }
 0x590   : > { %v2079_v29 = vld.sshfl [vmem:[#allocation1 + $0x28] sm:$0xff pattern:$0x73625140] }
 0x591   : > { %5661 = vmatmul.f32.vlgmr.msra.gmra.mxu0 %v2074_v32  ;;  %5701 = vmatmul.f32.vlgmr.msra.gmra.mxu2 %v2076_v54  ;;  %v1614_v54 = vld [vmem:[%s6450_s10 + $0x28c0] sm:$0xff]  ;;  %2083 = vst [vmem:[#allocation1 + $0x20] ss:$4 sm:$0xff] %v308_v23 }
 0x592   : > { %5733 = vmatpush.xpose.msrb.mxu0 %v1798_v34  ;;  %5773 = vmatpush.xpose.msrb.mxu2 %v1800_v58  ;;  %v4523_v34 = vadd.f32 %v4522_v28, %v4503_v1  ;;  %v1803_v58 = vld [vmem:[%s6450_s10 + $0x2ea8] sm:$0xff]  ;;  %v489_v1 = vld [vmem:[%s6450_s10 + $0x598] sm:$0xff] }
 0x593   : > { %5753 = vmatpush.xpose.msrb.mxu1 %v1799_v37  ;;  %5793 = vmatpush.xpose.msrb.mxu3 %v1801_v62  ;;  %v4562_v37 = vpop.f32.mrf.mxu1  ;;  %v1615_v62 = vld [vmem:[%s6450_s10 + $0x28c8] sm:$0xff]  ;;  %v4682_v30 = vpop.f32.mrf.mxu3 }
 0x594   : > { %5681 = vmatmul.f32.vlgmr.msra.gmra.mxu1 %v2075_v45  ;;  %5721 = vmatmul.f32.vlgmr.msra.gmra.mxu3 %v2077_v2  ;;  %v4543_v32 = vadd.f32 %v4542_v61, %v4523_v34  ;;  %v1617_v45 = vld [vmem:[%s6450_s10 + $0x28d8] sm:$0xff]  ;;  %v4582_v2 = vpop.f32.mrf.mxu2  ;;  %v2086_v28 = vld.sshfl [vmem:[#allocation1 + $0x10] sm:$0xff pattern:$0x73625140]  ;;  %v1620_v34 = vld [vmem:[%s6450_s10 + $0x28f0] sm:$0xff] }
 0x595   : > { %v2087_v61 = vld.sshfl [vmem:[#allocation1 + $0x18] sm:$0xff pattern:$0x73625140] }
 0x596   : > { %5734 = vmatpush.xpose.msrb.mxu0 %v1610_v21  ;;  %5774 = vmatpush.xpose.msrb.mxu2 %v1612_v5  ;;  %v4563_v4 = vadd.f32 %v4562_v37, %v4543_v32  ;;  %v1426_v21 = vld [vmem:[%s6450_s10 + $0x22e0] sm:$0xff]  ;;  %v1428_v5 = vld [vmem:[%s6450_s10 + $0x22f0] sm:$0xff] }
 0x597   : > { %5754 = vmatpush.xpose.msrb.mxu1 %v1611_v16  ;;  %5794 = vmatpush.xpose.msrb.mxu3 %v1613_v6  ;;  %v1427_v16 = vld [vmem:[%s6450_s10 + $0x22e8] sm:$0xff]  ;;  %v1429_v6 = vld [vmem:[%s6450_s10 + $0x22f8] sm:$0xff] }
 0x598   : > { %v4583_v55 = vadd.f32 %v4582_v2, %v4563_v4  ;;  %v1242_v4 = vld [vmem:[%s6450_s10 + $0x1d20] sm:$0xff] }
 0x59a   : > { %5735 = vmatpush.xpose.msrb.mxu0 %v1422_v63  ;;  %5775 = vmatpush.xpose.msrb.mxu2 %v1424_v46  ;;  %v1240_v63 = vld [vmem:[%s6450_s10 + $0x1d10] sm:$0xff]  ;;  %v4622_v46 = vpop.f32.mrf.mxu0  ;;  %v4603_v9 = vadd.f32 %v4602_v7, %v4583_v55 }
 0x59b   : > { %5755 = vmatpush.xpose.msrb.mxu1 %v1423_v56  ;;  %5795 = vmatpush.xpose.msrb.mxu3 %v1425_v51  ;;  %v1239_v56 = vld [vmem:[%s6450_s10 + $0x1d08] sm:$0xff]  ;;  %v1241_v51 = vld [vmem:[%s6450_s10 + $0x1d18] sm:$0xff]  ;;  %v4642_v25 = vpop.f32.mrf.mxu1 }
 0x59c   : > { %v4623_v13 = vadd.f32 %v4622_v46, %v4603_v9  ;;  %v1055_v9 = vld [vmem:[%s6450_s10 + $0x1748] sm:$0xff] }
 0x59e   : > { %5736 = vmatpush.xpose.msrb.mxu0 %v1234_v43  ;;  %5776 = vmatpush.xpose.msrb.mxu2 %v1236_v48  ;;  %v1050_v43 = vld [vmem:[%s6450_s10 + $0x1720] sm:$0xff]  ;;  %v1052_v48 = vld [vmem:[%s6450_s10 + $0x1730] sm:$0xff]  ;;  %v4643_v15 = vadd.f32 %v4642_v25, %v4623_v13 }
 0x59f   : > { %5756 = vmatpush.xpose.msrb.mxu1 %v1235_v10  ;;  %5796 = vmatpush.xpose.msrb.mxu3 %v1237_v11  ;;  %v1053_v10 = vld [vmem:[%s6450_s10 + $0x1738] sm:$0xff]  ;;  %v4662_v11 = vpop.f32.mrf.mxu2 }
 0x5a0   : > { %v4663_v19 = vadd.f32 %v4662_v11, %v4643_v15  ;;  %v309_v15 = vld [vmem:[%s6460_s12 + $0x170] sm:$0xff] }
 0x5a2   : > { %5737 = vmatpush.xpose.msrb.mxu0 %v1046_v52  ;;  %5777 = vmatpush.xpose.msrb.mxu2 %v1048_v14  ;;  %v862_v52 = vld [vmem:[%s6450_s10 + $0x1140] sm:$0xff]  ;;  %v864_v14 = vld [vmem:[%s6450_s10 + $0x1150] sm:$0xff]  ;;  %v4702_v0 = vpop.f32.mrf.mxu0 }
 0x5a3   : > { %5757 = vmatpush.xpose.msrb.mxu1 %v1047_v59  ;;  %5797 = vmatpush.xpose.msrb.mxu3 %v1049_v47  ;;  %v863_v59 = vld [vmem:[%s6450_s10 + $0x1148] sm:$0xff]  ;;  %v865_v47 = vld [vmem:[%s6450_s10 + $0x1158] sm:$0xff]  ;;  %v4722_v38 = vpop.f32.mrf.mxu1 }
 0x5a6   : > { %5738 = vmatpush.xpose.msrb.mxu0 %v858_v17  ;;  %5778 = vmatpush.xpose.msrb.mxu2 %v860_v27  ;;  %v674_v17 = vld [vmem:[%s6450_s10 + $0xb60] sm:$0xff]  ;;  %v676_v27 = vld [vmem:[%s6450_s10 + $0xb70] sm:$0xff] }
 0x5a7   : > { %5758 = vmatpush.xpose.msrb.mxu1 %v859_v18  ;;  %5798 = vmatpush.xpose.msrb.mxu3 %v861_v60  ;;  %v4683_v18 = vadd.f32 %v4682_v30, %v4663_v19  ;;  %v675_v60 = vld [vmem:[%s6450_s10 + $0xb68] sm:$0xff]  ;;  %v681_v30 = vld [vmem:[%s6450_s10 + $0xb98] sm:$0xff] }
 0x5a9   : > { %v4703_v57 = vadd.f32 %v4702_v0, %v4683_v18  ;;  %v1810_v18 = vld [vmem:[%s6450_s10 + $0x2ee0] sm:$0xff] }
 0x5aa   : > { %5739 = vmatpush.xpose.msrb.mxu0 %v670_v39  ;;  %5779 = vmatpush.xpose.msrb.mxu2 %v672_v33  ;;  %v486_v39 = vld [vmem:[%s6450_s10 + $0x580] sm:$0xff]  ;;  %v488_v33 = vld [vmem:[%s6450_s10 + $0x590] sm:$0xff] }
 0x5ab   : > { %5759 = vmatpush.xpose.msrb.mxu1 %v671_v31  ;;  %5799 = vmatpush.xpose.msrb.mxu3 %v673_v22  ;;  %v1808_v31 = vld [vmem:[%s6450_s10 + $0x2ed0] sm:$0xff]  ;;  %v487_v22 = vld [vmem:[%s6450_s10 + $0x588] sm:$0xff]  ;;  %v4802_v2 = vpop.f32.mrf.mxu1 }
 0x5ae   : > { %5740 = vmatpush.xpose.msrb.mxu0 %v482_v41  ;;  %5780 = vmatpush.xpose.msrb.mxu2 %v484_v42  ;;  %v4742_v41 = vpop.f32.mrf.mxu2  ;;  %v2084_v42 = vld.sshfl [vmem:[#allocation1] sm:$0xff pattern:$0x73625140] }
 0x5af   : > { %5760 = vmatpush.xpose.msrb.mxu1 %v483_v49  ;;  %5800 = vmatpush.xpose.msrb.mxu3 %v485_v50  ;;  %v1809_v49 = vld [vmem:[%s6450_s10 + $0x2ed8] sm:$0xff] }
 0x5b0   : > { %v2085_v50 = vld.sshfl [vmem:[#allocation1 + $0x8] sm:$0xff pattern:$0x73625140] }
 0x5b1   : > { %5741 = vmatmul.f32.vlgmr.msrb.gmra.mxu0 %v2078_v3  ;;  %5781 = vmatmul.f32.vlgmr.msrb.gmra.mxu2 %v2080_v40  ;;  %v1618_v40 = vld [vmem:[%s6450_s10 + $0x28e0] sm:$0xff]  ;;  %2092 = vst [vmem:[#allocation1] ss:$4 sm:$0xff] %v309_v15 }
 0x5b2   : > { %5813 = vmatpush.xpose.msra.mxu0 %v1802_v44  ;;  %5853 = vmatpush.xpose.msra.mxu2 %v1804_v36  ;;  %v4723_v44 = vadd.f32 %v4722_v38, %v4703_v57  ;;  %v1807_v36 = vld [vmem:[%s6450_s10 + $0x2ec8] sm:$0xff]  ;;  %v493_v57 = vld [vmem:[%s6450_s10 + $0x5b8] sm:$0xff]  ;;  %v494_v15 = vld [vmem:[%s6450_s10 + $0x5c0] sm:$0xff] }
 0x5b3   : > { %5833 = vmatpush.xpose.msra.mxu1 %v1803_v58  ;;  %5873 = vmatpush.xpose.msra.mxu3 %v1805_v12  ;;  %v4762_v58 = vpop.f32.mrf.mxu3  ;;  %v1619_v12 = vld [vmem:[%s6450_s10 + $0x28e8] sm:$0xff]  ;;  %v4882_v11 = vpop.f32.mrf.mxu1 }
 0x5b4   : > { %5761 = vmatmul.f32.vlgmr.msrb.gmra.mxu1 %v2079_v29  ;;  %5801 = vmatmul.f32.vlgmr.msrb.gmra.mxu3 %v2081_v53  ;;  %v4743_v3 = vadd.f32 %v4742_v41, %v4723_v44  ;;  %v1621_v29 = vld [vmem:[%s6450_s10 + $0x28f8] sm:$0xff]  ;;  %v4782_v53 = vpop.f32.mrf.mxu0  ;;  %v2090_v38 = vld.sshfl [vmem:[#allocation1 + $0x30] sm:$0xff pattern:$0x73625140]  ;;  %v1624_v44 = vld [vmem:[%s6450_s10 + $0x2910] sm:$0xff] }
 0x5b5   : > { %v2091_v41 = vld.sshfl [vmem:[#allocation1 + $0x38] sm:$0xff pattern:$0x73625140] }
 0x5b6   : > { %5814 = vmatpush.xpose.msra.mxu0 %v1614_v54  ;;  %5854 = vmatpush.xpose.msra.mxu2 %v1616_v20  ;;  %v4763_v32 = vadd.f32 %v4762_v58, %v4743_v3  ;;  %v1430_v54 = vld [vmem:[%s6450_s10 + $0x2300] sm:$0xff]  ;;  %v1432_v20 = vld [vmem:[%s6450_s10 + $0x2310] sm:$0xff] }
 0x5b7   : > { %5834 = vmatpush.xpose.msra.mxu1 %v1615_v62  ;;  %5874 = vmatpush.xpose.msra.mxu3 %v1617_v45  ;;  %v1431_v62 = vld [vmem:[%s6450_s10 + $0x2308] sm:$0xff]  ;;  %v1433_v45 = vld [vmem:[%s6450_s10 + $0x2318] sm:$0xff] }
 0x5b8   : > { %v4783_v37 = vadd.f32 %v4782_v53, %v4763_v32  ;;  %v1246_v32 = vld [vmem:[%s6450_s10 + $0x1d40] sm:$0xff] }
 0x5ba   : > { %5815 = vmatpush.xpose.msra.mxu0 %v1426_v21  ;;  %5855 = vmatpush.xpose.msra.mxu2 %v1428_v5  ;;  %v1244_v21 = vld [vmem:[%s6450_s10 + $0x1d30] sm:$0xff]  ;;  %v4822_v5 = vpop.f32.mrf.mxu2  ;;  %v4803_v55 = vadd.f32 %v4802_v2, %v4783_v37 }
 0x5bb   : > { %5835 = vmatpush.xpose.msra.mxu1 %v1427_v16  ;;  %5875 = vmatpush.xpose.msra.mxu3 %v1429_v6  ;;  %v1243_v16 = vld [vmem:[%s6450_s10 + $0x1d28] sm:$0xff]  ;;  %v1245_v6 = vld [vmem:[%s6450_s10 + $0x1d38] sm:$0xff]  ;;  %v4842_v46 = vpop.f32.mrf.mxu3 }
 0x5bc   : > { %v4823_v7 = vadd.f32 %v4822_v5, %v4803_v55  ;;  %v1059_v55 = vld [vmem:[%s6450_s10 + $0x1768] sm:$0xff] }
 0x5be   : > { %5816 = vmatpush.xpose.msra.mxu0 %v1238_v8  ;;  %5856 = vmatpush.xpose.msra.mxu2 %v1240_v63  ;;  %v1054_v8 = vld [vmem:[%s6450_s10 + $0x1740] sm:$0xff]  ;;  %v1056_v63 = vld [vmem:[%s6450_s10 + $0x1750] sm:$0xff]  ;;  %v4843_v13 = vadd.f32 %v4842_v46, %v4823_v7 }
 0x5bf   : > { %5836 = vmatpush.xpose.msra.mxu1 %v1239_v56  ;;  %5876 = vmatpush.xpose.msra.mxu3 %v1241_v51  ;;  %v1057_v56 = vld [vmem:[%s6450_s10 + $0x1758] sm:$0xff]  ;;  %v4862_v51 = vpop.f32.mrf.mxu0 }
 0x5c0   : > { %v4863_v25 = vadd.f32 %v4862_v51, %v4843_v13  ;;  %v682_v13 = vld [vmem:[%s6450_s10 + $0xba0] sm:$0xff] }
 0x5c2   : > { %5817 = vmatpush.xpose.msra.mxu0 %v1050_v43  ;;  %5857 = vmatpush.xpose.msra.mxu2 %v1052_v48  ;;  %v866_v43 = vld [vmem:[%s6450_s10 + $0x1160] sm:$0xff]  ;;  %v868_v48 = vld [vmem:[%s6450_s10 + $0x1170] sm:$0xff]  ;;  %v4902_v19 = vpop.f32.mrf.mxu2 }
 0x5c3   : > { %5837 = vmatpush.xpose.msra.mxu1 %v1051_v24  ;;  %5877 = vmatpush.xpose.msra.mxu3 %v1053_v10  ;;  %v867_v24 = vld [vmem:[%s6450_s10 + $0x1168] sm:$0xff]  ;;  %v869_v10 = vld [vmem:[%s6450_s10 + $0x1178] sm:$0xff]  ;;  %v4922_v0 = vpop.f32.mrf.mxu3 }
 0x5c6   : > { %5818 = vmatpush.xpose.msra.mxu0 %v862_v52  ;;  %5858 = vmatpush.xpose.msra.mxu2 %v864_v14  ;;  %v678_v52 = vld [vmem:[%s6450_s10 + $0xb80] sm:$0xff]  ;;  %v680_v14 = vld [vmem:[%s6450_s10 + $0xb90] sm:$0xff] }
 0x5c7   : > { %5838 = vmatpush.xpose.msra.mxu1 %v863_v59  ;;  %5878 = vmatpush.xpose.msra.mxu3 %v865_v47  ;;  %v4883_v59 = vadd.f32 %v4882_v11, %v4863_v25  ;;  %v679_v47 = vld [vmem:[%s6450_s10 + $0xb88] sm:$0xff] }
 0x5c9   : > { %v4903_v23 = vadd.f32 %v4902_v19, %v4883_v59  ;;  %v495_v19 = vld [vmem:[%s6450_s10 + $0x5c8] sm:$0xff]  ;;  %v497_v59 = vld [vmem:[%s6450_s10 + $0x5d8] sm:$0xff] }
 0x5ca   : > { %5819 = vmatpush.xpose.msra.mxu0 %v674_v17  ;;  %5859 = vmatpush.xpose.msra.mxu2 %v676_v27  ;;  %v490_v17 = vld [vmem:[%s6450_s10 + $0x5a0] sm:$0xff]  ;;  %v492_v27 = vld [vmem:[%s6450_s10 + $0x5b0] sm:$0xff] }
 0x5cb   : > { %5839 = vmatpush.xpose.msra.mxu1 %v675_v60  ;;  %5879 = vmatpush.xpose.msra.mxu3 %v677_v35  ;;  %v1812_v60 = vld [vmem:[%s6450_s10 + $0x2ef0] sm:$0xff]  ;;  %v491_v35 = vld [vmem:[%s6450_s10 + $0x5a8] sm:$0xff]  ;;  %v5002_v53 = vpop.f32.mrf.mxu3 }
 0x5ce   : > { %5820 = vmatpush.xpose.msra.mxu0 %v486_v39  ;;  %5860 = vmatpush.xpose.msra.mxu2 %v488_v33  ;;  %v4942_v39 = vpop.f32.mrf.mxu0  ;;  %v2088_v33 = vld.sshfl [vmem:[#allocation1 + $0x20] sm:$0xff pattern:$0x73625140] }
 0x5cf   : > { %5840 = vmatpush.xpose.msra.mxu1 %v487_v22  ;;  %5880 = vmatpush.xpose.msra.mxu3 %v489_v1  ;;  %v1813_v22 = vld [vmem:[%s6450_s10 + $0x2ef8] sm:$0xff] }
 0x5d0   : > { %v2089_v1 = vld.sshfl [vmem:[#allocation1 + $0x28] sm:$0xff pattern:$0x73625140] }
 0x5d1   : > { %5821 = vmatmul.f32.vlgmr.msra.gmra.mxu0 %v2084_v42  ;;  %5861 = vmatmul.f32.vlgmr.msra.gmra.mxu2 %v2086_v28  ;;  %v1622_v28 = vld [vmem:[%s6450_s10 + $0x2900] sm:$0xff] }
 0x5d2   : > { %5893 = vmatpush.xpose.msrb.mxu0 %v1806_v26  ;;  %5933 = vmatpush.xpose.msrb.mxu2 %v1808_v31  ;;  %v4923_v26 = vadd.f32 %v4922_v0, %v4903_v23  ;;  %v1811_v31 = vld [vmem:[%s6450_s10 + $0x2ee8] sm:$0xff] }
 0x5d3   : > { %5913 = vmatpush.xpose.msrb.mxu1 %v1807_v36  ;;  %5953 = vmatpush.xpose.msrb.mxu3 %v1809_v49  ;;  %v4962_v36 = vpop.f32.mrf.mxu1  ;;  %v1623_v49 = vld [vmem:[%s6450_s10 + $0x2908] sm:$0xff]  ;;  %v5082_v51 = vpop.f32.mrf.mxu3 }
 0x5d4   : > { %5841 = vmatmul.f32.vlgmr.msra.gmra.mxu1 %v2085_v50  ;;  %5881 = vmatmul.f32.vlgmr.msra.gmra.mxu3 %v2087_v61  ;;  %v4943_v42 = vadd.f32 %v4942_v39, %v4923_v26  ;;  %v1625_v50 = vld [vmem:[%s6450_s10 + $0x2918] sm:$0xff]  ;;  %v4982_v61 = vpop.f32.mrf.mxu2  ;;  %v2095_v23 = vld.sshfl [vmem:[#allocation1 + $0x10] sm:$0xff pattern:$0x73625140] }
 0x5d5   : > { %v2096_v0 = vld.sshfl [vmem:[#allocation1 + $0x18] sm:$0xff pattern:$0x73625140] }
 0x5d6   : > { %5894 = vmatpush.xpose.msrb.mxu0 %v1618_v40  ;;  %5934 = vmatpush.xpose.msrb.mxu2 %v1620_v34  ;;  %v4963_v3 = vadd.f32 %v4962_v36, %v4943_v42  ;;  %v1434_v40 = vld [vmem:[%s6450_s10 + $0x2320] sm:$0xff]  ;;  %v1436_v34 = vld [vmem:[%s6450_s10 + $0x2330] sm:$0xff] }
 0x5d7   : > { %5914 = vmatpush.xpose.msrb.mxu1 %v1619_v12  ;;  %5954 = vmatpush.xpose.msrb.mxu3 %v1621_v29  ;;  %v1435_v12 = vld [vmem:[%s6450_s10 + $0x2328] sm:$0xff]  ;;  %v1437_v29 = vld [vmem:[%s6450_s10 + $0x2338] sm:$0xff] }
 0x5d8   : > { %v4983_v58 = vadd.f32 %v4982_v61, %v4963_v3 }
 0x5da   : > { %5895 = vmatpush.xpose.msrb.mxu0 %v1430_v54  ;;  %5935 = vmatpush.xpose.msrb.mxu2 %v1432_v20  ;;  %v1248_v54 = vld [vmem:[%s6450_s10 + $0x1d50] sm:$0xff]  ;;  %v5022_v20 = vpop.f32.mrf.mxu0  ;;  %v5003_v37 = vadd.f32 %v5002_v53, %v4983_v58 }
 0x5db   : > { %5915 = vmatpush.xpose.msrb.mxu1 %v1431_v62  ;;  %5955 = vmatpush.xpose.msrb.mxu3 %v1433_v45  ;;  %v1247_v62 = vld [vmem:[%s6450_s10 + $0x1d48] sm:$0xff]  ;;  %v1249_v45 = vld [vmem:[%s6450_s10 + $0x1d58] sm:$0xff]  ;;  %v5042_v5 = vpop.f32.mrf.mxu1 }
 0x5dc   : > { %v5023_v2 = vadd.f32 %v5022_v20, %v5003_v37 }
 0x5de   : > { %5896 = vmatpush.xpose.msrb.mxu0 %v1242_v4  ;;  %5936 = vmatpush.xpose.msrb.mxu2 %v1244_v21  ;;  %v1058_v4 = vld [vmem:[%s6450_s10 + $0x1760] sm:$0xff]  ;;  %v1060_v21 = vld [vmem:[%s6450_s10 + $0x1770] sm:$0xff]  ;;  %v5043_v7 = vadd.f32 %v5042_v5, %v5023_v2 }
 0x5df   : > { %5916 = vmatpush.xpose.msrb.mxu1 %v1243_v16  ;;  %5956 = vmatpush.xpose.msrb.mxu3 %v1245_v6  ;;  %v1061_v16 = vld [vmem:[%s6450_s10 + $0x1778] sm:$0xff]  ;;  %v5062_v6 = vpop.f32.mrf.mxu2 }
 0x5e0   : > { %v5063_v46 = vadd.f32 %v5062_v6, %v5043_v7 }
 0x5e2   : > { %5897 = vmatpush.xpose.msrb.mxu0 %v1054_v8  ;;  %5937 = vmatpush.xpose.msrb.mxu2 %v1056_v63  ;;  %v870_v8 = vld [vmem:[%s6450_s10 + $0x1180] sm:$0xff]  ;;  %v872_v63 = vld [vmem:[%s6450_s10 + $0x1190] sm:$0xff]  ;;  %v5083_v25 = vadd.f32 %v5082_v51, %v5063_v46 }
 0x5e3   : > { %5917 = vmatpush.xpose.msrb.mxu1 %v1055_v9  ;;  %5957 = vmatpush.xpose.msrb.mxu3 %v1057_v56  ;;  %v871_v9 = vld [vmem:[%s6450_s10 + $0x1188] sm:$0xff]  ;;  %v873_v56 = vld [vmem:[%s6450_s10 + $0x1198] sm:$0xff] }
 0x5e6   : > { %5898 = vmatpush.xpose.msrb.mxu0 %v866_v43  ;;  %5938 = vmatpush.xpose.msrb.mxu2 %v868_v48  ;;  %v684_v43 = vld [vmem:[%s6450_s10 + $0xbb0] sm:$0xff]  ;;  %v5102_v48 = vpop.f32.mrf.mxu0 }
 0x5e7   : > { %5918 = vmatpush.xpose.msrb.mxu1 %v867_v24  ;;  %5958 = vmatpush.xpose.msrb.mxu3 %v869_v10  ;;  %v683_v24 = vld [vmem:[%s6450_s10 + $0xba8] sm:$0xff]  ;;  %v685_v10 = vld [vmem:[%s6450_s10 + $0xbb8] sm:$0xff]  ;;  %v5103_v11 = vadd.f32 %v5102_v48, %v5083_v25 }
 0x5ea   : > { %5899 = vmatpush.xpose.msrb.mxu0 %v678_v52  ;;  %5939 = vmatpush.xpose.msrb.mxu2 %v680_v14  ;;  %v496_v52 = vld [vmem:[%s6450_s10 + $0x5d0] sm:$0xff]  ;;  %v5122_v14 = vpop.f32.mrf.mxu1 }
 0x5eb   : > { %5919 = vmatpush.xpose.msrb.mxu1 %v679_v47  ;;  %5959 = vmatpush.xpose.msrb.mxu3 %v681_v30  ;;  %v5142_v47 = vpop.f32.mrf.mxu2  ;;  %v2093_v30 = vld.sshfl [vmem:[#allocation1] sm:$0xff pattern:$0x73625140] }
 0x5ee   : > { %5900 = vmatpush.xpose.msrb.mxu0 %v490_v17  ;;  %5940 = vmatpush.xpose.msrb.mxu2 %v492_v27  ;;  %v5123_v17 = vadd.f32 %v5122_v14, %v5103_v11  ;;  %v2094_v27 = vld.sshfl [vmem:[#allocation1 + $0x8] sm:$0xff pattern:$0x73625140] }
 0x5ef   : > { %5920 = vmatpush.xpose.msrb.mxu1 %v491_v35  ;;  %5960 = vmatpush.xpose.msrb.mxu3 %v493_v57  ;;  %v5182_v35 = vpop.f32.mrf.mxu0 }
 0x5f1   : > { %5901 = vmatmul.f32.vlgmr.msrb.gmra.mxu0 %v2088_v33  ;;  %5941 = vmatmul.f32.vlgmr.msrb.gmra.mxu2 %v2090_v38 }
 0x5f2   : > { %5973 = vmatpush.xpose.msra.mxu0 %v1810_v18  ;;  %6013 = vmatpush.xpose.msra.mxu2 %v1812_v60  ;;  %v5143_v18 = vadd.f32 %v5142_v47, %v5123_v17  ;;  %v5162_v60 = vpop.f32.mrf.mxu3  ;;  %v5202_v33 = vpop.f32.mrf.mxu1 }
 0x5f3   : > { %5993 = vmatpush.xpose.msra.mxu1 %v1811_v31  ;;  %6033 = vmatpush.xpose.msra.mxu3 %v1813_v22  ;;  %v5222_v38 = vpop.f32.mrf.mxu2 }
 0x5f4   : > { %5921 = vmatmul.f32.vlgmr.msrb.gmra.mxu1 %v2089_v1  ;;  %5961 = vmatmul.f32.vlgmr.msrb.gmra.mxu3 %v2091_v41  ;;  %v5163_v57 = vadd.f32 %v5162_v60, %v5143_v18 }
 0x5f6   : > { %5974 = vmatpush.xpose.msra.mxu0 %v1622_v28  ;;  %6014 = vmatpush.xpose.msra.mxu2 %v1624_v44  ;;  %v5183_v39 = vadd.f32 %v5182_v35, %v5163_v57 }
 0x5f7   : > { %5994 = vmatpush.xpose.msra.mxu1 %v1623_v49  ;;  %6034 = vmatpush.xpose.msra.mxu3 %v1625_v50  ;;  %v5262_v1 = vpop.f32.mrf.mxu0 }
 0x5f8   : > { %v5203_v26 = vadd.f32 %v5202_v33, %v5183_v39 }
 0x5fa   : > { %5975 = vmatpush.xpose.msra.mxu0 %v1434_v40  ;;  %6015 = vmatpush.xpose.msra.mxu2 %v1436_v34  ;;  %v5223_v31 = vadd.f32 %v5222_v38, %v5203_v26  ;;  %v5242_v22 = vpop.f32.mrf.mxu3  ;;  %v5282_v28 = vpop.f32.mrf.mxu1 }
 0x5fb   : > { %5995 = vmatpush.xpose.msra.mxu1 %v1435_v12  ;;  %6035 = vmatpush.xpose.msra.mxu3 %v1437_v29  ;;  %v5302_v44 = vpop.f32.mrf.mxu2 }
 0x5fc   : > { %v5243_v41 = vadd.f32 %v5242_v22, %v5223_v31 }
 0x5fe   : > { %5976 = vmatpush.xpose.msra.mxu0 %v1246_v32  ;;  %6016 = vmatpush.xpose.msra.mxu2 %v1248_v54  ;;  %v5263_v42 = vadd.f32 %v5262_v1, %v5243_v41 }
 0x5ff   : > { %5996 = vmatpush.xpose.msra.mxu1 %v1247_v62  ;;  %6036 = vmatpush.xpose.msra.mxu3 %v1249_v45  ;;  %v5342_v61 = vpop.f32.mrf.mxu0 }
 0x600   : > { %v5283_v36 = vadd.f32 %v5282_v28, %v5263_v42 }
 0x602   : > { %5977 = vmatpush.xpose.msra.mxu0 %v1058_v4  ;;  %6017 = vmatpush.xpose.msra.mxu2 %v1060_v21  ;;  %v5303_v49 = vadd.f32 %v5302_v44, %v5283_v36  ;;  %v5322_v50 = vpop.f32.mrf.mxu3  ;;  %v5362_v34 = vpop.f32.mrf.mxu1 }
 0x603   : > { %5997 = vmatpush.xpose.msra.mxu1 %v1059_v55  ;;  %6037 = vmatpush.xpose.msra.mxu3 %v1061_v16  ;;  %v5382_v58 = vpop.f32.mrf.mxu2 }
 0x604   : > { %v5323_v3 = vadd.f32 %v5322_v50, %v5303_v49 }
 0x606   : > { %5978 = vmatpush.xpose.msra.mxu0 %v870_v8  ;;  %6018 = vmatpush.xpose.msra.mxu2 %v872_v63  ;;  %v5343_v40 = vadd.f32 %v5342_v61, %v5323_v3 }
 0x607   : > { %5998 = vmatpush.xpose.msra.mxu1 %v871_v9  ;;  %6038 = vmatpush.xpose.msra.mxu3 %v873_v56  ;;  %v5422_v32 = vpop.f32.mrf.mxu0 }
 0x608   : > { %v5363_v12 = vadd.f32 %v5362_v34, %v5343_v40 }
 0x60a   : > { %5979 = vmatpush.xpose.msra.mxu0 %v682_v13  ;;  %6019 = vmatpush.xpose.msra.mxu2 %v684_v43  ;;  %v5383_v29 = vadd.f32 %v5382_v58, %v5363_v12  ;;  %v5402_v53 = vpop.f32.mrf.mxu3  ;;  %v5442_v37 = vpop.f32.mrf.mxu1 }
 0x60b   : > { %5999 = vmatpush.xpose.msra.mxu1 %v683_v24  ;;  %6039 = vmatpush.xpose.msra.mxu3 %v685_v10  ;;  %v5462_v62 = vpop.f32.mrf.mxu2 }
 0x60c   : > { %v5403_v54 = vadd.f32 %v5402_v53, %v5383_v29  ;;  %v262_v53 = vld [vmem:[#allocation2] sm:$0x3] }
 0x60e   : > { %5980 = vmatpush.xpose.msra.mxu0 %v494_v15  ;;  %6020 = vmatpush.xpose.msra.mxu2 %v496_v52  ;;  %v5423_v20 = vadd.f32 %v5422_v32, %v5403_v54 }
 0x60f   : > { %6000 = vmatpush.xpose.msra.mxu1 %v495_v19  ;;  %6040 = vmatpush.xpose.msra.mxu3 %v497_v59  ;;  %v5502_v21 = vpop.f32.mrf.mxu0 }
 0x610   : > { %v5443_v45 = vadd.f32 %v5442_v37, %v5423_v20 }
 0x611   : > { %5981 = vmatmul.f32.vlgmr.msra.gmra.mxu0 %v2093_v30  ;;  %6021 = vmatmul.f32.vlgmr.msra.gmra.mxu2 %v2095_v23 }
 0x612   : > { %6001 = vmatmul.f32.vlgmr.msra.gmra.mxu1 %v2094_v27  ;;  %6041 = vmatmul.f32.vlgmr.msra.gmra.mxu3 %v2096_v0  ;;  %v5463_v2 = vadd.f32 %v5462_v62, %v5443_v45  ;;  %v5482_v4 = vpop.f32.mrf.mxu3  ;;  %v5522_v16 = vpop.f32.mrf.mxu1 }
 0x613   : > { %v5542_v6 = vpop.f32.mrf.mxu2 }
 0x614   : > { %v5483_v5 = vadd.f32 %v5482_v4, %v5463_v2 }
 0x616   : > { %v5503_v55 = vadd.f32 %v5502_v21, %v5483_v5 }
 0x617   : > { %v5582_v46 = vpop.f32.mrf.mxu0 }
 0x618   : > { %v5523_v7 = vadd.f32 %v5522_v16, %v5503_v55 }
 0x61a   : > { %v5543_v8 = vadd.f32 %v5542_v6, %v5523_v7  ;;  %v5562_v63 = vpop.f32.mrf.mxu3  ;;  %v5602_v51 = vpop.f32.mrf.mxu1 }
 0x61b   : > { %v5622_v13 = vpop.f32.mrf.mxu2 }
 0x61c   : > { %v5563_v9 = vadd.f32 %v5562_v63, %v5543_v8 }
 0x61e   : > { %v5583_v56 = vadd.f32 %v5582_v46, %v5563_v9 }
 0x61f   : > { %v5662_v24 = vpop.f32.mrf.mxu0 }
 0x620   : > { %v5603_v43 = vadd.f32 %v5602_v51, %v5583_v56 }
 0x622   : > { %v5623_v48 = vadd.f32 %v5622_v13, %v5603_v43  ;;  %v5642_v25 = vpop.f32.mrf.mxu3  ;;  %v5682_v15 = vpop.f32.mrf.mxu1 }
 0x623   : > { %v5702_v52 = vpop.f32.mrf.mxu2 }
 0x624   : > { %v5643_v10 = vadd.f32 %v5642_v25, %v5623_v48 }
 0x626   : > { %v5663_v11 = vadd.f32 %v5662_v24, %v5643_v10 }
 0x628   : > { %v5683_v14 = vadd.f32 %v5682_v15, %v5663_v11 }
 0x62a   : > { %v5703_v19 = vadd.f32 %v5702_v52, %v5683_v14  ;;  %v5722_v59 = vpop.f32.mrf.mxu3 }
 0x62c   : > { %v5723_v30 = vadd.f32 %v5722_v59, %v5703_v19 }
 0x62e   : > { %v5742_v47 = vpop.f32.mrf.mxu0 }
 0x62f   : > { %v5743_v23 = vadd.f32 %v5742_v47, %v5723_v30 }
 0x631   : > { %v5762_v17 = vpop.f32.mrf.mxu1 }
 0x632   : > { %v5763_v0 = vadd.f32 %v5762_v17, %v5743_v23 }
 0x634   : > { %v5782_v27 = vpop.f32.mrf.mxu2 }
 0x635   : > { %v5783_v18 = vadd.f32 %v5782_v27, %v5763_v0 }
 0x637   : > { %v5802_v60 = vpop.f32.mrf.mxu3 }
 0x638   : > { %v5803_v57 = vadd.f32 %v5802_v60, %v5783_v18 }
 0x64e   : > { %v5822_v35 = vpop.f32.mrf.mxu0 }
 0x64f   : > { %v5823_v39 = vadd.f32 %v5822_v35, %v5803_v57 }
 0x651   : > { %v5842_v33 = vpop.f32.mrf.mxu1 }
 0x652   : > { %v5843_v26 = vadd.f32 %v5842_v33, %v5823_v39 }
 0x654   : > { %v5862_v38 = vpop.f32.mrf.mxu2 }
 0x655   : > { %v5863_v31 = vadd.f32 %v5862_v38, %v5843_v26 }
 0x657   : > { %v5882_v22 = vpop.f32.mrf.mxu3 }
 0x658   : > { %v5883_v41 = vadd.f32 %v5882_v22, %v5863_v31 }
 0x66e   : > { %v5902_v1 = vpop.f32.mrf.mxu0 }
 0x66f   : > { %v5903_v42 = vadd.f32 %v5902_v1, %v5883_v41 }
 0x671   : > { %v5922_v28 = vpop.f32.mrf.mxu1 }
 0x672   : > { %v5923_v36 = vadd.f32 %v5922_v28, %v5903_v42 }
 0x674   : > { %v5942_v44 = vpop.f32.mrf.mxu2 }
 0x675   : > { %v5943_v49 = vadd.f32 %v5942_v44, %v5923_v36 }
 0x677   : > { %v5962_v50 = vpop.f32.mrf.mxu3 }
 0x678   : > { %v5963_v61 = vadd.f32 %v5962_v50, %v5943_v49 }
 0x68e   : > { %v5982_v3 = vpop.f32.mrf.mxu0 }
 0x68f   : > { %v5983_v40 = vadd.f32 %v5982_v3, %v5963_v61  ;;  %v6002_v34 = vpop.f32.mrf.mxu1 }
 0x691   : > { %v6003_v58 = vadd.f32 %v6002_v34, %v5983_v40 }
 0x694   : > { %v6022_v12 = vpop.f32.mrf.mxu2 }
 0x695   : > { %v6023_v29 = vadd.f32 %v6022_v12, %v6003_v58  ;;  %v6042_v32 = vpop.f32.mrf.mxu3 }
 0x697   : > { %v6043_v54 = vadd.f32 %v6042_v32, %v6023_v29  ;;  %6051 = sbr.rel (%p6189_p7) target bundleno = 1860 (0x744), region = 52 }
 0x699   : > { %v6045_v20 = vadd.f32 %v6043_v54, %v262_v53 }
 0x69b   : > { %6047 = vst.msk [vmem:[#allocation2] sm:$0x3] %vm6046_vm1, %v6045_v20 }
 0x69c   : > { %v6077_v37 = vld [vmem:[%s8196_s3] sm:$0xff]  ;;  %vm6082_vm2 = vcmask 523264   ;;  %vm6109_vm7 = vcmask 58368  }
 0x69d   : > { %6190 = vmatpush.xpose.msk.msra.mxu0 %vm6082_vm2, %v6077_v37  ;;  %v6249_v45 = vld [vmem:[%s8195_s2] ss:$0 sm:$0xff] }
 0x69e   : > { %v6250_v43 = vld [vmem:[%s8197_s4] ss:$0 sm:$0xff] }
 0x6a2   : > { %v6052_v62 = vld [vmem:[#allocation2] sm:$0x3] }
 0x6a3   : > { %v6057_v2 = vadd.f32 %v6249_v45, %v6052_v62 }
 0x6a5   : > { %v6058_v4 = vsub.f32 0.0, %v6057_v2 }
 0x6a7   : > { %v6059_v21 = vmul.f32 1.442695, %v6058_v4 }
 0x6a9   : > { %6251 = vpow2.f32 %v6059_v21 }
 0x6af   : > { %v6252_v5 = vpop.eup %6251 }
 0x6b0   : > { %v6061_v55 = vadd.f32 1.0, %v6252_v5 }
 0x6b2   : > { %6253 = vrcp.f32 %v6061_v55  ;;  %v6073_v7 = vand.u32 2147483648, %v6061_v55  ;;  %vm6067_vm3 = vweird.f32 %v6061_v55  ;;  %v6071_v63 = vand.u32 2147483647, %v6061_v55 }
 0x6b4   : > { %v6074_v9 = vor.u32 1.1754944e-38, %v6073_v7  ;;  %vm6072_vm6 = vcmp.eq.f32.partialorder %v6071_v63, 8.507059e+37 }
 0x6b8   : > { %v6254_v16 = vpop.eup %6253 }
 0x6b9   : > { %v6063_v6 = vmul.f32 %v6254_v16, %v6061_v55  ;;  %vm6068_vm4 = vweird.f32 %v6254_v16 }
 0x6ba   : > { %vm6069_vm5 = vmor %vm6067_vm3, %vm6068_vm4 }
 0x6bb   : > { %v6064_v8 = vsub.f32 1.0, %v6063_v6 }
 0x6bd   : > { %v6065_v46 = vmul.f32 %v6254_v16, %v6064_v8 }
 0x6bf   : > { %v6066_v56 = vadd.f32 %v6254_v16, %v6065_v46 }
 0x6c1   : > { %v6070_v51 = vsel %vm6069_vm5, %v6254_v16, %v6066_v56 }
 0x6c2   : > { %v6075_v13 = vsel %vm6072_vm6, %v6074_v9, %v6070_v51 }
 0x6c3   : > { %6191 = vmatmul.msk.f32.vlgmr.msra.gmra.mxu0 %vm6082_vm2, %v6075_v13 }
 0x740   : > { %v6106_v48 = vpop.f32.mrf.mxu0 }
 0x741   : > { %v6107_v25 = vadd.f32 %v6250_v43, %v6106_v48 }
 0x743   : > { %6110 = vst.msk [vmem:[#allocation6] sm:$0x3] %vm6109_vm7, %v6107_v25 }
 0x744 PF: > { %p6210_p9 = scmp.eq.s32.totalorder %s6407_s22, 7  ;;  %s6357_s24 = smov [#allocation6]  }
 0x745   : > { %s6117_s25 = sshll.u32 %s6357_s24, 4  ;;  %s6119_s30 = sshll.u32 %s8198_s5, 4  ;;  %s6118_s25 = int_to_ptr.vmem [resolvable:$true] %s6117_s25  ;;  %s6120_s30 = int_to_ptr.hbm [resolvable:$true] %s6119_s30 }
 0x746   : > { %6202 = dma.vmem_to_hbm [thread:$0]  (%p6210_p9), %s6118_s25, 32, %s6120_s30, [#allocation5]  }
 0x747   : > { %6334 = dma.done.wait (%p6210_p9), [#allocation5], 32  }
 0x748   : > { %6336 = vsyncadd (%p6210_p9), [#allocation5], 4294967264 }
 0x749 PF: > { %p16_p10 = scmp.ge.s32.totalorder %s6410_s23, 10   ;;  %s8201_s18 = smov %s6343_s19 }
 0x74a   : > { %s8202_s19 = smov %s6347_s20  ;;  %s8203_s20 = smov %s6420_s26 }
 0x74b   : > { %s8204_s21 = smov %s6410_s23  ;;  %18 = sbr.rel (!%p16_p10) target bundleno = 4 (0x4), region = 89 }
 0x750   :  { %6133 = vsyncpa [#allocation4], 1 }
 0x751   :  { %6135 = vsyncpa [#allocation4 + $0x1], 1 }
 0x752   :  { %6136 = vsyncpa [#allocation5], 1 }
 0x753   :  { %6138 = vsyncpa [#allocation5 + $0x1], 1 }

</bundles_post_ra>
